<compile_context>
chip_gen: v7x
topology: tpu7x:2x2x1
jax: 0.10.0
libtpu: 0.0.40
codegen_flags: <defaults>
</compile_context>

<pallas_src>
import math
from functools import partial

import jax
import jax.numpy as jnp
from jax.experimental import pallas as pl
from jax.experimental.pallas import tpu as pltpu


# ----------------------------- kernel --------------------------------------- #

def _encoder_layer_kernel(*refs, n_head, d_k, d_v, norm, has_mask, has_non_pad,
                          return_attn, compute_dtype, exp_dtype):
    it = iter(refs)
    xfull_ref = next(it)                                   # (1, L, D)   f32
    mask_ref = next(it) if has_mask else None              # (1, 1|tq, L) int32
    npm_ref = next(it) if has_non_pad else None            # (1, tq, 1)  f32
    (wq_ref, bq_ref, wkvt_ref, bkvt_ref, wfc_ref, bfc_ref,
     ln1g_ref, ln1b_ref, w1_ref, b1_ref, w2_ref, b2_ref,
     ln2g_ref, ln2b_ref) = [next(it) for _ in range(14)]
    out_ref = next(it)                                     # (1, tq, D)
    attn_ref = next(it) if return_attn else None           # (1, H, tq, L)
    k_scr = next(it)                                       # (H, d_k, L) cd
    v_scr = next(it)                                       # (H, d_v, L) cd

    H, dk, dv = n_head, d_k, d_v
    cd = compute_dtype
    L = xfull_ref.shape[1]
    tq = out_ref.shape[1]
    qi = pl.program_id(1)

    # ---- K/V projection once per batch row, directly in transposed (h, d, L)
    # layout so both scratches are lane-dense in L (no per-tile relayouts). ----
    @pl.when(qi == 0)
    def _():
        xT = xfull_ref[0].T.astype(cd)                                  # (D, L)
        kvT = jnp.dot(wkvt_ref[...], xT,
                      preferred_element_type=jnp.float32) + bkvt_ref[...]
        k_scr[...] = kvT[: H * dk].reshape(H, dk, L).astype(cd)
        v_scr[...] = kvT[H * dk:].reshape(H, dv, L).astype(cd)

    # ---- query tile sliced out of the already-resident full row ----
    start = pl.multiple_of(qi * tq, tq)
    x_res = xfull_ref[0, pl.ds(start, tq), :]                           # (tq, D) f32

    q = jnp.dot(x_res.astype(cd), wq_ref[...],
                preferred_element_type=jnp.float32) + bq_ref[...]       # (tq, H*dk)
    q = q * (1.0 / math.sqrt(dk))                                       # temperature
    qh = jnp.transpose(q.reshape(tq, H, dk), (1, 0, 2)).astype(cd)      # (H, tq, dk)

    s = jnp.einsum("hqd,hdk->hqk", qh, k_scr[...],
                   preferred_element_type=jnp.float32)                  # (H, tq, L)
    if has_mask:
        # nonzero mask entry => key position is masked out.
        # TODO(synk): PyTorch masked_fill uses -inf; -1e30 keeps fully-masked
        # rows finite (uniform attention) instead of NaN.
        s = jnp.where((mask_ref[0] != 0)[None], jnp.float32(-1e30), s)
    s = s - jnp.max(s, axis=-1, keepdims=True)
    e = jnp.exp(s.astype(exp_dtype)).astype(jnp.float32)                # EUP
    denom = jnp.sum(e, axis=-1, keepdims=True)
    inv = pl.reciprocal(denom, approx=not return_attn)                  # exact if attn returned
    p = e * inv                                                         # (H, tq, L) f32
    if return_attn:
        attn_ref[0] = p.astype(attn_ref.dtype)

    o = jnp.einsum("hqk,hdk->hqd", p.astype(cd), v_scr[...],
                   preferred_element_type=jnp.float32)                  # (H, tq, dv)
    o = jnp.transpose(o, (1, 0, 2)).reshape(tq, H * dv)
    y = jnp.dot(o.astype(cd), wfc_ref[...],
                preferred_element_type=jnp.float32) + bfc_ref[...]
    y = y + x_res                                                       # residual

    # LayerNorm 1 (f32 statistics, eps = 1e-5)
    mu = jnp.mean(y, axis=-1, keepdims=True)
    var = jnp.mean(jnp.square(y - mu), axis=-1, keepdims=True)
    y = (y - mu) * jax.lax.rsqrt(var + 1e-5) * ln1g_ref[...] + ln1b_ref[...]
    if has_non_pad:
        y = y * npm_ref[0]

    # Position-wise FFN (Conv1d k=1 == per-token Linear) + residual + LN2
    h = jnp.dot(y.astype(cd), w1_ref[...],
                preferred_element_type=jnp.float32) + b1_ref[...]
    h = jnp.maximum(h, 0.0)
    z = jnp.dot(h.astype(cd), w2_ref[...],
                preferred_element_type=jnp.float32) + b2_ref[...]
    z = z + y
    if norm:
        mu2 = jnp.mean(z, axis=-1, keepdims=True)
        var2 = jnp.mean(jnp.square(z - mu2), axis=-1, keepdims=True)
        z = (z - mu2) * jax.lax.rsqrt(var2 + 1e-5) * ln2g_ref[...] + ln2b_ref[...]
    if has_non_pad:
        z = z * npm_ref[0]
    out_ref[0] = z.astype(out_ref.dtype)


# ----------------------------- wrapper -------------------------------------- #

def encoder_layer(params, x, non_pad_mask=None, slf_attn_mask=None, norm=True,
                  return_attn=True, block_q=128,
                  compute_dtype=jnp.bfloat16, exp_dtype=None,
                  attn_dtype=jnp.float32, vmem_limit_bytes=None):
    B, L, D = x.shape
    H, dk, dv = params["n_head"], params["d_k"], params["d_v"]
    tq = min(block_q, L)
    assert L % tq == 0, "block_q must divide the sequence length"
    n_qt = L // tq
    cd = compute_dtype
    if exp_dtype is None:
        # bf16 exp relieves the single EUP slot on v6e/v7x; on v5e pass
        # exp_dtype=jnp.float32 explicitly (no bf16 EUP there).
        exp_dtype = cd
    f32 = jnp.float32

    x = x.astype(f32)
    # matmul weights in compute dtype; biases / LN params stay f32
    w_q = params["wq"].astype(cd)
    b_q = params["bq"].astype(f32)
    # K|V fused and pre-transposed: kernel computes K^T/V^T = W^T @ x^T directly.
    w_kvT = jnp.concatenate([params["wk"], params["wv"]], axis=1).T.astype(cd)
    b_kvT = jnp.concatenate([params["bk"], params["bv"]], axis=1).reshape(-1, 1).astype(f32)
    w_fc = params["wfc"].astype(cd)
    b_fc = params["bfc"].astype(f32)
    w_1 = params["w1"].astype(cd)
    b_1 = params["b1"].astype(f32)
    w_2 = params["w2"].astype(cd)
    b_2 = params["b2"].astype(f32)
    ln1g = params["ln1_g"].astype(f32)
    ln1b = params["ln1_b"].astype(f32)
    ln2g = params["ln2_g"].astype(f32)
    ln2b = params["ln2_b"].astype(f32)

    has_mask = slf_attn_mask is not None
    has_npm = non_pad_mask is not None

    inputs = [x]
    base_specs = [pl.BlockSpec((1, L, D), lambda b, q: (b, 0, 0))]       # full row
    if has_mask:
        m = slf_attn_mask.astype(jnp.int32)
        inputs.append(m)
        if m.shape[1] == 1:   # key-padding mask (B, 1, L): broadcast over queries
            base_specs.append(pl.BlockSpec((1, 1, L), lambda b, q: (b, 0, 0)))
        else:                 # dense per-query mask (B, L, L)
            base_specs.append(pl.BlockSpec((1, tq, L), lambda b, q: (b, q, 0)))
    if has_npm:
        inputs.append(non_pad_mask.astype(f32))
        base_specs.append(pl.BlockSpec((1, tq, 1), lambda b, q: (b, q, 0)))

    weights = [w_q, b_q, w_kvT, b_kvT, w_fc, b_fc, ln1g, ln1b,
               w_1, b_1, w_2, b_2, ln2g, ln2b]
    inputs += weights

    out_shapes = [jax.ShapeDtypeStruct((B, L, D), f32)]
    out_specs = [pl.BlockSpec((1, tq, D), lambda b, q: (b, q, 0))]
    if return_attn:
        out_shapes.append(jax.ShapeDtypeStruct((B, H, L, L), attn_dtype))
        out_specs.append(pl.BlockSpec((1, H, tq, L), lambda b, q: (b, 0, q, 0)))

    kernel = partial(_encoder_layer_kernel, n_head=H, d_k=dk, d_v=dv, norm=norm,
                     has_mask=has_mask, has_non_pad=has_npm,
                     return_attn=return_attn, compute_dtype=cd, exp_dtype=exp_dtype)

    def run(single_buffer_weights):
        if single_buffer_weights:
            # constant index_map -> double-buffering the weights is pure VMEM waste
            w_spec = lambda w: pl.BlockSpec(w.shape, lambda b, q: (0, 0),
                                            pipeline_mode=pl.Buffered(1))
        else:
            w_spec = lambda w: pl.BlockSpec(w.shape, lambda b, q: (0, 0))
        in_specs = base_specs + [w_spec(w) for w in weights]
        fn = pl.pallas_call(
            kernel,
            out_shape=tuple(out_shapes),
            grid_spec=pltpu.PrefetchScalarGridSpec(
                num_scalar_prefetch=0,
                grid=(B, n_qt),
                in_specs=in_specs,
                out_specs=tuple(out_specs),
                scratch_shapes=[pltpu.VMEM((H, dk, L), cd),   # K^T cache (per row)
                                pltpu.VMEM((H, dv, L), cd)]), # V^T cache (per row)
            compiler_params=pltpu.CompilerParams(
                dimension_semantics=("parallel", "arbitrary"),
                vmem_limit_bytes=vmem_limit_bytes),
        )
        return fn(*inputs)

    try:
        outs = run(True)
    except Exception:
        # TODO(synk): pl.Buffered(1) single-buffered weight specs not supported
        # on this jax build; fall back to default double-buffered weights.
        outs = run(False)

    enc_output = outs[0]
    enc_slf_attn = outs[1] if return_attn else None
    return enc_output, enc_slf_attn


# ------------------------- params / reference ------------------------------- #

def make_params(key, d_model, d_inner, n_head, d_k, d_v):
    ks = jax.random.split(key, 10)
    f = lambda k, shape, s=0.05: (s * jax.random.normal(k, shape)).astype(jnp.float32)
    return {
        "n_head": n_head, "d_k": d_k, "d_v": d_v,
        "wq": f(ks[0], (d_model, n_head * d_k)), "bq": f(ks[1], (1, n_head * d_k)),
        "wk": f(ks[2], (d_model, n_head * d_k)), "bk": f(ks[3], (1, n_head * d_k)),
        "wv": f(ks[4], (d_model, n_head * d_v)), "bv": f(ks[5], (1, n_head * d_v)),
        "wfc": f(ks[6], (n_head * d_v, d_model)), "bfc": f(ks[7], (1, d_model)),
        "ln1_g": jnp.ones((1, d_model), jnp.float32),
        "ln1_b": jnp.zeros((1, d_model), jnp.float32),
        "w1": f(ks[8], (d_model, d_inner)), "b1": jnp.zeros((1, d_inner), jnp.float32),
        "w2": f(ks[9], (d_inner, d_model)), "b2": jnp.zeros((1, d_model), jnp.float32),
        "ln2_g": jnp.ones((1, d_model), jnp.float32),
        "ln2_b": jnp.zeros((1, d_model), jnp.float32),
    }


def reference_encoder_layer(p, x, non_pad_mask=None, slf_attn_mask=None, norm=True):
    """Pure-JAX reference matching the PyTorch forward (eval mode)."""
    H, dk, dv = p["n_head"], p["d_k"], p["d_v"]
    B, L, D = x.shape

    def ln(y, g, b):
        mu = y.mean(-1, keepdims=True)
        var = ((y - mu) ** 2).mean(-1, keepdims=True)
        return (y - mu) * jax.lax.rsqrt(var + 1e-5) * g + b

    q = (x @ p["wq"] + p["bq"]).reshape(B, L, H, dk)
    k = (x @ p["wk"] + p["bk"]).reshape(B, L, H, dk)
    v = (x @ p["wv"] + p["bv"]).reshape(B, L, H, dv)
    s = jnp.einsum("bqhd,bkhd->bhqk", q, k) / math.sqrt(dk)
    if slf_attn_mask is not None:
        s = jnp.where(slf_attn_mask[:, None, :, :] != 0, -1e30, s)
    attn = jax.nn.softmax(s, axis=-1)
    o = jnp.einsum("bhqk,bkhd->bqhd", attn, v).reshape(B, L, H * dv)
    y = ln(o @ p["wfc"] + p["bfc"] + x, p["ln1_g"], p["ln1_b"])
    if non_pad_mask is not None:
        y = y * non_pad_mask
    z = jnp.maximum(y @ p["w1"] + p["b1"], 0.0) @ p["w2"] + p["b2"] + y
    if norm:
        z = ln(z, p["ln2_g"], p["ln2_b"])
    if non_pad_mask is not None:
        z = z * non_pad_mask
    return z, attn


# --------------------------------- main ------------------------------------- #

if __name__ == "__main__":
    B, L = 2, 128                       # lane-dense (multiples of 128) last dims
    d_model, d_inner, n_head, d_k, d_v = 128, 256, 4, 32, 32

    key = jax.random.PRNGKey(0)
    kp, kx = jax.random.split(key)
    params = make_params(kp, d_model, d_inner, n_head, d_k, d_v)
    x = jax.random.normal(kx, (B, L, d_model), jnp.float32)

    ref_out, ref_attn = reference_encoder_layer(params, x, None, None, norm=True)

    # 1) f32 matmul inputs, no masking — tight check
    out, attn = encoder_layer(params, x, None, None, norm=True, block_q=64,
                              compute_dtype=jnp.float32)
    jax.block_until_ready(out)
    jax.block_until_ready(attn)
    assert out.shape == (B, L, d_model)
    assert attn.shape == (B, n_head, L, L)
    assert jnp.allclose(out, ref_out, rtol=5e-3, atol=5e-3)
    assert jnp.allclose(attn, ref_attn, rtol=5e-3, atol=5e-3)

    # 2) key-padding self-attention mask passed as (B, 1, L) + non-pad mask
    n_pad = 32
    key_is_pad = jnp.arange(L) >= (L - n_pad)
    slf_attn_mask = jnp.broadcast_to(
        key_is_pad[None, None, :].astype(jnp.int32), (B, 1, L))
    non_pad_mask = jnp.broadcast_to(
        (~key_is_pad).astype(jnp.float32)[None, :, None], (B, L, 1))
    out_m, attn_m = encoder_layer(params, x, non_pad_mask, slf_attn_mask,
                                  norm=True, block_q=64, compute_dtype=jnp.float32)
    jax.block_until_ready(out_m)
    ref_out_m, ref_attn_m = reference_encoder_layer(
        params, x, non_pad_mask, slf_attn_mask, norm=True)
    assert jnp.allclose(out_m, ref_out_m, rtol=5e-3, atol=5e-3)
    assert jnp.allclose(attn_m, ref_attn_m, rtol=5e-3, atol=5e-3)

    # 3) default bf16 compute path (weights / K-V scratch / exp in bf16,
    #    f32 accumulation + statistics), bf16 attention-map writeback
    out_bf, attn_bf = encoder_layer(params, x, None, None, norm=True, block_q=64,
                                    attn_dtype=jnp.bfloat16)
    jax.block_until_ready(out_bf)
    assert jnp.allclose(out_bf, ref_out, rtol=1e-1, atol=1e-1)
    assert jnp.allclose(attn_bf.astype(jnp.float32), ref_attn, rtol=5e-2, atol=5e-2)

    print("KERNEL_OK")
</pallas_src>

<mosaic_0001>
module attributes {stable_mosaic.version = 11 : i64} {
  func.func @_encoder_layer_kernel(%arg0: i32, %arg1: i32, %arg2: memref<1x128x128xf32, #tpu.memory_space<vmem>>, %arg3: memref<128x128xf32, #tpu.memory_space<vmem>>, %arg4: memref<1x128xf32, #tpu.memory_space<vmem>>, %arg5: memref<256x128xf32, #tpu.memory_space<vmem>>, %arg6: memref<256x1xf32, #tpu.memory_space<vmem>>, %arg7: memref<128x128xf32, #tpu.memory_space<vmem>>, %arg8: memref<1x128xf32, #tpu.memory_space<vmem>>, %arg9: memref<1x128xf32, #tpu.memory_space<vmem>>, %arg10: memref<1x128xf32, #tpu.memory_space<vmem>>, %arg11: memref<128x256xf32, #tpu.memory_space<vmem>>, %arg12: memref<1x256xf32, #tpu.memory_space<vmem>>, %arg13: memref<256x128xf32, #tpu.memory_space<vmem>>, %arg14: memref<1x128xf32, #tpu.memory_space<vmem>>, %arg15: memref<1x128xf32, #tpu.memory_space<vmem>>, %arg16: memref<1x128xf32, #tpu.memory_space<vmem>>, %arg17: memref<1x64x128xf32, #tpu.memory_space<vmem>>, %arg18: memref<1x4x64x128xf32, #tpu.memory_space<vmem>>, %arg19: memref<4x32x128xf32, #tpu.memory_space<vmem>>, %arg20: memref<4x32x128xf32, #tpu.memory_space<vmem>>) attributes {dimension_semantics = [#tpu.dimension_semantics<parallel>, #tpu.dimension_semantics<arbitrary>], iteration_bounds = array<i64: 2, 2>, scalar_prefetch = 0 : i64, scratch_operands = 2 : i64, tpu.core_type = #tpu.core_type<tc>, window_params = [{transform_indices = @transform_0, window_bounds = array<i64: 1, 128, 128>}, {pipeline_mode = #tpu.pipeline_mode<synchronous>, transform_indices = @transform_1, window_bounds = array<i64: 128, 128>}, {pipeline_mode = #tpu.pipeline_mode<synchronous>, transform_indices = @transform_2, window_bounds = array<i64: 1, 128>}, {pipeline_mode = #tpu.pipeline_mode<synchronous>, transform_indices = @transform_3, window_bounds = array<i64: 256, 128>}, {pipeline_mode = #tpu.pipeline_mode<synchronous>, transform_indices = @transform_4, window_bounds = array<i64: 256, 1>}, {pipeline_mode = #tpu.pipeline_mode<synchronous>, transform_indices = @transform_5, window_bounds = array<i64: 128, 128>}, {pipeline_mode = #tpu.pipeline_mode<synchronous>, transform_indices = @transform_6, window_bounds = array<i64: 1, 128>}, {pipeline_mode = #tpu.pipeline_mode<synchronous>, transform_indices = @transform_7, window_bounds = array<i64: 1, 128>}, {pipeline_mode = #tpu.pipeline_mode<synchronous>, transform_indices = @transform_8, window_bounds = array<i64: 1, 128>}, {pipeline_mode = #tpu.pipeline_mode<synchronous>, transform_indices = @transform_9, window_bounds = array<i64: 128, 256>}, {pipeline_mode = #tpu.pipeline_mode<synchronous>, transform_indices = @transform_10, window_bounds = array<i64: 1, 256>}, {pipeline_mode = #tpu.pipeline_mode<synchronous>, transform_indices = @transform_11, window_bounds = array<i64: 256, 128>}, {pipeline_mode = #tpu.pipeline_mode<synchronous>, transform_indices = @transform_12, window_bounds = array<i64: 1, 128>}, {pipeline_mode = #tpu.pipeline_mode<synchronous>, transform_indices = @transform_13, window_bounds = array<i64: 1, 128>}, {pipeline_mode = #tpu.pipeline_mode<synchronous>, transform_indices = @transform_14, window_bounds = array<i64: 1, 128>}, {transform_indices = @transform_15, window_bounds = array<i64: 1, 64, 128>}, {transform_indices = @transform_16, window_bounds = array<i64: 1, 4, 64, 128>}]} {
    %c0_i32 = arith.constant 0 : i32
    %0 = arith.cmpi eq, %arg1, %c0_i32 : i32
    %1 = arith.extui %0 : i1 to i32
    %c0_i32_0 = arith.constant 0 : i32
    %2 = arith.cmpi ne, %1, %c0_i32_0 : i32
    scf.if %2 {
      %c0_58 = arith.constant 0 : index
      %c0_59 = arith.constant 0 : index
      %c0_60 = arith.constant 0 : index
      %106 = vector.load %arg2[%c0_58, %c0_59, %c0_60] : memref<1x128x128xf32, #tpu.memory_space<vmem>>, vector<1x128x128xf32>
      %107 = vector.shape_cast %106 : vector<1x128x128xf32> to vector<128x128xf32>
      %108 = tpu.transpose %107, [1, 0] : vector<128x128xf32> -> vector<128x128xf32>
      %c0_61 = arith.constant 0 : index
      %c0_62 = arith.constant 0 : index
      %109 = vector.load %arg5[%c0_61, %c0_62] : memref<256x128xf32, #tpu.memory_space<vmem>>, vector<256x128xf32>
      %cst_63 = arith.constant dense<0.000000e+00> : vector<256x128xf32>
      %110 = tpu.matmul %109, %108, %cst_63 {dimension_numbers = #tpu.dot_dimension_numbers<[1], [0], [0], [1], [0, 0, 1, 1], [], []>} : vector<256x128xf32>, vector<128x128xf32>, vector<256x128xf32> -> vector<256x128xf32>
      %c0_64 = arith.constant 0 : index
      %c0_65 = arith.constant 0 : index
      %111 = vector.load %arg6[%c0_64, %c0_65] : memref<256x1xf32, #tpu.memory_space<vmem>>, vector<256x1xf32>
      %112 = vector.broadcast %111 : vector<256x1xf32> to vector<256x128xf32>
      %113 = arith.addf %110, %112 : vector<256x128xf32>
      %114 = vector.extract_strided_slice %113 {offsets = [0, 0], sizes = [128, 128], strides = [1, 1]} : vector<256x128xf32> to vector<128x128xf32>
      %115 = vector.shape_cast %114 : vector<128x128xf32> to vector<4x32x128xf32>
      %c0_66 = arith.constant 0 : index
      %c0_67 = arith.constant 0 : index
      %c0_68 = arith.constant 0 : index
      %116 = vector.load %arg19[%c0_66, %c0_67, %c0_68] : memref<4x32x128xf32, #tpu.memory_space<vmem>>, vector<4x32x128xf32>
      tpu.vector_store %arg19[%c0_66, %c0_67, %c0_68], %115 {strides = array<i32>} : memref<4x32x128xf32, #tpu.memory_space<vmem>>, vector<4x32x128xf32>,
      %117 = vector.extract_strided_slice %113 {offsets = [128, 0], sizes = [128, 128], strides = [1, 1]} : vector<256x128xf32> to vector<128x128xf32>
      %118 = vector.shape_cast %117 : vector<128x128xf32> to vector<4x32x128xf32>
      %c0_69 = arith.constant 0 : index
      %c0_70 = arith.constant 0 : index
      %c0_71 = arith.constant 0 : index
      %119 = vector.load %arg20[%c0_69, %c0_70, %c0_71] : memref<4x32x128xf32, #tpu.memory_space<vmem>>, vector<4x32x128xf32>
      tpu.vector_store %arg20[%c0_69, %c0_70, %c0_71], %118 {strides = array<i32>} : memref<4x32x128xf32, #tpu.memory_space<vmem>>, vector<4x32x128xf32>,
    } else {
    }
    %c64_i32 = arith.constant 64 : i32
    %3 = arith.muli %arg1, %c64_i32 : i32
    %4 = tpu.assume_multiple %3, 64 : i32
    %c0 = arith.constant 0 : index
    %5 = arith.index_cast %4 : i32 to index
    %c0_1 = arith.constant 0 : index
    %6 = vector.load %arg2[%c0, %5, %c0_1] : memref<1x128x128xf32, #tpu.memory_space<vmem>>, vector<1x64x128xf32>
    %7 = vector.shape_cast %6 : vector<1x64x128xf32> to vector<64x128xf32>
    %c0_2 = arith.constant 0 : index
    %c0_3 = arith.constant 0 : index
    %8 = vector.load %arg3[%c0_2, %c0_3] : memref<128x128xf32, #tpu.memory_space<vmem>>, vector<128x128xf32>
    %cst = arith.constant dense<0.000000e+00> : vector<64x128xf32>
    %9 = tpu.matmul %7, %8, %cst {dimension_numbers = #tpu.dot_dimension_numbers<[1], [0], [0], [1], [0, 0, 1, 1], [], []>} : vector<64x128xf32>, vector<128x128xf32>, vector<64x128xf32> -> vector<64x128xf32>
    %c0_4 = arith.constant 0 : index
    %c0_5 = arith.constant 0 : index
    %10 = vector.load %arg4[%c0_4, %c0_5] : memref<1x128xf32, #tpu.memory_space<vmem>>, vector<1x128xf32>
    %11 = vector.broadcast %10 : vector<1x128xf32> to vector<64x128xf32>
    %12 = arith.addf %9, %11 : vector<64x128xf32>
    %cst_6 = arith.constant 0.176776692 : f32
    %13 = vector.broadcast %cst_6 : f32 to vector<64x128xf32>
    %14 = arith.mulf %12, %13 : vector<64x128xf32>
    %15 = vector.shape_cast %14 : vector<64x128xf32> to vector<64x4x32xf32>
    %16 = tpu.transpose %15, [1, 0, 2] : vector<64x4x32xf32> -> vector<4x64x32xf32>
    %c0_7 = arith.constant 0 : index
    %c0_8 = arith.constant 0 : index
    %c0_9 = arith.constant 0 : index
    %17 = vector.load %arg19[%c0_7, %c0_8, %c0_9] : memref<4x32x128xf32, #tpu.memory_space<vmem>>, vector<4x32x128xf32>
    "tpu.trace_start"() <{level = 10 : i32, message = "hqd,hdk->hqk"}> : () -> ()
    %cst_10 = arith.constant dense<0.000000e+00> : vector<4x64x128xf32>
    %18 = tpu.matmul %16, %17, %cst_10 {dimension_numbers = #tpu.dot_dimension_numbers<[2], [1], [1], [2], [0, 0, 0, 1, 1, 2], [0], [0]>} : vector<4x64x32xf32>, vector<4x32x128xf32>, vector<4x64x128xf32> -> vector<4x64x128xf32>
    "tpu.trace_stop"() : () -> ()
    %cst_11 = arith.constant dense<0xFF800000> : vector<4x64xf32>
    %19 = vector.multi_reduction <maximumf>, %18, %cst_11 [2] : vector<4x64x128xf32> to vector<4x64xf32>
    %20 = vector.shape_cast %19 : vector<4x64xf32> to vector<4x64x1xf32>
    %21 = vector.broadcast %20 : vector<4x64x1xf32> to vector<4x64x128xf32>
    %22 = arith.subf %18, %21 : vector<4x64x128xf32>
    %23 = math.exp %22 : vector<4x64x128xf32>
    %cst_12 = arith.constant dense<0.000000e+00> : vector<4x64xf32>
    %24 = vector.multi_reduction <add>, %23, %cst_12 [2] : vector<4x64x128xf32> to vector<4x64xf32>
    %25 = vector.shape_cast %24 : vector<4x64xf32> to vector<4x64x1xf32>
    %26 = tpu.reciprocal %25 : vector<4x64x1xf32> -> vector<4x64x1xf32>
    %27 = vector.broadcast %26 : vector<4x64x1xf32> to vector<4x64x128xf32>
    %28 = arith.mulf %23, %27 : vector<4x64x128xf32>
    %c0_13 = arith.constant 0 : index
    %c0_14 = arith.constant 0 : index
    %c0_15 = arith.constant 0 : index
    %c0_16 = arith.constant 0 : index
    %29 = vector.load %arg18[%c0_13, %c0_14, %c0_15, %c0_16] : memref<1x4x64x128xf32, #tpu.memory_space<vmem>>, vector<1x4x64x128xf32>
    %30 = vector.shape_cast %29 : vector<1x4x64x128xf32> to vector<4x64x128xf32>
    %31 = vector.shape_cast %28 : vector<4x64x128xf32> to vector<1x4x64x128xf32>
    tpu.vector_store %arg18[%c0_13, %c0_14, %c0_15, %c0_16], %31 {strides = array<i32>} : memref<1x4x64x128xf32, #tpu.memory_space<vmem>>, vector<1x4x64x128xf32>,
    %c0_17 = arith.constant 0 : index
    %c0_18 = arith.constant 0 : index
    %c0_19 = arith.constant 0 : index
    %32 = vector.load %arg20[%c0_17, %c0_18, %c0_19] : memref<4x32x128xf32, #tpu.memory_space<vmem>>, vector<4x32x128xf32>
    "tpu.trace_start"() <{level = 10 : i32, message = "hqk,hdk->hqd"}> : () -> ()
    %cst_20 = arith.constant dense<0.000000e+00> : vector<4x64x32xf32>
    %33 = tpu.matmul %28, %32, %cst_20 {dimension_numbers = #tpu.dot_dimension_numbers<[2], [2], [1], [1], [0, 0, 0, 1, 1, 1], [0], [0]>} : vector<4x64x128xf32>, vector<4x32x128xf32>, vector<4x64x32xf32> -> vector<4x64x32xf32>
    "tpu.trace_stop"() : () -> ()
    %34 = tpu.transpose %33, [1, 0, 2] : vector<4x64x32xf32> -> vector<64x4x32xf32>
    %35 = vector.shape_cast %34 : vector<64x4x32xf32> to vector<64x128xf32>
    %c0_21 = arith.constant 0 : index
    %c0_22 = arith.constant 0 : index
    %36 = vector.load %arg7[%c0_21, %c0_22] : memref<128x128xf32, #tpu.memory_space<vmem>>, vector<128x128xf32>
    %cst_23 = arith.constant dense<0.000000e+00> : vector<64x128xf32>
    %37 = tpu.matmul %35, %36, %cst_23 {dimension_numbers = #tpu.dot_dimension_numbers<[1], [0], [0], [1], [0, 0, 1, 1], [], []>} : vector<64x128xf32>, vector<128x128xf32>, vector<64x128xf32> -> vector<64x128xf32>
    %c0_24 = arith.constant 0 : index
    %c0_25 = arith.constant 0 : index
    %38 = vector.load %arg8[%c0_24, %c0_25] : memref<1x128xf32, #tpu.memory_space<vmem>>, vector<1x128xf32>
    %39 = vector.broadcast %38 : vector<1x128xf32> to vector<64x128xf32>
    %40 = arith.addf %37, %39 : vector<64x128xf32>
    %41 = arith.addf %40, %7 : vector<64x128xf32>
    %cst_26 = arith.constant dense<0.000000e+00> : vector<64xf32>
    %42 = vector.multi_reduction <add>, %41, %cst_26 [1] : vector<64x128xf32> to vector<64xf32>
    %43 = vector.shape_cast %42 : vector<64xf32> to vector<64x1xf32>
    %cst_27 = arith.constant 1.280000e+02 : f32
    %44 = vector.broadcast %cst_27 : f32 to vector<64x1xf32>
    %45 = arith.divf %43, %44 : vector<64x1xf32>
    %46 = vector.broadcast %45 : vector<64x1xf32> to vector<64x128xf32>
    %47 = arith.subf %41, %46 : vector<64x128xf32>
    %48 = arith.mulf %47, %47 : vector<64x128xf32>
    %cst_28 = arith.constant dense<0.000000e+00> : vector<64xf32>
    %49 = vector.multi_reduction <add>, %48, %cst_28 [1] : vector<64x128xf32> to vector<64xf32>
    %50 = vector.shape_cast %49 : vector<64xf32> to vector<64x1xf32>
    %cst_29 = arith.constant 1.280000e+02 : f32
    %51 = vector.broadcast %cst_29 : f32 to vector<64x1xf32>
    %52 = arith.divf %50, %51 : vector<64x1xf32>
    %53 = vector.broadcast %45 : vector<64x1xf32> to vector<64x128xf32>
    %54 = arith.subf %41, %53 : vector<64x128xf32>
    %cst_30 = arith.constant 9.99999974E-6 : f32
    %55 = vector.broadcast %cst_30 : f32 to vector<64x1xf32>
    %56 = arith.addf %52, %55 : vector<64x1xf32>
    %57 = math.rsqrt %56 : vector<64x1xf32>
    %58 = vector.broadcast %57 : vector<64x1xf32> to vector<64x128xf32>
    %59 = arith.mulf %54, %58 : vector<64x128xf32>
    %c0_31 = arith.constant 0 : index
    %c0_32 = arith.constant 0 : index
    %60 = vector.load %arg9[%c0_31, %c0_32] : memref<1x128xf32, #tpu.memory_space<vmem>>, vector<1x128xf32>
    %61 = vector.broadcast %60 : vector<1x128xf32> to vector<64x128xf32>
    %62 = arith.mulf %59, %61 : vector<64x128xf32>
    %c0_33 = arith.constant 0 : index
    %c0_34 = arith.constant 0 : index
    %63 = vector.load %arg10[%c0_33, %c0_34] : memref<1x128xf32, #tpu.memory_space<vmem>>, vector<1x128xf32>
    %64 = vector.broadcast %63 : vector<1x128xf32> to vector<64x128xf32>
    %65 = arith.addf %62, %64 : vector<64x128xf32>
    %c0_35 = arith.constant 0 : index
    %c0_36 = arith.constant 0 : index
    %66 = vector.load %arg11[%c0_35, %c0_36] : memref<128x256xf32, #tpu.memory_space<vmem>>, vector<128x256xf32>
    %cst_37 = arith.constant dense<0.000000e+00> : vector<64x256xf32>
    %67 = tpu.matmul %65, %66, %cst_37 {dimension_numbers = #tpu.dot_dimension_numbers<[1], [0], [0], [1], [0, 0, 1, 1], [], []>} : vector<64x128xf32>, vector<128x256xf32>, vector<64x256xf32> -> vector<64x256xf32>
    %c0_38 = arith.constant 0 : index
    %c0_39 = arith.constant 0 : index
    %68 = vector.load %arg12[%c0_38, %c0_39] : memref<1x256xf32, #tpu.memory_space<vmem>>, vector<1x256xf32>
    %69 = vector.broadcast %68 : vector<1x256xf32> to vector<64x256xf32>
    %70 = arith.addf %67, %69 : vector<64x256xf32>
    %cst_40 = arith.constant 0.000000e+00 : f32
    %71 = vector.broadcast %cst_40 : f32 to vector<64x256xf32>
    %72 = arith.maximumf %70, %71 : vector<64x256xf32>
    %c0_41 = arith.constant 0 : index
    %c0_42 = arith.constant 0 : index
    %73 = vector.load %arg13[%c0_41, %c0_42] : memref<256x128xf32, #tpu.memory_space<vmem>>, vector<256x128xf32>
    %cst_43 = arith.constant dense<0.000000e+00> : vector<64x128xf32>
    %74 = tpu.matmul %72, %73, %cst_43 {dimension_numbers = #tpu.dot_dimension_numbers<[1], [0], [0], [1], [0, 0, 1, 1], [], []>} : vector<64x256xf32>, vector<256x128xf32>, vector<64x128xf32> -> vector<64x128xf32>
    %c0_44 = arith.constant 0 : index
    %c0_45 = arith.constant 0 : index
    %75 = vector.load %arg14[%c0_44, %c0_45] : memref<1x128xf32, #tpu.memory_space<vmem>>, vector<1x128xf32>
    %76 = vector.broadcast %75 : vector<1x128xf32> to vector<64x128xf32>
    %77 = arith.addf %74, %76 : vector<64x128xf32>
    %78 = arith.addf %77, %65 : vector<64x128xf32>
    %cst_46 = arith.constant dense<0.000000e+00> : vector<64xf32>
    %79 = vector.multi_reduction <add>, %78, %cst_46 [1] : vector<64x128xf32> to vector<64xf32>
    %80 = vector.shape_cast %79 : vector<64xf32> to vector<64x1xf32>
    %cst_47 = arith.constant 1.280000e+02 : f32
    %81 = vector.broadcast %cst_47 : f32 to vector<64x1xf32>
    %82 = arith.divf %80, %81 : vector<64x1xf32>
    %83 = vector.broadcast %82 : vector<64x1xf32> to vector<64x128xf32>
    %84 = arith.subf %78, %83 : vector<64x128xf32>
    %85 = arith.mulf %84, %84 : vector<64x128xf32>
    %cst_48 = arith.constant dense<0.000000e+00> : vector<64xf32>
    %86 = vector.multi_reduction <add>, %85, %cst_48 [1] : vector<64x128xf32> to vector<64xf32>
    %87 = vector.shape_cast %86 : vector<64xf32> to vector<64x1xf32>
    %cst_49 = arith.constant 1.280000e+02 : f32
    %88 = vector.broadcast %cst_49 : f32 to vector<64x1xf32>
    %89 = arith.divf %87, %88 : vector<64x1xf32>
    %90 = vector.broadcast %82 : vector<64x1xf32> to vector<64x128xf32>
    %91 = arith.subf %78, %90 : vector<64x128xf32>
    %cst_50 = arith.constant 9.99999974E-6 : f32
    %92 = vector.broadcast %cst_50 : f32 to vector<64x1xf32>
    %93 = arith.addf %89, %92 : vector<64x1xf32>
    %94 = math.rsqrt %93 : vector<64x1xf32>
    %95 = vector.broadcast %94 : vector<64x1xf32> to vector<64x128xf32>
    %96 = arith.mulf %91, %95 : vector<64x128xf32>
    %c0_51 = arith.constant 0 : index
    %c0_52 = arith.constant 0 : index
    %97 = vector.load %arg15[%c0_51, %c0_52] : memref<1x128xf32, #tpu.memory_space<vmem>>, vector<1x128xf32>
    %98 = vector.broadcast %97 : vector<1x128xf32> to vector<64x128xf32>
    %99 = arith.mulf %96, %98 : vector<64x128xf32>
    %c0_53 = arith.constant 0 : index
    %c0_54 = arith.constant 0 : index
    %100 = vector.load %arg16[%c0_53, %c0_54] : memref<1x128xf32, #tpu.memory_space<vmem>>, vector<1x128xf32>
    %101 = vector.broadcast %100 : vector<1x128xf32> to vector<64x128xf32>
    %102 = arith.addf %99, %101 : vector<64x128xf32>
    %c0_55 = arith.constant 0 : index
    %c0_56 = arith.constant 0 : index
    %c0_57 = arith.constant 0 : index
    %103 = vector.load %arg17[%c0_55, %c0_56, %c0_57] : memref<1x64x128xf32, #tpu.memory_space<vmem>>, vector<1x64x128xf32>
    %104 = vector.shape_cast %103 : vector<1x64x128xf32> to vector<64x128xf32>
    %105 = vector.shape_cast %102 : vector<64x128xf32> to vector<1x64x128xf32>
    tpu.vector_store %arg17[%c0_55, %c0_56, %c0_57], %105 {strides = array<i32>} : memref<1x64x128xf32, #tpu.memory_space<vmem>>, vector<1x64x128xf32>,
    return
  }
  func.func @transform_0(%arg0: i32, %arg1: i32) -> (i32, i32, i32) {
    %c0_i32 = arith.constant 0 : i32
    %c0_i32_0 = arith.constant 0 : i32
    %c0_i32_1 = arith.constant 0 : i32
    return %arg0, %c0_i32, %c0_i32_0 : i32, i32, i32
  }
  func.func @transform_1(%arg0: i32, %arg1: i32) -> (i32, i32) {
    %c0_i32 = arith.constant 0 : i32
    %c0_i32_0 = arith.constant 0 : i32
    %c0_i32_1 = arith.constant 0 : i32
    return %c0_i32, %c0_i32_0 : i32, i32
  }
  func.func @transform_2(%arg0: i32, %arg1: i32) -> (i32, i32) {
    %c0_i32 = arith.constant 0 : i32
    %c0_i32_0 = arith.constant 0 : i32
    %c0_i32_1 = arith.constant 0 : i32
    return %c0_i32, %c0_i32_0 : i32, i32
  }
  func.func @transform_3(%arg0: i32, %arg1: i32) -> (i32, i32) {
    %c0_i32 = arith.constant 0 : i32
    %c0_i32_0 = arith.constant 0 : i32
    %c0_i32_1 = arith.constant 0 : i32
    return %c0_i32, %c0_i32_0 : i32, i32
  }
  func.func @transform_4(%arg0: i32, %arg1: i32) -> (i32, i32) {
    %c0_i32 = arith.constant 0 : i32
    %c0_i32_0 = arith.constant 0 : i32
    %c0_i32_1 = arith.constant 0 : i32
    return %c0_i32, %c0_i32_0 : i32, i32
  }
  func.func @transform_5(%arg0: i32, %arg1: i32) -> (i32, i32) {
    %c0_i32 = arith.constant 0 : i32
    %c0_i32_0 = arith.constant 0 : i32
    %c0_i32_1 = arith.constant 0 : i32
    return %c0_i32, %c0_i32_0 : i32, i32
  }
  func.func @transform_6(%arg0: i32, %arg1: i32) -> (i32, i32) {
    %c0_i32 = arith.constant 0 : i32
    %c0_i32_0 = arith.constant 0 : i32
    %c0_i32_1 = arith.constant 0 : i32
    return %c0_i32, %c0_i32_0 : i32, i32
  }
  func.func @transform_7(%arg0: i32, %arg1: i32) -> (i32, i32) {
    %c0_i32 = arith.constant 0 : i32
    %c0_i32_0 = arith.constant 0 : i32
    %c0_i32_1 = arith.constant 0 : i32
    return %c0_i32, %c0_i32_0 : i32, i32
  }
  func.func @transform_8(%arg0: i32, %arg1: i32) -> (i32, i32) {
    %c0_i32 = arith.constant 0 : i32
    %c0_i32_0 = arith.constant 0 : i32
    %c0_i32_1 = arith.constant 0 : i32
    return %c0_i32, %c0_i32_0 : i32, i32
  }
  func.func @transform_9(%arg0: i32, %arg1: i32) -> (i32, i32) {
    %c0_i32 = arith.constant 0 : i32
    %c0_i32_0 = arith.constant 0 : i32
    %c0_i32_1 = arith.constant 0 : i32
    return %c0_i32, %c0_i32_0 : i32, i32
  }
  func.func @transform_10(%arg0: i32, %arg1: i32) -> (i32, i32) {
    %c0_i32 = arith.constant 0 : i32
    %c0_i32_0 = arith.constant 0 : i32
    %c0_i32_1 = arith.constant 0 : i32
    return %c0_i32, %c0_i32_0 : i32, i32
  }
  func.func @transform_11(%arg0: i32, %arg1: i32) -> (i32, i32) {
    %c0_i32 = arith.constant 0 : i32
    %c0_i32_0 = arith.constant 0 : i32
    %c0_i32_1 = arith.constant 0 : i32
    return %c0_i32, %c0_i32_0 : i32, i32
  }
  func.func @transform_12(%arg0: i32, %arg1: i32) -> (i32, i32) {
    %c0_i32 = arith.constant 0 : i32
    %c0_i32_0 = arith.constant 0 : i32
    %c0_i32_1 = arith.constant 0 : i32
    return %c0_i32, %c0_i32_0 : i32, i32
  }
  func.func @transform_13(%arg0: i32, %arg1: i32) -> (i32, i32) {
    %c0_i32 = arith.constant 0 : i32
    %c0_i32_0 = arith.constant 0 : i32
    %c0_i32_1 = arith.constant 0 : i32
    return %c0_i32, %c0_i32_0 : i32, i32
  }
  func.func @transform_14(%arg0: i32, %arg1: i32) -> (i32, i32) {
    %c0_i32 = arith.constant 0 : i32
    %c0_i32_0 = arith.constant 0 : i32
    %c0_i32_1 = arith.constant 0 : i32
    return %c0_i32, %c0_i32_0 : i32, i32
  }
  func.func @transform_15(%arg0: i32, %arg1: i32) -> (i32, i32, i32) {
    %c0_i32 = arith.constant 0 : i32
    %c0_i32_0 = arith.constant 0 : i32
    return %arg0, %arg1, %c0_i32 : i32, i32, i32
  }
  func.func @transform_16(%arg0: i32, %arg1: i32) -> (i32, i32, i32, i32) {
    %c0_i32 = arith.constant 0 : i32
    %c0_i32_0 = arith.constant 0 : i32
    %c0_i32_1 = arith.constant 0 : i32
    return %arg0, %c0_i32, %arg1, %c0_i32_0 : i32, i32, i32, i32
  }
}

module attributes {stable_mosaic.version = 11 : i64} {
  func.func @_encoder_layer_kernel(%arg0: i32, %arg1: i32, %arg2: memref<1x128x128xf32, #tpu.memory_space<vmem>>, %arg3: memref<128x128xf32, #tpu.memory_space<vmem>>, %arg4: memref<1x128xf32, #tpu.memory_space<vmem>>, %arg5: memref<256x128xf32, #tpu.memory_space<vmem>>, %arg6: memref<256x1xf32, #tpu.memory_space<vmem>>, %arg7: memref<128x128xf32, #tpu.memory_space<vmem>>, %arg8: memref<1x128xf32, #tpu.memory_space<vmem>>, %arg9: memref<1x128xf32, #tpu.memory_space<vmem>>, %arg10: memref<1x128xf32, #tpu.memory_space<vmem>>, %arg11: memref<128x256xf32, #tpu.memory_space<vmem>>, %arg12: memref<1x256xf32, #tpu.memory_space<vmem>>, %arg13: memref<256x128xf32, #tpu.memory_space<vmem>>, %arg14: memref<1x128xf32, #tpu.memory_space<vmem>>, %arg15: memref<1x128xf32, #tpu.memory_space<vmem>>, %arg16: memref<1x128xf32, #tpu.memory_space<vmem>>, %arg17: memref<1x64x128xf32, #tpu.memory_space<vmem>>, %arg18: memref<1x4x64x128xf32, #tpu.memory_space<vmem>>, %arg19: memref<4x32x128xf32, #tpu.memory_space<vmem>>, %arg20: memref<4x32x128xf32, #tpu.memory_space<vmem>>) attributes {dimension_semantics = [#tpu.dimension_semantics<parallel>, #tpu.dimension_semantics<arbitrary>], iteration_bounds = array<i64: 2, 2>, scalar_prefetch = 0 : i64, scratch_operands = 2 : i64, tpu.core_type = #tpu.core_type<tc>, window_params = [{transform_indices = @transform_0, window_bounds = array<i64: 1, 128, 128>}, {pipeline_mode = #tpu.pipeline_mode<synchronous>, transform_indices = @transform_1, window_bounds = array<i64: 128, 128>}, {pipeline_mode = #tpu.pipeline_mode<synchronous>, transform_indices = @transform_2, window_bounds = array<i64: 1, 128>}, {pipeline_mode = #tpu.pipeline_mode<synchronous>, transform_indices = @transform_3, window_bounds = array<i64: 256, 128>}, {pipeline_mode = #tpu.pipeline_mode<synchronous>, transform_indices = @transform_4, window_bounds = array<i64: 256, 1>}, {pipeline_mode = #tpu.pipeline_mode<synchronous>, transform_indices = @transform_5, window_bounds = array<i64: 128, 128>}, {pipeline_mode = #tpu.pipeline_mode<synchronous>, transform_indices = @transform_6, window_bounds = array<i64: 1, 128>}, {pipeline_mode = #tpu.pipeline_mode<synchronous>, transform_indices = @transform_7, window_bounds = array<i64: 1, 128>}, {pipeline_mode = #tpu.pipeline_mode<synchronous>, transform_indices = @transform_8, window_bounds = array<i64: 1, 128>}, {pipeline_mode = #tpu.pipeline_mode<synchronous>, transform_indices = @transform_9, window_bounds = array<i64: 128, 256>}, {pipeline_mode = #tpu.pipeline_mode<synchronous>, transform_indices = @transform_10, window_bounds = array<i64: 1, 256>}, {pipeline_mode = #tpu.pipeline_mode<synchronous>, transform_indices = @transform_11, window_bounds = array<i64: 256, 128>}, {pipeline_mode = #tpu.pipeline_mode<synchronous>, transform_indices = @transform_12, window_bounds = array<i64: 1, 128>}, {pipeline_mode = #tpu.pipeline_mode<synchronous>, transform_indices = @transform_13, window_bounds = array<i64: 1, 128>}, {pipeline_mode = #tpu.pipeline_mode<synchronous>, transform_indices = @transform_14, window_bounds = array<i64: 1, 128>}, {transform_indices = @transform_15, window_bounds = array<i64: 1, 64, 128>}, {transform_indices = @transform_16, window_bounds = array<i64: 1, 4, 64, 128>}]} {
    %c0_i32 = arith.constant 0 : i32
    %0 = arith.cmpi eq, %arg1, %c0_i32 : i32
    %1 = arith.extui %0 : i1 to i32
    %c0_i32_0 = arith.constant 0 : i32
    %2 = arith.cmpi ne, %1, %c0_i32_0 : i32
    scf.if %2 {
      %c0_58 = arith.constant 0 : index
      %c0_59 = arith.constant 0 : index
      %c0_60 = arith.constant 0 : index
      %106 = vector.load %arg2[%c0_58, %c0_59, %c0_60] : memref<1x128x128xf32, #tpu.memory_space<vmem>>, vector<1x128x128xf32>
      %107 = vector.shape_cast %106 : vector<1x128x128xf32> to vector<128x128xf32>
      %108 = tpu.transpose %107, [1, 0] : vector<128x128xf32> -> vector<128x128xf32>
      %c0_61 = arith.constant 0 : index
      %c0_62 = arith.constant 0 : index
      %109 = vector.load %arg5[%c0_61, %c0_62] : memref<256x128xf32, #tpu.memory_space<vmem>>, vector<256x128xf32>
      %cst_63 = arith.constant dense<0.000000e+00> : vector<256x128xf32>
      %110 = tpu.matmul %109, %108, %cst_63 {dimension_numbers = #tpu.dot_dimension_numbers<[1], [0], [0], [1], [0, 0, 1, 1], [], []>} : vector<256x128xf32>, vector<128x128xf32>, vector<256x128xf32> -> vector<256x128xf32>
      %c0_64 = arith.constant 0 : index
      %c0_65 = arith.constant 0 : index
      %111 = vector.load %arg6[%c0_64, %c0_65] : memref<256x1xf32, #tpu.memory_space<vmem>>, vector<256x1xf32>
      %112 = vector.broadcast %111 : vector<256x1xf32> to vector<256x128xf32>
      %113 = arith.addf %110, %112 : vector<256x128xf32>
      %114 = vector.extract_strided_slice %113 {offsets = [0, 0], sizes = [128, 128], strides = [1, 1]} : vector<256x128xf32> to vector<128x128xf32>
      %115 = vector.shape_cast %114 : vector<128x128xf32> to vector<4x32x128xf32>
      %c0_66 = arith.constant 0 : index
      %c0_67 = arith.constant 0 : index
      %c0_68 = arith.constant 0 : index
      %116 = vector.load %arg19[%c0_66, %c0_67, %c0_68] : memref<4x32x128xf32, #tpu.memory_space<vmem>>, vector<4x32x128xf32>
      tpu.vector_store %arg19[%c0_66, %c0_67, %c0_68], %115 {strides = array<i32>} : memref<4x32x128xf32, #tpu.memory_space<vmem>>, vector<4x32x128xf32>,
      %117 = vector.extract_strided_slice %113 {offsets = [128, 0], sizes = [128, 128], strides = [1, 1]} : vector<256x128xf32> to vector<128x128xf32>
      %118 = vector.shape_cast %117 : vector<128x128xf32> to vector<4x32x128xf32>
      %c0_69 = arith.constant 0 : index
      %c0_70 = arith.constant 0 : index
      %c0_71 = arith.constant 0 : index
      %119 = vector.load %arg20[%c0_69, %c0_70, %c0_71] : memref<4x32x128xf32, #tpu.memory_space<vmem>>, vector<4x32x128xf32>
      tpu.vector_store %arg20[%c0_69, %c0_70, %c0_71], %118 {strides = array<i32>} : memref<4x32x128xf32, #tpu.memory_space<vmem>>, vector<4x32x128xf32>,
    } else {
    }
    %c64_i32 = arith.constant 64 : i32
    %3 = arith.muli %arg1, %c64_i32 : i32
    %4 = tpu.assume_multiple %3, 64 : i32
    %c0 = arith.constant 0 : index
    %5 = arith.index_cast %4 : i32 to index
    %c0_1 = arith.constant 0 : index
    %6 = vector.load %arg2[%c0, %5, %c0_1] : memref<1x128x128xf32, #tpu.memory_space<vmem>>, vector<1x64x128xf32>
    %7 = vector.shape_cast %6 : vector<1x64x128xf32> to vector<64x128xf32>
    %c0_2 = arith.constant 0 : index
    %c0_3 = arith.constant 0 : index
    %8 = vector.load %arg3[%c0_2, %c0_3] : memref<128x128xf32, #tpu.memory_space<vmem>>, vector<128x128xf32>
    %cst = arith.constant dense<0.000000e+00> : vector<64x128xf32>
    %9 = tpu.matmul %7, %8, %cst {dimension_numbers = #tpu.dot_dimension_numbers<[1], [0], [0], [1], [0, 0, 1, 1], [], []>} : vector<64x128xf32>, vector<128x128xf32>, vector<64x128xf32> -> vector<64x128xf32>
    %c0_4 = arith.constant 0 : index
    %c0_5 = arith.constant 0 : index
    %10 = vector.load %arg4[%c0_4, %c0_5] : memref<1x128xf32, #tpu.memory_space<vmem>>, vector<1x128xf32>
    %11 = vector.broadcast %10 : vector<1x128xf32> to vector<64x128xf32>
    %12 = arith.addf %9, %11 : vector<64x128xf32>
    %cst_6 = arith.constant 0.176776692 : f32
    %13 = vector.broadcast %cst_6 : f32 to vector<64x128xf32>
    %14 = arith.mulf %12, %13 : vector<64x128xf32>
    %15 = vector.shape_cast %14 : vector<64x128xf32> to vector<64x4x32xf32>
    %16 = tpu.transpose %15, [1, 0, 2] : vector<64x4x32xf32> -> vector<4x64x32xf32>
    %c0_7 = arith.constant 0 : index
    %c0_8 = arith.constant 0 : index
    %c0_9 = arith.constant 0 : index
    %17 = vector.load %arg19[%c0_7, %c0_8, %c0_9] : memref<4x32x128xf32, #tpu.memory_space<vmem>>, vector<4x32x128xf32>
    "tpu.trace_start"() <{level = 10 : i32, message = "hqd,hdk->hqk"}> : () -> ()
    %cst_10 = arith.constant dense<0.000000e+00> : vector<4x64x128xf32>
    %18 = tpu.matmul %16, %17, %cst_10 {dimension_numbers = #tpu.dot_dimension_numbers<[2], [1], [1], [2], [0, 0, 0, 1, 1, 2], [0], [0]>} : vector<4x64x32xf32>, vector<4x32x128xf32>, vector<4x64x128xf32> -> vector<4x64x128xf32>
    "tpu.trace_stop"() : () -> ()
    %cst_11 = arith.constant dense<0xFF800000> : vector<4x64xf32>
    %19 = vector.multi_reduction <maximumf>, %18, %cst_11 [2] : vector<4x64x128xf32> to vector<4x64xf32>
    %20 = vector.shape_cast %19 : vector<4x64xf32> to vector<4x64x1xf32>
    %21 = vector.broadcast %20 : vector<4x64x1xf32> to vector<4x64x128xf32>
    %22 = arith.subf %18, %21 : vector<4x64x128xf32>
    %23 = math.exp %22 : vector<4x64x128xf32>
    %cst_12 = arith.constant dense<0.000000e+00> : vector<4x64xf32>
    %24 = vector.multi_reduction <add>, %23, %cst_12 [2] : vector<4x64x128xf32> to vector<4x64xf32>
    %25 = vector.shape_cast %24 : vector<4x64xf32> to vector<4x64x1xf32>
    %26 = tpu.reciprocal %25 : vector<4x64x1xf32> -> vector<4x64x1xf32>
    %27 = vector.broadcast %26 : vector<4x64x1xf32> to vector<4x64x128xf32>
    %28 = arith.mulf %23, %27 : vector<4x64x128xf32>
    %c0_13 = arith.constant 0 : index
    %c0_14 = arith.constant 0 : index
    %c0_15 = arith.constant 0 : index
    %c0_16 = arith.constant 0 : index
    %29 = vector.load %arg18[%c0_13, %c0_14, %c0_15, %c0_16] : memref<1x4x64x128xf32, #tpu.memory_space<vmem>>, vector<1x4x64x128xf32>
    %30 = vector.shape_cast %29 : vector<1x4x64x128xf32> to vector<4x64x128xf32>
    %31 = vector.shape_cast %28 : vector<4x64x128xf32> to vector<1x4x64x128xf32>
    tpu.vector_store %arg18[%c0_13, %c0_14, %c0_15, %c0_16], %31 {strides = array<i32>} : memref<1x4x64x128xf32, #tpu.memory_space<vmem>>, vector<1x4x64x128xf32>,
    %c0_17 = arith.constant 0 : index
    %c0_18 = arith.constant 0 : index
    %c0_19 = arith.constant 0 : index
    %32 = vector.load %arg20[%c0_17, %c0_18, %c0_19] : memref<4x32x128xf32, #tpu.memory_space<vmem>>, vector<4x32x128xf32>
    "tpu.trace_start"() <{level = 10 : i32, message = "hqk,hdk->hqd"}> : () -> ()
    %cst_20 = arith.constant dense<0.000000e+00> : vector<4x64x32xf32>
    %33 = tpu.matmul %28, %32, %cst_20 {dimension_numbers = #tpu.dot_dimension_numbers<[2], [2], [1], [1], [0, 0, 0, 1, 1, 1], [0], [0]>} : vector<4x64x128xf32>, vector<4x32x128xf32>, vector<4x64x32xf32> -> vector<4x64x32xf32>
    "tpu.trace_stop"() : () -> ()
    %34 = tpu.transpose %33, [1, 0, 2] : vector<4x64x32xf32> -> vector<64x4x32xf32>
    %35 = vector.shape_cast %34 : vector<64x4x32xf32> to vector<64x128xf32>
    %c0_21 = arith.constant 0 : index
    %c0_22 = arith.constant 0 : index
    %36 = vector.load %arg7[%c0_21, %c0_22] : memref<128x128xf32, #tpu.memory_space<vmem>>, vector<128x128xf32>
    %cst_23 = arith.constant dense<0.000000e+00> : vector<64x128xf32>
    %37 = tpu.matmul %35, %36, %cst_23 {dimension_numbers = #tpu.dot_dimension_numbers<[1], [0], [0], [1], [0, 0, 1, 1], [], []>} : vector<64x128xf32>, vector<128x128xf32>, vector<64x128xf32> -> vector<64x128xf32>
    %c0_24 = arith.constant 0 : index
    %c0_25 = arith.constant 0 : index
    %38 = vector.load %arg8[%c0_24, %c0_25] : memref<1x128xf32, #tpu.memory_space<vmem>>, vector<1x128xf32>
    %39 = vector.broadcast %38 : vector<1x128xf32> to vector<64x128xf32>
    %40 = arith.addf %37, %39 : vector<64x128xf32>
    %41 = arith.addf %40, %7 : vector<64x128xf32>
    %cst_26 = arith.constant dense<0.000000e+00> : vector<64xf32>
    %42 = vector.multi_reduction <add>, %41, %cst_26 [1] : vector<64x128xf32> to vector<64xf32>
    %43 = vector.shape_cast %42 : vector<64xf32> to vector<64x1xf32>
    %cst_27 = arith.constant 1.280000e+02 : f32
    %44 = vector.broadcast %cst_27 : f32 to vector<64x1xf32>
    %45 = arith.divf %43, %44 : vector<64x1xf32>
    %46 = vector.broadcast %45 : vector<64x1xf32> to vector<64x128xf32>
    %47 = arith.subf %41, %46 : vector<64x128xf32>
    %48 = arith.mulf %47, %47 : vector<64x128xf32>
    %cst_28 = arith.constant dense<0.000000e+00> : vector<64xf32>
    %49 = vector.multi_reduction <add>, %48, %cst_28 [1] : vector<64x128xf32> to vector<64xf32>
    %50 = vector.shape_cast %49 : vector<64xf32> to vector<64x1xf32>
    %cst_29 = arith.constant 1.280000e+02 : f32
    %51 = vector.broadcast %cst_29 : f32 to vector<64x1xf32>
    %52 = arith.divf %50, %51 : vector<64x1xf32>
    %53 = vector.broadcast %45 : vector<64x1xf32> to vector<64x128xf32>
    %54 = arith.subf %41, %53 : vector<64x128xf32>
    %cst_30 = arith.constant 9.99999974E-6 : f32
    %55 = vector.broadcast %cst_30 : f32 to vector<64x1xf32>
    %56 = arith.addf %52, %55 : vector<64x1xf32>
    %57 = math.rsqrt %56 : vector<64x1xf32>
    %58 = vector.broadcast %57 : vector<64x1xf32> to vector<64x128xf32>
    %59 = arith.mulf %54, %58 : vector<64x128xf32>
    %c0_31 = arith.constant 0 : index
    %c0_32 = arith.constant 0 : index
    %60 = vector.load %arg9[%c0_31, %c0_32] : memref<1x128xf32, #tpu.memory_space<vmem>>, vector<1x128xf32>
    %61 = vector.broadcast %60 : vector<1x128xf32> to vector<64x128xf32>
    %62 = arith.mulf %59, %61 : vector<64x128xf32>
    %c0_33 = arith.constant 0 : index
    %c0_34 = arith.constant 0 : index
    %63 = vector.load %arg10[%c0_33, %c0_34] : memref<1x128xf32, #tpu.memory_space<vmem>>, vector<1x128xf32>
    %64 = vector.broadcast %63 : vector<1x128xf32> to vector<64x128xf32>
    %65 = arith.addf %62, %64 : vector<64x128xf32>
    %c0_35 = arith.constant 0 : index
    %c0_36 = arith.constant 0 : index
    %66 = vector.load %arg11[%c0_35, %c0_36] : memref<128x256xf32, #tpu.memory_space<vmem>>, vector<128x256xf32>
    %cst_37 = arith.constant dense<0.000000e+00> : vector<64x256xf32>
    %67 = tpu.matmul %65, %66, %cst_37 {dimension_numbers = #tpu.dot_dimension_numbers<[1], [0], [0], [1], [0, 0, 1, 1], [], []>} : vector<64x128xf32>, vector<128x256xf32>, vector<64x256xf32> -> vector<64x256xf32>
    %c0_38 = arith.constant 0 : index
    %c0_39 = arith.constant 0 : index
    %68 = vector.load %arg12[%c0_38, %c0_39] : memref<1x256xf32, #tpu.memory_space<vmem>>, vector<1x256xf32>
    %69 = vector.broadcast %68 : vector<1x256xf32> to vector<64x256xf32>
    %70 = arith.addf %67, %69 : vector<64x256xf32>
    %cst_40 = arith.constant 0.000000e+00 : f32
    %71 = vector.broadcast %cst_40 : f32 to vector<64x256xf32>
    %72 = arith.maximumf %70, %71 : vector<64x256xf32>
    %c0_41 = arith.constant 0 : index
    %c0_42 = arith.constant 0 : index
    %73 = vector.load %arg13[%c0_41, %c0_42] : memref<256x128xf32, #tpu.memory_space<vmem>>, vector<256x128xf32>
    %cst_43 = arith.constant dense<0.000000e+00> : vector<64x128xf32>
    %74 = tpu.matmul %72, %73, %cst_43 {dimension_numbers = #tpu.dot_dimension_numbers<[1], [0], [0], [1], [0, 0, 1, 1], [], []>} : vector<64x256xf32>, vector<256x128xf32>, vector<64x128xf32> -> vector<64x128xf32>
    %c0_44 = arith.constant 0 : index
    %c0_45 = arith.constant 0 : index
    %75 = vector.load %arg14[%c0_44, %c0_45] : memref<1x128xf32, #tpu.memory_space<vmem>>, vector<1x128xf32>
    %76 = vector.broadcast %75 : vector<1x128xf32> to vector<64x128xf32>
    %77 = arith.addf %74, %76 : vector<64x128xf32>
    %78 = arith.addf %77, %65 : vector<64x128xf32>
    %cst_46 = arith.constant dense<0.000000e+00> : vector<64xf32>
    %79 = vector.multi_reduction <add>, %78, %cst_46 [1] : vector<64x128xf32> to vector<64xf32>
    %80 = vector.shape_cast %79 : vector<64xf32> to vector<64x1xf32>
    %cst_47 = arith.constant 1.280000e+02 : f32
    %81 = vector.broadcast %cst_47 : f32 to vector<64x1xf32>
    %82 = arith.divf %80, %81 : vector<64x1xf32>
    %83 = vector.broadcast %82 : vector<64x1xf32> to vector<64x128xf32>
    %84 = arith.subf %78, %83 : vector<64x128xf32>
    %85 = arith.mulf %84, %84 : vector<64x128xf32>
    %cst_48 = arith.constant dense<0.000000e+00> : vector<64xf32>
    %86 = vector.multi_reduction <add>, %85, %cst_48 [1] : vector<64x128xf32> to vector<64xf32>
    %87 = vector.shape_cast %86 : vector<64xf32> to vector<64x1xf32>
    %cst_49 = arith.constant 1.280000e+02 : f32
    %88 = vector.broadcast %cst_49 : f32 to vector<64x1xf32>
    %89 = arith.divf %87, %88 : vector<64x1xf32>
    %90 = vector.broadcast %82 : vector<64x1xf32> to vector<64x128xf32>
    %91 = arith.subf %78, %90 : vector<64x128xf32>
    %cst_50 = arith.constant 9.99999974E-6 : f32
    %92 = vector.broadcast %cst_50 : f32 to vector<64x1xf32>
    %93 = arith.addf %89, %92 : vector<64x1xf32>
    %94 = math.rsqrt %93 : vector<64x1xf32>
    %95 = vector.broadcast %94 : vector<64x1xf32> to vector<64x128xf32>
    %96 = arith.mulf %91, %95 : vector<64x128xf32>
    %c0_51 = arith.constant 0 : index
    %c0_52 = arith.constant 0 : index
    %97 = vector.load %arg15[%c0_51, %c0_52] : memref<1x128xf32, #tpu.memory_space<vmem>>, vector<1x128xf32>
    %98 = vector.broadcast %97 : vector<1x128xf32> to vector<64x128xf32>
    %99 = arith.mulf %96, %98 : vector<64x128xf32>
    %c0_53 = arith.constant 0 : index
    %c0_54 = arith.constant 0 : index
    %100 = vector.load %arg16[%c0_53, %c0_54] : memref<1x128xf32, #tpu.memory_space<vmem>>, vector<1x128xf32>
    %101 = vector.broadcast %100 : vector<1x128xf32> to vector<64x128xf32>
    %102 = arith.addf %99, %101 : vector<64x128xf32>
    %c0_55 = arith.constant 0 : index
    %c0_56 = arith.constant 0 : index
    %c0_57 = arith.constant 0 : index
    %103 = vector.load %arg17[%c0_55, %c0_56, %c0_57] : memref<1x64x128xf32, #tpu.memory_space<vmem>>, vector<1x64x128xf32>
    %104 = vector.shape_cast %103 : vector<1x64x128xf32> to vector<64x128xf32>
    %105 = vector.shape_cast %102 : vector<64x128xf32> to vector<1x64x128xf32>
    tpu.vector_store %arg17[%c0_55, %c0_56, %c0_57], %105 {strides = array<i32>} : memref<1x64x128xf32, #tpu.memory_space<vmem>>, vector<1x64x128xf32>,
    return
  }
  func.func @transform_0(%arg0: i32, %arg1: i32) -> (i32, i32, i32) {
    %c0_i32 = arith.constant 0 : i32
    %c0_i32_0 = arith.constant 0 : i32
    %c0_i32_1 = arith.constant 0 : i32
    return %arg0, %c0_i32, %c0_i32_0 : i32, i32, i32
  }
  func.func @transform_1(%arg0: i32, %arg1: i32) -> (i32, i32) {
    %c0_i32 = arith.constant 0 : i32
    %c0_i32_0 = arith.constant 0 : i32
    %c0_i32_1 = arith.constant 0 : i32
    return %c0_i32, %c0_i32_0 : i32, i32
  }
  func.func @transform_2(%arg0: i32, %arg1: i32) -> (i32, i32) {
    %c0_i32 = arith.constant 0 : i32
    %c0_i32_0 = arith.constant 0 : i32
    %c0_i32_1 = arith.constant 0 : i32
    return %c0_i32, %c0_i32_0 : i32, i32
  }
  func.func @transform_3(%arg0: i32, %arg1: i32) -> (i32, i32) {
    %c0_i32 = arith.constant 0 : i32
    %c0_i32_0 = arith.constant 0 : i32
    %c0_i32_1 = arith.constant 0 : i32
    return %c0_i32, %c0_i32_0 : i32, i32
  }
  func.func @transform_4(%arg0: i32, %arg1: i32) -> (i32, i32) {
    %c0_i32 = arith.constant 0 : i32
    %c0_i32_0 = arith.constant 0 : i32
    %c0_i32_1 = arith.constant 0 : i32
    return %c0_i32, %c0_i32_0 : i32, i32
  }
  func.func @transform_5(%arg0: i32, %arg1: i32) -> (i32, i32) {
    %c0_i32 = arith.constant 0 : i32
    %c0_i32_0 = arith.constant 0 : i32
    %c0_i32_1 = arith.constant 0 : i32
    return %c0_i32, %c0_i32_0 : i32, i32
  }
  func.func @transform_6(%arg0: i32, %arg1: i32) -> (i32, i32) {
    %c0_i32 = arith.constant 0 : i32
    %c0_i32_0 = arith.constant 0 : i32
    %c0_i32_1 = arith.constant 0 : i32
    return %c0_i32, %c0_i32_0 : i32, i32
  }
  func.func @transform_7(%arg0: i32, %arg1: i32) -> (i32, i32) {
    %c0_i32 = arith.constant 0 : i32
    %c0_i32_0 = arith.constant 0 : i32
    %c0_i32_1 = arith.constant 0 : i32
    return %c0_i32, %c0_i32_0 : i32, i32
  }
  func.func @transform_8(%arg0: i32, %arg1: i32) -> (i32, i32) {
    %c0_i32 = arith.constant 0 : i32
    %c0_i32_0 = arith.constant 0 : i32
    %c0_i32_1 = arith.constant 0 : i32
    return %c0_i32, %c0_i32_0 : i32, i32
  }
  func.func @transform_9(%arg0: i32, %arg1: i32) -> (i32, i32) {
    %c0_i32 = arith.constant 0 : i32
    %c0_i32_0 = arith.constant 0 : i32
    %c0_i32_1 = arith.constant 0 : i32
    return %c0_i32, %c0_i32_0 : i32, i32
  }
  func.func @transform_10(%arg0: i32, %arg1: i32) -> (i32, i32) {
    %c0_i32 = arith.constant 0 : i32
    %c0_i32_0 = arith.constant 0 : i32
    %c0_i32_1 = arith.constant 0 : i32
    return %c0_i32, %c0_i32_0 : i32, i32
  }
  func.func @transform_11(%arg0: i32, %arg1: i32) -> (i32, i32) {
    %c0_i32 = arith.constant 0 : i32
    %c0_i32_0 = arith.constant 0 : i32
    %c0_i32_1 = arith.constant 0 : i32
    return %c0_i32, %c0_i32_0 : i32, i32
  }
  func.func @transform_12(%arg0: i32, %arg1: i32) -> (i32, i32) {
    %c0_i32 = arith.constant 0 : i32
    %c0_i32_0 = arith.constant 0 : i32
    %c0_i32_1 = arith.constant 0 : i32
    return %c0_i32, %c0_i32_0 : i32, i32
  }
  func.func @transform_13(%arg0: i32, %arg1: i32) -> (i32, i32) {
    %c0_i32 = arith.constant 0 : i32
    %c0_i32_0 = arith.constant 0 : i32
    %c0_i32_1 = arith.constant 0 : i32
    return %c0_i32, %c0_i32_0 : i32, i32
  }
  func.func @transform_14(%arg0: i32, %arg1: i32) -> (i32, i32) {
    %c0_i32 = arith.constant 0 : i32
    %c0_i32_0 = arith.constant 0 : i32
    %c0_i32_1 = arith.constant 0 : i32
    return %c0_i32, %c0_i32_0 : i32, i32
  }
  func.func @transform_15(%arg0: i32, %arg1: i32) -> (i32, i32, i32) {
    %c0_i32 = arith.constant 0 : i32
    %c0_i32_0 = arith.constant 0 : i32
    return %arg0, %arg1, %c0_i32 : i32, i32, i32
  }
  func.func @transform_16(%arg0: i32, %arg1: i32) -> (i32, i32, i32, i32) {
    %c0_i32 = arith.constant 0 : i32
    %c0_i32_0 = arith.constant 0 : i32
    %c0_i32_1 = arith.constant 0 : i32
    return %arg0, %c0_i32, %arg1, %c0_i32_0 : i32, i32, i32, i32
  }
}

</mosaic_0001>

<bundles_post_ra>
// kernel: tpu_custom_call.1
= control target key start
LH: loop header
LB: loop body
LE: loop exit
PB: predicated region body
PF: predicated region fallthrough
CT: control target
= control target key end

     0   :  { %s9523_s0 = inlined_call_operand.vmem [shape: f32[2,128,128], index: 0, kind: input, shape index: {}]   ;;  %s9524_s1 = inlined_call_operand.hbm [shape: f32[128,128], index: 1, kind: input, shape index: {}]   ;;  %s9525_s2 = inlined_call_operand.vmem [shape: f32[1,128], index: 2, kind: input, shape index: {}]   ;;  %s9526_s3 = inlined_call_operand.hbm [shape: f32[256,128], index: 3, kind: input, shape index: {}]   ;;  %s9527_s4 = inlined_call_operand.vmem [shape: f32[256,1], index: 4, kind: input, shape index: {}]   ;;  %s9528_s5 = inlined_call_operand.hbm [shape: f32[128,128], index: 5, kind: input, shape index: {}]   ;;  %s9529_s6 = inlined_call_operand.vmem [shape: f32[1,128], index: 6, kind: input, shape index: {}]   ;;  %s9530_s7 = inlined_call_operand.vmem [shape: f32[1,128], index: 7, kind: input, shape index: {}]   ;;  %s9531_s8 = inlined_call_operand.vmem [shape: f32[1,128], index: 8, kind: input, shape index: {}]   ;;  %s9532_s9 = inlined_call_operand.hbm [shape: f32[128,256], index: 9, kind: input, shape index: {}]   ;;  %s9533_s10 = inlined_call_operand.vmem [shape: f32[1,256], index: 10, kind: input, shape index: {}]   ;;  %s9534_s11 = inlined_call_operand.hbm [shape: f32[256,128], index: 11, kind: input, shape index: {}]   ;;  %s9535_s12 = inlined_call_operand.vmem [shape: f32[1,128], index: 12, kind: input, shape index: {}]   ;;  %s9536_s13 = inlined_call_operand.vmem [shape: f32[1,128], index: 13, kind: input, shape index: {}]   ;;  %s9537_s14 = inlined_call_operand.vmem [shape: f32[1,128], index: 14, kind: input, shape index: {}]   ;;  %s9538_s15 = inlined_call_operand.hbm [shape: f32[2,128,128], index: 15, kind: output, shape index: {0}]   ;;  %s9539_s16 = inlined_call_operand.hbm [shape: f32[2,4,128,128], index: 16, kind: output, shape index: {1}]  }
   0x1   :  { %9560 = sst [smem:[#allocation33_spill]] %s9523_s0 }
   0x2   :  { %9561 = sst [smem:[#allocation34_spill]] %s9526_s3 }
   0x3   :  { %9562 = sst [smem:[#allocation35_spill]] %s9531_s8 }
   0x4   :  { %9563 = sst [smem:[#allocation36_spill]] %s9533_s10 }
   0x5   :  { %9564 = sst [smem:[#allocation37_spill]] %s9535_s12 }
   0x6   :  { %9565 = sst [smem:[#allocation38_spill]] %s9536_s13 }
   0x7   :  { %9566 = sst [smem:[#allocation39_spill]] %s9537_s14 }
   0x8   :  { %9567 = sst [smem:[#allocation40_spill]] %s9538_s15 }
   0x9   :  { %9568 = sst [smem:[#allocation41_spill]] %s9539_s16 }
   0xa   :  { %22 = vsyncpa [#allocation5], 0 }
   0xb   :  { %23 = vsyncpa [#allocation8], 0 }
   0xc   :  { %24 = vsyncpa [#allocation11], 0 }
   0xd   :  { %25 = vsyncpa [#allocation6], 0 }
   0xe   :  { %27 = vsyncpa [#allocation6 + $0x1], 0 }
   0xf   :  { %28 = vsyncpa [#allocation15], 0 }
  0x10   :  { %30 = vsyncpa [#allocation15 + $0x1], 0  ;;  %s7552_s21 = smov 0   ;;  %s7554_s22 = smov 0  }
  0x11   :  { %s7556_s23 = smov 0   ;;  %s7558_s24 = smov 0  }
  0x12   :  { %s7560_s25 = smov 0   ;;  %s7562_s26 = smov 0  }
  0x13   :  { %s7564_s27 = smov 0   ;;  %s7566_s28 = smov 0  }
  0x14 LB: > { %9569 = sst [smem:[#allocation23_spill]] %s7412_s21  ;;  %s5873_s29 = sadd.s32 4294967295, %s7440_s28   ;;  %s7440_s28 = sphi %s7566_s28, %s36_s28   ;;  %s7436_s27 = sphi %s7564_s27, %s9609_s27   ;;  %s7432_s26 = sphi %s7562_s26, %s9608_s26   ;;  %s7428_s25 = sphi %s7560_s25, %s9607_s25   ;;  %s7424_s24 = sphi %s7558_s24, %s9606_s24   ;;  %s7420_s23 = sphi %s7556_s23, %s9605_s23   ;;  %s7416_s22 = sphi %s7554_s22, %s9611_s22   ;;  %s7412_s21 = sphi %s7552_s21, %s9610_s21  }
  0x15   : > { %9570 = sst [smem:[#allocation24_spill]] %s7420_s23  ;;  %s5874_s30 = sadd.s32 4294967294, %s7440_s28  }
  0x16   : > { %9571 = sst [smem:[#allocation25_spill]] %s7432_s26  ;;  %s45_s0 = sadd.s32 1, %s7432_s26 }
  0x17   : > { %9572 = sst [smem:[#allocation26_spill]] %s7436_s27  ;;  %s48_s17 = sadd.s32 1, %s7436_s27 }
  0x18   : > { %9573 = sst [smem:[#allocation27_spill]] %s7440_s28  ;;  %p46_p0 = scmp.ge.s32.totalorder %s45_s0, 2 }
  0x19   : > { %s377_s18 = sadd.s32 1, %s7420_s23  ;;  %p387_p1 = scmp.ne.s32.totalorder %s7420_s23, %s7416_s22 }
  0x1a   : > { %p388_p2 = scmp.eq.s32.totalorder %s5873_s29, 3  ;;  %s9613_s0 = smov (%p46_p0, %s45_s0), 0 }
  0x1b   : > { %9574 = sst [smem:[#allocation28_spill]] %s9613_s0  ;;  %s9615_s17 = smov (!%p46_p0, %s48_s17), %s7436_s27 }
  0x1c   : > { %s373_s19 = ssub.s32 %s7432_s26, %s9613_s0  ;;  %p7604_p3 = por %p388_p2, %p387_p1 }
  0x1d   : > { %p50_p4 = scmp.ge.s32.totalorder %s9615_s17, 2  ;;  %p393_p5 = scmp.ne.s32.totalorder %s7416_s22, %s7412_s21 }
  0x1e   : > { %s9575_s20 = scalar_select %p7604_p3, 1, 0 }
  0x1f   : > { %p394_p6 = scmp.eq.s32.totalorder %s5874_s30, 3  ;;  %p5875_p7 = scmp.ge.s32.totalorder %s7440_s28, 1 }
  0x20   : > { %9576 = sst [smem:[#allocation29_spill]] %s9575_s20  ;;  %s9617_s17 = smov (%p50_p4, %s9615_s17), 0 }
  0x21   : > { %9577 = sst [smem:[#allocation30_spill]] %s9617_s17  ;;  %p7613_p8 = por %p394_p6, %p393_p5 }
  0x22   : > { %p429_p9 = scmp.lt.s32.totalorder %s7440_s28, 5  ;;  %s372_s15 = ssub.s32 %s7436_s27, %s9617_s17 }
  0x23   : > { %s9578_s16 = scalar_select %p7613_p8, 1, 0 }
  0x24   : > { %s374_s14 = sor.u32 %s373_s19, %s372_s15  ;;  %p7620_p10 = pnand %p5875_p7, %p429_p9 }
  0x25   : > { %9579 = sst [smem:[#allocation31_spill]] %s9578_s16  ;;  %p375_p11 = scmp.eq.s32.totalorder %s374_s14, 0 }
  0x26   : > { %s9580_s0 = scalar_select %p7620_p10, 1, 0 }
  0x27   : > { %p7624_p12 = scmp.eq.s32.totalorder %s5873_s29, 0  ;;  %p6838_p13 = pneg %p7620_p10 }
  0x28   : > { %s7631_s30 = scalar_select %p375_p11, %s7420_s23, %s377_s18  }
  0x29   : > { %s9581_s26 = scalar_select %p7624_p12, 1, 0 }
  0x2a   : > { %9582 = sst [smem:[#allocation32_spill]] %s7631_s30  ;;  %p7635_p0 = pnand %p7624_p12, %p6838_p13 }
  0x2b   : > { %s7442_s15 = smov [#allocation7]   ;;  %s7443_s17 = smov [#allocation10]  }
  0x2c   : > { %s457_s19 = sshll.u32 %s7442_s15, 4  ;;  %s495_s14 = sshll.u32 %s7443_s17, 4  ;;  %s458_s19 = int_to_ptr.vmem [resolvable:$true] %s457_s19  ;;  %s496_s14 = int_to_ptr.vmem [resolvable:$true] %s495_s14 }
  0x2d   : > { %s9584_s3 = sld [smem:[#allocation34_spill]]  ;;  %p7647_p2 = pneg %p7635_p0 }
  0x33   : > { %s7190_s21 = scalar_lea.hbm %s9584_s3, 4096 }
  0x34   : > { %p7191_p1 = scmp.ne.s32.totalorder %s9584_s3, %s7190_s21  ;;  %p7197_p6 = scmp.lt.u32.totalorder %s7190_s21, %s9584_s3 }
  0x36   : > { %p7193_p4 = pnand %p7647_p2, %p7191_p1 }
  0x38   : > { %p7194_p5 = pneg %p7193_p4 }
  0x3a   : > { %p7199_p7 = pnand %p7197_p6, %p7194_p5 }
  0x3c   : > { %7202 = shalt.err (!%p7199_p7)
}
  0x3d   : > { %s7203_s27 = scalar_lea.vmem %s458_s19, 4096  ;;  %p7211_p8 = scmp.lt.s32.totalorder %s458_s19, %s458_s19 }
  0x3e   : > { %p7204_p9 = scmp.ne.s32.totalorder %s458_s19, %s7203_s27  ;;  %p7212_p3 = scmp.lt.s32.totalorder %s7203_s27, %s7203_s27 }
  0x40   : > { %p7206_p11 = pnand %p7204_p9, %p7647_p2  ;;  %p7213_p12 = por %p7212_p3, %p7211_p8 }
  0x42   : > { %p7207_p13 = pneg %p7206_p11 }
  0x44   : > { %p7214_p10 = pnand %p7213_p12, %p7207_p13 }
  0x46   : > { %7217 = shalt.err (!%p7214_p10)
}
  0x47   : > { %s9556_s28 = smov 128   ;;  %s9558_s17 = smov 8  }
  0x48   : > { %6844 = dma.hbm_to_vmem [thread:$0]  (!%p7635_p0), %s9584_s3, 4096, %s458_s19, [#allocation8], %s9556_s28, %s9556_s28, %s9558_s17  }
  0x49   : > { %s7218_s15 = scalar_lea.hbm %s9532_s9, 4096 }
  0x4a   : > { %p7219_p3 = scmp.ne.s32.totalorder %s9532_s9, %s7218_s15  ;;  %p7225_p12 = scmp.lt.u32.totalorder %s7218_s15, %s9532_s9 }
  0x4c   : > { %p7221_p8 = pnand %p7219_p3, %p7647_p2 }
  0x4e   : > { %p7222_p10 = pneg %p7221_p8 }
  0x50   : > { %p7227_p1 = pnand %p7225_p12, %p7222_p10 }
  0x52   : > { %7230 = shalt.err (!%p7227_p1)
}
  0x53   : > { %s7231_s21 = scalar_lea.vmem %s496_s14, 4096  ;;  %p7239_p7 = scmp.lt.s32.totalorder %s496_s14, %s496_s14 }
  0x54   : > { %p7232_p4 = scmp.ne.s32.totalorder %s496_s14, %s7231_s21  ;;  %p7240_p9 = scmp.lt.s32.totalorder %s7231_s21, %s7231_s21 }
  0x56   : > { %p7234_p5 = pnand %p7232_p4, %p7647_p2  ;;  %p7241_p11 = por %p7240_p9, %p7239_p7 }
  0x58   : > { %p7235_p6 = pneg %p7234_p5 }
  0x5a   : > { %p7242_p13 = pnand %p7241_p11, %p7235_p6 }
  0x5c   : > { %7245 = shalt.err (!%p7242_p13)
}
  0x5d   : > { %s7446_s23 = smov 256   ;;  %s7447_s19 = smov 16  }
  0x5e   : > { %6850 = dma.hbm_to_vmem [thread:$0]  (!%p7635_p0), %s9532_s9, 4096, %s496_s14, [#allocation11], %s7446_s23, %s7446_s23, %s7447_s19  }
  0x5f   : > { %s7448_s20 = smov [#allocation4]   ;;  %s7449_s29 = smov [#allocation9]  }
  0x60   : > { %s441_s30 = sshll.u32 %s7448_s20, 4  ;;  %s473_s15 = sshll.u32 %s7449_s29, 4  ;;  %s442_s30 = int_to_ptr.vmem [resolvable:$true] %s441_s30  ;;  %s474_s15 = int_to_ptr.vmem [resolvable:$true] %s473_s15 }
  0x61   : > { %s7246_s21 = scalar_lea.hbm %s9524_s1, 2048 }
  0x62   : > { %p7247_p3 = scmp.ne.s32.totalorder %s9524_s1, %s7246_s21  ;;  %p7253_p12 = scmp.lt.u32.totalorder %s7246_s21, %s9524_s1 }
  0x64   : > { %p7249_p8 = pnand %p7247_p3, %p7647_p2 }
  0x66   : > { %p7250_p10 = pneg %p7249_p8 }
  0x68   : > { %p7255_p1 = pnand %p7253_p12, %p7250_p10 }
  0x6a   : > { %7258 = shalt.err (!%p7255_p1)
}
  0x6b   : > { %s7259_s14 = scalar_lea.vmem %s442_s30, 2048  ;;  %p7267_p7 = scmp.lt.s32.totalorder %s442_s30, %s442_s30 }
  0x6c   : > { %p7260_p4 = scmp.ne.s32.totalorder %s442_s30, %s7259_s14  ;;  %p7268_p9 = scmp.lt.s32.totalorder %s7259_s14, %s7259_s14 }
  0x6e   : > { %p7262_p5 = pnand %p7260_p4, %p7647_p2  ;;  %p7269_p11 = por %p7268_p9, %p7267_p7 }
  0x70   : > { %p7263_p6 = pneg %p7262_p5 }
  0x72   : > { %p7270_p13 = pnand %p7269_p11, %p7263_p6 }
  0x74   : > { %7273 = shalt.err (!%p7270_p13)
}
  0x75   : > { %s9586_s3 = smov 8   ;;  %s9587_s28 = smov 128  }
  0x76   : > { %6841 = dma.hbm_to_vmem [thread:$0]  (!%p7635_p0), %s9524_s1, 2048, %s442_s30, [#allocation5], %s9587_s28, %s9587_s28, %s9586_s3  }
  0x77   : > { %s7274_s19 = scalar_lea.hbm %s9528_s5, 2048 }
  0x78   : > { %p7275_p3 = scmp.ne.s32.totalorder %s9528_s5, %s7274_s19  ;;  %p7281_p12 = scmp.lt.u32.totalorder %s7274_s19, %s9528_s5 }
  0x7a   : > { %p7277_p8 = pnand %p7275_p3, %p7647_p2 }
  0x7c   : > { %p7278_p10 = pneg %p7277_p8 }
  0x7e   : > { %p7283_p1 = pnand %p7281_p12, %p7278_p10 }
  0x80   : > { %7286 = shalt.err (!%p7283_p1)
}
  0x81   : > { %s7287_s27 = scalar_lea.vmem %s474_s15, 2048  ;;  %p7295_p7 = scmp.lt.s32.totalorder %s474_s15, %s474_s15 }
  0x82   : > { %p7288_p4 = scmp.ne.s32.totalorder %s474_s15, %s7287_s27  ;;  %p7296_p9 = scmp.lt.s32.totalorder %s7287_s27, %s7287_s27 }
  0x84   : > { %p7290_p5 = pnand %p7288_p4, %p7647_p2  ;;  %p7297_p11 = por %p7296_p9, %p7295_p7 }
  0x86   : > { %p7291_p6 = pneg %p7290_p5 }
  0x88   : > { %p7298_p13 = pnand %p7297_p11, %p7291_p6 }
  0x8a   : > { %7301 = shalt.err (!%p7298_p13)
}
  0x8b   : > { %6847 = dma.hbm_to_vmem [thread:$0]  (!%p7635_p0), %s9528_s5, 2048, %s474_s15, [#allocation8], %s9587_s28, %s9587_s28, %s9586_s3  }
  0x8c   : > { %s7450_s14 = smov [#allocation12]   ;;  %s7302_s23 = scalar_lea.hbm %s9534_s11, 4096 }
  0x8d   : > { %s511_s8 = sshll.u32 %s7450_s14, 4  ;;  %p7303_p3 = scmp.ne.s32.totalorder %s9534_s11, %s7302_s23  ;;  %s512_s8 = int_to_ptr.vmem [resolvable:$true] %s511_s8 }
  0x8e   : > { %p7309_p12 = scmp.lt.u32.totalorder %s7302_s23, %s9534_s11 }
  0x8f   : > { %p7305_p8 = pnand %p7303_p3, %p7647_p2 }
  0x91   : > { %p7306_p10 = pneg %p7305_p8 }
  0x93   : > { %p7311_p1 = pnand %p7309_p12, %p7306_p10 }
  0x95   : > { %7314 = shalt.err (!%p7311_p1)
}
  0x96   : > { %s7315_s15 = scalar_lea.vmem %s512_s8, 4096  ;;  %p7323_p7 = scmp.lt.s32.totalorder %s512_s8, %s512_s8 }
  0x97   : > { %p7316_p4 = scmp.ne.s32.totalorder %s512_s8, %s7315_s15  ;;  %p7324_p9 = scmp.lt.s32.totalorder %s7315_s15, %s7315_s15 }
  0x99   : > { %p7318_p5 = pnand %p7316_p4, %p7647_p2  ;;  %p7325_p11 = por %p7324_p9, %p7323_p7 }
  0x9b   : > { %p7319_p6 = pneg %p7318_p5 }
  0x9d   : > { %p7326_p13 = pnand %p7325_p11, %p7319_p6 }
  0x9f   : > { %7329 = shalt.err (!%p7326_p13)
}
  0xa0   : > { %6853 = dma.hbm_to_vmem [thread:$0]  (!%p7635_p0), %s9534_s11, 4096, %s512_s8, [#allocation11], %s9587_s28, %s9587_s28, %s9586_s3  }
  0xa1   : > { %p9588_p3 = scmp.ne.s32.totalorder %s9580_s0, 0 }
  0xa2   : > { %p9589_p2 = scmp.ne.s32.totalorder (!%p9588_p3), %s9581_s26, 0 }
  0xa3   : > { %544 = sbr.rel (%p9588_p3) target bundleno = 3225 (0xc99), region = 80 }
  0xaa   : > { %7391 = dma.done.wait (%p9589_p2), [#allocation5], 2048  }
  0xab   : > { %7393 = vsyncadd (%p9589_p2), [#allocation5], 4294965248 }
  0xac   : > { %7395 = dma.done.wait (%p9589_p2), [#allocation8], 6144  }
  0xad   : > { %7397 = vsyncadd (%p9589_p2), [#allocation8], 4294961152 }
  0xae   : > { %7399 = dma.done.wait (%p9589_p2), [#allocation11], 8192  }
  0xaf   : > { %7401 = vsyncadd (%p9589_p2), [#allocation11], 4294959104  ;;  %s7762_s16 = sand.u32 1, %s7416_s22   ;;  %p615_p0 = scmp.lt.s32.totalorder %s7428_s25, 1 }
  0xb0   : > { %s5888_s0 = sshll.u32 %s7762_s16, 6  ;;  %s5889_s18 = sshll.u32 %s7762_s16, 8 }
  0xb1   : > { %s616_s3 = scalar_select %p615_p0, %s7428_s25, 1 }
  0xb2   : > { %s9590_s14 = sld [smem:[#allocation33_spill]]  ;;  %s7773_s10 = scalar_lea.vmem [#allocation13], %s5888_s0 }
  0xb3   : > { %s5975_s28 = sshll.u32 %s616_s3, 7  ;;  %s7775_s26 = scalar_lea.vmem [#allocation14], %s5889_s18 }
  0xb4   : > { %p5892_p8 = scmp.ne.s32.totalorder %s7424_s24, 0 }
  0xb5   : > { %v7451_v5 = vmov (!%p5892_p8), 0   ;;  %v676_v7 = vld [vmem:[%s9527_s4 + $0x10] sm:$0xff] (!%p5892_p8)  ;;  %v674_v8 = vld [vmem:[%s9527_s4] sm:$0xff] (!%p5892_p8)  ;;  %v677_v12 = vld [vmem:[%s9527_s4 + $0x18] sm:$0xff] (!%p5892_p8) }
  0xb6   : > { %625 = sbr.rel (%p5892_p8) target bundleno = 496 (0x1f0), region = 104  ;;  %6961 = vset.pattern.permute.xlu1 (!%p5892_p8), %v7451_v5  ;;  %6960 = vset.pattern.permute.xlu0 (!%p5892_p8), %v7451_v5  ;;  %v642_v11 = vld [vmem:[#allocation7] sm:$0xff] (!%p5892_p8)  ;;  %v675_v13 = vld [vmem:[%s9527_s4 + $0x8] sm:$0xff] (!%p5892_p8)  ;;  %v681_v20 = vld [vmem:[%s9527_s4 + $0x38] sm:$0xff] (!%p5892_p8) }
  0xb7   : > { %718 = vperm.xlu1 (!%p5892_p8), %6961, %v676_v7   ;;  %708 = vperm.xlu0 (!%p5892_p8), %6960, %v674_v8   ;;  %v658_v14 = vld [vmem:[#allocation7 + $0x80] sm:$0xff] (!%p5892_p8)  ;;  %v679_v16 = vld [vmem:[%s9527_s4 + $0x28] sm:$0xff] (!%p5892_p8)  ;;  %v680_v21 = vld [vmem:[%s9527_s4 + $0x30] sm:$0xff] (!%p5892_p8) }
  0xb8   : > { %s7771_s8 = scalar_lea.vmem %s9590_s14, %s5975_s28  ;;  %6256 = vmatprep.mubr.f32.mxu0 (!%p5892_p8), %v642_v11  ;;  %6280 = vmatprep.mubr.f32.mxu1 (!%p5892_p8), %v658_v14  ;;  %v678_v17 = vld [vmem:[%s9527_s4 + $0x20] sm:$0xff] (!%p5892_p8)  ;;  %v683_v23 = vld [vmem:[%s9527_s4 + $0x48] sm:$0xff] (!%p5892_p8)  ;;  %v685_v27 = vld [vmem:[%s9527_s4 + $0x58] sm:$0xff] (!%p5892_p8) }
  0xb9   : > { %v626_v0 = vld [vmem:[%s7771_s8] sm:$0xff] (!%p5892_p8)  ;;  %v627_v1 = vld [vmem:[%s7771_s8 + $0x8] sm:$0xff] (!%p5892_p8)  ;;  %v628_v2 = vld [vmem:[%s7771_s8 + $0x10] sm:$0xff] (!%p5892_p8) }
  0xba   : > { %v6552_v3 = vpack.c.bf16 (!%p5892_p8), %v627_v1, %v626_v0  ;;  %v629_v4 = vld [vmem:[%s7771_s8 + $0x18] sm:$0xff] (!%p5892_p8)  ;;  %v630_v9 = vld [vmem:[%s7771_s8 + $0x20] sm:$0xff] (!%p5892_p8)  ;;  %v631_v10 = vld [vmem:[%s7771_s8 + $0x28] sm:$0xff] (!%p5892_p8) }
  0xbb   : > { %v6556_v6 = vpack.c.bf16 (!%p5892_p8), %v629_v4, %v628_v2  ;;  %v6560_v15 = vpack.c.bf16 (!%p5892_p8), %v631_v10, %v630_v9  ;;  %723 = vperm.xlu1 (!%p5892_p8), %6961, %v677_v12   ;;  %713 = vperm.xlu0 (!%p5892_p8), %6960, %v675_v13   ;;  %v632_v18 = vld [vmem:[%s7771_s8 + $0x30] sm:$0xff] (!%p5892_p8)  ;;  %v633_v19 = vld [vmem:[%s7771_s8 + $0x38] sm:$0xff] (!%p5892_p8)  ;;  %v682_v24 = vld [vmem:[%s9527_s4 + $0x40] sm:$0xff] (!%p5892_p8) }
  0xbc   : > { %6553 = vmatprep.subr.bf16.mxu0 (!%p5892_p8), %v6552_v3  ;;  %6776 = vmatprep.subr.bf16.mxu1 (!%p5892_p8), %v6552_v3  ;;  %v6564_v22 = vpack.c.bf16 (!%p5892_p8), %v633_v19, %v632_v18  ;;  %v634_v25 = vld [vmem:[%s7771_s8 + $0x40] sm:$0xff] (!%p5892_p8)  ;;  %v635_v26 = vld [vmem:[%s7771_s8 + $0x48] sm:$0xff] (!%p5892_p8)  ;;  %v684_v28 = vld [vmem:[%s9527_s4 + $0x50] sm:$0xff] (!%p5892_p8) }
  0xbd   : > { %6555 = vmatpush3.bf16.xpose.msra.mxu0 %v6552_v3  ;;  %6784 = vmatpush3.bf16.xpose.msra.mxu1 %v6552_v3  ;;  %v6568_v29 = vpack.c.bf16 %v635_v26, %v634_v25  ;;  %v687_v30 = vld [vmem:[%s9527_s4 + $0x68] sm:$0xff]  ;;  %v686_v31 = vld [vmem:[%s9527_s4 + $0x60] sm:$0xff]  ;;  %v636_v32 = vld [vmem:[%s7771_s8 + $0x50] sm:$0xff] }
  0xbe   : > { %6557 = vmatprep.subr.bf16.mxu0 %v6556_v6  ;;  %6777 = vmatprep.subr.bf16.mxu1 %v6556_v6  ;;  %v637_v33 = vld [vmem:[%s7771_s8 + $0x58] sm:$0xff]  ;;  %v688_v35 = vld [vmem:[%s9527_s4 + $0x70] sm:$0xff]  ;;  %v691_v37 = vld [vmem:[%s9527_s4 + $0x88] sm:$0xff] }
  0xbf   : > { %733 = vperm.xlu1 %6961, %v679_v16   ;;  %728 = vperm.xlu0 %6960, %v678_v17   ;;  %v689_v34 = vld [vmem:[%s9527_s4 + $0x78] sm:$0xff]  ;;  %v6572_v36 = vpack.c.bf16 %v637_v33, %v636_v32  ;;  %v690_v38 = vld [vmem:[%s9527_s4 + $0x80] sm:$0xff]  ;;  %v639_v40 = vld [vmem:[%s7771_s8 + $0x68] sm:$0xff] }
  0xc0   : > { %v638_v39 = vld [vmem:[%s7771_s8 + $0x60] sm:$0xff]  ;;  %v693_v41 = vld [vmem:[%s9527_s4 + $0x98] sm:$0xff]  ;;  %v692_v42 = vld [vmem:[%s9527_s4 + $0x90] sm:$0xff] }
  0xc1   : > { %v6576_v43 = vpack.c.bf16 %v639_v40, %v638_v39  ;;  %v695_v44 = vld [vmem:[%s9527_s4 + $0xa8] sm:$0xff]  ;;  %v694_v45 = vld [vmem:[%s9527_s4 + $0xa0] sm:$0xff]  ;;  %v640_v46 = vld [vmem:[%s7771_s8 + $0x70] sm:$0xff] }
  0xc2   : > { %v641_v47 = vld [vmem:[%s7771_s8 + $0x78] sm:$0xff]  ;;  %v696_v49 = vld [vmem:[%s9527_s4 + $0xb0] sm:$0xff]  ;;  %v699_v51 = vld [vmem:[%s9527_s4 + $0xc8] sm:$0xff] }
  0xc3   : > { %743 = vperm.xlu1 %6961, %v681_v20   ;;  %738 = vperm.xlu0 %6960, %v680_v21   ;;  %v697_v48 = vld [vmem:[%s9527_s4 + $0xb8] sm:$0xff]  ;;  %v6580_v50 = vpack.c.bf16 %v641_v47, %v640_v46  ;;  %v698_v52 = vld [vmem:[%s9527_s4 + $0xc0] sm:$0xff]  ;;  %v700_v54 = vld [vmem:[%s9527_s4 + $0xd0] sm:$0xff] }
  0xc4   : > { %v701_v53 = vld [vmem:[%s9527_s4 + $0xd8] sm:$0xff]  ;;  %v703_v55 = vld [vmem:[%s9527_s4 + $0xe8] sm:$0xff]  ;;  %v702_v56 = vld [vmem:[%s9527_s4 + $0xe0] sm:$0xff] }
  0xc5   : > { %6559 = vmatpush3.bf16.xpose.msra.mxu0 %v6556_v6  ;;  %6785 = vmatpush3.bf16.xpose.msra.mxu1 %v6556_v6  ;;  %v705_v57 = vld [vmem:[%s9527_s4 + $0xf8] sm:$0xff]  ;;  %v704_v58 = vld [vmem:[%s9527_s4 + $0xf0] sm:$0xff]  ;;  %v643_v59 = vld [vmem:[#allocation7 + $0x8] sm:$0xff] }
  0xc6   : > { %6561 = vmatprep.subr.bf16.mxu0 %v6560_v15  ;;  %6778 = vmatprep.subr.bf16.mxu1 %v6560_v15  ;;  %v659_v60 = vld [vmem:[#allocation7 + $0x88] sm:$0xff]  ;;  %v644_v61 = vld [vmem:[#allocation7 + $0x10] sm:$0xff]  ;;  %v645_v63 = vld [vmem:[#allocation7 + $0x18] sm:$0xff] }
  0xc7   : > { %753 = vperm.xlu1 %6961, %v683_v23   ;;  %748 = vperm.xlu0 %6960, %v682_v24   ;;  %v660_v62 = vld [vmem:[#allocation7 + $0x90] sm:$0xff]  ;;  %v661_v0 = vld [vmem:[#allocation7 + $0x98] sm:$0xff]  ;;  %v646_v1 = vld [vmem:[#allocation7 + $0x20] sm:$0xff] }
  0xc8   : > { %v662_v2 = vld [vmem:[#allocation7 + $0xa0] sm:$0xff]  ;;  %v647_v3 = vld [vmem:[#allocation7 + $0x28] sm:$0xff]  ;;  %v648_v5 = vld [vmem:[#allocation7 + $0x30] sm:$0xff] }
  0xc9   : > { %v663_v4 = vld [vmem:[#allocation7 + $0xa8] sm:$0xff]  ;;  %v664_v6 = vld [vmem:[#allocation7 + $0xb0] sm:$0xff]  ;;  %v649_v7 = vld [vmem:[#allocation7 + $0x38] sm:$0xff] }
  0xca   : > { %v665_v8 = vld [vmem:[#allocation7 + $0xb8] sm:$0xff]  ;;  %v650_v9 = vld [vmem:[#allocation7 + $0x40] sm:$0xff]  ;;  %v651_v11 = vld [vmem:[#allocation7 + $0x48] sm:$0xff] }
  0xcb   : > { %763 = vperm.xlu1 %6961, %v685_v27   ;;  %758 = vperm.xlu0 %6960, %v684_v28   ;;  %v666_v10 = vld [vmem:[#allocation7 + $0xc0] sm:$0xff]  ;;  %v667_v12 = vld [vmem:[#allocation7 + $0xc8] sm:$0xff]  ;;  %v652_v13 = vld [vmem:[#allocation7 + $0x50] sm:$0xff] }
  0xcc   : > { %v668_v14 = vld [vmem:[#allocation7 + $0xd0] sm:$0xff]  ;;  %v669_v16 = vld [vmem:[#allocation7 + $0xd8] sm:$0xff]  ;;  %v654_v17 = vld [vmem:[#allocation7 + $0x60] sm:$0xff] }
  0xcd   : > { %6563 = vmatpush3.bf16.xpose.msra.mxu0 %v6560_v15  ;;  %6786 = vmatpush3.bf16.xpose.msra.mxu1 %v6560_v15  ;;  %v653_v15 = vld [vmem:[#allocation7 + $0x58] sm:$0xff]  ;;  %v670_v18 = vld [vmem:[#allocation7 + $0xe0] sm:$0xff]  ;;  %v655_v19 = vld [vmem:[#allocation7 + $0x68] sm:$0xff] }
  0xce   : > { %6565 = vmatprep.subr.bf16.mxu0 %v6564_v22  ;;  %6779 = vmatprep.subr.bf16.mxu1 %v6564_v22  ;;  %v671_v20 = vld [vmem:[#allocation7 + $0xe8] sm:$0xff]  ;;  %v656_v21 = vld [vmem:[#allocation7 + $0x70] sm:$0xff]  ;;  %v657_v23 = vld [vmem:[#allocation7 + $0x78] sm:$0xff] }
  0xcf   : > { %773 = vperm.xlu1 %6961, %v687_v30   ;;  %768 = vperm.xlu0 %6960, %v686_v31   ;;  %v673_v24 = vld [vmem:[#allocation7 + $0xf8] sm:$0xff] }
  0xd3   : > { %783 = vperm.xlu1 %6961, %v689_v34   ;;  %778 = vperm.xlu0 %6960, %v688_v35  }
  0xd5   : > { %6567 = vmatpush3.bf16.xpose.msra.mxu0 %v6564_v22  ;;  %6787 = vmatpush3.bf16.xpose.msra.mxu1 %v6564_v22  ;;  %v672_v22 = vld [vmem:[#allocation7 + $0xf0] sm:$0xff] }
  0xd6   : > { %6569 = vmatprep.subr.bf16.mxu0 %v6568_v29  ;;  %6780 = vmatprep.subr.bf16.mxu1 %v6568_v29 }
  0xd7   : > { %793 = vperm.xlu1 %6961, %v691_v37   ;;  %788 = vperm.xlu0 %6960, %v690_v38  }
  0xdb   : > { %803 = vperm.xlu1 %6961, %v693_v41   ;;  %798 = vperm.xlu0 %6960, %v692_v42  }
  0xdd   : > { %6571 = vmatpush3.bf16.xpose.msra.mxu0 %v6568_v29  ;;  %6788 = vmatpush3.bf16.xpose.msra.mxu1 %v6568_v29 }
  0xde   : > { %6573 = vmatprep.subr.bf16.mxu0 %v6572_v36  ;;  %6781 = vmatprep.subr.bf16.mxu1 %v6572_v36 }
  0xdf   : > { %813 = vperm.xlu1 %6961, %v695_v44   ;;  %808 = vperm.xlu0 %6960, %v694_v45  }
  0xe3   : > { %823 = vperm.xlu1 %6961, %v697_v48   ;;  %818 = vperm.xlu0 %6960, %v696_v49  }
  0xe5   : > { %6575 = vmatpush3.bf16.xpose.msra.mxu0 %v6572_v36  ;;  %6789 = vmatpush3.bf16.xpose.msra.mxu1 %v6572_v36 }
  0xe6   : > { %6577 = vmatprep.subr.bf16.mxu0 %v6576_v43  ;;  %6782 = vmatprep.subr.bf16.mxu1 %v6576_v43 }
  0xe7   : > { %833 = vperm.xlu1 %6961, %v699_v51   ;;  %828 = vperm.xlu0 %6960, %v698_v52  }
  0xeb   : > { %843 = vperm.xlu1 %6961, %v701_v53   ;;  %838 = vperm.xlu0 %6960, %v700_v54  }
  0xed   : > { %6579 = vmatpush3.bf16.xpose.msra.mxu0 %v6576_v43  ;;  %6790 = vmatpush3.bf16.xpose.msra.mxu1 %v6576_v43 }
  0xee   : > { %6581 = vmatprep.subr.bf16.mxu0 %v6580_v50  ;;  %6783 = vmatprep.subr.bf16.mxu1 %v6580_v50 }
  0xef   : > { %853 = vperm.xlu1 %6961, %v703_v55   ;;  %848 = vperm.xlu0 %6960, %v702_v56  }
  0xf3   : > { %863 = vperm.xlu1 %6961, %v705_v57   ;;  %858 = vperm.xlu0 %6960, %v704_v58  }
  0xf5   : > { %6583 = vmatpush3.bf16.xpose.msra.mxu0 %v6580_v50  ;;  %6791 = vmatpush3.bf16.xpose.msra.mxu1 %v6580_v50 }
  0xfc   : > { %6257 = vmatmul.mubr.f32.vlgmr.msra.gmra.mrb[0].mxu0 %v643_v59  ;;  %6281 = vmatmul.mubr.f32.vlgmr.msra.gmra.mrb[0].mxu1 %v659_v60 }
  0xfd   : > { %6259 = vmatprep.mubr.f32.mxu0 %v644_v61  ;;  %6283 = vmatprep.mubr.f32.mxu1 %v660_v62 }
 0x100   : > { %6260 = vmatmul.mubr.f32.gmra.mrb[2].mxu0 %v645_v63  ;;  %6284 = vmatmul.mubr.f32.gmra.mrb[2].mxu1 %v661_v0 }
 0x101   : > { %6262 = vmatprep.mubr.f32.mxu0 %v646_v1  ;;  %6286 = vmatprep.mubr.f32.mxu1 %v662_v2 }
 0x104   : > { %6263 = vmatmul.mubr.f32.gmra.mrb[4].mxu0 %v647_v3  ;;  %6287 = vmatmul.mubr.f32.gmra.mrb[4].mxu1 %v663_v4 }
 0x105   : > { %6265 = vmatprep.mubr.f32.mxu0 %v648_v5  ;;  %6289 = vmatprep.mubr.f32.mxu1 %v664_v6 }
 0x108   : > { %6266 = vmatmul.mubr.f32.gmra.mrb[6].mxu0 %v649_v7  ;;  %6290 = vmatmul.mubr.f32.gmra.mrb[6].mxu1 %v665_v8 }
 0x109   : > { %6268 = vmatprep.mubr.f32.mxu0 %v650_v9  ;;  %6292 = vmatprep.mubr.f32.mxu1 %v666_v10 }
 0x10c   : > { %6269 = vmatmul.mubr.f32.gmra.mrb[8].mxu0 %v651_v11  ;;  %6293 = vmatmul.mubr.f32.gmra.mrb[8].mxu1 %v667_v12 }
 0x10d   : > { %6271 = vmatprep.mubr.f32.mxu0 %v652_v13  ;;  %6295 = vmatprep.mubr.f32.mxu1 %v668_v14 }
 0x110   : > { %6272 = vmatmul.mubr.f32.gmra.mrb[10].mxu0 %v653_v15  ;;  %6296 = vmatmul.mubr.f32.gmra.mrb[10].mxu1 %v669_v16 }
 0x111   : > { %6274 = vmatprep.mubr.f32.mxu0 %v654_v17  ;;  %6298 = vmatprep.mubr.f32.mxu1 %v670_v18 }
 0x114   : > { %6275 = vmatmul.mubr.f32.gmra.mrb[12].mxu0 %v655_v19  ;;  %6299 = vmatmul.mubr.f32.gmra.mrb[12].mxu1 %v671_v20 }
 0x115   : > { %6277 = vmatprep.mubr.f32.mxu0 %v656_v21  ;;  %6301 = vmatprep.mubr.f32.mxu1 %v672_v22 }
 0x118   : > { %6278 = vmatmul.mubr.f32.gmra.mrb[14].mxu0 %v657_v23  ;;  %6302 = vmatmul.mubr.f32.gmra.mrb[14].mxu1 %v673_v24 }
 0x136   : > { %v719_v25 = vpop.permute.xlu1 %718  ;;  %v709_v26 = vpop.permute.xlu0 %708 }
 0x13a   : > { %v724_v27 = vpop.permute.xlu1 %723  ;;  %v714_v28 = vpop.permute.xlu0 %713 }
 0x13e   : > { %v734_v29 = vpop.permute.xlu1 %733  ;;  %v729_v30 = vpop.permute.xlu0 %728 }
 0x142   : > { %v744_v31 = vpop.permute.xlu1 %743  ;;  %v7890_v32 = vpop.permute.xlu0 %738 }
 0x146   : > { %v7892_v33 = vpop.permute.xlu1 %753  ;;  %v7894_v34 = vpop.permute.xlu0 %748 }
 0x14a   : > { %v7896_v35 = vpop.permute.xlu1 %763  ;;  %v7898_v36 = vpop.permute.xlu0 %758 }
 0x14e   : > { %v7900_v37 = vpop.permute.xlu1 %773  ;;  %v7902_v38 = vpop.permute.xlu0 %768 }
 0x152   : > { %v7904_v39 = vpop.permute.xlu1 %783  ;;  %v7906_v40 = vpop.permute.xlu0 %778 }
 0x156   : > { %v794_v41 = vpop.permute.xlu1 %793  ;;  %v789_v42 = vpop.permute.xlu0 %788 }
 0x15a   : > { %v804_v43 = vpop.permute.xlu1 %803  ;;  %v799_v44 = vpop.permute.xlu0 %798 }
 0x15e   : > { %v814_v45 = vpop.permute.xlu1 %813  ;;  %v809_v46 = vpop.permute.xlu0 %808 }
 0x162   : > { %v824_v47 = vpop.permute.xlu1 %823  ;;  %v819_v48 = vpop.permute.xlu0 %818 }
 0x166   : > { %v834_v57 = vpop.permute.xlu1 %833  ;;  %v829_v58 = vpop.permute.xlu0 %828 }
 0x16a   : > { %v844_v11 = vpop.permute.xlu1 %843  ;;  %v839_v12 = vpop.permute.xlu0 %838 }
 0x1cf   : > { %v6258_v49 = vpop.f32.mrb[0].mxu0  ;;  %v6282_v50 = vpop.f32.mrb[0].mxu1 }
 0x1d0   : > { %v938_v51 = vadd.f32 %v6258_v49, %v714_v28  ;;  %v1018_v52 = vadd.f32 %v6282_v50, %v794_v41  ;;  %v932_v53 = vpop.f32.mrb[1].mxu0  ;;  %v1012_v54 = vpop.f32.mrb[1].mxu1 }
 0x1d1   : > { %v933_v55 = vadd.f32 %v932_v53, %v709_v26  ;;  %v1013_v56 = vadd.f32 %v1012_v54, %v789_v42 }
 0x1d2   : > { %1092 = vst [vmem:[#allocation2 + $0x8] sm:$0xff] %v938_v51  ;;  %1108 = vst [vmem:[#allocation3 + $0x8] sm:$0xff] %v1018_v52 }
 0x1d3   : > { %1091 = vst [vmem:[#allocation2] sm:$0xff] %v933_v55  ;;  %1107 = vst [vmem:[#allocation3] sm:$0xff] %v1013_v56  ;;  %v6261_v59 = vpop.f32.mrb[2].mxu0  ;;  %v6285_v60 = vpop.f32.mrb[2].mxu1 }
 0x1d4   : > { %v948_v61 = vadd.f32 %v6261_v59, %v724_v27  ;;  %v1028_v62 = vadd.f32 %v6285_v60, %v804_v43  ;;  %v942_v63 = vpop.f32.mrb[3].mxu0  ;;  %v1022_v0 = vpop.f32.mrb[3].mxu1 }
 0x1d5   : > { %v943_v1 = vadd.f32 %v942_v63, %v719_v25  ;;  %v1023_v2 = vadd.f32 %v1022_v0, %v799_v44 }
 0x1d6   : > { %1094 = vst [vmem:[#allocation2 + $0x18] sm:$0xff] %v948_v61  ;;  %1110 = vst [vmem:[#allocation3 + $0x18] sm:$0xff] %v1028_v62 }
 0x1d7   : > { %1093 = vst [vmem:[#allocation2 + $0x10] sm:$0xff] %v943_v1  ;;  %1109 = vst [vmem:[#allocation3 + $0x10] sm:$0xff] %v1023_v2  ;;  %v6264_v3 = vpop.f32.mrb[4].mxu0  ;;  %v6288_v4 = vpop.f32.mrb[4].mxu1 }
 0x1d8   : > { %v958_v5 = vadd.f32 %v6264_v3, %v734_v29  ;;  %v1038_v6 = vadd.f32 %v6288_v4, %v814_v45  ;;  %v952_v7 = vpop.f32.mrb[5].mxu0  ;;  %v1032_v8 = vpop.f32.mrb[5].mxu1 }
 0x1d9   : > { %v953_v9 = vadd.f32 %v952_v7, %v729_v30  ;;  %v1033_v10 = vadd.f32 %v1032_v8, %v809_v46  ;;  %v854_v29 = vpop.permute.xlu1 %853  ;;  %v849_v30 = vpop.permute.xlu0 %848 }
 0x1da   : > { %1096 = vst [vmem:[#allocation2 + $0x28] sm:$0xff] %v958_v5  ;;  %1112 = vst [vmem:[#allocation3 + $0x28] sm:$0xff] %v1038_v6 }
 0x1db   : > { %1095 = vst [vmem:[#allocation2 + $0x20] sm:$0xff] %v953_v9  ;;  %1111 = vst [vmem:[#allocation3 + $0x20] sm:$0xff] %v1033_v10  ;;  %v6267_v13 = vpop.f32.mrb[6].mxu0  ;;  %v6291_v14 = vpop.f32.mrb[6].mxu1 }
 0x1dc   : > { %v968_v15 = vadd.f32 %v6267_v13, %v744_v31  ;;  %v1048_v16 = vadd.f32 %v6291_v14, %v824_v47  ;;  %v962_v17 = vpop.f32.mrb[7].mxu0  ;;  %v1042_v18 = vpop.f32.mrb[7].mxu1 }
 0x1dd   : > { %v963_v19 = vadd.f32 %v962_v17, %v7890_v32  ;;  %v1043_v20 = vadd.f32 %v1042_v18, %v819_v48  ;;  %v864_v52 = vpop.permute.xlu1 %863  ;;  %v859_v53 = vpop.permute.xlu0 %858 }
 0x1de   : > { %1098 = vst [vmem:[#allocation2 + $0x38] sm:$0xff] %v968_v15  ;;  %1114 = vst [vmem:[#allocation3 + $0x38] sm:$0xff] %v1048_v16 }
 0x1df   : > { %1097 = vst [vmem:[#allocation2 + $0x30] sm:$0xff] %v963_v19  ;;  %1113 = vst [vmem:[#allocation3 + $0x30] sm:$0xff] %v1043_v20  ;;  %v6270_v21 = vpop.f32.mrb[8].mxu0  ;;  %v6294_v22 = vpop.f32.mrb[8].mxu1 }
 0x1e0   : > { %v978_v23 = vadd.f32 %v6270_v21, %v7892_v33  ;;  %v1058_v24 = vadd.f32 %v6294_v22, %v834_v57  ;;  %v972_v25 = vpop.f32.mrb[9].mxu0  ;;  %v1052_v26 = vpop.f32.mrb[9].mxu1 }
 0x1e1   : > { %v973_v27 = vadd.f32 %v972_v25, %v7894_v34  ;;  %v1053_v28 = vadd.f32 %v1052_v26, %v829_v58 }
 0x1e2   : > { %1100 = vst [vmem:[#allocation2 + $0x48] sm:$0xff] %v978_v23  ;;  %1116 = vst [vmem:[#allocation3 + $0x48] sm:$0xff] %v1058_v24 }
 0x1e3   : > { %1099 = vst [vmem:[#allocation2 + $0x40] sm:$0xff] %v973_v27  ;;  %1115 = vst [vmem:[#allocation3 + $0x40] sm:$0xff] %v1053_v28  ;;  %v6273_v31 = vpop.f32.mrb[10].mxu0  ;;  %v6297_v32 = vpop.f32.mrb[10].mxu1 }
 0x1e4   : > { %v988_v41 = vadd.f32 %v6273_v31, %v7896_v35  ;;  %v1068_v42 = vadd.f32 %v6297_v32, %v844_v11  ;;  %v982_v43 = vpop.f32.mrb[11].mxu0  ;;  %v1062_v44 = vpop.f32.mrb[11].mxu1 }
 0x1e5   : > { %v983_v33 = vadd.f32 %v982_v43, %v7898_v36  ;;  %v1063_v45 = vadd.f32 %v1062_v44, %v839_v12 }
 0x1e6   : > { %1102 = vst [vmem:[#allocation2 + $0x58] sm:$0xff] %v988_v41  ;;  %1118 = vst [vmem:[#allocation3 + $0x58] sm:$0xff] %v1068_v42 }
 0x1e7   : > { %1101 = vst [vmem:[#allocation2 + $0x50] sm:$0xff] %v983_v33  ;;  %1117 = vst [vmem:[#allocation3 + $0x50] sm:$0xff] %v1063_v45  ;;  %v6276_v34 = vpop.f32.mrb[12].mxu0  ;;  %v6300_v46 = vpop.f32.mrb[12].mxu1 }
 0x1e8   : > { %v998_v47 = vadd.f32 %v6276_v34, %v7900_v37  ;;  %v1078_v48 = vadd.f32 %v6300_v46, %v854_v29  ;;  %v992_v49 = vpop.f32.mrb[13].mxu0  ;;  %v1072_v50 = vpop.f32.mrb[13].mxu1 }
 0x1e9   : > { %v993_v51 = vadd.f32 %v992_v49, %v7902_v38  ;;  %v1073_v35 = vadd.f32 %v1072_v50, %v849_v30 }
 0x1ea   : > { %1104 = vst [vmem:[#allocation2 + $0x68] sm:$0xff] %v998_v47  ;;  %1120 = vst [vmem:[#allocation3 + $0x68] sm:$0xff] %v1078_v48 }
 0x1eb   : > { %1103 = vst [vmem:[#allocation2 + $0x60] sm:$0xff] %v993_v51  ;;  %1119 = vst [vmem:[#allocation3 + $0x60] sm:$0xff] %v1073_v35  ;;  %v6279_v36 = vpop.f32.mrb[14].mxu0  ;;  %v6303_v54 = vpop.f32.mrb[14].mxu1 }
 0x1ec   : > { %v1008_v55 = vadd.f32 %v6279_v36, %v7904_v39  ;;  %v1088_v56 = vadd.f32 %v6303_v54, %v864_v52  ;;  %v1002_v57 = vpop.f32.mrb[15].mxu0  ;;  %v1082_v58 = vpop.f32.mrb[15].mxu1 }
 0x1ed   : > { %v1003_v37 = vadd.f32 %v1002_v57, %v7906_v40  ;;  %v1083_v59 = vadd.f32 %v1082_v58, %v859_v53 }
 0x1ee   : > { %1106 = vst [vmem:[#allocation2 + $0x78] sm:$0xff] %v1008_v55  ;;  %1122 = vst [vmem:[#allocation3 + $0x78] sm:$0xff] %v1088_v56 }
 0x1ef   : > { %1105 = vst [vmem:[#allocation2 + $0x70] sm:$0xff] %v1003_v37  ;;  %1121 = vst [vmem:[#allocation3 + $0x70] sm:$0xff] %v1083_v59 }
 0x1f0 PF: > { %v1133_v38 = vld [vmem:[#allocation4] sm:$0xff]  ;;  %v1134_v60 = vld [vmem:[#allocation4 + $0x8] sm:$0xff]  ;;  %v1135_v61 = vld [vmem:[#allocation4 + $0x10] sm:$0xff]  ;;  %s5893_s17 = sshll.u32 %s7424_s24, 6  ;;  %s7452_s12 = smov 64   ;;  %vm2453_vm0 = vcmask 261120  }
 0x1f1   : > { %v6584_v62 = vpack.c.bf16 %v1134_v60, %v1133_v38  ;;  %v1136_v63 = vld [vmem:[#allocation4 + $0x18] sm:$0xff]  ;;  %v1137_v0 = vld [vmem:[#allocation4 + $0x20] sm:$0xff]  ;;  %v1138_v1 = vld [vmem:[#allocation4 + $0x28] sm:$0xff]  ;;  %s7919_s23 = scalar_lea.vmem %s7771_s8, %s5893_s17  ;;  %s7453_s13 = smov 96   ;;  %vm4918_vm1 = vcmask 523264   ;;  %vm4927_vm2 = vcmask 785408  }
 0x1f2   : > { %v6588_v39 = vpack.c.bf16 %v1136_v63, %v1135_v61  ;;  %v6592_v40 = vpack.c.bf16 %v1138_v1, %v1137_v0  ;;  %v1125_v2 = vld [vmem:[%s7919_s23] sm:$0xff]  ;;  %v1139_v3 = vld [vmem:[#allocation4 + $0x30] sm:$0xff]  ;;  %v1140_v4 = vld [vmem:[#allocation4 + $0x38] sm:$0xff]  ;;  %s7454_s20 = smov 32   ;;  %s9591_s28 = sld [smem:[#allocation35_spill]] }
 0x1f3   : > { %6585 = vmatprep.subr.bf16.mxu0 %v6584_v62  ;;  %6336 = vmatprep.mubr.f32.mxu0 %v1125_v2  ;;  %v6596_v5 = vpack.c.bf16 %v1140_v4, %v1139_v3  ;;  %v1141_v6 = vld [vmem:[#allocation4 + $0x40] sm:$0xff]  ;;  %v1142_v7 = vld [vmem:[#allocation4 + $0x48] sm:$0xff]  ;;  %v1143_v9 = vld [vmem:[#allocation4 + $0x50] sm:$0xff]  ;;  %v1354_v3 = vlaneseq  ;;  %v7456_v4 = vmov 1934713408   ;;  %s9592_s14 = sld [smem:[#allocation36_spill]] }
 0x1f4   : > { %6587 = vmatpush3.bf16.msra.mxu0 %v6584_v62  ;;  %v6600_v8 = vpack.c.bf16 %v1142_v7, %v1141_v6  ;;  %v1144_v10 = vld [vmem:[#allocation4 + $0x58] sm:$0xff]  ;;  %v1145_v12 = vld [vmem:[#allocation4 + $0x60] sm:$0xff]  ;;  %v1146_v13 = vld [vmem:[#allocation4 + $0x68] sm:$0xff]  ;;  %s9593_s8 = sld [smem:[#allocation37_spill]]  ;;  %s9595_s29 = sld [smem:[#allocation39_spill]] }
 0x1f5   : > { %6589 = vmatprep.subr.bf16.mxu0 %v6588_v39  ;;  %v6604_v11 = vpack.c.bf16 %v1144_v10, %v1143_v9  ;;  %v6608_v14 = vpack.c.bf16 %v1146_v13, %v1145_v12  ;;  %v1147_v15 = vld [vmem:[#allocation4 + $0x70] sm:$0xff]  ;;  %v1148_v16 = vld [vmem:[#allocation4 + $0x78] sm:$0xff]  ;;  %v1126_v18 = vld [vmem:[%s7919_s23 + $0x8] sm:$0xff]  ;;  %v7999_v7 = vshrl.u32 %v1354_v3, 7  ;;  %s5967_s27 = sshll.u32 %s7424_s24, 3  ;;  %s5968_s0 = sshll.u32 %s7428_s25, 4 }
 0x1f6   : > { %v6612_v17 = vpack.c.bf16 %v1148_v16, %v1147_v15  ;;  %v1127_v19 = vld [vmem:[%s7919_s23 + $0x10] sm:$0xff]  ;;  %v1128_v20 = vld [vmem:[%s7919_s23 + $0x18] sm:$0xff]  ;;  %v1129_v21 = vld [vmem:[%s7919_s23 + $0x20] sm:$0xff]  ;;  %s5660_s18 = sadd.s32 %s5968_s0, %s5967_s27  ;;  %s9596_s3 = sld [smem:[#allocation29_spill]] }
 0x1f7   : > { %v1130_v22 = vld [vmem:[%s7919_s23 + $0x28] sm:$0xff]  ;;  %v1131_v23 = vld [vmem:[%s7919_s23 + $0x30] sm:$0xff]  ;;  %v1132_v24 = vld [vmem:[%s7919_s23 + $0x38] sm:$0xff]  ;;  %s5663_s30 = sshll.u32 %s7773_s10, 4  ;;  %s9597_s17 = sld [smem:[#allocation40_spill]]  ;;  %s9445_s30 = int_to_ptr.vmem [resolvable:$true] %s5663_s30 }
 0x1f8   : > { %6591 = vmatpush3.bf16.msra.mxu0 %v6588_v39  ;;  %v5894_v25 = vld [vmem:[%s9525_s2] ss:$0 sm:$0xff]  ;;  %v2438_v45 = vld [vmem:[#allocation2 + $0x8] sm:$0xff]  ;;  %v2439_v35 = vld [vmem:[#allocation2 + $0x10] sm:$0xff]  ;;  %s7330_s19 = scalar_lea.vmem %s9445_s30, 1024 }
 0x1f9   : > { %6593 = vmatprep.subr.bf16.mxu0 %v6592_v40  ;;  %v2437_v33 = vld [vmem:[#allocation2] sm:$0xff]  ;;  %v2450_v47 = vld [vmem:[#allocation2 + $0x68] sm:$0xff]  ;;  %v2440_v52 = vld [vmem:[#allocation2 + $0x18] sm:$0xff]  ;;  %p7331_p10 = scmp.ne.s32.totalorder %s9445_s30, %s7330_s19 }
 0x1fa   : > { %v2449_v34 = vld [vmem:[#allocation2 + $0x60] sm:$0xff]  ;;  %v6616_v46 = vpack.c.bf16 %v2438_v45, %v2437_v33  ;;  %v2451_v53 = vld [vmem:[#allocation2 + $0x70] sm:$0xff]  ;;  %v6620_v54 = vpack.c.bf16 %v2440_v52, %v2439_v35  ;;  %v2452_v55 = vld [vmem:[#allocation2 + $0x78] sm:$0xff] }
 0x1fb   : > { %v6640_v49 = vpack.c.bf16 %v2450_v47, %v2449_v34  ;;  %v6644_v56 = vpack.c.bf16 %v2452_v55, %v2451_v53  ;;  %v2441_v39 = vld [vmem:[#allocation2 + $0x20] sm:$0xff]  ;;  %v2442_v0 = vld [vmem:[#allocation2 + $0x28] sm:$0xff] }
 0x1fc   : > { %6595 = vmatpush3.bf16.msra.mxu0 %v6592_v40  ;;  %6617 = vmatprep.subr.bf16.mxu1 %v6616_v46  ;;  %v7996_v1 = vpack.c.bf16 %v2442_v0, %v2441_v39  ;;  %v7455_v40 = vmov 1983009808   ;;  %v2446_v33 = vld [vmem:[#allocation2 + $0x48] sm:$0xff]  ;;  %p9598_p12 = scmp.ne.s32.totalorder %s9596_s3, 0 }
 0x1fd   : > { %6597 = vmatprep.subr.bf16.mxu0 %v6596_v5  ;;  %6619 = vmatpush3.bf16.msra.mxu1 %v6616_v46  ;;  %v1352_v2 = vunpack.c.l.s4 %v7455_v40 }
 0x1fe   : > { %6621 = vmatprep.subr.bf16.mxu1 %v6620_v54  ;;  %p7332_p1 = pnand %p7331_p10, %p9598_p12 }
 0x1ff   : > { %v1353_v6 = vunpack.c.0.s8 %v1352_v2 }
 0x200   : > { %6599 = vmatpush3.bf16.msra.mxu0 %v6596_v5  ;;  %v1384_v5 = vunpack.c.l.s4 %v7456_v4  ;;  %p7333_p4 = pneg %p7332_p1 }
 0x201   : > { %6601 = vmatprep.subr.bf16.mxu0 %v6600_v8  ;;  %6623 = vmatpush3.bf16.msra.mxu1 %v6620_v54 }
 0x202   : > { %6625 = vmatprep.subr.bf16.mxu1 %v7996_v1  ;;  %v1385_v10 = vunpack.c.0.s8 %v1384_v5 }
 0x204   : > { %6603 = vmatpush3.bf16.msra.mxu0 %v6600_v8 }
 0x205   : > { %6605 = vmatprep.subr.bf16.mxu0 %v6604_v11 }
 0x208   : > { %6607 = vmatpush3.bf16.msra.mxu0 %v6604_v11  ;;  %v8002_v11 = vsub.s32 %v1353_v6, %v7999_v7 }
 0x209   : > { %6609 = vmatprep.subr.bf16.mxu0 %v6608_v14 }
 0x20c   : > { %6611 = vmatpush3.bf16.msra.mxu0 %v6608_v14 }
 0x20d   : > { %6613 = vmatprep.subr.bf16.mxu0 %v6612_v17 }
 0x210   : > { %6615 = vmatpush3.bf16.msra.mxu0 %v6612_v17 }
 0x211   : > { %6641 = vmatprep.subr.bf16.mxu0 %v6640_v49 }
 0x213   : > { %6337 = vmatmul.mubr.f32.vlgmr.msra.gmra.mrb[0].mxu0 %v1126_v18  ;;  %v8007_v18 = vsub.s32 %v1385_v10, %v7999_v7 }
 0x214   : > { %6339 = vmatprep.mubr.f32.mxu0 %v1127_v19  ;;  %6643 = vmatpush3.bf16.msra.mxu0 %v6640_v49 }
 0x215   : > { %6645 = vmatprep.subr.bf16.mxu0 %v6644_v56 }
 0x217   : > { %6340 = vmatmul.mubr.f32.gmra.mrb[2].mxu0 %v1128_v20 }
 0x218   : > { %6342 = vmatprep.mubr.f32.mxu0 %v1129_v21  ;;  %6647 = vmatpush3.bf16.msra.mxu0 %v6644_v56 }
 0x21b   : > { %6343 = vmatmul.mubr.f32.gmra.mrb[4].mxu0 %v1130_v22 }
 0x21c   : > { %6345 = vmatprep.mubr.f32.mxu0 %v1131_v23 }
 0x21f   : > { %6346 = vmatmul.mubr.f32.gmra.mrb[6].mxu0 %v1132_v24 }
 0x2e6   : > { %v6338_v26 = vpop.f32.mrb[0].mxu0 }
 0x2e7   : > { %v1228_v27 = vadd.f32 %v6338_v26, %v5894_v25  ;;  %v1222_v28 = vpop.f32.mrb[1].mxu0 }
 0x2e8   : > { %v1223_v30 = vadd.f32 %v5894_v25, %v1222_v28 }
 0x2e9   : > { %v7932_v29 = vmul.f32 0.17677669, %v1228_v27 }
 0x2ea   : > { %v6341_v31 = vpop.f32.mrb[2].mxu0  ;;  %v7938_v41 = vmul.f32 0.17677669, %v1223_v30 }
 0x2eb   : > { %1303 = vrot.lane.b32.xlu0 %v7932_v29, %s7452_s12  ;;  %1279 = vrot.lane.b32.xlu1 %v7932_v29, %s7453_s13  ;;  %v1232_v32 = vpop.f32.mrb[3].mxu0  ;;  %v1238_v43 = vadd.f32 %v6341_v31, %v5894_v25 }
 0x2ec   : > { %v1233_v36 = vadd.f32 %v5894_v25, %v1232_v32 }
 0x2ed   : > { %v7944_v50 = vmul.f32 0.17677669, %v1238_v43  ;;  %v2444_v43 = vld [vmem:[#allocation2 + $0x38] sm:$0xff] }
 0x2ee   : > { %v6344_v42 = vpop.f32.mrb[4].mxu0  ;;  %v7954_v57 = vmul.f32 0.17677669, %v1233_v36 }
 0x2ef   : > { %1327 = vrot.lane.b32.xlu1 %v7932_v29, %s7454_s20  ;;  %1277 = vrot.lane.b32.xlu0 %v7938_v41, %s7453_s13  ;;  %v1242_v44 = vpop.f32.mrb[5].mxu0  ;;  %v1248_v58 = vadd.f32 %v6344_v42, %v5894_v25 }
 0x2f0   : > { %v1243_v59 = vadd.f32 %v5894_v25, %v1242_v44  ;;  %v2445_v44 = vld [vmem:[#allocation2 + $0x40] sm:$0xff] }
 0x2f1   : > { %v7960_v37 = vmul.f32 0.17677669, %v1248_v58  ;;  %v8025_v55 = vpack.c.bf16 %v2446_v33, %v2445_v44 }
 0x2f2   : > { %v6347_v48 = vpop.f32.mrb[6].mxu0  ;;  %v7970_v38 = vmul.f32 0.17677669, %v1243_v59 }
 0x2f3   : > { %1325 = vrot.lane.b32.xlu1 %v7938_v41, %s7454_s20  ;;  %1301 = vrot.lane.b32.xlu0 %v7938_v41, %s7452_s12  ;;  %v1252_v51 = vpop.f32.mrb[7].mxu0  ;;  %v1258_v60 = vadd.f32 %v6347_v48, %v5894_v25 }
 0x2f4   : > { %v1253_v61 = vadd.f32 %v5894_v25, %v1252_v51 }
 0x2f5   : > { %v7976_v62 = vmul.f32 0.17677669, %v1258_v60 }
 0x2f6   : > { %v7978_v63 = vmul.f32 0.17677669, %v1253_v61 }
 0x2f7   : > { %1283 = vrot.lane.b32.xlu1 %v7944_v50, %s7453_s13  ;;  %1307 = vrot.lane.b32.xlu0 %v7944_v50, %s7452_s12 }
 0x2fb   : > { %1331 = vrot.lane.b32.xlu1 %v7944_v50, %s7454_s20  ;;  %1281 = vrot.lane.b32.xlu0 %v7954_v57, %s7453_s13 }
 0x2ff   : > { %1305 = vrot.lane.b32.xlu1 %v7954_v57, %s7452_s12  ;;  %1329 = vrot.lane.b32.xlu0 %v7954_v57, %s7454_s20 }
 0x303   : > { %1287 = vrot.lane.b32.xlu1 %v7960_v37, %s7453_s13  ;;  %1311 = vrot.lane.b32.xlu0 %v7960_v37, %s7452_s12 }
 0x307   : > { %1335 = vrot.lane.b32.xlu1 %v7960_v37, %s7454_s20  ;;  %1285 = vrot.lane.b32.xlu0 %v7970_v38, %s7453_s13 }
 0x30b   : > { %1309 = vrot.lane.b32.xlu1 %v7970_v38, %s7452_s12  ;;  %1333 = vrot.lane.b32.xlu0 %v7970_v38, %s7454_s20 }
 0x30f   : > { %1291 = vrot.lane.b32.xlu1 %v7976_v62, %s7453_s13  ;;  %1289 = vrot.lane.b32.xlu0 %v7978_v63, %s7453_s13 }
 0x313   : > { %1313 = vrot.lane.b32.xlu1 %v7978_v63, %s7452_s12  ;;  %1337 = vrot.lane.b32.xlu0 %v7978_v63, %s7454_s20 }
 0x317   : > { %1339 = vrot.lane.b32.xlu1 %v7976_v62, %s7454_s20  ;;  %1315 = vrot.lane.b32.xlu0 %v7976_v62, %s7452_s12 }
 0x35d   : > { %v1304_v8 = vpop.permute.xlu0 %1303  ;;  %v1280_v9 = vpop.permute.xlu1 %1279 }
 0x35e   : > { %v1417_v12 = vcombine.low %v7932_v29, %v1304_v8  ;;  %v1418_v13 = vcombine.high %v7932_v29, %v1304_v8  ;;  %v2443_v29 = vld [vmem:[#allocation2 + $0x30] sm:$0xff] }
 0x35f   : > { %v8023_v54 = vpack.c.bf16 %v2444_v43, %v2443_v29 }
 0x360   : > { %v1425_v19 = vrot.slane %v1417_v12, %v8002_v11  ;;  %v1432_v20 = vrot.slane %v1418_v13, %v8002_v11 }
 0x361   : > { %v1328_v14 = vpop.permute.xlu1 %1327  ;;  %v1278_v15 = vpop.permute.xlu0 %1277 }
 0x362   : > { %v1433_v16 = vcombine.low %v1280_v9, %v1328_v14  ;;  %v1434_v17 = vcombine.high %v1280_v9, %v1328_v14 }
 0x364   : > { %v1441_v21 = vrot.slane %v1433_v16, %v8002_v11  ;;  %v1448_v22 = vrot.slane %v1434_v17, %v8002_v11 }
 0x365   : > { %v1326_v23 = vpop.permute.xlu1 %1325  ;;  %v1302_v24 = vpop.permute.xlu0 %1301 }
 0x366   : > { %v1449_v25 = vcombine.low %v1425_v19, %v1441_v21  ;;  %v1450_v26 = vcombine.high %v1425_v19, %v1441_v21  ;;  %v1465_v27 = vcombine.low %v1432_v20, %v1448_v22  ;;  %v1466_v28 = vcombine.high %v1432_v20, %v1448_v22 }
 0x367   : > { %v1365_v30 = vcombine.low %v1278_v15, %v1326_v23  ;;  %v1366_v31 = vcombine.high %v1278_v15, %v1326_v23  ;;  %v1349_v32 = vcombine.low %v7938_v41, %v1302_v24  ;;  %v1350_v42 = vcombine.high %v7938_v41, %v1302_v24 }
 0x368   : > { %v1457_v45 = vrot.slane %v1449_v25, %v8007_v18  ;;  %v1464_v34 = vrot.slane %v1450_v26, %v8007_v18  ;;  %v1473_v46 = vrot.slane %v1465_v27, %v8007_v18  ;;  %v1480_v47 = vrot.slane %v1466_v28, %v8007_v18 }
 0x369   : > { %v1373_v48 = vrot.slane %v1365_v30, %v8002_v11  ;;  %v1380_v49 = vrot.slane %v1366_v31, %v8002_v11  ;;  %v1357_v51 = vrot.slane %v1349_v32, %v8002_v11  ;;  %v1364_v35 = vrot.slane %v1350_v42, %v8002_v11  ;;  %v1284_v41 = vpop.permute.xlu1 %1283  ;;  %v1308_v52 = vpop.permute.xlu0 %1307 }
 0x36a   : > { %v1961_v53 = vcombine.low %v1457_v45, %v1464_v34  ;;  %v5897_v36 = vcombine.high %v1457_v45, %v1464_v34  ;;  %v1977_v61 = vcombine.low %v1473_v46, %v1480_v47  ;;  %v5898_v39 = vcombine.high %v1473_v46, %v1480_v47 }
 0x36b   : > { %v1381_v56 = vcombine.low %v1357_v51, %v1373_v48  ;;  %v1382_v58 = vcombine.high %v1357_v51, %v1373_v48  ;;  %v1397_v59 = vcombine.low %v1364_v35, %v1380_v49  ;;  %v1398_v60 = vcombine.high %v1364_v35, %v1380_v49 }
 0x36c   : > { %v1553_v0 = vcombine.low %v7944_v50, %v1308_v52  ;;  %v1554_v40 = vcombine.high %v7944_v50, %v1308_v52  ;;  %v8034_v12 = vrot.slane %v1961_v53, %v8002_v11  ;;  %v8037_v13 = vrot.slane %v5897_v36, %v8002_v11 }
 0x36d   : > { %v1389_v2 = vrot.slane %v1381_v56, %v8007_v18  ;;  %v1396_v3 = vrot.slane %v1382_v58, %v8007_v18  ;;  %v1405_v4 = vrot.slane %v1397_v59, %v8007_v18  ;;  %v1412_v5 = vrot.slane %v1398_v60, %v8007_v18  ;;  %v1332_v6 = vpop.permute.xlu1 %1331  ;;  %v1282_v8 = vpop.permute.xlu0 %1281 }
 0x36e   : > { %v1569_v9 = vcombine.low %v1284_v41, %v1332_v6  ;;  %v1570_v10 = vcombine.high %v1284_v41, %v1332_v6  ;;  %v1561_v50 = vrot.slane %v1553_v0, %v8002_v11  ;;  %v1568_v14 = vrot.slane %v1554_v40, %v8002_v11 }
 0x36f   : > { %v1893_v15 = vcombine.low %v1389_v2, %v1396_v3  ;;  %v5895_v16 = vcombine.high %v1389_v2, %v1396_v3  ;;  %v1909_v20 = vcombine.low %v1405_v4, %v1412_v5  ;;  %v5896_v21 = vcombine.high %v1405_v4, %v1412_v5 }
 0x370   : > { %v1577_v17 = vrot.slane %v1569_v9, %v8002_v11  ;;  %v1584_v19 = vrot.slane %v1570_v10, %v8002_v11  ;;  %v8046_v26 = vrot.slane %v1977_v61, %v8002_v11  ;;  %v8049_v27 = vrot.slane %v5898_v39, %v8002_v11 }
 0x371   : > { %v1306_v22 = vpop.permute.xlu1 %1305  ;;  %v1330_v23 = vpop.permute.xlu0 %1329  ;;  %v1900_v24 = vrot.slane %v1893_v15, %v8002_v11  ;;  %v1908_v25 = vrot.slane %v5895_v16, %v8002_v11  ;;  %v1916_v53 = vrot.slane %v1909_v20, %v8002_v11  ;;  %v1924_v36 = vrot.slane %v5896_v21, %v8002_v11 }
 0x372   : > { %v1585_v28 = vcombine.low %v1561_v50, %v1577_v17  ;;  %v1586_v29 = vcombine.high %v1561_v50, %v1577_v17  ;;  %v1601_v30 = vcombine.low %v1568_v14, %v1584_v19  ;;  %v1602_v31 = vcombine.high %v1568_v14, %v1584_v19 }
 0x373   : > { %v1485_v32 = vcombine.low %v7954_v57, %v1306_v22  ;;  %v1486_v42 = vcombine.high %v7954_v57, %v1306_v22  ;;  %v1501_v43 = vcombine.low %v1282_v8, %v1330_v23  ;;  %v1502_v44 = vcombine.high %v1282_v8, %v1330_v23 }
 0x374   : > { %v8054_v33 = vrot.slane %v1585_v28, %v8007_v18  ;;  %v8057_v45 = vrot.slane %v1586_v29, %v8007_v18  ;;  %v8060_v34 = vrot.slane %v1601_v30, %v8007_v18  ;;  %v8063_v46 = vrot.slane %v1602_v31, %v8007_v18 }
 0x375   : > { %v1493_v47 = vrot.slane %v1485_v32, %v8002_v11  ;;  %v1500_v48 = vrot.slane %v1486_v42, %v8002_v11  ;;  %v1509_v57 = vrot.slane %v1501_v43, %v8002_v11  ;;  %v1516_v49 = vrot.slane %v1502_v44, %v8002_v11  ;;  %v1288_v51 = vpop.permute.xlu1 %1287  ;;  %v1312_v35 = vpop.permute.xlu0 %1311 }
 0x376   : > { %v2097_v41 = vcombine.low %v8054_v33, %v8057_v45  ;;  %v5901_v52 = vcombine.high %v8054_v33, %v8057_v45  ;;  %v1689_v61 = vcombine.low %v7960_v37, %v1312_v35  ;;  %v1690_v39 = vcombine.high %v7960_v37, %v1312_v35 }
 0x377   : > { %v1517_v56 = vcombine.low %v1493_v47, %v1509_v57  ;;  %v1518_v58 = vcombine.high %v1493_v47, %v1509_v57  ;;  %v1533_v59 = vcombine.low %v1500_v48, %v1516_v49  ;;  %v1534_v60 = vcombine.high %v1500_v48, %v1516_v49 }
 0x378   : > { %v1925_v0 = vcombine.low %v1900_v24, %v1908_v25  ;;  %v1926_v40 = vcombine.high %v1900_v24, %v1908_v25  ;;  %v2113_v2 = vcombine.low %v8060_v34, %v8063_v46  ;;  %v5902_v3 = vcombine.high %v8060_v34, %v8063_v46 }
 0x379   : > { %v8082_v4 = vrot.slane %v1517_v56, %v8007_v18  ;;  %v8085_v5 = vrot.slane %v1518_v58, %v8007_v18  ;;  %v1336_v6 = vpop.permute.xlu1 %1335  ;;  %v8087_v8 = vpop.permute.xlu0 %1285  ;;  %v8090_v9 = vrot.slane %v1533_v59, %v8007_v18  ;;  %v8093_v37 = vrot.slane %v1534_v60, %v8007_v18 }
 0x37a   : > { %v8096_v10 = vrot.slane %v1925_v0, %v8007_v18  ;;  %v1941_v50 = vcombine.low %v1916_v53, %v1924_v36  ;;  %v1697_v16 = vrot.slane %v1689_v61, %v8002_v11  ;;  %v1704_v17 = vrot.slane %v1690_v39, %v8002_v11 }
 0x37b   : > { %v2029_v14 = vcombine.low %v8082_v4, %v8085_v5  ;;  %v5899_v15 = vcombine.high %v8082_v4, %v8085_v5  ;;  %v1942_v19 = vcombine.high %v1916_v53, %v1924_v36  ;;  %v8108_v21 = vrot.slane %v1926_v40, %v8007_v18 }
 0x37c   : > { %v8105_v20 = vrot.slane %v1941_v50, %v8007_v18  ;;  %v1705_v22 = vcombine.low %v1288_v51, %v1336_v6  ;;  %v1706_v23 = vcombine.high %v1288_v51, %v1336_v6  ;;  %v1993_v24 = vcombine.low %v8034_v12, %v8037_v13 }
 0x37d   : > { %v1994_v25 = vcombine.high %v8034_v12, %v8037_v13  ;;  %v2009_v28 = vcombine.low %v8046_v26, %v8049_v27  ;;  %v1310_v29 = vpop.permute.xlu1 %1309  ;;  %v2045_v30 = vcombine.low %v8090_v9, %v8093_v37  ;;  %v8121_v32 = vrot.slane %v1942_v19, %v8007_v18  ;;  %v1334_v47 = vpop.permute.xlu0 %1333 }
 0x37e   : > { %v1957_v31 = vcombine.low %v8096_v10, %v8105_v20  ;;  %v1713_v42 = vrot.slane %v1705_v22, %v8002_v11  ;;  %v1720_v43 = vrot.slane %v1706_v23, %v8002_v11  ;;  %v8126_v44 = vrot.slane %v1993_v24, %v8007_v18 }
 0x37f   : > { %v8129_v12 = vrot.slane %v1994_v25, %v8007_v18  ;;  %v2010_v13 = vcombine.high %v8046_v26, %v8049_v27  ;;  %v1960_v48 = vcombine.high %v8108_v21, %v8121_v32  ;;  %v8137_v51 = vrot.slane %v2009_v28, %v8007_v18 }
 0x380   : > { %6356 = vmatprep.mubr.msk.f32.mxu1 %vm2453_vm0, %v1957_v31  ;;  %v1721_v57 = vcombine.low %v1697_v16, %v1713_v42  ;;  %v1722_v49 = vcombine.high %v1697_v16, %v1713_v42  ;;  %v1737_v35 = vcombine.low %v1704_v17, %v1720_v43  ;;  %v1738_v53 = vcombine.high %v1704_v17, %v1720_v43 }
 0x381   : > { %v8140_v36 = vrot.slane %v2010_v13, %v8007_v18  ;;  %v1621_v56 = vcombine.low %v7970_v38, %v1310_v29  ;;  %v8143_v58 = vpop.permute.xlu1 %1291  ;;  %v5900_v26 = vcombine.high %v8090_v9, %v8093_v37  ;;  %6416 = vmatprep.mubr.msk.f32.mxu0 %vm2453_vm0, %v1960_v48  ;;  %v2025_v60 = vcombine.low %v8126_v44, %v8137_v51  ;;  %v1290_v17 = vpop.permute.xlu0 %1289 }
 0x382   : > { %v8149_v27 = vrot.slane %v1721_v57, %v8007_v18  ;;  %v8152_v59 = vrot.slane %v1722_v49, %v8007_v18  ;;  %v8157_v61 = vrot.slane %v1737_v35, %v8007_v18  ;;  %v8160_v39 = vrot.slane %v1738_v53, %v8007_v18 }
 0x383   : > { %v2028_v0 = vcombine.high %v8129_v12, %v8140_v36  ;;  %v1622_v40 = vcombine.high %v7970_v38, %v1310_v29  ;;  %6357 = vmatmul.mubr.msk.f32.vlgmr.msra.gmra.mrb[0].mxu1 %vm2453_vm0, %v2025_v60  ;;  %v1629_v6 = vrot.slane %v1621_v56, %v8002_v11  ;;  %v1637_v9 = vcombine.low %v8087_v8, %v1334_v47 }
 0x384   : > { %v2233_v4 = vcombine.low %v8149_v27, %v8152_v59  ;;  %v5905_v5 = vcombine.high %v8149_v27, %v8152_v59  ;;  %v2249_v37 = vcombine.low %v8157_v61, %v8160_v39  ;;  %v5906_v50 = vcombine.high %v8157_v61, %v8160_v39  ;;  %6627 = vmatpush3.bf16.msra.mxu1 %v7996_v1 }
 0x385   : > { %6417 = vmatmul.mubr.msk.f32.vlgmr.msra.gmra.mrb[8].mxu0 %vm2453_vm0, %v2028_v0  ;;  %v1636_v38 = vrot.slane %v1622_v40, %v8002_v11  ;;  %v1638_v16 = vcombine.high %v8087_v8, %v1334_v47  ;;  %v1314_v19 = vpop.permute.xlu1 %1313  ;;  %v1645_v22 = vrot.slane %v1637_v9, %v8002_v11  ;;  %v2036_v23 = vrot.slane %v2029_v14, %v8002_v11  ;;  %v1338_v60 = vpop.permute.xlu0 %1337 }
 0x386   : > { %v2044_v24 = vrot.slane %v5899_v15, %v8002_v11  ;;  %v2052_v25 = vrot.slane %v2045_v30, %v8002_v11  ;;  %v2060_v29 = vrot.slane %v5900_v26, %v8002_v11  ;;  %v1757_v31 = vcombine.low %v7978_v63, %v1314_v19  ;;  %6629 = vmatprep.subr.bf16.mxu1 %v8023_v54 }
 0x387   : > { %v1652_v28 = vrot.slane %v1638_v16, %v8002_v11  ;;  %v1758_v8 = vcombine.high %v7978_v63, %v1314_v19  ;;  %v1653_v42 = vcombine.low %v1629_v6, %v1645_v22  ;;  %v1654_v43 = vcombine.high %v1629_v6, %v1645_v22 }
 0x388   : > { %v2061_v13 = vcombine.low %v2036_v23, %v2044_v24  ;;  %v2062_v14 = vcombine.high %v2036_v23, %v2044_v24  ;;  %v2077_v48 = vcombine.low %v2052_v25, %v2060_v29  ;;  %v2078_v30 = vcombine.high %v2052_v25, %v2060_v29  ;;  %6631 = vmatpush3.bf16.msra.mxu1 %v8023_v54 }
 0x389   : > { %v1669_v47 = vcombine.low %v1636_v38, %v1652_v28  ;;  %v1670_v15 = vcombine.high %v1636_v38, %v1652_v28  ;;  %v8190_v1 = vrot.slane %v1653_v42, %v8007_v18  ;;  %v8193_v57 = vrot.slane %v1654_v43, %v8007_v18  ;;  %6633 = vmatprep.subr.bf16.mxu1 %v8025_v55  ;;  %v1340_v9 = vpop.permute.xlu1 %1339  ;;  %v1316_v46 = vpop.permute.xlu0 %1315 }
 0x38a   : > { %v8196_v49 = vrot.slane %v2061_v13, %v8007_v18  ;;  %v8199_v63 = vrot.slane %v2062_v14, %v8007_v18  ;;  %v8209_v56 = vrot.slane %v2077_v48, %v8007_v18  ;;  %v8212_v26 = vrot.slane %v2078_v30, %v8007_v18 }
 0x38b   : > { %v8203_v35 = vrot.slane %v1669_v47, %v8007_v18  ;;  %v8206_v53 = vrot.slane %v1670_v15, %v8007_v18  ;;  %v2165_v0 = vcombine.low %v8190_v1, %v8193_v57  ;;  %v5903_v54 = vcombine.high %v8190_v1, %v8193_v57 }
 0x38c   : > { %v1765_v40 = vrot.slane %v1757_v31, %v8002_v11  ;;  %v1772_v6 = vrot.slane %v1758_v8, %v8002_v11  ;;  %v2093_v19 = vcombine.low %v8196_v49, %v8209_v56  ;;  %v2096_v22 = vcombine.high %v8199_v63, %v8212_v26 }
 0x38d   : > { %v2181_v38 = vcombine.low %v8203_v35, %v8206_v53  ;;  %v5904_v16 = vcombine.high %v8203_v35, %v8206_v53  ;;  %v2104_v23 = vrot.slane %v2097_v41, %v8002_v11  ;;  %v2112_v24 = vrot.slane %v5901_v52, %v8002_v11 }
 0x38e   : > { %v2120_v25 = vrot.slane %v2113_v2, %v8002_v11  ;;  %v2128_v28 = vrot.slane %v5902_v3, %v8002_v11  ;;  %6359 = vmatprep.mubr.msk.f32.mxu1 %vm2453_vm0, %v2093_v19  ;;  %6419 = vmatprep.mubr.msk.f32.mxu0 %vm2453_vm0, %v2096_v22  ;;  %v1773_v41 = vcombine.low %v1290_v17, %v1338_v60 }
 0x38f   : > { %v1774_v29 = vcombine.high %v1290_v17, %v1338_v60  ;;  %v1841_v31 = vcombine.low %v8143_v58, %v1340_v9  ;;  %v2129_v33 = vcombine.low %v2104_v23, %v2112_v24  ;;  %v2130_v52 = vcombine.high %v2104_v23, %v2112_v24 }
 0x390   : > { %v2145_v45 = vcombine.low %v2120_v25, %v2128_v28  ;;  %v2146_v8 = vcombine.high %v2120_v25, %v2128_v28  ;;  %v1781_v42 = vrot.slane %v1773_v41, %v8002_v11  ;;  %v1842_v43 = vcombine.high %v8143_v58, %v1340_v9 }
 0x391   : > { %v1788_v2 = vrot.slane %v1774_v29, %v8002_v11  ;;  %v1849_v34 = vrot.slane %v1841_v31, %v8002_v11  ;;  %v8253_v3 = vrot.slane %v2129_v33, %v8007_v18  ;;  %v8259_v13 = vrot.slane %v2130_v52, %v8007_v18 }
 0x392   : > { %v8256_v17 = vrot.slane %v2145_v45, %v8007_v18  ;;  %v8262_v14 = vrot.slane %v2146_v8, %v8007_v18  ;;  %v1789_v47 = vcombine.low %v1765_v40, %v1781_v42  ;;  %v1790_v15 = vcombine.high %v1765_v40, %v1781_v42 }
 0x393   : > { %v1805_v48 = vcombine.low %v1772_v6, %v1788_v2  ;;  %v1806_v30 = vcombine.high %v1772_v6, %v1788_v2  ;;  %v1856_v57 = vrot.slane %v1842_v43, %v8002_v11  ;;  %v1825_v35 = vcombine.low %v7976_v62, %v1316_v46 }
 0x394   : > { %v2161_v58 = vcombine.low %v8253_v3, %v8256_v17  ;;  %v2164_v1 = vcombine.high %v8259_v13, %v8262_v14  ;;  %v1797_v53 = vrot.slane %v1789_v47, %v8007_v18  ;;  %v1804_v60 = vrot.slane %v1790_v15, %v8007_v18 }
 0x395   : > { %v1813_v9 = vrot.slane %v1805_v48, %v8007_v18  ;;  %v1820_v40 = vrot.slane %v1806_v30, %v8007_v18  ;;  %v1826_v6 = vcombine.high %v7976_v62, %v1316_v46  ;;  %v1833_v19 = vrot.slane %v1825_v35, %v8002_v11 }
 0x396   : > { %6360 = vmatmul.mubr.msk.f32.gmra.mrb[2].mxu1 %vm2453_vm0, %v2161_v58  ;;  %6420 = vmatmul.mubr.msk.f32.gmra.mrb[10].mxu0 %vm2453_vm0, %v2164_v1  ;;  %v2172_v22 = vrot.slane %v2165_v0, %v8002_v11  ;;  %v2301_v23 = vcombine.low %v1797_v53, %v1804_v60  ;;  %v5907_v24 = vcombine.high %v1797_v53, %v1804_v60 }
 0x397   : > { %v2317_v25 = vcombine.low %v1813_v9, %v1820_v40  ;;  %v5908_v28 = vcombine.high %v1813_v9, %v1820_v40  ;;  %v1840_v41 = vrot.slane %v1826_v6, %v8002_v11  ;;  %v1857_v29 = vcombine.low %v1833_v19, %v1849_v34 }
 0x398   : > { %v1858_v31 = vcombine.high %v1833_v19, %v1849_v34  ;;  %v2180_v33 = vrot.slane %v5903_v54, %v8002_v11  ;;  %v2188_v45 = vrot.slane %v2181_v38, %v8002_v11  ;;  %v2196_v52 = vrot.slane %v5904_v16, %v8002_v11 }
 0x399   : > { %v2240_v62 = vrot.slane %v2233_v4, %v8002_v11  ;;  %v2248_v0 = vrot.slane %v5905_v5, %v8002_v11  ;;  %v1865_v8 = vrot.slane %v1857_v29, %v8007_v18  ;;  %v1873_v2 = vcombine.low %v1840_v41, %v1856_v57 }
 0x39a   : > { %v1872_v42 = vrot.slane %v1858_v31, %v8007_v18  ;;  %v1874_v54 = vcombine.high %v1840_v41, %v1856_v57  ;;  %v2197_v43 = vcombine.low %v2172_v22, %v2180_v33  ;;  %v2213_v38 = vcombine.low %v2188_v45, %v2196_v52 }
 0x39b   : > { %v2198_v34 = vcombine.high %v2172_v22, %v2180_v33  ;;  %v2214_v16 = vcombine.high %v2188_v45, %v2196_v52  ;;  %v1881_v46 = vrot.slane %v1873_v2, %v8007_v18  ;;  %v2256_v1 = vrot.slane %v2249_v37, %v8002_v11 }
 0x39c   : > { %v1888_v47 = vrot.slane %v1874_v54, %v8007_v18  ;;  %v2369_v4 = vcombine.low %v1865_v8, %v1872_v42  ;;  %v5909_v15 = vcombine.high %v1865_v8, %v1872_v42  ;;  %v8296_v48 = vrot.slane %v2197_v43, %v8007_v18 }
 0x39d   : > { %v8299_v27 = vrot.slane %v2213_v38, %v8007_v18  ;;  %v8302_v59 = vrot.slane %v2198_v34, %v8007_v18  ;;  %v8305_v5 = vrot.slane %v2214_v16, %v8007_v18  ;;  %v2264_v57 = vrot.slane %v5906_v50, %v8002_v11 }
 0x39e   : > { %v2385_v30 = vcombine.low %v1881_v46, %v1888_v47  ;;  %v5910_v58 = vcombine.high %v1881_v46, %v1888_v47  ;;  %v2265_v60 = vcombine.low %v2240_v62, %v2248_v0  ;;  %v2266_v9 = vcombine.high %v2240_v62, %v2248_v0 }
 0x39f   : > { %v2229_v35 = vcombine.low %v8296_v48, %v8299_v27  ;;  %v2232_v53 = vcombine.high %v8302_v59, %v8305_v5  ;;  %v2281_v40 = vcombine.low %v2256_v1, %v2264_v57  ;;  %v2282_v6 = vcombine.high %v2256_v1, %v2264_v57 }
 0x3a0   : > { %v2308_v19 = vrot.slane %v2301_v23, %v8002_v11  ;;  %v2316_v22 = vrot.slane %v5907_v24, %v8002_v11  ;;  %v2273_v61 = vrot.slane %v2265_v60, %v8007_v18  ;;  %v8325_v39 = vrot.slane %v2266_v9, %v8007_v18  ;;  %v2448_v60 = vld [vmem:[#allocation2 + $0x58] sm:$0xff] }
 0x3a1   : > { %6362 = vmatprep.mubr.msk.f32.mxu1 %vm2453_vm0, %v2229_v35  ;;  %6422 = vmatprep.mubr.msk.f32.mxu0 %vm2453_vm0, %v2232_v53  ;;  %v2324_v37 = vrot.slane %v2317_v25, %v8002_v11  ;;  %v2289_v50 = vrot.slane %v2281_v40, %v8007_v18  ;;  %v8330_v41 = vrot.slane %v2282_v6, %v8007_v18  ;;  %v2447_v53 = vld [vmem:[#allocation2 + $0x50] sm:$0xff] }
 0x3a2   : > { %v2332_v23 = vrot.slane %v5908_v28, %v8002_v11  ;;  %v2333_v29 = vcombine.low %v2308_v19, %v2316_v22  ;;  %v2334_v24 = vcombine.high %v2308_v19, %v2316_v22  ;;  %v2376_v31 = vrot.slane %v2369_v4, %v8002_v11 }
 0x3a3   : > { %v2384_v33 = vrot.slane %v5909_v15, %v8002_v11  ;;  %v2392_v45 = vrot.slane %v2385_v30, %v8002_v11  ;;  %v2297_v52 = vcombine.low %v2273_v61, %v2289_v50  ;;  %v2300_v62 = vcombine.high %v8325_v39, %v8330_v41 }
 0x3a4   : > { %v2341_v25 = vrot.slane %v2333_v29, %v8007_v18  ;;  %v2349_v0 = vcombine.low %v2324_v37, %v2332_v23  ;;  %v2348_v8 = vrot.slane %v2334_v24, %v8007_v18  ;;  %v2350_v42 = vcombine.high %v2324_v37, %v2332_v23 }
 0x3a5   : > { %v2400_v28 = vrot.slane %v5910_v58, %v8002_v11  ;;  %v2401_v2 = vcombine.low %v2376_v31, %v2384_v33  ;;  %6363 = vmatmul.mubr.msk.f32.gmra.mrb[4].mxu1 %vm2453_vm0, %v2297_v52  ;;  %6423 = vmatmul.mubr.msk.f32.gmra.mrb[12].mxu0 %vm2453_vm0, %v2300_v62  ;;  %v2402_v43 = vcombine.high %v2376_v31, %v2384_v33 }
 0x3a6   : > { %v2357_v54 = vrot.slane %v2349_v0, %v8007_v18  ;;  %v2364_v38 = vrot.slane %v2350_v42, %v8007_v18  ;;  %v1958_v35 = vcombine.high %v8096_v10, %v8105_v20  ;;  %v2026_v9 = vcombine.high %v8126_v44, %v8137_v51 }
 0x3a7   : > { %v2409_v34 = vrot.slane %v2401_v2, %v8007_v18  ;;  %v2417_v16 = vcombine.low %v2392_v45, %v2400_v28  ;;  %v2418_v46 = vcombine.high %v2392_v45, %v2400_v28  ;;  %v2416_v4 = vrot.slane %v2402_v43, %v8007_v18 }
 0x3a8   : > { %v2365_v47 = vcombine.low %v2341_v25, %v2357_v54  ;;  %v2368_v15 = vcombine.high %v2348_v8, %v2364_v38  ;;  %v6636_v40 = vpack.c.bf16 %v2448_v60, %v2447_v53  ;;  %v2094_v6 = vcombine.high %v8196_v49, %v8209_v56 }
 0x3a9   : > { %v2425_v30 = vrot.slane %v2417_v16, %v8007_v18  ;;  %v2432_v58 = vrot.slane %v2418_v46, %v8007_v18  ;;  %v2162_v10 = vcombine.high %v8253_v3, %v8256_v17  ;;  %v2230_v20 = vcombine.high %v8296_v48, %v8299_v27 }
 0x3aa   : > { %6365 = vmatprep.mubr.msk.f32.mxu1 %vm2453_vm0, %v2365_v47  ;;  %6425 = vmatprep.mubr.msk.f32.mxu0 %vm2453_vm0, %v2368_v15  ;;  %v2298_v44 = vcombine.high %v2273_v61, %v2289_v50  ;;  %v2366_v51 = vcombine.high %v2341_v25, %v2357_v54  ;;  %v2027_v56 = vcombine.low %v8129_v12, %v8140_v36 }
 0x3ab   : > { %v2433_v1 = vcombine.low %v2409_v34, %v2425_v30  ;;  %v2436_v57 = vcombine.high %v2416_v4, %v2432_v58  ;;  %v2434_v49 = vcombine.high %v2409_v34, %v2425_v30  ;;  %v2095_v3 = vcombine.low %v8199_v63, %v8212_v26 }
 0x3ac   : > { %v2163_v17 = vcombine.low %v8259_v13, %v8262_v14  ;;  %v2367_v12 = vcombine.low %v2348_v8, %v2364_v38  ;;  %v2435_v36 = vcombine.low %v2416_v4, %v2432_v58 }
 0x3ad   : > { %6366 = vmatmul.mubr.msk.f32.gmra.mrb[6].mxu1 %vm2453_vm0, %v2433_v1  ;;  %6426 = vmatmul.mubr.msk.f32.gmra.mrb[14].mxu0 %vm2453_vm0, %v2436_v57 }
 0x3ae   : > { %6376 = vmatprep.mubr.msk.f32.mxu1 %vm2453_vm0, %v1958_v35 }
 0x3b1   : > { %6377 = vmatmul.mubr.msk.f32.vlgmr.msra.gmra.mrb[8].mxu1 %vm2453_vm0, %v2026_v9 }
 0x3b2   : > { %6379 = vmatprep.mubr.msk.f32.mxu1 %vm2453_vm0, %v2094_v6  ;;  %6635 = vmatpush3.bf16.msra.mxu1 %v8025_v55  ;;  %v1959_v55 = vcombine.low %v8108_v21, %v8121_v32  ;;  %v2231_v21 = vcombine.low %v8302_v59, %v8305_v5  ;;  %v2299_v32 = vcombine.low %v8325_v39, %v8330_v41 }
 0x3b3   : > { %6637 = vmatprep.subr.bf16.mxu1 %v6636_v40 }
 0x3b5   : > { %6380 = vmatmul.mubr.msk.f32.gmra.mrb[10].mxu1 %vm2453_vm0, %v2162_v10 }
 0x3b6   : > { %6382 = vmatprep.mubr.msk.f32.mxu1 %vm2453_vm0, %v2230_v20  ;;  %6639 = vmatpush3.bf16.msra.mxu1 %v6636_v40  ;;  %v3290_v20 = vld [vmem:[#allocation3] sm:$0xff] }
 0x3b9   : > { %6383 = vmatmul.mubr.msk.f32.gmra.mrb[12].mxu1 %vm2453_vm0, %v2298_v44  ;;  %v3291_v44 = vld [vmem:[#allocation3 + $0x8] sm:$0xff] }
 0x3ba   : > { %6385 = vmatprep.mubr.msk.f32.mxu1 %vm2453_vm0, %v2366_v51  ;;  %v3292_v51 = vld [vmem:[#allocation3 + $0x10] sm:$0xff] }
 0x3bd   : > { %6386 = vmatmul.mubr.msk.f32.gmra.mrb[14].mxu1 %vm2453_vm0, %v2434_v49  ;;  %v6648_v49 = vpack.c.bf16 %v3291_v44, %v3290_v20 }
 0x3be   : > { %6396 = vmatprep.mubr.msk.f32.mxu1 %vm2453_vm0, %v1959_v55  ;;  %v3293_v55 = vld [vmem:[#allocation3 + $0x18] sm:$0xff] }
 0x3bf   : > { %6649 = vmatprep.subr.bf16.mxu1 %v6648_v49 }
 0x3c1   : > { %6397 = vmatmul.mubr.msk.f32.vlgmr.msra.gmra.mrb[16].mxu1 %vm2453_vm0, %v2027_v56 }
 0x3c2   : > { %6399 = vmatprep.mubr.msk.f32.mxu1 %vm2453_vm0, %v2095_v3  ;;  %v6652_v3 = vpack.c.bf16 %v3293_v55, %v3292_v51  ;;  %6651 = vmatpush3.bf16.xpose.msra.mxu1 %v6648_v49 }
 0x3c4   : > { %6653 = vmatprep.subr.bf16.mxu1 %v6652_v3 }
 0x3c5   : > { %6400 = vmatmul.mubr.msk.f32.gmra.mrb[18].mxu1 %vm2453_vm0, %v2163_v17 }
 0x3c6   : > { %6402 = vmatprep.mubr.msk.f32.mxu1 %vm2453_vm0, %v2231_v21 }
 0x3c9   : > { %6403 = vmatmul.mubr.msk.f32.gmra.mrb[20].mxu1 %vm2453_vm0, %v2299_v32 }
 0x3ca   : > { %6405 = vmatprep.mubr.msk.f32.mxu1 %vm2453_vm0, %v2367_v12  ;;  %6655 = vmatpush3.bf16.xpose.msra.mxu1 %v6652_v3 }
 0x3cd   : > { %6406 = vmatmul.mubr.msk.f32.gmra.mrb[22].mxu1 %vm2453_vm0, %v2435_v36 }
 0x456   : > { %v8392_v63 = vpop.f32.mrb[0].mxu1 }
 0x457   : > { %2972 = vmax.xlane.f32.xlu0 %v8392_v63  ;;  %v8397_v13 = vpop.f32.mrb[1].mxu1 }
 0x458   : > { %v8394_v26 = vpop.f32.mrb[8].mxu0 }
 0x459   : > { %v8399_v14 = vpop.f32.mrb[9].mxu0 }
 0x45b   : > { %2970 = vmax.xlane.f32.xlu0 %v8397_v13 }
 0x469   : > { %v8402_v48 = vpop.f32.mrb[2].mxu1  ;;  %v8404_v27 = vpop.f32.mrb[10].mxu0 }
 0x46a   : > { %v8406_v59 = vpop.f32.mrb[11].mxu0  ;;  %2976 = vmax.xlane.f32.xlu1 %v8402_v48  ;;  %v8409_v5 = vpop.f32.mrb[3].mxu1 }
 0x46e   : > { %2974 = vmax.xlane.f32.xlu1 %v8409_v5 }
 0x478   : > { %v8412_v19 = vpop.f32.mrb[4].mxu1  ;;  %v8414_v22 = vpop.f32.mrb[12].mxu0 }
 0x479   : > { %v8416_v61 = vpop.f32.mrb[5].mxu1  ;;  %v8418_v39 = vpop.f32.mrb[13].mxu0 }
 0x47a   : > { %2978 = vmax.xlane.f32.xlu1 %v8416_v61 }
 0x480   : > { %v8421_v37 = vpop.f32.mrb[6].mxu1  ;;  %v8423_v50 = vpop.f32.mrb[14].mxu0 }
 0x481   : > { %v8425_v41 = vpop.f32.mrb[7].mxu1  ;;  %v8427_v23 = vpop.f32.mrb[15].mxu0 }
 0x484   : > { %v8429_v29 = vpop.f32.mrb[8].mxu1 }
 0x485   : > { %2988 = vmax.xlane.f32.xlu0 %v8429_v29  ;;  %v8432_v24 = vpop.f32.mrb[9].mxu1 }
 0x486   : > { %2986 = vmax.xlane.f32.xlu1 %v8432_v24 }
 0x488   : > { %v8435_v31 = vpop.f32.mrb[10].mxu1 }
 0x489   : > { %2992 = vmax.xlane.f32.xlu0 %v8435_v31  ;;  %v8438_v33 = vpop.f32.mrb[11].mxu1 }
 0x48a   : > { %2980 = vmax.xlane.f32.xlu1 %v8412_v19 }
 0x48c   : > { %v8441_v45 = vpop.f32.mrb[12].mxu1 }
 0x48d   : > { %2990 = vmax.xlane.f32.xlu0 %v8438_v33  ;;  %v8444_v52 = vpop.f32.mrb[13].mxu1 }
 0x48e   : > { %2982 = vmax.xlane.f32.xlu1 %v8425_v41 }
 0x490   : > { %v8447_v62 = vpop.f32.mrb[14].mxu1 }
 0x491   : > { %2996 = vmax.xlane.f32.xlu0 %v8441_v45  ;;  %v8450_v25 = vpop.f32.mrb[15].mxu1 }
 0x492   : > { %2984 = vmax.xlane.f32.xlu1 %v8421_v37 }
 0x494   : > { %v8453_v0 = vpop.f32.mrb[16].mxu1 }
 0x495   : > { %2994 = vmax.xlane.f32.xlu0 %v8444_v52  ;;  %v8456_v8 = vpop.f32.mrb[17].mxu1 }
 0x496   : > { %3002 = vmax.xlane.f32.xlu1 %v8456_v8 }
 0x498   : > { %v8459_v42 = vpop.f32.mrb[18].mxu1 }
 0x499   : > { %3000 = vmax.xlane.f32.xlu0 %v8447_v62  ;;  %v8462_v28 = vpop.f32.mrb[19].mxu1 }
 0x49a   : > { %3004 = vmax.xlane.f32.xlu1 %v8453_v0 }
 0x49c   : > { %v8465_v2 = vpop.f32.mrb[20].mxu1 }
 0x49d   : > { %2998 = vmax.xlane.f32.xlu0 %v8450_v25  ;;  %v8468_v54 = vpop.f32.mrb[21].mxu1 }
 0x49e   : > { %3006 = vmax.xlane.f32.xlu1 %v8462_v28 }
 0x4a0   : > { %v8471_v43 = vpop.f32.mrb[22].mxu1 }
 0x4a1   : > { %3018 = vmax.xlane.f32.xlu0 %v8399_v14  ;;  %v8474_v38 = vpop.f32.mrb[23].mxu1 }
 0x4a2   : > { %3008 = vmax.xlane.f32.xlu1 %v8459_v42 }
 0x4a5   : > { %3020 = vmax.xlane.f32.xlu0 %v8394_v26 }
 0x4a6   : > { %3010 = vmax.xlane.f32.xlu1 %v8468_v54 }
 0x4a9   : > { %3022 = vmax.xlane.f32.xlu0 %v8406_v59 }
 0x4aa   : > { %3012 = vmax.xlane.f32.xlu1 %v8465_v2 }
 0x4ad   : > { %3024 = vmax.xlane.f32.xlu0 %v8404_v27 }
 0x4ae   : > { %3014 = vmax.xlane.f32.xlu1 %v8474_v38 }
 0x4b1   : > { %3026 = vmax.xlane.f32.xlu0 %v8418_v39 }
 0x4b2   : > { %3016 = vmax.xlane.f32.xlu1 %v8471_v43 }
 0x4b5   : > { %3028 = vmax.xlane.f32.xlu0 %v8414_v22 }
 0x4b9   : > { %3030 = vmax.xlane.f32.xlu0 %v8427_v23 }
 0x4bd   : > { %3032 = vmax.xlane.f32.xlu0 %v8423_v50 }
 0x4e4   : > { %v2973_v34 = vpop.xlane.xlu0 %2972 }
 0x4e5   : > { %v3035_v16 = vsub.f32 %v8392_v63, %v2973_v34 }
 0x4e7   : > { %v3068_v46 = vmul.f32 1.442695, %v3035_v16 }
 0x4e8   : > { %v2971_v47 = vpop.xlane.xlu0 %2970 }
 0x4e9   : > { %7022 = vpow2.f32 %v3068_v46  ;;  %v3034_v4 = vsub.f32 %v8397_v13, %v2971_v47 }
 0x4eb   : > { %v3066_v15 = vmul.f32 1.442695, %v3034_v4 }
 0x4ed   : > { %7024 = vpow2.f32 %v3066_v15 }
 0x4f3   : > { %v8490_v30 = vpop.eup %7022 }
 0x4f4   : > { %3132 = vadd.xlane.f32.xlu1 %v8490_v30 }
 0x4f7   : > { %v2977_v58 = vpop.xlane.xlu1 %2976  ;;  %v8493_v1 = vpop.eup %7024 }
 0x4f8   : > { %v3037_v57 = vsub.f32 %v8402_v48, %v2977_v58  ;;  %3130 = vadd.xlane.f32.xlu1 %v8493_v1 }
 0x4fa   : > { %v3072_v35 = vmul.f32 1.442695, %v3037_v57 }
 0x4fb   : > { %v2975_v53 = vpop.xlane.xlu1 %2974 }
 0x4fc   : > { %7026 = vpow2.f32 %v3072_v35  ;;  %v3036_v60 = vsub.f32 %v8409_v5, %v2975_v53 }
 0x4fe   : > { %v3070_v9 = vmul.f32 1.442695, %v3036_v60 }
 0x500   : > { %7028 = vpow2.f32 %v3070_v9 }
 0x506   : > { %v8498_v40 = vpop.eup %7026 }
 0x507   : > { %3136 = vadd.xlane.f32.xlu1 %v8498_v40  ;;  %v2979_v10 = vpop.xlane.xlu1 %2978 }
 0x508   : > { %v3038_v5 = vsub.f32 %v8416_v61, %v2979_v10 }
 0x50a   : > { %v8501_v6 = vpop.eup %7028  ;;  %v3074_v4 = vmul.f32 1.442695, %v3038_v5 }
 0x50b   : > { %3134 = vadd.xlane.f32.xlu1 %v8501_v6 }
 0x512   : > { %v2989_v56 = vpop.xlane.xlu0 %2988 }
 0x513   : > { %v3043_v17 = vsub.f32 %v8429_v29, %v2989_v56  ;;  %v2987_v21 = vpop.xlane.xlu1 %2986 }
 0x514   : > { %v3042_v32 = vsub.f32 %v8432_v24, %v2987_v21 }
 0x515   : > { %v3084_v12 = vmul.f32 1.442695, %v3043_v17 }
 0x516   : > { %v2993_v36 = vpop.xlane.xlu0 %2992  ;;  %v3082_v63 = vmul.f32 1.442695, %v3042_v32 }
 0x517   : > { %7030 = vpow2.f32 %v3084_v12  ;;  %v3045_v13 = vsub.f32 %v8435_v31, %v2993_v36  ;;  %v2981_v48 = vpop.xlane.xlu1 %2980 }
 0x518   : > { %v3039_v34 = vsub.f32 %v8412_v19, %v2981_v48  ;;  %7032 = vpow2.f32 %v3082_v63 }
 0x519   : > { %v3088_v29 = vmul.f32 1.442695, %v3045_v13 }
 0x51a   : > { %v3076_v16 = vmul.f32 1.442695, %v3039_v34  ;;  %v2991_v46 = vpop.xlane.xlu0 %2990 }
 0x51b   : > { %v3044_v47 = vsub.f32 %v8438_v33, %v2991_v46  ;;  %v2983_v24 = vpop.xlane.xlu1 %2982 }
 0x51c   : > { %7034 = vpow2.f32 %v3076_v16  ;;  %v3040_v61 = vsub.f32 %v8425_v41, %v2983_v24 }
 0x51d   : > { %7036 = vpow2.f32 %v3088_v29  ;;  %v3086_v58 = vmul.f32 1.442695, %v3044_v47 }
 0x51e   : > { %v2997_v15 = vpop.xlane.xlu0 %2996  ;;  %7038 = vpow2.f32 %v3074_v4  ;;  %v3078_v20 = vmul.f32 1.442695, %v3040_v61 }
 0x51f   : > { %v3047_v31 = vsub.f32 %v8441_v45, %v2997_v15  ;;  %v2985_v57 = vpop.xlane.xlu1 %2984  ;;  %7040 = vpow2.f32 %v3086_v58 }
 0x520   : > { %v3041_v19 = vsub.f32 %v8421_v37, %v2985_v57 }
 0x521   : > { %v8513_v35 = vpop.eup %7030  ;;  %v3092_v60 = vmul.f32 1.442695, %v3047_v31 }
 0x522   : > { %v3080_v53 = vmul.f32 1.442695, %v3041_v19  ;;  %3148 = vadd.xlane.f32.xlu0 %v8513_v35  ;;  %v2995_v33 = vpop.xlane.xlu0 %2994  ;;  %v8518_v44 = vpop.eup %7032 }
 0x523   : > { %v3046_v9 = vsub.f32 %v8444_v52, %v2995_v33  ;;  %v3003_v10 = vpop.xlane.xlu1 %3002 }
 0x524   : > { %7042 = vpow2.f32 %v3080_v53  ;;  %v3050_v45 = vsub.f32 %v8456_v8, %v3003_v10 }
 0x525   : > { %7044 = vpow2.f32 %v3092_v60  ;;  %v3090_v51 = vmul.f32 1.442695, %v3046_v9 }
 0x526   : > { %v8520_v41 = vpop.eup %7034  ;;  %3146 = vadd.xlane.f32.xlu0 %v8518_v44  ;;  %v3001_v37 = vpop.xlane.xlu0 %3000  ;;  %7046 = vpow2.f32 %v3078_v20  ;;  %v3098_v52 = vmul.f32 1.442695, %v3050_v45 }
 0x527   : > { %v3049_v49 = vsub.f32 %v8447_v62, %v3001_v37  ;;  %v3005_v55 = vpop.xlane.xlu1 %3004  ;;  %3140 = vadd.xlane.f32.xlu1 %v8520_v41  ;;  %v8526_v3 = vpop.eup %7036  ;;  %7048 = vpow2.f32 %v3090_v51  ;;  %v3295_v51 = vld [vmem:[#allocation3 + $0x28] sm:$0xff] }
 0x528   : > { %v3051_v56 = vsub.f32 %v8453_v0, %v3005_v55  ;;  %v8528_v8 = vpop.eup %7038  ;;  %7050 = vpow2.f32 %v3098_v52 }
 0x529   : > { %v3096_v21 = vmul.f32 1.442695, %v3049_v49  ;;  %v8534_v63 = vpop.eup %7040  ;;  %v3296_v49 = vld [vmem:[#allocation3 + $0x30] sm:$0xff] }
 0x52a   : > { %3152 = vadd.xlane.f32.xlu0 %v8526_v3  ;;  %v2999_v17 = vpop.xlane.xlu0 %2998  ;;  %v3100_v62 = vmul.f32 1.442695, %v3051_v56 }
 0x52b   : > { %v3048_v32 = vsub.f32 %v8450_v25, %v2999_v17  ;;  %v3007_v12 = vpop.xlane.xlu1 %3006  ;;  %3138 = vadd.xlane.f32.xlu1 %v8528_v8  ;;  %7052 = vpow2.f32 %v3096_v21  ;;  %v3297_v17 = vld [vmem:[#allocation3 + $0x38] sm:$0xff] }
 0x52c   : > { %v3052_v36 = vsub.f32 %v8462_v28, %v3007_v12  ;;  %7054 = vpow2.f32 %v3100_v62 }
 0x52d   : > { %v3094_v48 = vmul.f32 1.442695, %v3048_v32 }
 0x52e   : > { %v8536_v0 = vpop.eup %7042  ;;  %3150 = vadd.xlane.f32.xlu0 %v8534_v63  ;;  %v3019_v13 = vpop.xlane.xlu0 %3018  ;;  %v3102_v25 = vmul.f32 1.442695, %v3052_v36 }
 0x52f   : > { %v3058_v5 = vsub.f32 %v8399_v14, %v3019_v13  ;;  %v3009_v34 = vpop.xlane.xlu1 %3008  ;;  %3144 = vadd.xlane.f32.xlu1 %v8536_v0  ;;  %v8542_v46 = vpop.eup %7044  ;;  %7056 = vpow2.f32 %v3094_v48 }
 0x530   : > { %v3053_v16 = vsub.f32 %v8459_v42, %v3009_v34  ;;  %v8544_v28 = vpop.eup %7046  ;;  %7058 = vpow2.f32 %v3102_v25 }
 0x531   : > { %v3114_v47 = vmul.f32 1.442695, %v3058_v5  ;;  %v8550_v58 = vpop.eup %7048 }
 0x532   : > { %3156 = vadd.xlane.f32.xlu0 %v8542_v46  ;;  %v3021_v29 = vpop.xlane.xlu0 %3020  ;;  %v3104_v14 = vmul.f32 1.442695, %v3053_v16  ;;  %v8552_v42 = vpop.eup %7050 }
 0x533   : > { %v3059_v24 = vsub.f32 %v8394_v26, %v3021_v29  ;;  %v3011_v4 = vpop.xlane.xlu1 %3010  ;;  %3142 = vadd.xlane.f32.xlu1 %v8544_v28  ;;  %7060 = vpow2.f32 %v3114_v47  ;;  %v3298_v29 = vld [vmem:[#allocation3 + $0x40] sm:$0xff]  ;;  %v3299_v47 = vld [vmem:[#allocation3 + $0x48] sm:$0xff] }
 0x534   : > { %v3054_v15 = vsub.f32 %v8468_v54, %v3011_v4  ;;  %7062 = vpow2.f32 %v3104_v14 }
 0x535   : > { %v3116_v57 = vmul.f32 1.442695, %v3059_v24  ;;  %v8558_v33 = vpop.eup %7052 }
 0x536   : > { %3154 = vadd.xlane.f32.xlu0 %v8550_v58  ;;  %v3023_v31 = vpop.xlane.xlu0 %3022  ;;  %v3106_v26 = vmul.f32 1.442695, %v3054_v15  ;;  %v8560_v54 = vpop.eup %7054 }
 0x537   : > { %v3060_v61 = vsub.f32 %v8406_v59, %v3023_v31  ;;  %v3013_v19 = vpop.xlane.xlu1 %3012  ;;  %3162 = vadd.xlane.f32.xlu1 %v8552_v42  ;;  %7064 = vpow2.f32 %v3116_v57 }
 0x538   : > { %v3055_v53 = vsub.f32 %v8465_v2, %v3013_v19  ;;  %7066 = vpow2.f32 %v3106_v26  ;;  %v3294_v2 = vld [vmem:[#allocation3 + $0x20] sm:$0xff] }
 0x539   : > { %v3118_v9 = vmul.f32 1.442695, %v3060_v61  ;;  %v8566_v37 = vpop.eup %7056  ;;  %v6656_v56 = vpack.c.bf16 %v3295_v51, %v3294_v2 }
 0x53a   : > { %3160 = vadd.xlane.f32.xlu0 %v8558_v33  ;;  %v3025_v60 = vpop.xlane.xlu0 %3024  ;;  %v3108_v59 = vmul.f32 1.442695, %v3055_v53  ;;  %v8568_v55 = vpop.eup %7058 }
 0x53b   : > { %v3061_v10 = vsub.f32 %v8404_v27, %v3025_v60  ;;  %v3015_v20 = vpop.xlane.xlu1 %3014  ;;  %3164 = vadd.xlane.f32.xlu1 %v8560_v54  ;;  %7068 = vpow2.f32 %v3118_v9  ;;  %6657 = vmatprep.subr.bf16.mxu0 %v6656_v56  ;;  %v3302_v9 = vld [vmem:[#allocation3 + $0x60] sm:$0xff] }
 0x53c   : > { %v3056_v45 = vsub.f32 %v8474_v38, %v3015_v20  ;;  %v6660_v38 = vpack.c.bf16 %v3297_v17, %v3296_v49  ;;  %7070 = vpow2.f32 %v3108_v59  ;;  %6659 = vmatpush3.bf16.xpose.msra.mxu0 %v6656_v56  ;;  %v3300_v56 = vld [vmem:[#allocation3 + $0x50] sm:$0xff]  ;;  %v3301_v17 = vld [vmem:[#allocation3 + $0x58] sm:$0xff] }
 0x53d   : > { %v3120_v27 = vmul.f32 1.442695, %v3061_v10  ;;  %v8574_v36 = vpop.eup %7060  ;;  %v3303_v10 = vld [vmem:[#allocation3 + $0x68] sm:$0xff] }
 0x53e   : > { %3158 = vadd.xlane.f32.xlu0 %v8566_v37  ;;  %v3027_v52 = vpop.xlane.xlu0 %3026  ;;  %v3110_v12 = vmul.f32 1.442695, %v3056_v45  ;;  %v8576_v13 = vpop.eup %7062  ;;  %6661 = vmatprep.subr.bf16.mxu0 %v6660_v38  ;;  %v8610_v20 = vpack.c.bf16 %v3303_v10, %v3302_v9 }
 0x53f   : > { %v3062_v21 = vsub.f32 %v8418_v39, %v3027_v52  ;;  %v3017_v32 = vpop.xlane.xlu1 %3016  ;;  %3166 = vadd.xlane.f32.xlu1 %v8568_v55  ;;  %7072 = vpow2.f32 %v3120_v27 }
 0x540   : > { %v3057_v62 = vsub.f32 %v8471_v43, %v3017_v32  ;;  %7074 = vpow2.f32 %v3110_v12  ;;  %v6668_v32 = vpack.c.bf16 %v3301_v17, %v3300_v56 }
 0x541   : > { %v3122_v39 = vmul.f32 1.442695, %v3062_v21  ;;  %v8581_v25 = vpop.eup %7064 }
 0x542   : > { %3178 = vadd.xlane.f32.xlu0 %v8574_v36  ;;  %v3029_v48 = vpop.xlane.xlu0 %3028  ;;  %v3112_v34 = vmul.f32 1.442695, %v3057_v62  ;;  %v8583_v43 = vpop.eup %7066 }
 0x543   : > { %v3063_v5 = vsub.f32 %v8414_v22, %v3029_v48  ;;  %3168 = vadd.xlane.f32.xlu1 %v8576_v13  ;;  %7076 = vpow2.f32 %v3122_v39  ;;  %v6664_v22 = vpack.c.bf16 %v3299_v47, %v3298_v29 }
 0x544   : > { %7078 = vpow2.f32 %v3112_v34  ;;  %6663 = vmatpush3.bf16.xpose.msra.mxu0 %v6660_v38 }
 0x545   : > { %v3124_v24 = vmul.f32 1.442695, %v3063_v5  ;;  %v8588_v14 = vpop.eup %7068  ;;  %6665 = vmatprep.subr.bf16.mxu1 %v6664_v22  ;;  %6673 = vmatprep.subr.bf16.mxu0 %v8610_v20 }
 0x546   : > { %3180 = vadd.xlane.f32.xlu0 %v8581_v25  ;;  %v3031_v16 = vpop.xlane.xlu0 %3030  ;;  %v8590_v15 = vpop.eup %7070 }
 0x547   : > { %v3064_v4 = vsub.f32 %v8427_v23, %v3031_v16  ;;  %3170 = vadd.xlane.f32.xlu1 %v8583_v43  ;;  %7080 = vpow2.f32 %v3124_v24 }
 0x549   : > { %v3126_v57 = vmul.f32 1.442695, %v3064_v4  ;;  %v8595_v23 = vpop.eup %7072  ;;  %v3304_v4 = vld [vmem:[#allocation3 + $0x70] sm:$0xff] }
 0x54a   : > { %3182 = vadd.xlane.f32.xlu0 %v8588_v14  ;;  %v3033_v31 = vpop.xlane.xlu0 %3032  ;;  %v8597_v19 = vpop.eup %7074 }
 0x54b   : > { %v3065_v61 = vsub.f32 %v8423_v50, %v3033_v31  ;;  %3172 = vadd.xlane.f32.xlu1 %v8590_v15  ;;  %7082 = vpow2.f32 %v3126_v57 }
 0x54d   : > { %v3128_v26 = vmul.f32 1.442695, %v3065_v61  ;;  %v8601_v53 = vpop.eup %7076 }
 0x54e   : > { %3184 = vadd.xlane.f32.xlu0 %v8595_v23  ;;  %v8603_v60 = vpop.eup %7078 }
 0x54f   : > { %3174 = vadd.xlane.f32.xlu1 %v8597_v19  ;;  %7084 = vpow2.f32 %v3128_v26 }
 0x551   : > { %v8607_v50 = vpop.eup %7080 }
 0x552   : > { %3186 = vadd.xlane.f32.xlu0 %v8601_v53 }
 0x553   : > { %3176 = vadd.xlane.f32.xlu1 %v8603_v60 }
 0x555   : > { %v8612_v59 = vpop.eup %7082 }
 0x556   : > { %3188 = vadd.xlane.f32.xlu0 %v8607_v50 }
 0x559   : > { %v8616_v45 = vpop.eup %7084 }
 0x55a   : > { %3190 = vadd.xlane.f32.xlu0 %v8612_v59 }
 0x55e   : > { %3192 = vadd.xlane.f32.xlu0 %v8616_v45 }
 0x581   : > { %v3133_v2 = vpop.xlane.xlu1 %3132 }
 0x582   : > { %7086 = vrcp.f32 %v3133_v2 }
 0x585   : > { %v3131_v51 = vpop.xlane.xlu1 %3130 }
 0x586   : > { %7088 = vrcp.f32 %v3131_v51 }
 0x58c   : > { %v7087_v49 = vpop.eup %7086 }
 0x58d   : > { %v3227_v52 = vmul.f32 %v7087_v49, %v8490_v30 }
 0x58f   : > { %3259 = vst [vmem:[%s7775_s26 + $0x8] sm:$0xff] %v3227_v52 }
 0x590   : > { %v7089_v27 = vpop.eup %7088 }
 0x591   : > { %v3226_v21 = vmul.f32 %v7089_v27, %v8493_v1 }
 0x593   : > { %3258 = vst [vmem:[%s7775_s26] sm:$0xff] %v3226_v21  ;;  %6436 = vmatprep.mubr.f32.mxu1 %v3226_v21 }
 0x594   : > { %v3137_v38 = vpop.xlane.xlu1 %3136  ;;  %6437 = vmatmul.mubr.f32.vlgmr.msra.gmra.mrb[24].mxu1 %v3227_v52 }
 0x595   : > { %7090 = vrcp.f32 %v3137_v38  ;;  %6667 = vmatpush3.bf16.xpose.msra.mxu1 %v6664_v22  ;;  %v3305_v22 = vld [vmem:[#allocation3 + $0x78] sm:$0xff] }
 0x596   : > { %6669 = vmatprep.subr.bf16.mxu1 %v6668_v32  ;;  %v6676_v2 = vpack.c.bf16 %v3305_v22, %v3304_v4 }
 0x598   : > { %v3135_v12 = vpop.xlane.xlu1 %3134 }
 0x599   : > { %7092 = vrcp.f32 %v3135_v12 }
 0x59d   : > { %6671 = vmatpush3.bf16.xpose.msra.mxu1 %v6668_v32 }
 0x59f   : > { %v7091_v30 = vpop.eup %7090 }
 0x5a0   : > { %v3229_v62 = vmul.f32 %v7091_v30, %v8498_v40 }
 0x5a2   : > { %3261 = vst [vmem:[%s7775_s26 + $0x18] sm:$0xff] %v3229_v62 }
 0x5a3   : > { %v7093_v48 = vpop.eup %7092 }
 0x5a4   : > { %v3228_v39 = vmul.f32 %v7093_v48, %v8501_v6 }
 0x5a6   : > { %3260 = vst [vmem:[%s7775_s26 + $0x10] sm:$0xff] %v3228_v39  ;;  %6439 = vmatprep.mubr.f32.mxu1 %v3228_v39 }
 0x5a7   : > { %6440 = vmatmul.mubr.f32.gmra.mrb[26].mxu1 %v3229_v62 }
 0x5af   : > { %v3149_v1 = vpop.xlane.xlu0 %3148 }
 0x5b0   : > { %7094 = vrcp.f32 %v3149_v1 }
 0x5b3   : > { %v3147_v5 = vpop.xlane.xlu0 %3146 }
 0x5b4   : > { %7096 = vrcp.f32 %v3147_v5  ;;  %v3141_v34 = vpop.xlane.xlu1 %3140 }
 0x5b5   : > { %7098 = vrcp.f32 %v3141_v34 }
 0x5b7   : > { %v3153_v16 = vpop.xlane.xlu0 %3152 }
 0x5b8   : > { %7100 = vrcp.f32 %v3153_v16  ;;  %v3139_v29 = vpop.xlane.xlu1 %3138 }
 0x5b9   : > { %7102 = vrcp.f32 %v3139_v29 }
 0x5ba   : > { %v7095_v47 = vpop.eup %7094 }
 0x5bb   : > { %v3235_v40 = vmul.f32 %v7095_v47, %v8513_v35  ;;  %v3151_v24 = vpop.xlane.xlu0 %3150 }
 0x5bc   : > { %7104 = vrcp.f32 %v3151_v24  ;;  %v3145_v6 = vpop.xlane.xlu1 %3144 }
 0x5bd   : > { %3267 = vst [vmem:[%s7775_s26 + $0x48] sm:$0xff] %v3235_v40  ;;  %7106 = vrcp.f32 %v3145_v6 }
 0x5be   : > { %v7097_v31 = vpop.eup %7096 }
 0x5bf   : > { %v7099_v57 = vpop.eup %7098  ;;  %v3157_v61 = vpop.xlane.xlu0 %3156  ;;  %v3234_v26 = vmul.f32 %v7097_v31, %v8518_v44 }
 0x5c0   : > { %7108 = vrcp.f32 %v3157_v61  ;;  %v3143_v9 = vpop.xlane.xlu1 %3142  ;;  %v3231_v10 = vmul.f32 %v7099_v57, %v8520_v41 }
 0x5c1   : > { %7110 = vrcp.f32 %v3143_v9  ;;  %3266 = vst [vmem:[%s7775_s26 + $0x40] sm:$0xff] %v3234_v26  ;;  %6456 = vmatprep.mubr.f32.mxu0 %v3234_v26 }
 0x5c2   : > { %v7101_v35 = vpop.eup %7100  ;;  %6457 = vmatmul.mubr.f32.vlgmr.msra.gmra.mrb[16].mxu0 %v3235_v40  ;;  %3263 = vst [vmem:[%s7775_s26 + $0x28] sm:$0xff] %v3231_v10 }
 0x5c3   : > { %v7103_v51 = vpop.eup %7102  ;;  %v3155_v49 = vpop.xlane.xlu0 %3154  ;;  %v3237_v52 = vmul.f32 %v7101_v35, %v8526_v3  ;;  %6675 = vmatpush3.bf16.xpose.msra.mxu0 %v8610_v20 }
 0x5c4   : > { %7112 = vrcp.f32 %v3155_v49  ;;  %v3163_v44 = vpop.xlane.xlu1 %3162  ;;  %v3230_v41 = vmul.f32 %v7103_v51, %v8528_v8  ;;  %6677 = vmatprep.subr.bf16.mxu0 %v6676_v2 }
 0x5c5   : > { %7114 = vrcp.f32 %v3163_v44  ;;  %3269 = vst [vmem:[%s7775_s26 + $0x58] sm:$0xff] %v3237_v52 }
 0x5c6   : > { %v7105_v56 = vpop.eup %7104  ;;  %3262 = vst [vmem:[%s7775_s26 + $0x20] sm:$0xff] %v3230_v41  ;;  %6442 = vmatprep.mubr.f32.mxu1 %v3230_v41 }
 0x5c7   : > { %v7107_v17 = vpop.eup %7106  ;;  %6443 = vmatmul.mubr.f32.gmra.mrb[28].mxu1 %v3231_v10  ;;  %v3161_v27 = vpop.xlane.xlu0 %3160  ;;  %v3236_v21 = vmul.f32 %v7105_v56, %v8534_v63 }
 0x5c8   : > { %7116 = vrcp.f32 %v3161_v27  ;;  %v3165_v3 = vpop.xlane.xlu1 %3164  ;;  %v3233_v20 = vmul.f32 %v7107_v17, %v8536_v0 }
 0x5c9   : > { %7118 = vrcp.f32 %v3165_v3  ;;  %3268 = vst [vmem:[%s7775_s26 + $0x50] sm:$0xff] %v3236_v21  ;;  %6459 = vmatprep.mubr.f32.mxu0 %v3236_v21 }
 0x5ca   : > { %v7109_v8 = vpop.eup %7108  ;;  %6460 = vmatmul.mubr.f32.gmra.mrb[18].mxu0 %v3237_v52  ;;  %3265 = vst [vmem:[%s7775_s26 + $0x38] sm:$0xff] %v3233_v20 }
 0x5cb   : > { %v7111_v32 = vpop.eup %7110  ;;  %v3159_v38 = vpop.xlane.xlu0 %3158  ;;  %v3239_v12 = vmul.f32 %v7109_v8, %v8542_v46  ;;  %6679 = vmatpush3.bf16.xpose.msra.mxu0 %v6676_v2 }
 0x5cc   : > { %7120 = vrcp.f32 %v3159_v38  ;;  %v3167_v63 = vpop.xlane.xlu1 %3166  ;;  %v3232_v30 = vmul.f32 %v7111_v32, %v8544_v28 }
 0x5cd   : > { %7122 = vrcp.f32 %v3167_v63  ;;  %3271 = vst [vmem:[%s7775_s26 + $0x68] sm:$0xff] %v3239_v12  ;;  %v4938_v63 = vld [vmem:[#allocation9 + $0x10] sm:$0xff] }
 0x5ce   : > { %v7113_v0 = vpop.eup %7112  ;;  %3264 = vst [vmem:[%s7775_s26 + $0x30] sm:$0xff] %v3232_v30  ;;  %6445 = vmatprep.mubr.f32.mxu1 %v3232_v30 }
 0x5cf   : > { %v7115_v62 = vpop.eup %7114  ;;  %6446 = vmatmul.mubr.f32.gmra.mrb[30].mxu1 %v3233_v20  ;;  %v3179_v48 = vpop.xlane.xlu0 %3178  ;;  %v3238_v39 = vmul.f32 %v7113_v0, %v8550_v58  ;;  %v4939_v0 = vld [vmem:[#allocation9 + $0x18] sm:$0xff] }
 0x5d0   : > { %7124 = vrcp.f32 %v3179_v48  ;;  %v3169_v1 = vpop.xlane.xlu1 %3168  ;;  %v3242_v46 = vmul.f32 %v7115_v62, %v8552_v42  ;;  %v4940_v62 = vld [vmem:[#allocation9 + $0x20] sm:$0xff]  ;;  %v4941_v48 = vld [vmem:[#allocation9 + $0x28] sm:$0xff] }
 0x5d1   : > { %7126 = vrcp.f32 %v3169_v1  ;;  %3270 = vst [vmem:[%s7775_s26 + $0x60] sm:$0xff] %v3238_v39  ;;  %6462 = vmatprep.mubr.f32.mxu0 %v3238_v39  ;;  %v4942_v39 = vld [vmem:[#allocation9 + $0x30] sm:$0xff]  ;;  %v4943_v1 = vld [vmem:[#allocation9 + $0x38] sm:$0xff] }
 0x5d2   : > { %v7117_v28 = vpop.eup %7116  ;;  %6463 = vmatmul.mubr.f32.gmra.mrb[20].mxu0 %v3239_v12  ;;  %3274 = vst [vmem:[%s7775_s26 + $0x80] sm:$0xff] %v3242_v46  ;;  %6476 = vmatprep.mubr.f32.mxu1 %v3242_v46  ;;  %v4937_v12 = vld [vmem:[#allocation9 + $0x8] sm:$0xff]  ;;  %v6692_v46 = vpack.c.bf16 %v4943_v1, %v4942_v39 }
 0x5d3   : > { %v7119_v5 = vpop.eup %7118  ;;  %v3181_v34 = vpop.xlane.xlu0 %3180  ;;  %v3241_v16 = vmul.f32 %v7117_v28, %v8558_v33  ;;  %v4944_v28 = vld [vmem:[#allocation9 + $0x40] sm:$0xff] }
 0x5d4   : > { %v3243_v58 = vmul.f32 %v7119_v5, %v8560_v54  ;;  %7128 = vrcp.f32 %v3181_v34  ;;  %v3171_v29 = vpop.xlane.xlu1 %3170  ;;  %v4945_v5 = vld [vmem:[#allocation9 + $0x48] sm:$0xff] }
 0x5d5   : > { %7130 = vrcp.f32 %v3171_v29  ;;  %3273 = vst [vmem:[%s7775_s26 + $0x78] sm:$0xff] %v3241_v16  ;;  %v6696_v34 = vpack.c.bf16 %v4945_v5, %v4944_v28 }
 0x5d6   : > { %v7121_v42 = vpop.eup %7120  ;;  %3275 = vst [vmem:[%s7775_s26 + $0x88] sm:$0xff] %v3243_v58  ;;  %6477 = vmatmul.mubr.f32.vlgmr.msra.gmra.mrb[32].mxu1 %v3243_v58  ;;  %v4947_v58 = vld [vmem:[#allocation9 + $0x58] sm:$0xff] }
 0x5d7   : > { %v7123_v47 = vpop.eup %7122  ;;  %v3183_v40 = vpop.xlane.xlu0 %3182  ;;  %v3240_v24 = vmul.f32 %v7121_v42, %v8566_v37 }
 0x5d8   : > { %7132 = vrcp.f32 %v3183_v40  ;;  %v3173_v6 = vpop.xlane.xlu1 %3172  ;;  %v3244_v33 = vmul.f32 %v7123_v47, %v8568_v55 }
 0x5d9   : > { %7134 = vrcp.f32 %v3173_v6  ;;  %3272 = vst [vmem:[%s7775_s26 + $0x70] sm:$0xff] %v3240_v24  ;;  %6465 = vmatprep.mubr.f32.mxu0 %v3240_v24 }
 0x5da   : > { %v7125_v54 = vpop.eup %7124  ;;  %6466 = vmatmul.mubr.f32.gmra.mrb[22].mxu0 %v3241_v16  ;;  %3276 = vst [vmem:[%s7775_s26 + $0x90] sm:$0xff] %v3244_v33  ;;  %6479 = vmatprep.mubr.f32.mxu1 %v3244_v33  ;;  %v4946_v16 = vld [vmem:[#allocation9 + $0x50] sm:$0xff] }
 0x5db   : > { %v7127_v4 = vpop.eup %7126  ;;  %v3185_v22 = vpop.xlane.xlu0 %3184  ;;  %v3250_v31 = vmul.f32 %v7125_v54, %v8574_v36  ;;  %v6700_v47 = vpack.c.bf16 %v4947_v58, %v4946_v16 }
 0x5dc   : > { %7136 = vrcp.f32 %v3185_v22  ;;  %v3175_v37 = vpop.xlane.xlu1 %3174  ;;  %v3245_v57 = vmul.f32 %v7127_v4, %v8576_v13 }
 0x5dd   : > { %7138 = vrcp.f32 %v3175_v37  ;;  %3282 = vst [vmem:[%s7775_s26 + $0xc0] sm:$0xff] %v3250_v31  ;;  %6496 = vmatprep.mubr.f32.mxu0 %v3250_v31 }
 0x5de   : > { %v7129_v55 = vpop.eup %7128  ;;  %3277 = vst [vmem:[%s7775_s26 + $0x98] sm:$0xff] %v3245_v57  ;;  %6480 = vmatmul.mubr.f32.gmra.mrb[34].mxu1 %v3245_v57 }
 0x5df   : > { %v7131_v61 = vpop.eup %7130  ;;  %v3251_v26 = vmul.f32 %v7129_v55, %v8581_v25  ;;  %v3187_v9 = vpop.xlane.xlu0 %3186 }
 0x5e0   : > { %7140 = vrcp.f32 %v3187_v9  ;;  %v3177_v10 = vpop.xlane.xlu1 %3176  ;;  %v3246_v36 = vmul.f32 %v7131_v61, %v8583_v43 }
 0x5e1   : > { %3283 = vst [vmem:[%s7775_s26 + $0xc8] sm:$0xff] %v3251_v26  ;;  %7142 = vrcp.f32 %v3177_v10  ;;  %6497 = vmatmul.mubr.f32.vlgmr.msra.gmra.mrb[24].mxu0 %v3251_v26 }
 0x5e2   : > { %v7133_v13 = vpop.eup %7132  ;;  %3278 = vst [vmem:[%s7775_s26 + $0xa0] sm:$0xff] %v3246_v36  ;;  %6482 = vmatprep.mubr.f32.mxu1 %v3246_v36 }
 0x5e3   : > { %v7135_v2 = vpop.eup %7134  ;;  %v3189_v35 = vpop.xlane.xlu0 %3188  ;;  %v3252_v51 = vmul.f32 %v7133_v13, %v8588_v14 }
 0x5e4   : > { %7144 = vrcp.f32 %v3189_v35  ;;  %v3247_v25 = vmul.f32 %v7135_v2, %v8590_v15 }
 0x5e5   : > { %3284 = vst [vmem:[%s7775_s26 + $0xd0] sm:$0xff] %v3252_v51  ;;  %6499 = vmatprep.mubr.f32.mxu0 %v3252_v51 }
 0x5e6   : > { %v7137_v49 = vpop.eup %7136  ;;  %3279 = vst [vmem:[%s7775_s26 + $0xa8] sm:$0xff] %v3247_v25  ;;  %6483 = vmatmul.mubr.f32.gmra.mrb[36].mxu1 %v3247_v25 }
 0x5e7   : > { %v7139_v43 = vpop.eup %7138  ;;  %v3191_v52 = vpop.xlane.xlu0 %3190  ;;  %v3253_v44 = vmul.f32 %v7137_v49, %v8595_v23 }
 0x5e8   : > { %7146 = vrcp.f32 %v3191_v52  ;;  %v3248_v41 = vmul.f32 %v7139_v43, %v8597_v19 }
 0x5e9   : > { %3285 = vst [vmem:[%s7775_s26 + $0xd8] sm:$0xff] %v3253_v44  ;;  %6500 = vmatmul.mubr.f32.gmra.mrb[26].mxu0 %v3253_v44 }
 0x5ea   : > { %v7141_v14 = vpop.eup %7140  ;;  %3280 = vst [vmem:[%s7775_s26 + $0xb0] sm:$0xff] %v3248_v41  ;;  %6485 = vmatprep.mubr.f32.mxu1 %v3248_v41 }
 0x5eb   : > { %v7143_v15 = vpop.eup %7142  ;;  %v3193_v56 = vpop.xlane.xlu0 %3192  ;;  %v3254_v17 = vmul.f32 %v7141_v14, %v8601_v53 }
 0x5ec   : > { %7148 = vrcp.f32 %v3193_v56  ;;  %v3249_v27 = vmul.f32 %v7143_v15, %v8603_v60 }
 0x5ed   : > { %3286 = vst [vmem:[%s7775_s26 + $0xe0] sm:$0xff] %v3254_v17  ;;  %6502 = vmatprep.mubr.f32.mxu0 %v3254_v17 }
 0x5ee   : > { %v7145_v23 = vpop.eup %7144  ;;  %3281 = vst [vmem:[%s7775_s26 + $0xb8] sm:$0xff] %v3249_v27  ;;  %6486 = vmatmul.mubr.f32.gmra.mrb[38].mxu1 %v3249_v27 }
 0x5ef   : > { %v3255_v19 = vmul.f32 %v7145_v23, %v8607_v50  ;;  %v4936_v50 = vld [vmem:[#allocation9] sm:$0xff] }
 0x5f0   : > { %v6680_v30 = vpack.c.bf16 %v4937_v12, %v4936_v50 }
 0x5f1   : > { %3287 = vst [vmem:[%s7775_s26 + $0xe8] sm:$0xff] %v3255_v19  ;;  %6503 = vmatmul.mubr.f32.gmra.mrb[28].mxu0 %v3255_v19 }
 0x5f2   : > { %v7147_v21 = vpop.eup %7146  ;;  %6681 = vmatprep.subr.bf16.mxu1 %v6680_v30 }
 0x5f3   : > { %v3256_v3 = vmul.f32 %v7147_v21, %v8612_v59  ;;  %v6684_v59 = vpack.c.bf16 %v4939_v0, %v4938_v63  ;;  %6683 = vmatpush3.bf16.msra.mxu1 %v6680_v30 }
 0x5f5   : > { %3288 = vst [vmem:[%s7775_s26 + $0xf0] sm:$0xff] %v3256_v3  ;;  %6505 = vmatprep.mubr.f32.mxu0 %v3256_v3  ;;  %6685 = vmatprep.subr.bf16.mxu1 %v6684_v59 }
 0x5f6   : > { %v7149_v20 = vpop.eup %7148 }
 0x5f7   : > { %v3257_v53 = vmul.f32 %v7149_v20, %v8616_v45  ;;  %v6688_v45 = vpack.c.bf16 %v4941_v48, %v4940_v62  ;;  %6687 = vmatpush3.bf16.msra.mxu1 %v6684_v59 }
 0x5f9   : > { %3289 = vst [vmem:[%s7775_s26 + $0xf8] sm:$0xff] %v3257_v53  ;;  %6506 = vmatmul.mubr.f32.gmra.mrb[30].mxu0 %v3257_v53  ;;  %6689 = vmatprep.subr.bf16.mxu1 %v6688_v45 }
 0x5fb   : > { %6691 = vmatpush3.bf16.msra.mxu1 %v6688_v45 }
 0x5fc   : > { %6693 = vmatprep.subr.bf16.mxu1 %v6692_v46 }
 0x5ff   : > { %6695 = vmatpush3.bf16.msra.mxu1 %v6692_v46 }
 0x600   : > { %6697 = vmatprep.subr.bf16.mxu1 %v6696_v34 }
 0x603   : > { %6699 = vmatpush3.bf16.msra.mxu1 %v6696_v34 }
 0x604   : > { %6701 = vmatprep.subr.bf16.mxu1 %v6700_v47 }
 0x607   : > { %6703 = vmatpush3.bf16.msra.mxu1 %v6700_v47 }
 0x667   : > { %v6438_v60 = vpop.f32.mrb[24].mxu1 }
 0x668   : > { %v8684_v8 = vpop.f32.mrb[25].mxu1 }
 0x67a   : > { %v8686_v32 = vpop.f32.mrb[26].mxu1 }
 0x67b   : > { %v8688_v38 = vpop.f32.mrb[27].mxu1 }
 0x695   : > { %v6458_v29 = vpop.f32.mrb[16].mxu0 }
 0x696   : > { %v3477_v42 = vpop.f32.mrb[17].mxu0 }
 0x69a   : > { %v8690_v40 = vpop.f32.mrb[28].mxu1 }
 0x69b   : > { %v8692_v24 = vpop.f32.mrb[29].mxu1 }
 0x69d   : > { %v8694_v6 = vpop.f32.mrb[18].mxu0 }
 0x69e   : > { %v8696_v33 = vpop.f32.mrb[19].mxu0 }
 0x6a2   : > { %v8698_v54 = vpop.f32.mrb[30].mxu1 }
 0x6a3   : > { %v8700_v4 = vpop.f32.mrb[31].mxu1 }
 0x6a5   : > { %v8702_v22 = vpop.f32.mrb[20].mxu0 }
 0x6a6   : > { %v8704_v31 = vpop.f32.mrb[21].mxu0 }
 0x6a9   : > { %v6478_v37 = vpop.f32.mrb[32].mxu1 }
 0x6aa   : > { %v3794_v57 = vcombine.low %v6438_v60, %v6478_v37  ;;  %v3795_v55 = vcombine.high %v6438_v60, %v6478_v37  ;;  %v3582_v61 = vpop.f32.mrb[33].mxu1 }
 0x6ab   : > { %v3726_v26 = vcombine.low %v8684_v8, %v3582_v61  ;;  %v3727_v9 = vcombine.high %v8684_v8, %v3582_v61 }
 0x6ac   : > { %v3802_v52 = vrot.slane %v3794_v57, %v8002_v11  ;;  %v3809_v44 = vrot.slane %v3795_v55, %v8002_v11 }
 0x6ad   : > { %v8708_v10 = vpop.f32.mrb[22].mxu0  ;;  %v3734_v56 = vrot.slane %v3726_v26, %v8002_v11  ;;  %v3741_v17 = vrot.slane %v3727_v9, %v8002_v11 }
 0x6ae   : > { %v8710_v36 = vpop.f32.mrb[23].mxu0 }
 0x6b1   : > { %v6481_v13 = vpop.f32.mrb[34].mxu1 }
 0x6b2   : > { %v3930_v2 = vcombine.low %v8686_v32, %v6481_v13  ;;  %v3931_v35 = vcombine.high %v8686_v32, %v6481_v13  ;;  %v3592_v51 = vpop.f32.mrb[35].mxu1 }
 0x6b3   : > { %v3862_v25 = vcombine.low %v8688_v38, %v3592_v51  ;;  %v3863_v49 = vcombine.high %v8688_v38, %v3592_v51 }
 0x6b4   : > { %v6498_v43 = vpop.f32.mrb[24].mxu0  ;;  %v8721_v19 = vrot.slane %v3930_v2, %v8002_v11  ;;  %v8724_v21 = vrot.slane %v3931_v35, %v8002_v11 }
 0x6b5   : > { %v3810_v41 = vcombine.low %v6458_v29, %v6498_v43  ;;  %v3811_v14 = vcombine.high %v6458_v29, %v6498_v43  ;;  %v3687_v15 = vpop.f32.mrb[25].mxu0  ;;  %v8729_v53 = vrot.slane %v3862_v25, %v8002_v11  ;;  %v8732_v60 = vrot.slane %v3863_v49, %v8002_v11 }
 0x6b6   : > { %v3742_v27 = vcombine.low %v3477_v42, %v3687_v15  ;;  %v3743_v23 = vcombine.high %v3477_v42, %v3687_v15 }
 0x6b7   : > { %v3818_v3 = vrot.slane %v3810_v41, %v8002_v11  ;;  %v3825_v20 = vrot.slane %v3811_v14, %v8002_v11 }
 0x6b8   : > { %v3750_v8 = vrot.slane %v3742_v27, %v8002_v11  ;;  %v3757_v32 = vrot.slane %v3743_v23, %v8002_v11 }
 0x6b9   : > { %v3826_v38 = vcombine.low %v3802_v52, %v3818_v3  ;;  %v3827_v50 = vcombine.high %v3802_v52, %v3818_v3  ;;  %v3842_v12 = vcombine.low %v3809_v44, %v3825_v20  ;;  %v3843_v63 = vcombine.high %v3809_v44, %v3825_v20  ;;  %v6484_v30 = vpop.f32.mrb[36].mxu1 }
 0x6ba   : > { %v3758_v0 = vcombine.low %v3734_v56, %v3750_v8  ;;  %v3759_v59 = vcombine.high %v3734_v56, %v3750_v8  ;;  %v3774_v62 = vcombine.low %v3741_v17, %v3757_v32  ;;  %v3775_v48 = vcombine.high %v3741_v17, %v3757_v32  ;;  %v3602_v45 = vpop.f32.mrb[37].mxu1 }
 0x6bb   : > { %v3834_v39 = vrot.slane %v3826_v38, %v8007_v18  ;;  %v3841_v1 = vrot.slane %v3827_v50, %v8007_v18  ;;  %v3850_v46 = vrot.slane %v3842_v12, %v8007_v18  ;;  %v3857_v28 = vrot.slane %v3843_v63, %v8007_v18 }
 0x6bc   : > { %v3766_v5 = vrot.slane %v3758_v0, %v8007_v18  ;;  %v3773_v34 = vrot.slane %v3759_v59, %v8007_v18  ;;  %v3782_v16 = vrot.slane %v3774_v62, %v8007_v18  ;;  %v3789_v58 = vrot.slane %v3775_v48, %v8007_v18  ;;  %v6501_v29 = vpop.f32.mrb[26].mxu0 }
 0x6bd   : > { %v4338_v42 = vcombine.low %v3834_v39, %v3841_v1  ;;  %v5945_v47 = vcombine.high %v3834_v39, %v3841_v1  ;;  %v4354_v37 = vcombine.low %v3850_v46, %v3857_v28  ;;  %v5946_v57 = vcombine.high %v3850_v46, %v3857_v28  ;;  %v3697_v55 = vpop.f32.mrb[27].mxu0 }
 0x6be   : > { %v4270_v61 = vcombine.low %v3766_v5, %v3773_v34  ;;  %v5943_v26 = vcombine.high %v3766_v5, %v3773_v34  ;;  %v4286_v9 = vcombine.low %v3782_v16, %v3789_v58  ;;  %v5944_v13 = vcombine.high %v3782_v16, %v3789_v58 }
 0x6bf   : > { %v8745_v2 = vrot.slane %v4338_v42, %v8002_v11  ;;  %v8748_v35 = vrot.slane %v5945_v47, %v8002_v11  ;;  %v8751_v51 = vrot.slane %v4354_v37, %v8002_v11  ;;  %v8754_v25 = vrot.slane %v5946_v57, %v8002_v11 }
 0x6c0   : > { %v8757_v49 = vrot.slane %v4270_v61, %v8002_v11  ;;  %v8760_v43 = vrot.slane %v5943_v26, %v8002_v11  ;;  %v8763_v52 = vrot.slane %v4286_v9, %v8002_v11  ;;  %v8766_v44 = vrot.slane %v5944_v13, %v8002_v11 }
 0x6c1   : > { %v4066_v41 = vcombine.low %v8690_v40, %v6484_v30  ;;  %v4067_v14 = vcombine.high %v8690_v40, %v6484_v30  ;;  %v3998_v15 = vcombine.low %v8692_v24, %v3602_v45  ;;  %v3999_v56 = vcombine.high %v8692_v24, %v3602_v45  ;;  %v6487_v17 = vpop.f32.mrb[38].mxu1 }
 0x6c2   : > { %v3946_v27 = vcombine.low %v8694_v6, %v6501_v29  ;;  %v3947_v23 = vcombine.high %v8694_v6, %v6501_v29  ;;  %v3878_v3 = vcombine.low %v8696_v33, %v3697_v55  ;;  %v3879_v20 = vcombine.high %v8696_v33, %v3697_v55  ;;  %v3612_v8 = vpop.f32.mrb[39].mxu1 }
 0x6c3   : > { %v8777_v32 = vrot.slane %v4066_v41, %v8002_v11  ;;  %v8780_v38 = vrot.slane %v4067_v14, %v8002_v11  ;;  %v8783_v40 = vrot.slane %v3998_v15, %v8002_v11  ;;  %v8786_v24 = vrot.slane %v3999_v56, %v8002_v11 }
 0x6c4   : > { %v3954_v50 = vrot.slane %v3946_v27, %v8002_v11  ;;  %v3961_v6 = vrot.slane %v3947_v23, %v8002_v11  ;;  %v3886_v12 = vrot.slane %v3878_v3, %v8002_v11  ;;  %v3893_v33 = vrot.slane %v3879_v20, %v8002_v11  ;;  %v6504_v63 = vpop.f32.mrb[28].mxu0 }
 0x6c5   : > { %v4202_v30 = vcombine.low %v8698_v54, %v6487_v17  ;;  %v4203_v0 = vcombine.high %v8698_v54, %v6487_v17  ;;  %v4134_v59 = vcombine.low %v8700_v4, %v3612_v8  ;;  %v4135_v62 = vcombine.high %v8700_v4, %v3612_v8  ;;  %v3707_v48 = vpop.f32.mrb[29].mxu0 }
 0x6c6   : > { %v3962_v45 = vcombine.low %v8721_v19, %v3954_v50  ;;  %v3963_v39 = vcombine.high %v8721_v19, %v3954_v50  ;;  %v3978_v1 = vcombine.low %v8724_v21, %v3961_v6  ;;  %v3979_v46 = vcombine.high %v8724_v21, %v3961_v6 }
 0x6c7   : > { %v3894_v28 = vcombine.low %v8729_v53, %v3886_v12  ;;  %v3895_v5 = vcombine.high %v8729_v53, %v3886_v12  ;;  %v3910_v34 = vcombine.low %v8732_v60, %v3893_v33  ;;  %v3911_v54 = vcombine.high %v8732_v60, %v3893_v33 }
 0x6c8   : > { %v3970_v16 = vrot.slane %v3962_v45, %v8007_v18  ;;  %v3977_v4 = vrot.slane %v3963_v39, %v8007_v18  ;;  %v3986_v58 = vrot.slane %v3978_v1, %v8007_v18  ;;  %v3993_v19 = vrot.slane %v3979_v46, %v8007_v18 }
 0x6c9   : > { %v3902_v29 = vrot.slane %v3894_v28, %v8007_v18  ;;  %v3909_v21 = vrot.slane %v3895_v5, %v8007_v18  ;;  %v3918_v42 = vrot.slane %v3910_v34, %v8007_v18  ;;  %v3925_v53 = vrot.slane %v3911_v54, %v8007_v18 }
 0x6ca   : > { %v4474_v47 = vcombine.low %v3970_v16, %v3977_v4  ;;  %v5949_v37 = vcombine.high %v3970_v16, %v3977_v4  ;;  %v4490_v57 = vcombine.low %v3986_v58, %v3993_v19  ;;  %v5950_v60 = vcombine.high %v3986_v58, %v3993_v19 }
 0x6cb   : > { %v4406_v55 = vcombine.low %v3902_v29, %v3909_v21  ;;  %v5947_v61 = vcombine.high %v3902_v29, %v3909_v21  ;;  %v4422_v26 = vcombine.low %v3918_v42, %v3925_v53  ;;  %v5948_v9 = vcombine.high %v3918_v42, %v3925_v53 }
 0x6cc   : > { %v8813_v13 = vrot.slane %v4474_v47, %v8002_v11  ;;  %v8816_v41 = vrot.slane %v5949_v37, %v8002_v11  ;;  %v8819_v14 = vrot.slane %v4490_v57, %v8002_v11  ;;  %v8822_v15 = vrot.slane %v5950_v60, %v8002_v11  ;;  %v8824_v56 = vpop.f32.mrb[30].mxu0 }
 0x6cd   : > { %v8827_v17 = vrot.slane %v4406_v55, %v8002_v11  ;;  %v8830_v27 = vrot.slane %v5947_v61, %v8002_v11  ;;  %v8833_v23 = vrot.slane %v4422_v26, %v8002_v11  ;;  %v8836_v3 = vrot.slane %v5948_v9, %v8002_v11  ;;  %v8838_v20 = vpop.f32.mrb[31].mxu0 }
 0x6ce   : > { %v8841_v8 = vrot.slane %v4202_v30, %v8002_v11  ;;  %v8844_v50 = vrot.slane %v4203_v0, %v8002_v11  ;;  %v8847_v6 = vrot.slane %v4134_v59, %v8002_v11  ;;  %v8850_v12 = vrot.slane %v4135_v62, %v8002_v11 }
 0x6cf   : > { %v4082_v33 = vcombine.low %v8702_v22, %v6504_v63  ;;  %v4083_v45 = vcombine.high %v8702_v22, %v6504_v63  ;;  %v4014_v39 = vcombine.low %v8704_v31, %v3707_v48  ;;  %v4015_v1 = vcombine.high %v8704_v31, %v3707_v48 }
 0x6d0   : > { %v4303_v30 = vcombine.high %v8757_v49, %v8760_v43  ;;  %v4319_v0 = vcombine.high %v8763_v52, %v8766_v44  ;;  %v4371_v59 = vcombine.high %v8745_v2, %v8748_v35  ;;  %v4387_v62 = vcombine.high %v8751_v51, %v8754_v25 }
 0x6d1   : > { %v4090_v46 = vrot.slane %v4082_v33, %v8002_v11  ;;  %v4097_v22 = vrot.slane %v4083_v45, %v8002_v11  ;;  %v4022_v63 = vrot.slane %v4014_v39, %v8002_v11  ;;  %v4029_v31 = vrot.slane %v4015_v1, %v8002_v11 }
 0x6d2   : > { %v8869_v48 = vrot.slane %v4303_v30, %v8007_v18  ;;  %v8872_v28 = vrot.slane %v4319_v0, %v8007_v18  ;;  %v8875_v5 = vrot.slane %v4371_v59, %v8007_v18  ;;  %v8878_v34 = vrot.slane %v4387_v62, %v8007_v18 }
 0x6d3   : > { %v4098_v54 = vcombine.low %v8777_v32, %v4090_v46  ;;  %v4099_v16 = vcombine.high %v8777_v32, %v4090_v46  ;;  %v4114_v4 = vcombine.low %v8780_v38, %v4097_v22  ;;  %v4115_v58 = vcombine.high %v8780_v38, %v4097_v22 }
 0x6d4   : > { %v4030_v19 = vcombine.low %v8783_v40, %v4022_v63  ;;  %v4031_v29 = vcombine.high %v8783_v40, %v4022_v63  ;;  %v4046_v21 = vcombine.low %v8786_v24, %v4029_v31  ;;  %v4047_v42 = vcombine.high %v8786_v24, %v4029_v31 }
 0x6d5   : > { %v4106_v53 = vrot.slane %v4098_v54, %v8007_v18  ;;  %v4113_v47 = vrot.slane %v4099_v16, %v8007_v18  ;;  %v4122_v37 = vrot.slane %v4114_v4, %v8007_v18  ;;  %v4129_v32 = vrot.slane %v4115_v58, %v8007_v18 }
 0x6d6   : > { %v4038_v57 = vrot.slane %v4030_v19, %v8007_v18  ;;  %v4045_v38 = vrot.slane %v4031_v29, %v8007_v18  ;;  %v4054_v60 = vrot.slane %v4046_v21, %v8007_v18  ;;  %v4061_v40 = vrot.slane %v4047_v42, %v8007_v18 }
 0x6d7   : > { %v4610_v55 = vcombine.low %v4106_v53, %v4113_v47  ;;  %v5953_v61 = vcombine.high %v4106_v53, %v4113_v47  ;;  %v4626_v26 = vcombine.low %v4122_v37, %v4129_v32  ;;  %v5954_v24 = vcombine.high %v4122_v37, %v4129_v32 }
 0x6d8   : > { %v4542_v9 = vcombine.low %v4038_v57, %v4045_v38  ;;  %v5951_v33 = vcombine.high %v4038_v57, %v4045_v38  ;;  %v4558_v45 = vcombine.low %v4054_v60, %v4061_v40  ;;  %v5952_v39 = vcombine.high %v4054_v60, %v4061_v40 }
 0x6d9   : > { %v8897_v1 = vrot.slane %v4610_v55, %v8002_v11  ;;  %v8900_v30 = vrot.slane %v5953_v61, %v8002_v11  ;;  %v8903_v0 = vrot.slane %v4626_v26, %v8002_v11  ;;  %v8906_v59 = vrot.slane %v5954_v24, %v8002_v11 }
 0x6da   : > { %v8909_v62 = vrot.slane %v4542_v9, %v8002_v11  ;;  %v8912_v46 = vrot.slane %v5951_v33, %v8002_v11  ;;  %v8915_v22 = vrot.slane %v4558_v45, %v8002_v11  ;;  %v8918_v63 = vrot.slane %v5952_v39, %v8002_v11 }
 0x6db   : > { %v4336_v31 = vcombine.low %v8869_v48, %v8872_v28  ;;  %v4404_v54 = vcombine.low %v8875_v5, %v8878_v34  ;;  %v4302_v16 = vcombine.low %v8757_v49, %v8760_v43  ;;  %v4318_v4 = vcombine.low %v8763_v52, %v8766_v44 }
 0x6dc   : > { %v4370_v58 = vcombine.low %v8745_v2, %v8748_v35  ;;  %v4386_v19 = vcombine.low %v8751_v51, %v8754_v25  ;;  %v4218_v29 = vcombine.low %v8708_v10, %v8824_v56  ;;  %v4219_v21 = vcombine.high %v8708_v10, %v8824_v56 }
 0x6dd   : > { %v6967_v42 = vpack.i.bf16 %v4404_v54, %v4336_v31  ;;  %v8937_v53 = vrot.slane %v4302_v16, %v8007_v18  ;;  %v8940_v49 = vrot.slane %v4318_v4, %v8007_v18  ;;  %v4150_v43 = vcombine.low %v8710_v36, %v8838_v20 }
 0x6de   : > { %v8945_v2 = vrot.slane %v4370_v58, %v8007_v18  ;;  %v8948_v35 = vrot.slane %v4386_v19, %v8007_v18  ;;  %v4226_v51 = vrot.slane %v4218_v29, %v8002_v11  ;;  %v4233_v10 = vrot.slane %v4219_v21, %v8002_v11 }
 0x6df   : > { %6968 = vrot.lane.b32.xlu0 %v6967_v42, %s7452_s12  ;;  %v4335_v25 = vcombine.high %v8937_v53, %v8940_v49  ;;  %v4334_v52 = vcombine.low %v8937_v53, %v8940_v49  ;;  %v4151_v44 = vcombine.high %v8710_v36, %v8838_v20  ;;  %v4158_v56 = vrot.slane %v4150_v43, %v8002_v11 }
 0x6e0   : > { %v4402_v47 = vcombine.low %v8945_v2, %v8948_v35  ;;  %v4403_v37 = vcombine.high %v8945_v2, %v8948_v35  ;;  %v4234_v32 = vcombine.low %v8841_v8, %v4226_v51  ;;  %v4235_v57 = vcombine.high %v8841_v8, %v4226_v51 }
 0x6e1   : > { %v4250_v38 = vcombine.low %v8844_v50, %v4233_v10  ;;  %v4251_v60 = vcombine.high %v8844_v50, %v4233_v10  ;;  %v4165_v40 = vrot.slane %v4151_v44, %v8002_v11  ;;  %v4166_v36 = vcombine.low %v8847_v6, %v4158_v56 }
 0x6e2   : > { %v6962_v20 = vpack.i.bf16 %v4403_v37, %v4335_v25  ;;  %v4242_v55 = vrot.slane %v4234_v32, %v8007_v18  ;;  %v4249_v61 = vrot.slane %v4235_v57, %v8007_v18  ;;  %v4167_v26 = vcombine.high %v8847_v6, %v4158_v56 }
 0x6e3   : > { %v4258_v24 = vrot.slane %v4250_v38, %v8007_v18  ;;  %v4265_v9 = vrot.slane %v4251_v60, %v8007_v18  ;;  %v4174_v8 = vrot.slane %v4166_v36, %v8007_v18  ;;  %v4182_v33 = vcombine.low %v8850_v12, %v4165_v40 }
 0x6e4   : > { %6963 = vrot.lane.b32.xlu1 %v6962_v20, %s7454_s20  ;;  %v4746_v50 = vcombine.low %v4242_v55, %v4249_v61  ;;  %v5957_v45 = vcombine.high %v4242_v55, %v4249_v61  ;;  %v4181_v39 = vrot.slane %v4167_v26, %v8007_v18  ;;  %v4183_v31 = vcombine.high %v8850_v12, %v4165_v40 }
 0x6e5   : > { %v4762_v54 = vcombine.low %v4258_v24, %v4265_v9  ;;  %v5958_v16 = vcombine.high %v4258_v24, %v4265_v9  ;;  %v4190_v6 = vrot.slane %v4182_v33, %v8007_v18  ;;  %v4337_v4 = vcombine.high %v8869_v48, %v8872_v28 }
 0x6e6   : > { %v8984_v58 = vrot.slane %v4746_v50, %v8002_v11  ;;  %v8987_v19 = vrot.slane %v5957_v45, %v8002_v11  ;;  %v4197_v29 = vrot.slane %v4183_v31, %v8007_v18  ;;  %v4678_v21 = vcombine.low %v4174_v8, %v4181_v39 }
 0x6e7   : > { %v8991_v42 = vrot.slane %v4762_v54, %v8002_v11  ;;  %v8994_v12 = vrot.slane %v5958_v16, %v8002_v11  ;;  %v5955_v43 = vcombine.high %v4174_v8, %v4181_v39  ;;  %v4405_v51 = vcombine.high %v8875_v5, %v8878_v34 }
 0x6e8   : > { %v8999_v48 = vrot.slane %v4678_v21, %v8002_v11  ;;  %v4694_v28 = vcombine.low %v4190_v6, %v4197_v29  ;;  %v5956_v10 = vcombine.high %v4190_v6, %v4197_v29  ;;  %v4439_v25 = vcombine.high %v8827_v17, %v8830_v27 }
 0x6e9   : > { %v9004_v44 = vrot.slane %v5955_v43, %v8002_v11  ;;  %v6972_v56 = vpack.i.bf16 %v4405_v51, %v4337_v4  ;;  %v4455_v37 = vcombine.high %v8833_v23, %v8836_v3  ;;  %v4507_v32 = vcombine.high %v8813_v13, %v8816_v41 }
 0x6ea   : > { %v9011_v5 = vrot.slane %v4694_v28, %v8002_v11  ;;  %v9014_v34 = vrot.slane %v5956_v10, %v8002_v11  ;;  %v4453_v57 = vrot.slane %v4439_v25, %v8007_v18  ;;  %v4523_v38 = vcombine.high %v8819_v14, %v8822_v15 }
 0x6eb   : > { %6973 = vrot.lane.b32.xlu1 %v6972_v56, %s7453_s13  ;;  %v4469_v60 = vrot.slane %v4455_v37, %v8007_v18  ;;  %v4521_v40 = vrot.slane %v4507_v32, %v8007_v18  ;;  %v4438_v36 = vcombine.low %v8827_v17, %v8830_v27  ;;  %v4454_v20 = vcombine.low %v8833_v23, %v8836_v3 }
 0x6ec   : > { %v4537_v11 = vrot.slane %v4523_v38, %v8007_v18  ;;  %v4506_v55 = vcombine.low %v8813_v13, %v8816_v41  ;;  %v4522_v61 = vcombine.low %v8819_v14, %v8822_v15  ;;  %v4575_v26 = vcombine.high %v8909_v62, %v8912_v46 }
 0x6ed   : > { %v4472_v24 = vcombine.low %v4453_v57, %v4469_v60  ;;  %v9034_v9 = vrot.slane %v4438_v36, %v8007_v18  ;;  %v9037_v17 = vrot.slane %v4454_v20, %v8007_v18  ;;  %v4473_v27 = vcombine.high %v4453_v57, %v4469_v60 }
 0x6ee   : > { %v4540_v23 = vcombine.low %v4521_v40, %v4537_v11  ;;  %v9040_v3 = vrot.slane %v4506_v55, %v8007_v18  ;;  %v9043_v13 = vrot.slane %v4522_v61, %v8007_v18  ;;  %v4541_v41 = vcombine.high %v4521_v40, %v4537_v11 }
 0x6ef   : > { %v4471_v14 = vcombine.high %v9034_v9, %v9037_v17  ;;  %v4470_v15 = vcombine.low %v9034_v9, %v9037_v17  ;;  %v4589_v8 = vrot.slane %v4575_v26, %v8007_v18  ;;  %v4591_v33 = vcombine.high %v8915_v22, %v8918_v63 }
 0x6f0   : > { %v6982_v50 = vpack.i.bf16 %v4540_v23, %v4472_v24  ;;  %v4538_v45 = vcombine.low %v9040_v3, %v9043_v13  ;;  %v4539_v39 = vcombine.high %v9040_v3, %v9043_v13  ;;  %v6987_v31 = vpack.i.bf16 %v4541_v41, %v4473_v27  ;;  %v4948_v24 = vld [vmem:[#allocation9 + $0x60] sm:$0xff] }
 0x6f1   : > { %v4605_v54 = vrot.slane %v4591_v33, %v8007_v18  ;;  %v4643_v16 = vcombine.high %v8897_v1, %v8900_v30  ;;  %v4659_v6 = vcombine.high %v8903_v0, %v8906_v59  ;;  %v4574_v4 = vcombine.low %v8909_v62, %v8912_v46  ;;  %v4950_v33 = vld [vmem:[#allocation9 + $0x70] sm:$0xff] }
 0x6f2   : > { %6983 = vrot.lane.b32.xlu0 %v6982_v50, %s7452_s12  ;;  %v6977_v29 = vpack.i.bf16 %v4539_v39, %v4471_v14  ;;  %v4590_v21 = vcombine.low %v8915_v22, %v8918_v63  ;;  %v4642_v43 = vcombine.low %v8897_v1, %v8900_v30  ;;  %v4658_v51 = vcombine.low %v8903_v0, %v8906_v59  ;;  %v4951_v50 = vld [vmem:[#allocation9 + $0x78] sm:$0xff] }
 0x6f3   : > { %v4608_v28 = vcombine.low %v4589_v8, %v4605_v54  ;;  %v4657_v10 = vrot.slane %v4643_v16, %v8007_v18  ;;  %v4673_v25 = vrot.slane %v4659_v6, %v8007_v18  ;;  %v9073_v56 = vrot.slane %v4574_v4, %v8007_v18 }
 0x6f4   : > { %6978 = vrot.lane.b32.xlu1 %v6977_v29, %s7454_s20  ;;  %v9077_v62 = vrot.slane %v4590_v21, %v8007_v18  ;;  %v9080_v46 = vrot.slane %v4642_v43, %v8007_v18  ;;  %v9083_v1 = vrot.slane %v4658_v51, %v8007_v18  ;;  %v4609_v30 = vcombine.high %v4589_v8, %v4605_v54  ;;  %v4949_v8 = vld [vmem:[#allocation9 + $0x68] sm:$0xff] }
 0x6f5   : > { %v4676_v0 = vcombine.low %v4657_v10, %v4673_v25  ;;  %v4677_v59 = vcombine.high %v4657_v10, %v4673_v25  ;;  %v4711_v22 = vcombine.high %v8999_v48, %v9004_v44  ;;  %v4727_v63 = vcombine.high %v9011_v5, %v9014_v34 }
 0x6f6   : > { %v4607_v37 = vcombine.high %v9073_v56, %v9077_v62  ;;  %v4674_v32 = vcombine.low %v9080_v46, %v9083_v1  ;;  %v4675_v57 = vcombine.high %v9080_v46, %v9083_v1  ;;  %v4606_v38 = vcombine.low %v9073_v56, %v9077_v62 }
 0x6f7   : > { %v6997_v60 = vpack.i.bf16 %v4676_v0, %v4608_v28  ;;  %v7002_v40 = vpack.i.bf16 %v4677_v59, %v4609_v30  ;;  %v4725_v36 = vrot.slane %v4711_v22, %v8007_v18  ;;  %v4741_v20 = vrot.slane %v4727_v63, %v8007_v18 }
 0x6f8   : > { %6988 = vrot.lane.b32.xlu1 %v6987_v31, %s7453_s13  ;;  %v6992_v11 = vpack.i.bf16 %v4675_v57, %v4607_v37  ;;  %v4779_v55 = vcombine.high %v8984_v58, %v8987_v19  ;;  %v4795_v61 = vcombine.high %v8991_v42, %v8994_v12  ;;  %v4710_v26 = vcombine.low %v8999_v48, %v9004_v44 }
 0x6f9   : > { %v4744_v27 = vcombine.low %v4725_v36, %v4741_v20  ;;  %v4726_v23 = vcombine.low %v9011_v5, %v9014_v34  ;;  %v4778_v41 = vcombine.low %v8984_v58, %v8987_v19  ;;  %v4794_v14 = vcombine.low %v8991_v42, %v8994_v12 }
 0x6fa   : > { %6993 = vrot.lane.b32.xlu0 %v6992_v11, %s7454_s20  ;;  %v4793_v39 = vrot.slane %v4779_v55, %v8007_v18  ;;  %v4809_v48 = vrot.slane %v4795_v61, %v8007_v18  ;;  %v9116_v44 = vrot.slane %v4710_v26, %v8007_v18  ;;  %v4745_v31 = vcombine.high %v4725_v36, %v4741_v20 }
 0x6fb   : > { %v9119_v5 = vrot.slane %v4726_v23, %v8007_v18  ;;  %v9122_v58 = vrot.slane %v4778_v41, %v8007_v18  ;;  %v9125_v19 = vrot.slane %v4794_v14, %v8007_v18  ;;  %v6704_v34 = vpack.c.bf16 %v4949_v8, %v4948_v24 }
 0x6fc   : > { %6998 = vrot.lane.b32.xlu1 %v6997_v60, %s7452_s12  ;;  %v4812_v42 = vcombine.low %v4793_v39, %v4809_v48  ;;  %v4813_v12 = vcombine.high %v4793_v39, %v4809_v48  ;;  %v6708_v54 = vpack.c.bf16 %v4951_v50, %v4950_v33 }
 0x6fd   : > { %v4743_v16 = vcombine.high %v9116_v44, %v9119_v5  ;;  %v4810_v6 = vcombine.low %v9122_v58, %v9125_v19  ;;  %v4811_v4 = vcombine.high %v9122_v58, %v9125_v19  ;;  %v4742_v29 = vcombine.low %v9116_v44, %v9119_v5  ;;  %6705 = vmatprep.subr.bf16.mxu1 %v6704_v34  ;;  %v5959_v5 = vld [vmem:[%s9529_s6] ss:$0 sm:$0xff] }
 0x6fe   : > { %7003 = vrot.lane.b32.xlu0 %v7002_v40, %s7453_s13  ;;  %v7012_v18 = vpack.i.bf16 %v4812_v42, %v4744_v27  ;;  %v7017_v21 = vpack.i.bf16 %v4813_v12, %v4745_v31  ;;  %6707 = vmatpush3.bf16.msra.mxu1 %v6704_v34 }
 0x6ff   : > { %v7007_v43 = vpack.i.bf16 %v4811_v4, %v4743_v16  ;;  %6709 = vmatprep.subr.bf16.mxu1 %v6708_v54 }
 0x701   : > { %7008 = vrot.lane.b32.xlu1 %v7007_v43, %s7454_s20 }
 0x702   : > { %7013 = vrot.lane.b32.xlu0 %v7012_v18, %s7452_s12  ;;  %6711 = vmatpush3.bf16.msra.mxu1 %v6708_v54  ;;  %s7458_s12 = smov [#allocation13]  }
 0x705   : > { %7018 = vrot.lane.b32.xlu1 %v7017_v21, %s7453_s13  ;;  %s9594_s13 = sld [smem:[#allocation38_spill]] }
 0x751   : > { %v6969_v25 = vpop.permute.xlu0 %6968 }
 0x752   : > { %v6971_v30 = vunpack.i.h.bf16 %v6969_v25  ;;  %v6970_v0 = vunpack.i.l.bf16 %v6969_v25 }
 0x756   : > { %v6964_v51 = vpop.permute.xlu1 %6963 }
 0x757   : > { %v6966_v28 = vunpack.i.h.bf16 %v6964_v51  ;;  %v6965_v10 = vunpack.i.l.bf16 %v6964_v51 }
 0x759   : > { %v4911_v59 = vsel %vm2453_vm0, %v4402_v47, %v6966_v28  ;;  %v4910_v22 = vsel %vm2453_vm0, %v4334_v52, %v6965_v10  ;;  %v7182_v10 = vld [vmem:[%s7919_s23 + $0x8] sm:$0xff] }
 0x75a   : > { %v4920_v60 = vsel %vm4918_vm1, %v4911_v59, %v6971_v30  ;;  %v4919_v40 = vsel %vm4918_vm1, %v4910_v22, %v6970_v0  ;;  %v7183_v30 = vld [vmem:[%s7919_s23] sm:$0xff] }
 0x75d   : > { %v6974_v63 = vpop.permute.xlu1 %6973 }
 0x75e   : > { %v6976_v37 = vunpack.i.h.bf16 %v6974_v63  ;;  %v6975_v57 = vunpack.i.l.bf16 %v6974_v63 }
 0x760   : > { %v4928_v36 = vsel %vm4927_vm2, %v4919_v40, %v6975_v57  ;;  %v4929_v2 = vsel %vm4927_vm2, %v4920_v60, %v6976_v37  ;;  %v7184_v57 = vld [vmem:[%s7919_s23 + $0x10] sm:$0xff] }
 0x761   : > { %6540 = vmatprep.mubr.f32.mxu1 %v4928_v36 }
 0x762   : > { %6541 = vmatmul.mubr.f32.vlgmr.msra.gmra.mrb[40].mxu1 %v4929_v2 }
 0x764   : > { %v6984_v35 = vpop.permute.xlu0 %6983 }
 0x765   : > { %v6986_v49 = vunpack.i.h.bf16 %v6984_v35  ;;  %v6985_v52 = vunpack.i.l.bf16 %v6984_v35  ;;  %v7185_v35 = vld [vmem:[%s7919_s23 + $0x18] sm:$0xff] }
 0x766   : > { %v6979_v47 = vpop.permute.xlu1 %6978 }
 0x767   : > { %v6981_v20 = vunpack.i.h.bf16 %v6979_v47  ;;  %v6980_v53 = vunpack.i.l.bf16 %v6979_v47 }
 0x769   : > { %v4912_v11 = vsel %vm2453_vm0, %v4470_v15, %v6980_v53  ;;  %v4913_v55 = vsel %vm2453_vm0, %v4538_v45, %v6981_v20  ;;  %v7186_v53 = vld [vmem:[%s7919_s23 + $0x28] sm:$0xff] }
 0x76a   : > { %v6989_v61 = vpop.permute.xlu1 %6988  ;;  %v4921_v23 = vsel %vm4918_vm1, %v4912_v11, %v6985_v52  ;;  %v4922_v41 = vsel %vm4918_vm1, %v4913_v55, %v6986_v49  ;;  %v7187_v52 = vld [vmem:[%s7919_s23 + $0x20] sm:$0xff] }
 0x76b   : > { %v6991_v26 = vunpack.i.h.bf16 %v6989_v61  ;;  %v6990_v24 = vunpack.i.l.bf16 %v6989_v61 }
 0x76c   : > { %v6994_v27 = vpop.permute.xlu0 %6993 }
 0x76d   : > { %v6996_v14 = vunpack.i.h.bf16 %v6994_v27  ;;  %v6995_v8 = vunpack.i.l.bf16 %v6994_v27  ;;  %v4930_v33 = vsel %vm4927_vm2, %v4921_v23, %v6990_v24  ;;  %v4931_v9 = vsel %vm4927_vm2, %v4922_v41, %v6991_v26  ;;  %v7188_v27 = vld [vmem:[%s7919_s23 + $0x38] sm:$0xff]  ;;  %v7189_v41 = vld [vmem:[%s7919_s23 + $0x30] sm:$0xff] }
 0x76e   : > { %v6999_v17 = vpop.permute.xlu1 %6998  ;;  %6543 = vmatprep.mubr.f32.mxu1 %v4930_v33  ;;  %v5194_v33 = vld [vmem:[#allocation10 + $0x18] sm:$0xff] }
 0x76f   : > { %v7001_v15 = vunpack.i.h.bf16 %v6999_v17  ;;  %v7000_v3 = vunpack.i.l.bf16 %v6999_v17  ;;  %6544 = vmatmul.mubr.f32.gmra.mrb[42].mxu1 %v4931_v9  ;;  %v4914_v13 = vsel %vm2453_vm0, %v4606_v38, %v6995_v8  ;;  %v4915_v45 = vsel %vm2453_vm0, %v4674_v32, %v6996_v14  ;;  %v5192_v8 = vld [vmem:[#allocation10 + $0x8] sm:$0xff]  ;;  %v5191_v9 = vld [vmem:[#allocation10] sm:$0xff] }
 0x770   : > { %v7004_v50 = vpop.permute.xlu0 %7003  ;;  %v6712_v17 = vpack.c.bf16 %v5194_v33, %v5192_v8  ;;  %v5214_v8 = vld [vmem:[#allocation10 + $0xb8] sm:$0xff] }
 0x771   : > { %v7006_v39 = vunpack.i.h.bf16 %v7004_v50  ;;  %v7005_v48 = vunpack.i.l.bf16 %v7004_v50  ;;  %v4923_v31 = vsel %vm4918_vm1, %v4914_v13, %v7000_v3  ;;  %v4924_v42 = vsel %vm4918_vm1, %v4915_v45, %v7001_v15  ;;  %v5193_v15 = vld [vmem:[#allocation10 + $0x10] sm:$0xff]  ;;  %v5196_v3 = vld [vmem:[#allocation10 + $0x28] sm:$0xff]  ;;  %v5198_v13 = vld [vmem:[#allocation10 + $0x38] sm:$0xff] }
 0x772   : > { %v6714_v45 = vpack.c.bf16 %v5193_v15, %v5191_v9  ;;  %v6716_v50 = vpack.c.bf16 %v5198_v13, %v5196_v3  ;;  %6713 = vmatprep.subr.bf16.mxu0 %v6712_v17  ;;  %v5211_v9 = vld [vmem:[#allocation10 + $0xa0] sm:$0xff]  ;;  %v5213_v17 = vld [vmem:[#allocation10 + $0xb0] sm:$0xff]  ;;  %v5216_v3 = vld [vmem:[#allocation10 + $0xc8] sm:$0xff] }
 0x773   : > { %v7009_v12 = vpop.permute.xlu1 %7008  ;;  %v4932_v34 = vsel %vm4927_vm2, %v4923_v31, %v7005_v48  ;;  %v4933_v54 = vsel %vm4927_vm2, %v4924_v42, %v7006_v39  ;;  %v5195_v39 = vld [vmem:[#allocation10 + $0x20] sm:$0xff]  ;;  %v5197_v48 = vld [vmem:[#allocation10 + $0x30] sm:$0xff]  ;;  %v5200_v31 = vld [vmem:[#allocation10 + $0x48] sm:$0xff]  ;;  %v6734_v15 = vpack.c.bf16 %v5213_v17, %v5211_v9 }
 0x774   : > { %v7011_v56 = vunpack.i.h.bf16 %v7009_v12  ;;  %v7010_v62 = vunpack.i.l.bf16 %v7009_v12  ;;  %v7014_v38 = vpop.permute.xlu0 %7013  ;;  %6546 = vmatprep.mubr.f32.mxu1 %v4932_v34  ;;  %v5202_v42 = vld [vmem:[#allocation10 + $0x58] sm:$0xff]  ;;  %6715 = vmatpush1.bf16.msra.mxu0 %v6714_v45  ;;  %v6718_v12 = vpack.c.bf16 %v5197_v48, %v5195_v39  ;;  %v5217_v39 = vld [vmem:[#allocation10 + $0xd0] sm:$0xff] }
 0x775   : > { %v7016_v16 = vunpack.i.h.bf16 %v7014_v38  ;;  %v7015_v46 = vunpack.i.l.bf16 %v7014_v38  ;;  %6547 = vmatmul.mubr.f32.gmra.mrb[44].mxu1 %v4933_v54  ;;  %6717 = vmatprep.subr.bf16.mxu0 %v6716_v50  ;;  %v6720_v34 = vpack.c.bf16 %v5202_v42, %v5200_v31  ;;  %v5199_v54 = vld [vmem:[#allocation10 + $0x40] sm:$0xff]  ;;  %v5218_v13 = vld [vmem:[#allocation10 + $0xd8] sm:$0xff]  ;;  %v5220_v31 = vld [vmem:[#allocation10 + $0xe8] sm:$0xff] }
 0x776   : > { %v4916_v1 = vsel %vm2453_vm0, %v4742_v29, %v7010_v62  ;;  %v4917_v32 = vsel %vm2453_vm0, %v4810_v6, %v7011_v56  ;;  %v5201_v56 = vld [vmem:[#allocation10 + $0x50] sm:$0xff]  ;;  %v6736_v45 = vpack.c.bf16 %v5218_v13, %v5216_v3  ;;  %v5215_v50 = vld [vmem:[#allocation10 + $0xc0] sm:$0xff]  ;;  %v5222_v42 = vld [vmem:[#allocation10 + $0xf8] sm:$0xff] }
 0x777   : > { %v7019_v4 = vpop.permute.xlu1 %7018  ;;  %v4925_v43 = vsel %vm4918_vm1, %v4916_v1, %v7015_v46  ;;  %v4926_v51 = vsel %vm4918_vm1, %v4917_v32, %v7016_v16  ;;  %v6722_v62 = vpack.c.bf16 %v5201_v56, %v5199_v54  ;;  %v6738_v48 = vpack.c.bf16 %v5217_v39, %v5215_v50  ;;  %v5221_v54 = vld [vmem:[#allocation10 + $0xf0] sm:$0xff] }
 0x778   : > { %v7021_v18 = vunpack.i.h.bf16 %v7019_v4  ;;  %v7020_v21 = vunpack.i.l.bf16 %v7019_v4  ;;  %6719 = vmatpush1.bf16.msra.mxu0 %v6718_v12  ;;  %v6740_v12 = vpack.c.bf16 %v5222_v42, %v5220_v31  ;;  %v9283_v42 = vld [vmem:[%s9530_s7] ss:$0 sm:$0xff] }
 0x779   : > { %6721 = vmatprep.subr.bf16.mxu0 %v6720_v34  ;;  %v5219_v34 = vld [vmem:[#allocation10 + $0xe0] sm:$0xff] }
 0x77a   : > { %v4934_v28 = vsel %vm4927_vm2, %v4925_v43, %v7020_v21  ;;  %v4935_v44 = vsel %vm4927_vm2, %v4926_v51, %v7021_v18  ;;  %v6742_v56 = vpack.c.bf16 %v5221_v54, %v5219_v34 }
 0x77b   : > { %6549 = vmatprep.mubr.f32.mxu1 %v4934_v28 }
 0x77c   : > { %6550 = vmatmul.mubr.f32.gmra.mrb[46].mxu1 %v4935_v44  ;;  %6723 = vmatpush1.bf16.msra.mxu0 %v6722_v62  ;;  %v7457_v62 = vmov 0.0  }
 0x77d   : > { %5299 = vmatprep.mubr.f32.mxu0 %v7457_v62 }
 0x835   : > { %v6542_v58 = vpop.f32.mrb[40].mxu1 }
 0x836   : > { %v5031_v19 = vadd.f32 %v6542_v58, %v5959_v5  ;;  %v5025_v6 = vpop.f32.mrb[41].mxu1 }
 0x837   : > { %v5026_v29 = vadd.f32 %v5959_v5, %v5025_v6 }
 0x838   : > { %v9192_v25 = vadd.f32 %v7182_v10, %v5031_v19 }
 0x839   : > { %v5064_v0 = vadd.f32 %v7183_v30, %v5026_v29 }
 0x83a   : > { %5074 = vadd.xlane.f32.xlu1 %v9192_v25 }
 0x83b   : > { %5072 = vadd.xlane.f32.xlu0 %v5064_v0 }
 0x842   : > { %v6545_v59 = vpop.f32.mrb[42].mxu1 }
 0x843   : > { %v5035_v22 = vpop.f32.mrb[43].mxu1  ;;  %v5041_v37 = vadd.f32 %v6545_v59, %v5959_v5 }
 0x844   : > { %v5036_v63 = vadd.f32 %v5959_v5, %v5035_v22 }
 0x845   : > { %v5067_v47 = vadd.f32 %v7185_v35, %v5041_v37  ;;  %v5204_v35 = vld [vmem:[#allocation10 + $0x68] sm:$0xff] }
 0x846   : > { %v5066_v60 = vadd.f32 %v7184_v57, %v5036_v63 }
 0x848   : > { %5076 = vadd.xlane.f32.xlu0 %v5066_v60  ;;  %v6548_v40 = vpop.f32.mrb[44].mxu1 }
 0x849   : > { %v5051_v36 = vadd.f32 %v6548_v40, %v5959_v5  ;;  %v5045_v2 = vpop.f32.mrb[45].mxu1 }
 0x84a   : > { %v5046_v20 = vadd.f32 %v5959_v5, %v5045_v2 }
 0x84b   : > { %v9199_v49 = vadd.f32 %v7186_v53, %v5051_v36 }
 0x84c   : > { %v5068_v11 = vadd.f32 %v7187_v52, %v5046_v20  ;;  %5078 = vadd.xlane.f32.xlu0 %v5067_v47  ;;  %v5205_v52 = vld [vmem:[#allocation10 + $0x70] sm:$0xff] }
 0x84e   : > { %5080 = vadd.xlane.f32.xlu1 %v5068_v11 }
 0x84f   : > { %v6551_v55 = vpop.f32.mrb[46].mxu1 }
 0x850   : > { %5082 = vadd.xlane.f32.xlu0 %v9199_v49  ;;  %v5061_v61 = vadd.f32 %v6551_v55, %v5959_v5  ;;  %v5055_v26 = vpop.f32.mrb[47].mxu1 }
 0x851   : > { %v5056_v24 = vadd.f32 %v5959_v5, %v5055_v26  ;;  %v5210_v26 = vld [vmem:[#allocation10 + $0x98] sm:$0xff] }
 0x852   : > { %v9204_v23 = vadd.f32 %v7188_v27, %v5061_v61  ;;  %v5208_v61 = vld [vmem:[#allocation10 + $0x88] sm:$0xff]  ;;  %v5207_v27 = vld [vmem:[#allocation10 + $0x80] sm:$0xff] }
 0x853   : > { %v5070_v14 = vadd.f32 %v7189_v41, %v5056_v24  ;;  %v6728_v24 = vpack.c.bf16 %v5210_v26, %v5208_v61  ;;  %v5391_v61 = vld [vmem:[#allocation12 + $0xd8] sm:$0xff] }
 0x854   : > { %5086 = vadd.xlane.f32.xlu0 %v9204_v23 }
 0x855   : > { %5084 = vadd.xlane.f32.xlu1 %v5070_v14 }
 0x8c7   : > { %v5075_v38 = vpop.xlane.xlu1 %5074 }
 0x8c8   : > { %v5090_v16 = vmul.f32 0.0078125, %v5075_v38  ;;  %v5073_v46 = vpop.xlane.xlu0 %5072  ;;  %v5380_v38 = vld [vmem:[#allocation12 + $0x80] sm:$0xff] }
 0x8c9   : > { %v5089_v1 = vmul.f32 0.0078125, %v5073_v46  ;;  %v5364_v46 = vld [vmem:[#allocation12] sm:$0xff] }
 0x8ca   : > { %v9209_v32 = vsub.f32 %v9192_v25, %v5090_v16  ;;  %v5381_v16 = vld [vmem:[#allocation12 + $0x88] sm:$0xff] }
 0x8cb   : > { %v9211_v4 = vsub.f32 %v5064_v0, %v5089_v1  ;;  %v6744_v1 = vpack.c.bf16 %v5381_v16, %v5380_v38  ;;  %v9290_v38 = vld [vmem:[%s9591_s28] ss:$0 sm:$0xff]  ;;  %s5969_s28 = sshll.u32 %s5660_s18, 7 }
 0x8cc   : > { %v5106_v18 = vmul.f32 %v9209_v32, %v9209_v32  ;;  %s9443_s23 = scalar_lea.hbm %s9597_s17, %s5969_s28 }
 0x8cd   : > { %v5105_v21 = vmul.f32 %v9211_v4, %v9211_v4  ;;  %6792 = vmatprep.subr.bf16.mxu1 %v6744_v1 }
 0x8ce   : > { %5115 = vadd.xlane.f32.xlu0 %v5106_v18  ;;  %v5365_v18 = vld [vmem:[#allocation12 + $0x8] sm:$0xff] }
 0x8cf   : > { %5113 = vadd.xlane.f32.xlu1 %v5105_v21  ;;  %v5382_v21 = vld [vmem:[#allocation12 + $0x90] sm:$0xff] }
 0x8d5   : > { %v5077_v43 = vpop.xlane.xlu0 %5076 }
 0x8d6   : > { %v5091_v51 = vmul.f32 0.0078125, %v5077_v43  ;;  %v5383_v43 = vld [vmem:[#allocation12 + $0x98] sm:$0xff] }
 0x8d8   : > { %v9217_v28 = vsub.f32 %v5066_v60, %v5091_v51  ;;  %v9244_v51 = vpack.c.bf16 %v5365_v18, %v5364_v46 }
 0x8d9   : > { %v5079_v44 = vpop.xlane.xlu0 %5078 }
 0x8da   : > { %v5092_v5 = vmul.f32 0.0078125, %v5079_v44  ;;  %v5107_v58 = vmul.f32 %v9217_v28, %v9217_v28  ;;  %v9246_v44 = vpack.c.bf16 %v5383_v43, %v5382_v21  ;;  %6800 = vmatpush3.bf16.msra.mxu1 %v9244_v51 }
 0x8db   : > { %v5081_v19 = vpop.xlane.xlu1 %5080 }
 0x8dc   : > { %v9221_v6 = vsub.f32 %v5067_v47, %v5092_v5  ;;  %5117 = vadd.xlane.f32.xlu1 %v5107_v58  ;;  %v5093_v29 = vmul.f32 0.0078125, %v5081_v19  ;;  %v5206_v47 = vld [vmem:[#allocation10 + $0x78] sm:$0xff]  ;;  %v5366_v5 = vld [vmem:[#allocation12 + $0x10] sm:$0xff]  ;;  %v5384_v19 = vld [vmem:[#allocation12 + $0xa0] sm:$0xff]  ;;  %6793 = vmatprep.subr.bf16.mxu1 %v9246_v44 }
 0x8dd   : > { %v5083_v10 = vpop.xlane.xlu0 %5082  ;;  %v6724_v53 = vpack.c.bf16 %v5206_v47, %v5204_v35  ;;  %v5367_v58 = vld [vmem:[#allocation12 + $0x18] sm:$0xff]  ;;  %v5388_v47 = vld [vmem:[#allocation12 + $0xc0] sm:$0xff] }
 0x8de   : > { %v9223_v25 = vsub.f32 %v5068_v11, %v5093_v29  ;;  %v5094_v30 = vmul.f32 0.0078125, %v5083_v10  ;;  %v5108_v0 = vmul.f32 %v9221_v6, %v9221_v6  ;;  %v5385_v29 = vld [vmem:[#allocation12 + $0xa8] sm:$0xff]  ;;  %v9250_v10 = vpack.c.bf16 %v5367_v58, %v5366_v5  ;;  %v5371_v35 = vld [vmem:[#allocation12 + $0x38] sm:$0xff] }
 0x8df   : > { %6725 = vmatprep.subr.bf16.mxu0 %v6724_v53 }
 0x8e0   : > { %v9228_v59 = vsub.f32 %v9199_v49, %v5094_v30  ;;  %5119 = vadd.xlane.f32.xlu0 %v5108_v0  ;;  %v5109_v22 = vmul.f32 %v9223_v25, %v9223_v25  ;;  %v5203_v49 = vld [vmem:[#allocation10 + $0x60] sm:$0xff]  ;;  %v9252_v30 = vpack.c.bf16 %v5385_v29, %v5384_v19  ;;  %6801 = vmatpush3.bf16.msra.mxu1 %v9250_v10 }
 0x8e1   : > { %v5087_v63 = vpop.xlane.xlu0 %5086  ;;  %v6726_v55 = vpack.c.bf16 %v5205_v52, %v5203_v49  ;;  %v5368_v0 = vld [vmem:[#allocation12 + $0x20] sm:$0xff] }
 0x8e2   : > { %5121 = vadd.xlane.f32.xlu1 %v5109_v22  ;;  %v5110_v37 = vmul.f32 %v9228_v59, %v9228_v59  ;;  %v5096_v57 = vmul.f32 0.0078125, %v5087_v63  ;;  %v5085_v60 = vpop.xlane.xlu1 %5084  ;;  %v5369_v22 = vld [vmem:[#allocation12 + $0x28] sm:$0xff]  ;;  %v5386_v63 = vld [vmem:[#allocation12 + $0xb0] sm:$0xff]  ;;  %6794 = vmatprep.subr.bf16.mxu1 %v9252_v30  ;;  %v5372_v52 = vld [vmem:[#allocation12 + $0x40] sm:$0xff] }
 0x8e3   : > { %v5095_v40 = vmul.f32 0.0078125, %v5085_v60  ;;  %6727 = vmatpush1.bf16.msra.mxu0 %v6726_v55  ;;  %v5390_v55 = vld [vmem:[#allocation12 + $0xd0] sm:$0xff] }
 0x8e4   : > { %5123 = vadd.xlane.f32.xlu0 %v5110_v37  ;;  %v9235_v36 = vsub.f32 %v9204_v23, %v5096_v57  ;;  %v5209_v23 = vld [vmem:[#allocation10 + $0x90] sm:$0xff]  ;;  %6729 = vmatprep.subr.bf16.mxu0 %v6728_v24  ;;  %v5387_v37 = vld [vmem:[#allocation12 + $0xb8] sm:$0xff]  ;;  %v9256_v57 = vpack.c.bf16 %v5369_v22, %v5368_v0  ;;  %v9270_v24 = vpack.c.bf16 %v5391_v61, %v5390_v55 }
 0x8e5   : > { %v9237_v2 = vsub.f32 %v5070_v14, %v5095_v40  ;;  %v6730_v41 = vpack.c.bf16 %v5209_v23, %v5207_v27  ;;  %v5212_v14 = vld [vmem:[#allocation10 + $0xa8] sm:$0xff]  ;;  %v9258_v60 = vpack.c.bf16 %v5387_v37, %v5386_v63  ;;  %v5370_v40 = vld [vmem:[#allocation12 + $0x30] sm:$0xff]  ;;  %v5375_v23 = vld [vmem:[#allocation12 + $0x58] sm:$0xff] }
 0x8e6   : > { %v5112_v20 = vmul.f32 %v9235_v36, %v9235_v36  ;;  %v6732_v33 = vpack.c.bf16 %v5214_v8, %v5212_v14  ;;  %6802 = vmatpush3.bf16.msra.mxu1 %v9256_v57  ;;  %v9262_v53 = vpack.c.bf16 %v5371_v35, %v5370_v40  ;;  %v5374_v27 = vld [vmem:[#allocation12 + $0x50] sm:$0xff]  ;;  %v5393_v14 = vld [vmem:[#allocation12 + $0xe8] sm:$0xff] }
 0x8e7   : > { %v5111_v11 = vmul.f32 %v9237_v2, %v9237_v2  ;;  %6731 = vmatpush1.bf16.msra.mxu0 %v6730_v41  ;;  %6795 = vmatprep.subr.bf16.mxu1 %v9258_v60  ;;  %v5392_v41 = vld [vmem:[#allocation12 + $0xe0] sm:$0xff]  ;;  %v9274_v8 = vpack.c.bf16 %v5375_v23, %v5374_v27 }
 0x8e8   : > { %5127 = vadd.xlane.f32.xlu0 %v5112_v20  ;;  %6733 = vmatprep.subr.bf16.mxu0 %v6732_v33  ;;  %v5389_v20 = vld [vmem:[#allocation12 + $0xc8] sm:$0xff]  ;;  %v9276_v33 = vpack.c.bf16 %v5393_v14, %v5392_v41 }
 0x8e9   : > { %5125 = vadd.xlane.f32.xlu1 %v5111_v11  ;;  %v9264_v49 = vpack.c.bf16 %v5389_v20, %v5388_v47  ;;  %v5373_v11 = vld [vmem:[#allocation12 + $0x48] sm:$0xff] }
 0x8ea   : > { %6803 = vmatpush3.bf16.msra.mxu1 %v9262_v53  ;;  %v9268_v26 = vpack.c.bf16 %v5373_v11, %v5372_v52  ;;  %v5377_v14 = vld [vmem:[#allocation12 + $0x68] sm:$0xff] }
 0x8eb   : > { %6735 = vmatpush1.bf16.msra.mxu0 %v6734_v15  ;;  %6796 = vmatprep.subr.bf16.mxu1 %v9264_v49 }
 0x8ec   : > { %6737 = vmatprep.subr.bf16.mxu0 %v6736_v45 }
 0x8ee   : > { %6804 = vmatpush3.bf16.msra.mxu1 %v9268_v26 }
 0x8ef   : > { %6739 = vmatpush1.bf16.msra.mxu0 %v6738_v48  ;;  %6797 = vmatprep.subr.bf16.mxu1 %v9270_v24 }
 0x8f0   : > { %6741 = vmatprep.subr.bf16.mxu0 %v6740_v12 }
 0x8f2   : > { %6805 = vmatpush3.bf16.msra.mxu1 %v9274_v8 }
 0x8f3   : > { %6743 = vmatpush1.bf16.msra.mxu0 %v6742_v56  ;;  %6798 = vmatprep.subr.bf16.mxu1 %v9276_v33 }
 0x8f4   : > { %6745 = vmatprep.subr.bf16.mxu0 %v6744_v1 }
 0x95b   : > { %v5116_v9 = vpop.xlane.xlu0 %5115 }
 0x95c   : > { %v5130_v17 = vmul.f32 0.0078125, %v5116_v9  ;;  %v5114_v15 = vpop.xlane.xlu1 %5113  ;;  %v5395_v9 = vld [vmem:[#allocation12 + $0xf8] sm:$0xff] }
 0x95d   : > { %v5129_v3 = vmul.f32 0.0078125, %v5114_v15  ;;  %v5378_v15 = vld [vmem:[#allocation12 + $0x70] sm:$0xff] }
 0x95e   : > { %v5138_v13 = vadd.f32 1e-05, %v5130_v17 }
 0x95f   : > { %v5137_v45 = vadd.f32 1e-05, %v5129_v3  ;;  %v5379_v3 = vld [vmem:[#allocation12 + $0x78] sm:$0xff] }
 0x960   : > { %7150 = vrsqrt.f32 %v5138_v13  ;;  %v6774_v13 = vpack.c.bf16 %v5379_v3, %v5378_v15  ;;  %v5962_v3 = vld [vmem:[%s9593_s8] ss:$0 sm:$0xff]  ;;  %s5643_s8 = scalar_lea.sflag [#allocation6], %s7762_s16 }
 0x961   : > { %7152 = vrsqrt.f32 %v5137_v45  ;;  %v5223_v45 = vld [vmem:[%s9592_s14] sm:$0x3] }
 0x969   : > { %v5118_v50 = vpop.xlane.xlu1 %5117 }
 0x96a   : > { %v7151_v39 = vpop.eup %7150  ;;  %v5131_v48 = vmul.f32 0.0078125, %v5118_v50  ;;  %v5231_v50 = vsub.s32 1, %v7999_v7 }
 0x96b   : > { %v7153_v31 = vpop.eup %7152  ;;  %v5154_v54 = vmul.f32 %v7151_v39, %v9209_v32 }
 0x96c   : > { %v5153_v12 = vmul.f32 %v7153_v31, %v9211_v4  ;;  %v5139_v34 = vadd.f32 1e-05, %v5131_v48  ;;  %v5232_v48 = vrot.slane %v5223_v45, %v5231_v50 }
 0x96d   : > { %v5120_v56 = vpop.xlane.xlu0 %5119  ;;  %v5169_v4 = vmul.f32 %v9283_v42, %v5154_v54 }
 0x96e   : > { %7154 = vrsqrt.f32 %v5139_v34  ;;  %v5132_v16 = vmul.f32 0.0078125, %v5120_v56  ;;  %v5168_v46 = vmul.f32 %v9283_v42, %v5153_v12 }
 0x96f   : > { %v5122_v1 = vpop.xlane.xlu1 %5121  ;;  %v9301_v29 = vadd.f32 %v9290_v38, %v5169_v4 }
 0x970   : > { %v5140_v18 = vadd.f32 1e-05, %v5132_v16  ;;  %v5133_v21 = vmul.f32 0.0078125, %v5122_v1  ;;  %v9294_v43 = vadd.f32 %v9290_v38, %v5168_v46 }
 0x971   : > { %v5124_v5 = vpop.xlane.xlu0 %5123 }
 0x972   : > { %7156 = vrsqrt.f32 %v5140_v18  ;;  %v5141_v32 = vadd.f32 1e-05, %v5133_v21  ;;  %v5134_v58 = vmul.f32 0.0078125, %v5124_v5  ;;  %5300 = vmatmul.mubr.f32.vlgmr.msra.gmra.mrb[32].mxu0 %v9294_v43 }
 0x973   : > { %5305 = vmatprep.mubr.f32.mxu0 %v7457_v62  ;;  %6747 = vmatpush3.bf16.msra.mxu0 %v9244_v51 }
 0x974   : > { %7158 = vrsqrt.f32 %v5141_v32  ;;  %v5142_v19 = vadd.f32 1e-05, %v5134_v58  ;;  %6749 = vmatprep.subr.bf16.mxu0 %v9246_v44 }
 0x975   : > { %v5128_v0 = vpop.xlane.xlu0 %5127 }
 0x976   : > { %7160 = vrsqrt.f32 %v5142_v19  ;;  %v5136_v22 = vmul.f32 0.0078125, %v5128_v0  ;;  %v5126_v63 = vpop.xlane.xlu1 %5125  ;;  %5306 = vmatmul.mubr.f32.gmra.mrb[34].mxu0 %v9301_v29 }
 0x977   : > { %v5135_v37 = vmul.f32 0.0078125, %v5126_v63  ;;  %5311 = vmatprep.mubr.f32.mxu0 %v7457_v62  ;;  %6751 = vmatpush3.bf16.msra.mxu0 %v9250_v10 }
 0x978   : > { %v7155_v40 = vpop.eup %7154  ;;  %v5144_v51 = vadd.f32 1e-05, %v5136_v22  ;;  %6753 = vmatprep.subr.bf16.mxu0 %v9252_v30 }
 0x979   : > { %v5143_v35 = vadd.f32 1e-05, %v5135_v37  ;;  %v5155_v47 = vmul.f32 %v7155_v40, %v9217_v28 }
 0x97b   : > { %7162 = vrsqrt.f32 %v5143_v35  ;;  %v5170_v44 = vmul.f32 %v9283_v42, %v5155_v47  ;;  %6755 = vmatpush3.bf16.msra.mxu0 %v9256_v57 }
 0x97c   : > { %v7157_v20 = vpop.eup %7156  ;;  %7164 = vrsqrt.f32 %v5144_v51  ;;  %6757 = vmatprep.subr.bf16.mxu0 %v9258_v60 }
 0x97d   : > { %v9313_v52 = vadd.f32 %v9290_v38, %v5170_v44  ;;  %v5156_v10 = vmul.f32 %v7157_v20, %v9221_v6 }
 0x97e   : > { %v7159_v11 = vpop.eup %7158 }
 0x97f   : > { %5312 = vmatmul.mubr.f32.gmra.mrb[36].mxu0 %v9313_v52  ;;  %v5171_v30 = vmul.f32 %v9283_v42, %v5156_v10  ;;  %v5157_v28 = vmul.f32 %v7159_v11, %v9223_v25 }
 0x980   : > { %v7161_v55 = vpop.eup %7160  ;;  %5317 = vmatprep.mubr.f32.mxu0 %v7457_v62  ;;  %6759 = vmatpush3.bf16.msra.mxu0 %v9262_v53 }
 0x981   : > { %v9322_v57 = vadd.f32 %v9290_v38, %v5171_v30  ;;  %v5172_v60 = vmul.f32 %v9283_v42, %v5157_v28  ;;  %v5158_v61 = vmul.f32 %v7161_v55, %v9228_v59  ;;  %6761 = vmatprep.subr.bf16.mxu0 %v9264_v49 }
 0x983   : > { %5318 = vmatmul.mubr.f32.gmra.mrb[38].mxu0 %v9322_v57  ;;  %v9329_v6 = vadd.f32 %v9290_v38, %v5172_v60  ;;  %v5173_v53 = vmul.f32 %v9283_v42, %v5158_v61 }
 0x984   : > { %5323 = vmatprep.mubr.f32.mxu0 %v7457_v62  ;;  %6763 = vmatpush3.bf16.msra.mxu0 %v9268_v26 }
 0x985   : > { %v7163_v25 = vpop.eup %7162  ;;  %6765 = vmatprep.subr.bf16.mxu0 %v9270_v24  ;;  %v9341_v49 = vadd.f32 %v9290_v38, %v5173_v53 }
 0x986   : > { %v7165_v27 = vpop.eup %7164  ;;  %v5159_v23 = vmul.f32 %v7163_v25, %v9237_v2 }
 0x987   : > { %5324 = vmatmul.mubr.f32.gmra.mrb[40].mxu0 %v9329_v6  ;;  %v5160_v26 = vmul.f32 %v7165_v27, %v9235_v36  ;;  %v5376_v36 = vld [vmem:[#allocation12 + $0x60] sm:$0xff] }
 0x988   : > { %5329 = vmatprep.mubr.f32.mxu0 %v7457_v62  ;;  %v5174_v59 = vmul.f32 %v9283_v42, %v5159_v23  ;;  %6767 = vmatpush3.bf16.msra.mxu0 %v9274_v8  ;;  %v6770_v8 = vpack.c.bf16 %v5377_v14, %v5376_v36 }
 0x989   : > { %6769 = vmatprep.subr.bf16.mxu0 %v9276_v33  ;;  %v5175_v2 = vmul.f32 %v9283_v42, %v5160_v26  ;;  %v5394_v33 = vld [vmem:[#allocation12 + $0xf0] sm:$0xff] }
 0x98a   : > { %v9347_v24 = vadd.f32 %v9290_v38, %v5174_v59  ;;  %v6772_v17 = vpack.c.bf16 %v5395_v9, %v5394_v33  ;;  %6806 = vmatpush3.bf16.msra.mxu1 %v6770_v8 }
 0x98b   : > { %5330 = vmatmul.mubr.f32.gmra.mrb[42].mxu0 %v9341_v49  ;;  %v9354_v41 = vadd.f32 %v9290_v38, %v5175_v2 }
 0x98c   : > { %5335 = vmatprep.mubr.f32.mxu0 %v7457_v62  ;;  %6771 = vmatpush3.bf16.msra.mxu0 %v6770_v8 }
 0x98d   : > { %6773 = vmatprep.subr.bf16.mxu0 %v6772_v17  ;;  %6799 = vmatprep.subr.bf16.mxu1 %v6772_v17 }
 0x98e   : > { %6807 = vmatpush3.bf16.msra.mxu1 %v6774_v13 }
 0x98f   : > { %5336 = vmatmul.mubr.f32.gmra.mrb[44].mxu0 %v9347_v24 }
 0x990   : > { %5341 = vmatprep.mubr.f32.mxu0 %v7457_v62  ;;  %6775 = vmatpush3.bf16.msra.mxu0 %v6774_v13  ;;  %v5227_v62 = vsub.s32 0, %v7999_v7 }
 0x992   : > { %v5228_v39 = vrot.slane %v5223_v45, %v5227_v62 }
 0x993   : > { %5342 = vmatmul.mubr.f32.gmra.mrb[46].mxu0 %v9354_v41 }
 0xa45   : > { %v5301_v31 = vpop.f32.mrb[32].mxu0 }
 0xa46   : > { %v5302_v42 = vadd.f32 %v5301_v31, %v5228_v39  ;;  %v5303_v12 = vpop.f32.mrb[33].mxu0 }
 0xa47   : > { %v5304_v34 = vadd.f32 %v5303_v12, %v5232_v48 }
 0xa48   : > { %v5348_v38 = vmax.f32 %v5302_v42, 0.0 }
 0xa49   : > { %v5349_v54 = vmax.f32 %v5304_v34, 0.0  ;;  %v5307_v56 = vpop.f32.mrb[34].mxu0 }
 0xa4a   : > { %v5308_v16 = vadd.f32 %v5307_v56, %v5228_v39  ;;  %v5309_v46 = vpop.f32.mrb[35].mxu0 }
 0xa4b   : > { %v5310_v1 = vadd.f32 %v5309_v46, %v5232_v48  ;;  %5467 = vmatprep.mubr.f32.mxu0 %v5349_v54 }
 0xa4c   : > { %5468 = vmatmul.mubr.f32.vlgmr.msra.gmra.mrb[48].mxu0 %v5348_v38  ;;  %v5350_v21 = vmax.f32 %v5308_v16, 0.0 }
 0xa4d   : > { %v5351_v18 = vmax.f32 %v5310_v1, 0.0 }
 0xa4f   : > { %5472 = vmatprep.mubr.f32.mxu0 %v5351_v18 }
 0xa50   : > { %5473 = vmatmul.mubr.f32.gmra.mrb[50].mxu0 %v5350_v21 }
 0xa52   : > { %v5313_v4 = vpop.f32.mrb[36].mxu0 }
 0xa53   : > { %v5314_v7 = vadd.f32 %v5313_v4, %v5228_v39  ;;  %v5315_v5 = vpop.f32.mrb[37].mxu0 }
 0xa54   : > { %v5316_v32 = vadd.f32 %v5315_v5, %v5232_v48 }
 0xa55   : > { %v5352_v0 = vmax.f32 %v5314_v7, 0.0 }
 0xa56   : > { %v5353_v58 = vmax.f32 %v5316_v32, 0.0  ;;  %v5319_v19 = vpop.f32.mrb[38].mxu0 }
 0xa57   : > { %v5320_v22 = vadd.f32 %v5319_v19, %v5228_v39  ;;  %v5321_v63 = vpop.f32.mrb[39].mxu0 }
 0xa58   : > { %v5322_v37 = vadd.f32 %v5321_v63, %v5232_v48  ;;  %5477 = vmatprep.mubr.f32.mxu0 %v5353_v58 }
 0xa59   : > { %5478 = vmatmul.mubr.f32.gmra.mrb[52].mxu0 %v5352_v0  ;;  %v5354_v35 = vmax.f32 %v5320_v22, 0.0 }
 0xa5a   : > { %v5355_v40 = vmax.f32 %v5322_v37, 0.0  ;;  %v5325_v51 = vpop.f32.mrb[40].mxu0 }
 0xa5b   : > { %v5326_v47 = vadd.f32 %v5325_v51, %v5228_v39  ;;  %v5327_v44 = vpop.f32.mrb[41].mxu0 }
 0xa5c   : > { %v5328_v20 = vadd.f32 %v5327_v44, %v5232_v48  ;;  %5482 = vmatprep.mubr.f32.mxu1 %v5355_v40 }
 0xa5d   : > { %5483 = vmatmul.mubr.f32.vlgmr.msra.gmra.mrb[48].mxu1 %v5354_v35  ;;  %v5356_v30 = vmax.f32 %v5326_v47, 0.0 }
 0xa5e   : > { %v5357_v10 = vmax.f32 %v5328_v20, 0.0  ;;  %v5331_v11 = vpop.f32.mrb[42].mxu0 }
 0xa5f   : > { %v5332_v28 = vadd.f32 %v5331_v11, %v5228_v39  ;;  %v5333_v55 = vpop.f32.mrb[43].mxu0 }
 0xa60   : > { %v5334_v60 = vadd.f32 %v5333_v55, %v5232_v48  ;;  %5487 = vmatprep.mubr.f32.mxu1 %v5357_v10 }
 0xa61   : > { %5488 = vmatmul.mubr.f32.gmra.mrb[50].mxu1 %v5356_v30  ;;  %v5358_v53 = vmax.f32 %v5332_v28, 0.0 }
 0xa62   : > { %v5359_v61 = vmax.f32 %v5334_v60, 0.0  ;;  %v5337_v25 = vpop.f32.mrb[44].mxu0 }
 0xa63   : > { %v5338_v27 = vadd.f32 %v5337_v25, %v5228_v39  ;;  %v5339_v23 = vpop.f32.mrb[45].mxu0 }
 0xa64   : > { %v5340_v59 = vadd.f32 %v5339_v23, %v5232_v48  ;;  %5492 = vmatprep.mubr.f32.mxu1 %v5359_v61 }
 0xa65   : > { %5493 = vmatmul.mubr.f32.gmra.mrb[52].mxu1 %v5358_v53  ;;  %v5360_v36 = vmax.f32 %v5338_v27, 0.0 }
 0xa66   : > { %v5361_v26 = vmax.f32 %v5340_v59, 0.0  ;;  %v5343_v2 = vpop.f32.mrb[46].mxu0 }
 0xa67   : > { %v5344_v14 = vadd.f32 %v5343_v2, %v5228_v39  ;;  %v5345_v8 = vpop.f32.mrb[47].mxu0 }
 0xa68   : > { %v5346_v33 = vadd.f32 %v5345_v8, %v5232_v48  ;;  %5497 = vmatprep.mubr.f32.mxu1 %v5361_v26 }
 0xa69   : > { %5498 = vmatmul.mubr.f32.gmra.mrb[54].mxu1 %v5360_v36  ;;  %v5362_v17 = vmax.f32 %v5344_v14, 0.0 }
 0xa6a   : > { %v5363_v9 = vmax.f32 %v5346_v33, 0.0 }
 0xa6c   : > { %5502 = vmatprep.mubr.f32.mxu1 %v5363_v9 }
 0xa6d   : > { %5503 = vmatmul.mubr.f32.gmra.mrb[56].mxu1 %v5362_v17 }
 0xb1f   : > { %v6200_v15 = vpop.f32.mrb[48].mxu0 }
 0xb20   : > { %v6201_v13 = vpop.f32.mrb[49].mxu0 }
 0xb21   : > { %v6202_v62 = vadd.f32 %v6201_v13, %v6200_v15 }
 0xb23   : > { %v5470_v45 = vadd.f32 %v6202_v62, %v5962_v3  ;;  %v6203_v50 = vpop.f32.mrb[50].mxu0 }
 0xb24   : > { %v6204_v31 = vpop.f32.mrb[51].mxu0 }
 0xb25   : > { %v6205_v42 = vadd.f32 %v6204_v31, %v6203_v50  ;;  %v5508_v39 = vadd.f32 %v5470_v45, %v9294_v43 }
 0xb27   : > { %v5475_v48 = vadd.f32 %v6205_v42, %v5962_v3  ;;  %5516 = vadd.xlane.f32.xlu1 %v5508_v39 }
 0xb29   : > { %v5509_v12 = vadd.f32 %v5475_v48, %v9301_v29 }
 0xb2b   : > { %5518 = vadd.xlane.f32.xlu0 %v5509_v12 }
 0xb2c   : > { %v6206_v34 = vpop.f32.mrb[52].mxu0 }
 0xb2d   : > { %v6207_v54 = vpop.f32.mrb[53].mxu0 }
 0xb2e   : > { %v6208_v56 = vadd.f32 %v6207_v54, %v6206_v34 }
 0xb30   : > { %v5480_v38 = vadd.f32 %v6208_v56, %v5962_v3  ;;  %v6209_v16 = vpop.f32.mrb[48].mxu1 }
 0xb31   : > { %v6210_v46 = vpop.f32.mrb[49].mxu1 }
 0xb32   : > { %v6211_v1 = vadd.f32 %v6210_v46, %v6209_v16  ;;  %v5510_v18 = vadd.f32 %v5480_v38, %v9313_v52 }
 0xb34   : > { %v5485_v21 = vadd.f32 %v6211_v1, %v5962_v3  ;;  %v6212_v4 = vpop.f32.mrb[50].mxu1  ;;  %5520 = vadd.xlane.f32.xlu1 %v5510_v18 }
 0xb35   : > { %v6213_v7 = vpop.f32.mrb[51].mxu1 }
 0xb36   : > { %v6214_v5 = vadd.f32 %v6213_v7, %v6212_v4  ;;  %v5511_v43 = vadd.f32 %v5485_v21, %v9322_v57  ;;  %v9405_v7 = vld [vmem:[%s9595_s29] ss:$0 sm:$0xff] }
 0xb38   : > { %v5490_v32 = vadd.f32 %v6214_v5, %v5962_v3  ;;  %v6215_v58 = vpop.f32.mrb[52].mxu1  ;;  %5522 = vadd.xlane.f32.xlu0 %v5511_v43 }
 0xb39   : > { %v6216_v29 = vpop.f32.mrb[53].mxu1 }
 0xb3a   : > { %v6217_v19 = vadd.f32 %v6216_v29, %v6215_v58  ;;  %v5512_v0 = vadd.f32 %v5490_v32, %v9329_v6 }
 0xb3c   : > { %v5495_v22 = vadd.f32 %v6217_v19, %v5962_v3  ;;  %v6218_v63 = vpop.f32.mrb[54].mxu1  ;;  %5524 = vadd.xlane.f32.xlu1 %v5512_v0 }
 0xb3d   : > { %v6219_v37 = vpop.f32.mrb[55].mxu1 }
 0xb3e   : > { %v6220_v40 = vadd.f32 %v6219_v37, %v6218_v63  ;;  %v5513_v52 = vadd.f32 %v5495_v22, %v9341_v49 }
 0xb40   : > { %v5500_v51 = vadd.f32 %v6220_v40, %v5962_v3  ;;  %5526 = vadd.xlane.f32.xlu0 %v5513_v52  ;;  %v6221_v35 = vpop.f32.mrb[56].mxu1 }
 0xb41   : > { %v6222_v47 = vpop.f32.mrb[57].mxu1 }
 0xb42   : > { %v6223_v44 = vadd.f32 %v6222_v47, %v6221_v35  ;;  %v5514_v57 = vadd.f32 %v5500_v51, %v9347_v24 }
 0xb44   : > { %v5505_v20 = vadd.f32 %v6223_v44, %v5962_v3  ;;  %5528 = vadd.xlane.f32.xlu1 %v5514_v57 }
 0xb46   : > { %v5515_v10 = vadd.f32 %v5505_v20, %v9354_v41 }
 0xb48   : > { %5530 = vadd.xlane.f32.xlu0 %v5515_v10 }
 0xbb4   : > { %v5517_v6 = vpop.xlane.xlu1 %5516 }
 0xbb5   : > { %v5532_v11 = vmul.f32 0.0078125, %v5517_v6 }
 0xbb7   : > { %v5540_v30 = vsub.f32 %v5508_v39, %v5532_v11 }
 0xbb8   : > { %v5519_v28 = vpop.xlane.xlu0 %5518 }
 0xbb9   : > { %v5533_v55 = vmul.f32 0.0078125, %v5519_v28  ;;  %v5548_v60 = vmul.f32 %v5540_v30, %v5540_v30 }
 0xbbb   : > { %v5541_v61 = vsub.f32 %v5509_v12, %v5533_v55  ;;  %5556 = vadd.xlane.f32.xlu1 %v5548_v60 }
 0xbbd   : > { %v5549_v49 = vmul.f32 %v5541_v61, %v5541_v61 }
 0xbbf   : > { %5558 = vadd.xlane.f32.xlu0 %v5549_v49 }
 0xbc1   : > { %v5521_v25 = vpop.xlane.xlu1 %5520 }
 0xbc2   : > { %v5534_v53 = vmul.f32 0.0078125, %v5521_v25 }
 0xbc4   : > { %v9373_v27 = vsub.f32 %v5510_v18, %v5534_v53  ;;  %v9400_v18 = vld [vmem:[%s9594_s13] ss:$0 sm:$0xff]  ;;  %s7334_s13 = sshll.u32 %s7458_s12, 4  ;;  %s7335_s13 = int_to_ptr.vmem [resolvable:$false] %s7334_s13 }
 0xbc5   : > { %v5523_v24 = vpop.xlane.xlu0 %5522  ;;  %s7336_s20 = scalar_lea.vmem %s7335_s13, 2048  ;;  %p7337_p5 = scmp.lt.s32.totalorder %s9445_s30, %s7335_s13 }
 0xbc6   : > { %v5535_v23 = vmul.f32 0.0078125, %v5523_v24  ;;  %v5550_v41 = vmul.f32 %v9373_v27, %v9373_v27  ;;  %p7338_p6 = scmp.lt.s32.totalorder %s7336_s20, %s7330_s19 }
 0xbc8   : > { %v9377_v59 = vsub.f32 %v5511_v43, %v5535_v23  ;;  %5560 = vadd.xlane.f32.xlu1 %v5550_v41  ;;  %p7339_p7 = por %p7338_p6, %p7337_p5 }
 0xbc9   : > { %v5525_v26 = vpop.xlane.xlu1 %5524 }
 0xbca   : > { %v5536_v2 = vmul.f32 0.0078125, %v5525_v26  ;;  %v5551_v36 = vmul.f32 %v9377_v59, %v9377_v59  ;;  %p7340_p9 = pnand %p7339_p7, %p7333_p4 }
 0xbcc   : > { %v9381_v14 = vsub.f32 %v5512_v0, %v5536_v2  ;;  %5562 = vadd.xlane.f32.xlu0 %v5551_v36 }
 0xbcd   : > { %v5527_v8 = vpop.xlane.xlu0 %5526 }
 0xbce   : > { %v5537_v33 = vmul.f32 0.0078125, %v5527_v8  ;;  %v5552_v9 = vmul.f32 %v9381_v14, %v9381_v14 }
 0xbd0   : > { %v9385_v17 = vsub.f32 %v5513_v52, %v5537_v33  ;;  %5564 = vadd.xlane.f32.xlu1 %v5552_v9 }
 0xbd1   : > { %v5529_v15 = vpop.xlane.xlu1 %5528 }
 0xbd2   : > { %v5538_v3 = vmul.f32 0.0078125, %v5529_v15  ;;  %v5553_v13 = vmul.f32 %v9385_v17, %v9385_v17 }
 0xbd4   : > { %v9389_v62 = vsub.f32 %v5514_v57, %v5538_v3  ;;  %5566 = vadd.xlane.f32.xlu0 %v5553_v13 }
 0xbd5   : > { %v5531_v45 = vpop.xlane.xlu0 %5530 }
 0xbd6   : > { %v5539_v50 = vmul.f32 0.0078125, %v5531_v45  ;;  %v5554_v31 = vmul.f32 %v9389_v62, %v9389_v62 }
 0xbd8   : > { %v9393_v42 = vsub.f32 %v5515_v10, %v5539_v50  ;;  %5568 = vadd.xlane.f32.xlu1 %v5554_v31 }
 0xbda   : > { %v5555_v39 = vmul.f32 %v9393_v42, %v9393_v42 }
 0xbdc   : > { %5570 = vadd.xlane.f32.xlu0 %v5555_v39 }
 0xc48   : > { %v5557_v48 = vpop.xlane.xlu1 %5556 }
 0xc49   : > { %v5572_v12 = vmul.f32 0.0078125, %v5557_v48 }
 0xc4b   : > { %v5580_v34 = vadd.f32 1e-05, %v5572_v12 }
 0xc4c   : > { %v5559_v54 = vpop.xlane.xlu0 %5558 }
 0xc4d   : > { %7166 = vrsqrt.f32 %v5580_v34  ;;  %v5573_v56 = vmul.f32 0.0078125, %v5559_v54 }
 0xc4f   : > { %v5581_v38 = vadd.f32 1e-05, %v5573_v56 }
 0xc51   : > { %7168 = vrsqrt.f32 %v5581_v38 }
 0xc55   : > { %v5561_v16 = vpop.xlane.xlu1 %5560 }
 0xc56   : > { %v5574_v46 = vmul.f32 0.0078125, %v5561_v16 }
 0xc57   : > { %v7167_v1 = vpop.eup %7166 }
 0xc58   : > { %v5596_v21 = vmul.f32 %v7167_v1, %v5540_v30  ;;  %v5582_v4 = vadd.f32 1e-05, %v5574_v46 }
 0xc59   : > { %v5563_v5 = vpop.xlane.xlu0 %5562 }
 0xc5a   : > { %v5611_v43 = vmul.f32 %v9400_v18, %v5596_v21  ;;  %7170 = vrsqrt.f32 %v5582_v4  ;;  %v5575_v32 = vmul.f32 0.0078125, %v5563_v5 }
 0xc5b   : > { %v7169_v58 = vpop.eup %7168 }
 0xc5c   : > { %v5626_v29 = vadd.f32 %v9405_v7, %v5611_v43  ;;  %v5597_v19 = vmul.f32 %v7169_v58, %v5541_v61  ;;  %v5583_v0 = vadd.f32 1e-05, %v5575_v32 }
 0xc5d   : > { %v5565_v22 = vpop.xlane.xlu1 %5564 }
 0xc5e   : > { %5634 = vst [vmem:[%s7773_s10] sm:$0xff] %v5626_v29  ;;  %v5612_v63 = vmul.f32 %v9400_v18, %v5597_v19  ;;  %7172 = vrsqrt.f32 %v5583_v0  ;;  %v5576_v37 = vmul.f32 0.0078125, %v5565_v22 }
 0xc60   : > { %v5627_v40 = vadd.f32 %v9405_v7, %v5612_v63  ;;  %v5584_v52 = vadd.f32 1e-05, %v5576_v37 }
 0xc61   : > { %v5567_v51 = vpop.xlane.xlu0 %5566 }
 0xc62   : > { %5635 = vst [vmem:[%s7773_s10 + $0x8] sm:$0xff] %v5627_v40  ;;  %7174 = vrsqrt.f32 %v5584_v52  ;;  %v5577_v35 = vmul.f32 0.0078125, %v5567_v51 }
 0xc64   : > { %v7171_v47 = vpop.eup %7170  ;;  %v5585_v44 = vadd.f32 1e-05, %v5577_v35 }
 0xc65   : > { %v5598_v57 = vmul.f32 %v7171_v47, %v9373_v27  ;;  %v5569_v20 = vpop.xlane.xlu1 %5568 }
 0xc66   : > { %7176 = vrsqrt.f32 %v5585_v44  ;;  %v5578_v10 = vmul.f32 0.0078125, %v5569_v20 }
 0xc67   : > { %v5613_v6 = vmul.f32 %v9400_v18, %v5598_v57 }
 0xc68   : > { %v7173_v11 = vpop.eup %7172  ;;  %v5586_v30 = vadd.f32 1e-05, %v5578_v10 }
 0xc69   : > { %v5628_v28 = vadd.f32 %v9405_v7, %v5613_v6  ;;  %v5599_v55 = vmul.f32 %v7173_v11, %v9377_v59  ;;  %v5571_v60 = vpop.xlane.xlu0 %5570 }
 0xc6a   : > { %7178 = vrsqrt.f32 %v5586_v30  ;;  %v5579_v61 = vmul.f32 0.0078125, %v5571_v60 }
 0xc6b   : > { %5636 = vst [vmem:[%s7773_s10 + $0x10] sm:$0xff] %v5628_v28  ;;  %v5614_v49 = vmul.f32 %v9400_v18, %v5599_v55 }
 0xc6c   : > { %v7175_v25 = vpop.eup %7174  ;;  %v5587_v53 = vadd.f32 1e-05, %v5579_v61 }
 0xc6d   : > { %v5629_v27 = vadd.f32 %v9405_v7, %v5614_v49  ;;  %v5600_v24 = vmul.f32 %v7175_v25, %v9381_v14 }
 0xc6e   : > { %7180 = vrsqrt.f32 %v5587_v53 }
 0xc6f   : > { %5637 = vst [vmem:[%s7773_s10 + $0x18] sm:$0xff] %v5629_v27  ;;  %v5615_v23 = vmul.f32 %v9400_v18, %v5600_v24 }
 0xc70   : > { %v7177_v41 = vpop.eup %7176 }
 0xc71   : > { %v5630_v59 = vadd.f32 %v9405_v7, %v5615_v23  ;;  %v5601_v26 = vmul.f32 %v7177_v41, %v9385_v17 }
 0xc73   : > { %5638 = vst [vmem:[%s7773_s10 + $0x20] sm:$0xff] %v5630_v59  ;;  %v5616_v2 = vmul.f32 %v9400_v18, %v5601_v26 }
 0xc74   : > { %v7179_v36 = vpop.eup %7178 }
 0xc75   : > { %v5631_v14 = vadd.f32 %v9405_v7, %v5616_v2  ;;  %v5602_v8 = vmul.f32 %v7179_v36, %v9389_v62 }
 0xc77   : > { %5639 = vst [vmem:[%s7773_s10 + $0x28] sm:$0xff] %v5631_v14  ;;  %v5617_v33 = vmul.f32 %v9400_v18, %v5602_v8 }
 0xc78   : > { %v7181_v9 = vpop.eup %7180 }
 0xc79   : > { %v5632_v17 = vadd.f32 %v9405_v7, %v5617_v33  ;;  %v5603_v15 = vmul.f32 %v7181_v9, %v9393_v42 }
 0xc7b   : > { %5640 = vst [vmem:[%s7773_s10 + $0x30] sm:$0xff] %v5632_v17  ;;  %v5618_v3 = vmul.f32 %v9400_v18, %v5603_v15 }
 0xc7d   : > { %v5633_v13 = vadd.f32 %v9405_v7, %v5618_v3 }
 0xc7f   : > { %5641 = vst [vmem:[%s7773_s10 + $0x38] sm:$0xff] %v5633_v13 }
 0xc80   : > { %7343 = shalt.err (!%p7340_p9)
}
 0xc81   : > { %s7344_s10 = scalar_lea.hbm %s9443_s23, 1024  ;;  %s7348_s0 = scalar_lea.hbm %s9597_s17, 4096 }
 0xc82   : > { %p7345_p11 = scmp.ne.s32.totalorder %s9443_s23, %s7344_s10  ;;  %p7349_p2 = scmp.lt.u32.totalorder %s9443_s23, %s9597_s17 }
 0xc83   : > { %p7350_p0 = scmp.lt.u32.totalorder %s7348_s0, %s7344_s10  ;;  %p7352_p10 = scmp.lt.u32.totalorder %s7344_s10, %s9443_s23 }
 0xc84   : > { %p7346_p13 = pnand %p7345_p11, %p9598_p12 }
 0xc85   : > { %p7351_p8 = por %p7350_p0, %p7349_p2 }
 0xc86   : > { %p7347_p3 = pneg %p7346_p13 }
 0xc87   : > { %p7353_p1 = por %p7352_p10, %p7351_p8 }
 0xc89   : > { %p7354_p4 = pnand %p7353_p1, %p7347_p3 }
 0xc8b   : > { %7357 = shalt.err (!%p7354_p4)
}
 0xc8c   : > { %s7459_s21 = smov 128   ;;  %s7460_s14 = smov 8  }
 0xc8d   : > { %6828 = dma.vmem_to_hbm [thread:$0]  (%p9598_p12), %s9445_s30, 1024, %s9443_s23, %s5643_s8, %s7459_s21, %s7459_s21, %s7460_s14  }
 0xc8e   : > { %s5648_s19 = scalar_lea.sflag [#allocation15], %s7762_s16 }
 0xc8f   : > { %s5971_s12 = sshll.u32 %s7428_s25, 6  ;;  %s5697_s13 = sshll.u32 %s7775_s26, 4  ;;  %s5698_s13 = int_to_ptr.vmem [resolvable:$true] %s5697_s13 }
 0xc90   : > { %s5678_s20 = sadd.s32 %s5971_s12, %s5967_s27  ;;  %s9599_s30 = sld [smem:[#allocation41_spill]] }
 0xc91   : > { %s5972_s10 = sshll.u32 %s5678_s20, 7  ;;  %s7461_s23 = smov 1024  }
 0xc92   : > { %6829 = sst [smem:[#allocation17]] (%p9598_p12), %s7461_s23  ;;  %s7462_s8 = smov 2048  }
 0xc93   : > { %6830 = sst [smem:[#allocation17 + $0x1]] (%p9598_p12), %s7462_s8  ;;  %s7463_s0 = smov 8  }
 0xc94   : > { %6831 = sst [smem:[#allocation17 + $0x2]] (%p9598_p12), %s7463_s0  ;;  %s7464_s25 = smov 128  }
 0xc95   : > { %6832 = sst [smem:[#allocation17 + $0x3]] (%p9598_p12), %s7464_s25  ;;  %s7465_s24 = smov [#allocation16]  }
 0xc96   : > { %s5680_s16 = scalar_lea.hbm %s9599_s30, %s5972_s10  ;;  %6833 = sst [smem:[#allocation17 + $0x4]] (%p9598_p12), %s7464_s25 }
 0xc97   : > { %6834 = sst [smem:[#allocation17 + $0x5]] (%p9598_p12), %s7463_s0  ;;  %s7466_s26 = smov 0  }
 0xc98   : > { %6835 = dma.general (%p9598_p12), %s5698_s13, 4096, %s5680_s16, %s5648_s19, %s7465_s24, [#allocation17], %s7466_s26, 0  }
 0xc99 PF: > { %s9600_s27 = sld [smem:[#allocation27_spill]]  ;;  %s9601_s18 = sld [smem:[#allocation23_spill]] }
 0xc9a   : > { %s9602_s28 = sld [smem:[#allocation31_spill]] }
 0xc9f   : > { %p6871_p5 = scmp.ge.s32.totalorder %s9600_s27, 2  ;;  %s5725_s21 = sand.u32 1, %s9601_s18  }
 0xca0   : > { %p9603_p6 = scmp.ne.s32.totalorder %s9602_s28, 0  ;;  %s5726_s14 = scalar_lea.sflag [#allocation6], %s5725_s21 }
 0xca2   : > { %p6855_p7 = pnand %p6871_p5, %p9603_p6 }
 0xca4   : > { %7403 = dma.done.wait (!%p6855_p7), %s5726_s14, 1024  }
 0xca5   : > { %7405 = vsyncadd (!%p6855_p7), %s5726_s14, 4294966272  ;;  %s5735_s12 = scalar_lea.sflag [#allocation15], %s5725_s21 }
 0xca6   : > { %7407 = dma.done.wait (!%p6855_p7), %s5735_s12, 4096  }
 0xca7   : > { %7409 = vsyncadd (!%p6855_p7), %s5735_s12, 4294963200  ;;  %s36_s28 = sadd.s32 1, %s9600_s27   ;;  %s9604_s3 = sld [smem:[#allocation24_spill]] }
 0xca8   : > { %p33_p9 = scmp.ge.s32.totalorder %s36_s28, 6   ;;  %s9605_s23 = sld [smem:[#allocation32_spill]] }
 0xca9   : > { %s9606_s24 = sld [smem:[#allocation25_spill]]  ;;  %s9607_s25 = sld [smem:[#allocation26_spill]] }
 0xcaa   : > { %s9608_s26 = sld [smem:[#allocation28_spill]]  ;;  %s9609_s27 = sld [smem:[#allocation30_spill]] }
 0xcab   : > { %s9610_s21 = smov %s7416_s22  ;;  %35 = sbr.rel (!%p33_p9) target bundleno = 20 (0x14), region = 163 }
 0xcad   : > { %s9611_s22 = smov %s9604_s3 }
 0xcb2   :  { %5740 = vsyncpa [#allocation5], 1 }
 0xcb3   :  { %5742 = vsyncpa [#allocation5 + $0x1], 1 }
 0xcb4   :  { %5743 = vsyncpa [#allocation8], 1 }
 0xcb5   :  { %5744 = vsyncpa [#allocation11], 1 }
 0xcb6   :  { %5745 = vsyncpa [#allocation6], 1 }
 0xcb7   :  { %5747 = vsyncpa [#allocation6 + $0x1], 1 }
 0xcb8   :  { %5748 = vsyncpa [#allocation15], 1 }
 0xcb9   :  { %5750 = vsyncpa [#allocation15 + $0x1], 1 }

// kernel: tpu_custom_call.1
= control target key start
LH: loop header
LB: loop body
LE: loop exit
PB: predicated region body
PF: predicated region fallthrough
CT: control target
= control target key end

     0   :  { %s9523_s0 = inlined_call_operand.vmem [shape: f32[2,128,128], index: 0, kind: input, shape index: {}]   ;;  %s9524_s1 = inlined_call_operand.hbm [shape: f32[128,128], index: 1, kind: input, shape index: {}]   ;;  %s9525_s2 = inlined_call_operand.vmem [shape: f32[1,128], index: 2, kind: input, shape index: {}]   ;;  %s9526_s3 = inlined_call_operand.hbm [shape: f32[256,128], index: 3, kind: input, shape index: {}]   ;;  %s9527_s4 = inlined_call_operand.vmem [shape: f32[256,1], index: 4, kind: input, shape index: {}]   ;;  %s9528_s5 = inlined_call_operand.hbm [shape: f32[128,128], index: 5, kind: input, shape index: {}]   ;;  %s9529_s6 = inlined_call_operand.vmem [shape: f32[1,128], index: 6, kind: input, shape index: {}]   ;;  %s9530_s7 = inlined_call_operand.vmem [shape: f32[1,128], index: 7, kind: input, shape index: {}]   ;;  %s9531_s8 = inlined_call_operand.vmem [shape: f32[1,128], index: 8, kind: input, shape index: {}]   ;;  %s9532_s9 = inlined_call_operand.hbm [shape: f32[128,256], index: 9, kind: input, shape index: {}]   ;;  %s9533_s10 = inlined_call_operand.vmem [shape: f32[1,256], index: 10, kind: input, shape index: {}]   ;;  %s9534_s11 = inlined_call_operand.hbm [shape: f32[256,128], index: 11, kind: input, shape index: {}]   ;;  %s9535_s12 = inlined_call_operand.vmem [shape: f32[1,128], index: 12, kind: input, shape index: {}]   ;;  %s9536_s13 = inlined_call_operand.vmem [shape: f32[1,128], index: 13, kind: input, shape index: {}]   ;;  %s9537_s14 = inlined_call_operand.vmem [shape: f32[1,128], index: 14, kind: input, shape index: {}]   ;;  %s9538_s15 = inlined_call_operand.hbm [shape: f32[2,128,128], index: 15, kind: output, shape index: {0}]   ;;  %s9539_s16 = inlined_call_operand.hbm [shape: f32[2,4,128,128], index: 16, kind: output, shape index: {1}]  }
   0x1   :  { %9560 = sst [smem:[#allocation33_spill]] %s9523_s0 }
   0x2   :  { %9561 = sst [smem:[#allocation34_spill]] %s9526_s3 }
   0x3   :  { %9562 = sst [smem:[#allocation35_spill]] %s9531_s8 }
   0x4   :  { %9563 = sst [smem:[#allocation36_spill]] %s9533_s10 }
   0x5   :  { %9564 = sst [smem:[#allocation37_spill]] %s9535_s12 }
   0x6   :  { %9565 = sst [smem:[#allocation38_spill]] %s9536_s13 }
   0x7   :  { %9566 = sst [smem:[#allocation39_spill]] %s9537_s14 }
   0x8   :  { %9567 = sst [smem:[#allocation40_spill]] %s9538_s15 }
   0x9   :  { %9568 = sst [smem:[#allocation41_spill]] %s9539_s16 }
   0xa   :  { %22 = vsyncpa [#allocation5], 0 }
   0xb   :  { %23 = vsyncpa [#allocation8], 0 }
   0xc   :  { %24 = vsyncpa [#allocation11], 0 }
   0xd   :  { %25 = vsyncpa [#allocation6], 0 }
   0xe   :  { %27 = vsyncpa [#allocation6 + $0x1], 0 }
   0xf   :  { %28 = vsyncpa [#allocation15], 0 }
  0x10   :  { %30 = vsyncpa [#allocation15 + $0x1], 0  ;;  %s7552_s21 = smov 0   ;;  %s7554_s22 = smov 0  }
  0x11   :  { %s7556_s23 = smov 0   ;;  %s7558_s24 = smov 0  }
  0x12   :  { %s7560_s25 = smov 0   ;;  %s7562_s26 = smov 0  }
  0x13   :  { %s7564_s27 = smov 0   ;;  %s7566_s28 = smov 0  }
  0x14 LB: > { %9569 = sst [smem:[#allocation23_spill]] %s7412_s21  ;;  %s5873_s29 = sadd.s32 4294967295, %s7440_s28   ;;  %s7440_s28 = sphi %s7566_s28, %s36_s28   ;;  %s7436_s27 = sphi %s7564_s27, %s9609_s27   ;;  %s7432_s26 = sphi %s7562_s26, %s9608_s26   ;;  %s7428_s25 = sphi %s7560_s25, %s9607_s25   ;;  %s7424_s24 = sphi %s7558_s24, %s9606_s24   ;;  %s7420_s23 = sphi %s7556_s23, %s9605_s23   ;;  %s7416_s22 = sphi %s7554_s22, %s9611_s22   ;;  %s7412_s21 = sphi %s7552_s21, %s9610_s21  }
  0x15   : > { %9570 = sst [smem:[#allocation24_spill]] %s7420_s23  ;;  %s5874_s30 = sadd.s32 4294967294, %s7440_s28  }
  0x16   : > { %9571 = sst [smem:[#allocation25_spill]] %s7432_s26  ;;  %s45_s0 = sadd.s32 1, %s7432_s26 }
  0x17   : > { %9572 = sst [smem:[#allocation26_spill]] %s7436_s27  ;;  %s48_s17 = sadd.s32 1, %s7436_s27 }
  0x18   : > { %9573 = sst [smem:[#allocation27_spill]] %s7440_s28  ;;  %p46_p0 = scmp.ge.s32.totalorder %s45_s0, 2 }
  0x19   : > { %s377_s18 = sadd.s32 1, %s7420_s23  ;;  %p387_p1 = scmp.ne.s32.totalorder %s7420_s23, %s7416_s22 }
  0x1a   : > { %p388_p2 = scmp.eq.s32.totalorder %s5873_s29, 3  ;;  %s9613_s0 = smov (%p46_p0, %s45_s0), 0 }
  0x1b   : > { %9574 = sst [smem:[#allocation28_spill]] %s9613_s0  ;;  %s9615_s17 = smov (!%p46_p0, %s48_s17), %s7436_s27 }
  0x1c   : > { %s373_s19 = ssub.s32 %s7432_s26, %s9613_s0  ;;  %p7604_p3 = por %p388_p2, %p387_p1 }
  0x1d   : > { %p50_p4 = scmp.ge.s32.totalorder %s9615_s17, 2  ;;  %p393_p5 = scmp.ne.s32.totalorder %s7416_s22, %s7412_s21 }
  0x1e   : > { %s9575_s20 = scalar_select %p7604_p3, 1, 0 }
  0x1f   : > { %p394_p6 = scmp.eq.s32.totalorder %s5874_s30, 3  ;;  %p5875_p7 = scmp.ge.s32.totalorder %s7440_s28, 1 }
  0x20   : > { %9576 = sst [smem:[#allocation29_spill]] %s9575_s20  ;;  %s9617_s17 = smov (%p50_p4, %s9615_s17), 0 }
  0x21   : > { %9577 = sst [smem:[#allocation30_spill]] %s9617_s17  ;;  %p7613_p8 = por %p394_p6, %p393_p5 }
  0x22   : > { %p429_p9 = scmp.lt.s32.totalorder %s7440_s28, 5  ;;  %s372_s15 = ssub.s32 %s7436_s27, %s9617_s17 }
  0x23   : > { %s9578_s16 = scalar_select %p7613_p8, 1, 0 }
  0x24   : > { %s374_s14 = sor.u32 %s373_s19, %s372_s15  ;;  %p7620_p10 = pnand %p5875_p7, %p429_p9 }
  0x25   : > { %9579 = sst [smem:[#allocation31_spill]] %s9578_s16  ;;  %p375_p11 = scmp.eq.s32.totalorder %s374_s14, 0 }
  0x26   : > { %s9580_s0 = scalar_select %p7620_p10, 1, 0 }
  0x27   : > { %p7624_p12 = scmp.eq.s32.totalorder %s5873_s29, 0  ;;  %p6838_p13 = pneg %p7620_p10 }
  0x28   : > { %s7631_s30 = scalar_select %p375_p11, %s7420_s23, %s377_s18  }
  0x29   : > { %s9581_s26 = scalar_select %p7624_p12, 1, 0 }
  0x2a   : > { %9582 = sst [smem:[#allocation32_spill]] %s7631_s30  ;;  %p7635_p0 = pnand %p7624_p12, %p6838_p13 }
  0x2b   : > { %s7442_s15 = smov [#allocation7]   ;;  %s7443_s17 = smov [#allocation10]  }
  0x2c   : > { %s457_s19 = sshll.u32 %s7442_s15, 4  ;;  %s495_s14 = sshll.u32 %s7443_s17, 4  ;;  %s458_s19 = int_to_ptr.vmem [resolvable:$true] %s457_s19  ;;  %s496_s14 = int_to_ptr.vmem [resolvable:$true] %s495_s14 }
  0x2d   : > { %s9584_s3 = sld [smem:[#allocation34_spill]]  ;;  %p7647_p2 = pneg %p7635_p0 }
  0x33   : > { %s7190_s21 = scalar_lea.hbm %s9584_s3, 4096 }
  0x34   : > { %p7191_p1 = scmp.ne.s32.totalorder %s9584_s3, %s7190_s21  ;;  %p7197_p6 = scmp.lt.u32.totalorder %s7190_s21, %s9584_s3 }
  0x36   : > { %p7193_p4 = pnand %p7647_p2, %p7191_p1 }
  0x38   : > { %p7194_p5 = pneg %p7193_p4 }
  0x3a   : > { %p7199_p7 = pnand %p7197_p6, %p7194_p5 }
  0x3c   : > { %7202 = shalt.err (!%p7199_p7)
}
  0x3d   : > { %s7203_s27 = scalar_lea.vmem %s458_s19, 4096  ;;  %p7211_p8 = scmp.lt.s32.totalorder %s458_s19, %s458_s19 }
  0x3e   : > { %p7204_p9 = scmp.ne.s32.totalorder %s458_s19, %s7203_s27  ;;  %p7212_p3 = scmp.lt.s32.totalorder %s7203_s27, %s7203_s27 }
  0x40   : > { %p7206_p11 = pnand %p7204_p9, %p7647_p2  ;;  %p7213_p12 = por %p7212_p3, %p7211_p8 }
  0x42   : > { %p7207_p13 = pneg %p7206_p11 }
  0x44   : > { %p7214_p10 = pnand %p7213_p12, %p7207_p13 }
  0x46   : > { %7217 = shalt.err (!%p7214_p10)
}
  0x47   : > { %s9556_s28 = smov 128   ;;  %s9558_s17 = smov 8  }
  0x48   : > { %6844 = dma.hbm_to_vmem [thread:$0]  (!%p7635_p0), %s9584_s3, 4096, %s458_s19, [#allocation8], %s9556_s28, %s9556_s28, %s9558_s17  }
  0x49   : > { %s7218_s15 = scalar_lea.hbm %s9532_s9, 4096 }
  0x4a   : > { %p7219_p3 = scmp.ne.s32.totalorder %s9532_s9, %s7218_s15  ;;  %p7225_p12 = scmp.lt.u32.totalorder %s7218_s15, %s9532_s9 }
  0x4c   : > { %p7221_p8 = pnand %p7219_p3, %p7647_p2 }
  0x4e   : > { %p7222_p10 = pneg %p7221_p8 }
  0x50   : > { %p7227_p1 = pnand %p7225_p12, %p7222_p10 }
  0x52   : > { %7230 = shalt.err (!%p7227_p1)
}
  0x53   : > { %s7231_s21 = scalar_lea.vmem %s496_s14, 4096  ;;  %p7239_p7 = scmp.lt.s32.totalorder %s496_s14, %s496_s14 }
  0x54   : > { %p7232_p4 = scmp.ne.s32.totalorder %s496_s14, %s7231_s21  ;;  %p7240_p9 = scmp.lt.s32.totalorder %s7231_s21, %s7231_s21 }
  0x56   : > { %p7234_p5 = pnand %p7232_p4, %p7647_p2  ;;  %p7241_p11 = por %p7240_p9, %p7239_p7 }
  0x58   : > { %p7235_p6 = pneg %p7234_p5 }
  0x5a   : > { %p7242_p13 = pnand %p7241_p11, %p7235_p6 }
  0x5c   : > { %7245 = shalt.err (!%p7242_p13)
}
  0x5d   : > { %s7446_s23 = smov 256   ;;  %s7447_s19 = smov 16  }
  0x5e   : > { %6850 = dma.hbm_to_vmem [thread:$0]  (!%p7635_p0), %s9532_s9, 4096, %s496_s14, [#allocation11], %s7446_s23, %s7446_s23, %s7447_s19  }
  0x5f   : > { %s7448_s20 = smov [#allocation4]   ;;  %s7449_s29 = smov [#allocation9]  }
  0x60   : > { %s441_s30 = sshll.u32 %s7448_s20, 4  ;;  %s473_s15 = sshll.u32 %s7449_s29, 4  ;;  %s442_s30 = int_to_ptr.vmem [resolvable:$true] %s441_s30  ;;  %s474_s15 = int_to_ptr.vmem [resolvable:$true] %s473_s15 }
  0x61   : > { %s7246_s21 = scalar_lea.hbm %s9524_s1, 2048 }
  0x62   : > { %p7247_p3 = scmp.ne.s32.totalorder %s9524_s1, %s7246_s21  ;;  %p7253_p12 = scmp.lt.u32.totalorder %s7246_s21, %s9524_s1 }
  0x64   : > { %p7249_p8 = pnand %p7247_p3, %p7647_p2 }
  0x66   : > { %p7250_p10 = pneg %p7249_p8 }
  0x68   : > { %p7255_p1 = pnand %p7253_p12, %p7250_p10 }
  0x6a   : > { %7258 = shalt.err (!%p7255_p1)
}
  0x6b   : > { %s7259_s14 = scalar_lea.vmem %s442_s30, 2048  ;;  %p7267_p7 = scmp.lt.s32.totalorder %s442_s30, %s442_s30 }
  0x6c   : > { %p7260_p4 = scmp.ne.s32.totalorder %s442_s30, %s7259_s14  ;;  %p7268_p9 = scmp.lt.s32.totalorder %s7259_s14, %s7259_s14 }
  0x6e   : > { %p7262_p5 = pnand %p7260_p4, %p7647_p2  ;;  %p7269_p11 = por %p7268_p9, %p7267_p7 }
  0x70   : > { %p7263_p6 = pneg %p7262_p5 }
  0x72   : > { %p7270_p13 = pnand %p7269_p11, %p7263_p6 }
  0x74   : > { %7273 = shalt.err (!%p7270_p13)
}
  0x75   : > { %s9586_s3 = smov 8   ;;  %s9587_s28 = smov 128  }
  0x76   : > { %6841 = dma.hbm_to_vmem [thread:$0]  (!%p7635_p0), %s9524_s1, 2048, %s442_s30, [#allocation5], %s9587_s28, %s9587_s28, %s9586_s3  }
  0x77   : > { %s7274_s19 = scalar_lea.hbm %s9528_s5, 2048 }
  0x78   : > { %p7275_p3 = scmp.ne.s32.totalorder %s9528_s5, %s7274_s19  ;;  %p7281_p12 = scmp.lt.u32.totalorder %s7274_s19, %s9528_s5 }
  0x7a   : > { %p7277_p8 = pnand %p7275_p3, %p7647_p2 }
  0x7c   : > { %p7278_p10 = pneg %p7277_p8 }
  0x7e   : > { %p7283_p1 = pnand %p7281_p12, %p7278_p10 }
  0x80   : > { %7286 = shalt.err (!%p7283_p1)
}
  0x81   : > { %s7287_s27 = scalar_lea.vmem %s474_s15, 2048  ;;  %p7295_p7 = scmp.lt.s32.totalorder %s474_s15, %s474_s15 }
  0x82   : > { %p7288_p4 = scmp.ne.s32.totalorder %s474_s15, %s7287_s27  ;;  %p7296_p9 = scmp.lt.s32.totalorder %s7287_s27, %s7287_s27 }
  0x84   : > { %p7290_p5 = pnand %p7288_p4, %p7647_p2  ;;  %p7297_p11 = por %p7296_p9, %p7295_p7 }
  0x86   : > { %p7291_p6 = pneg %p7290_p5 }
  0x88   : > { %p7298_p13 = pnand %p7297_p11, %p7291_p6 }
  0x8a   : > { %7301 = shalt.err (!%p7298_p13)
}
  0x8b   : > { %6847 = dma.hbm_to_vmem [thread:$0]  (!%p7635_p0), %s9528_s5, 2048, %s474_s15, [#allocation8], %s9587_s28, %s9587_s28, %s9586_s3  }
  0x8c   : > { %s7450_s14 = smov [#allocation12]   ;;  %s7302_s23 = scalar_lea.hbm %s9534_s11, 4096 }
  0x8d   : > { %s511_s8 = sshll.u32 %s7450_s14, 4  ;;  %p7303_p3 = scmp.ne.s32.totalorder %s9534_s11, %s7302_s23  ;;  %s512_s8 = int_to_ptr.vmem [resolvable:$true] %s511_s8 }
  0x8e   : > { %p7309_p12 = scmp.lt.u32.totalorder %s7302_s23, %s9534_s11 }
  0x8f   : > { %p7305_p8 = pnand %p7303_p3, %p7647_p2 }
  0x91   : > { %p7306_p10 = pneg %p7305_p8 }
  0x93   : > { %p7311_p1 = pnand %p7309_p12, %p7306_p10 }
  0x95   : > { %7314 = shalt.err (!%p7311_p1)
}
  0x96   : > { %s7315_s15 = scalar_lea.vmem %s512_s8, 4096  ;;  %p7323_p7 = scmp.lt.s32.totalorder %s512_s8, %s512_s8 }
  0x97   : > { %p7316_p4 = scmp.ne.s32.totalorder %s512_s8, %s7315_s15  ;;  %p7324_p9 = scmp.lt.s32.totalorder %s7315_s15, %s7315_s15 }
  0x99   : > { %p7318_p5 = pnand %p7316_p4, %p7647_p2  ;;  %p7325_p11 = por %p7324_p9, %p7323_p7 }
  0x9b   : > { %p7319_p6 = pneg %p7318_p5 }
  0x9d   : > { %p7326_p13 = pnand %p7325_p11, %p7319_p6 }
  0x9f   : > { %7329 = shalt.err (!%p7326_p13)
}
  0xa0   : > { %6853 = dma.hbm_to_vmem [thread:$0]  (!%p7635_p0), %s9534_s11, 4096, %s512_s8, [#allocation11], %s9587_s28, %s9587_s28, %s9586_s3  }
  0xa1   : > { %p9588_p3 = scmp.ne.s32.totalorder %s9580_s0, 0 }
  0xa2   : > { %p9589_p2 = scmp.ne.s32.totalorder (!%p9588_p3), %s9581_s26, 0 }
  0xa3   : > { %544 = sbr.rel (%p9588_p3) target bundleno = 3225 (0xc99), region = 80 }
  0xaa   : > { %7391 = dma.done.wait (%p9589_p2), [#allocation5], 2048  }
  0xab   : > { %7393 = vsyncadd (%p9589_p2), [#allocation5], 4294965248 }
  0xac   : > { %7395 = dma.done.wait (%p9589_p2), [#allocation8], 6144  }
  0xad   : > { %7397 = vsyncadd (%p9589_p2), [#allocation8], 4294961152 }
  0xae   : > { %7399 = dma.done.wait (%p9589_p2), [#allocation11], 8192  }
  0xaf   : > { %7401 = vsyncadd (%p9589_p2), [#allocation11], 4294959104  ;;  %s7762_s16 = sand.u32 1, %s7416_s22   ;;  %p615_p0 = scmp.lt.s32.totalorder %s7428_s25, 1 }
  0xb0   : > { %s5888_s0 = sshll.u32 %s7762_s16, 6  ;;  %s5889_s18 = sshll.u32 %s7762_s16, 8 }
  0xb1   : > { %s616_s3 = scalar_select %p615_p0, %s7428_s25, 1 }
  0xb2   : > { %s9590_s14 = sld [smem:[#allocation33_spill]]  ;;  %s7773_s10 = scalar_lea.vmem [#allocation13], %s5888_s0 }
  0xb3   : > { %s5975_s28 = sshll.u32 %s616_s3, 7  ;;  %s7775_s26 = scalar_lea.vmem [#allocation14], %s5889_s18 }
  0xb4   : > { %p5892_p8 = scmp.ne.s32.totalorder %s7424_s24, 0 }
  0xb5   : > { %v7451_v5 = vmov (!%p5892_p8), 0   ;;  %v676_v7 = vld [vmem:[%s9527_s4 + $0x10] sm:$0xff] (!%p5892_p8)  ;;  %v674_v8 = vld [vmem:[%s9527_s4] sm:$0xff] (!%p5892_p8)  ;;  %v677_v12 = vld [vmem:[%s9527_s4 + $0x18] sm:$0xff] (!%p5892_p8) }
  0xb6   : > { %625 = sbr.rel (%p5892_p8) target bundleno = 496 (0x1f0), region = 104  ;;  %6961 = vset.pattern.permute.xlu1 (!%p5892_p8), %v7451_v5  ;;  %6960 = vset.pattern.permute.xlu0 (!%p5892_p8), %v7451_v5  ;;  %v642_v11 = vld [vmem:[#allocation7] sm:$0xff] (!%p5892_p8)  ;;  %v675_v13 = vld [vmem:[%s9527_s4 + $0x8] sm:$0xff] (!%p5892_p8)  ;;  %v681_v20 = vld [vmem:[%s9527_s4 + $0x38] sm:$0xff] (!%p5892_p8) }
  0xb7   : > { %718 = vperm.xlu1 (!%p5892_p8), %6961, %v676_v7   ;;  %708 = vperm.xlu0 (!%p5892_p8), %6960, %v674_v8   ;;  %v658_v14 = vld [vmem:[#allocation7 + $0x80] sm:$0xff] (!%p5892_p8)  ;;  %v679_v16 = vld [vmem:[%s9527_s4 + $0x28] sm:$0xff] (!%p5892_p8)  ;;  %v680_v21 = vld [vmem:[%s9527_s4 + $0x30] sm:$0xff] (!%p5892_p8) }
  0xb8   : > { %s7771_s8 = scalar_lea.vmem %s9590_s14, %s5975_s28  ;;  %6256 = vmatprep.mubr.f32.mxu0 (!%p5892_p8), %v642_v11  ;;  %6280 = vmatprep.mubr.f32.mxu1 (!%p5892_p8), %v658_v14  ;;  %v678_v17 = vld [vmem:[%s9527_s4 + $0x20] sm:$0xff] (!%p5892_p8)  ;;  %v683_v23 = vld [vmem:[%s9527_s4 + $0x48] sm:$0xff] (!%p5892_p8)  ;;  %v685_v27 = vld [vmem:[%s9527_s4 + $0x58] sm:$0xff] (!%p5892_p8) }
  0xb9   : > { %v626_v0 = vld [vmem:[%s7771_s8] sm:$0xff] (!%p5892_p8)  ;;  %v627_v1 = vld [vmem:[%s7771_s8 + $0x8] sm:$0xff] (!%p5892_p8)  ;;  %v628_v2 = vld [vmem:[%s7771_s8 + $0x10] sm:$0xff] (!%p5892_p8) }
  0xba   : > { %v6552_v3 = vpack.c.bf16 (!%p5892_p8), %v627_v1, %v626_v0  ;;  %v629_v4 = vld [vmem:[%s7771_s8 + $0x18] sm:$0xff] (!%p5892_p8)  ;;  %v630_v9 = vld [vmem:[%s7771_s8 + $0x20] sm:$0xff] (!%p5892_p8)  ;;  %v631_v10 = vld [vmem:[%s7771_s8 + $0x28] sm:$0xff] (!%p5892_p8) }
  0xbb   : > { %v6556_v6 = vpack.c.bf16 (!%p5892_p8), %v629_v4, %v628_v2  ;;  %v6560_v15 = vpack.c.bf16 (!%p5892_p8), %v631_v10, %v630_v9  ;;  %723 = vperm.xlu1 (!%p5892_p8), %6961, %v677_v12   ;;  %713 = vperm.xlu0 (!%p5892_p8), %6960, %v675_v13   ;;  %v632_v18 = vld [vmem:[%s7771_s8 + $0x30] sm:$0xff] (!%p5892_p8)  ;;  %v633_v19 = vld [vmem:[%s7771_s8 + $0x38] sm:$0xff] (!%p5892_p8)  ;;  %v682_v24 = vld [vmem:[%s9527_s4 + $0x40] sm:$0xff] (!%p5892_p8) }
  0xbc   : > { %6553 = vmatprep.subr.bf16.mxu0 (!%p5892_p8), %v6552_v3  ;;  %6776 = vmatprep.subr.bf16.mxu1 (!%p5892_p8), %v6552_v3  ;;  %v6564_v22 = vpack.c.bf16 (!%p5892_p8), %v633_v19, %v632_v18  ;;  %v634_v25 = vld [vmem:[%s7771_s8 + $0x40] sm:$0xff] (!%p5892_p8)  ;;  %v635_v26 = vld [vmem:[%s7771_s8 + $0x48] sm:$0xff] (!%p5892_p8)  ;;  %v684_v28 = vld [vmem:[%s9527_s4 + $0x50] sm:$0xff] (!%p5892_p8) }
  0xbd   : > { %6555 = vmatpush3.bf16.xpose.msra.mxu0 %v6552_v3  ;;  %6784 = vmatpush3.bf16.xpose.msra.mxu1 %v6552_v3  ;;  %v6568_v29 = vpack.c.bf16 %v635_v26, %v634_v25  ;;  %v687_v30 = vld [vmem:[%s9527_s4 + $0x68] sm:$0xff]  ;;  %v686_v31 = vld [vmem:[%s9527_s4 + $0x60] sm:$0xff]  ;;  %v636_v32 = vld [vmem:[%s7771_s8 + $0x50] sm:$0xff] }
  0xbe   : > { %6557 = vmatprep.subr.bf16.mxu0 %v6556_v6  ;;  %6777 = vmatprep.subr.bf16.mxu1 %v6556_v6  ;;  %v637_v33 = vld [vmem:[%s7771_s8 + $0x58] sm:$0xff]  ;;  %v688_v35 = vld [vmem:[%s9527_s4 + $0x70] sm:$0xff]  ;;  %v691_v37 = vld [vmem:[%s9527_s4 + $0x88] sm:$0xff] }
  0xbf   : > { %733 = vperm.xlu1 %6961, %v679_v16   ;;  %728 = vperm.xlu0 %6960, %v678_v17   ;;  %v689_v34 = vld [vmem:[%s9527_s4 + $0x78] sm:$0xff]  ;;  %v6572_v36 = vpack.c.bf16 %v637_v33, %v636_v32  ;;  %v690_v38 = vld [vmem:[%s9527_s4 + $0x80] sm:$0xff]  ;;  %v639_v40 = vld [vmem:[%s7771_s8 + $0x68] sm:$0xff] }
  0xc0   : > { %v638_v39 = vld [vmem:[%s7771_s8 + $0x60] sm:$0xff]  ;;  %v693_v41 = vld [vmem:[%s9527_s4 + $0x98] sm:$0xff]  ;;  %v692_v42 = vld [vmem:[%s9527_s4 + $0x90] sm:$0xff] }
  0xc1   : > { %v6576_v43 = vpack.c.bf16 %v639_v40, %v638_v39  ;;  %v695_v44 = vld [vmem:[%s9527_s4 + $0xa8] sm:$0xff]  ;;  %v694_v45 = vld [vmem:[%s9527_s4 + $0xa0] sm:$0xff]  ;;  %v640_v46 = vld [vmem:[%s7771_s8 + $0x70] sm:$0xff] }
  0xc2   : > { %v641_v47 = vld [vmem:[%s7771_s8 + $0x78] sm:$0xff]  ;;  %v696_v49 = vld [vmem:[%s9527_s4 + $0xb0] sm:$0xff]  ;;  %v699_v51 = vld [vmem:[%s9527_s4 + $0xc8] sm:$0xff] }
  0xc3   : > { %743 = vperm.xlu1 %6961, %v681_v20   ;;  %738 = vperm.xlu0 %6960, %v680_v21   ;;  %v697_v48 = vld [vmem:[%s9527_s4 + $0xb8] sm:$0xff]  ;;  %v6580_v50 = vpack.c.bf16 %v641_v47, %v640_v46  ;;  %v698_v52 = vld [vmem:[%s9527_s4 + $0xc0] sm:$0xff]  ;;  %v700_v54 = vld [vmem:[%s9527_s4 + $0xd0] sm:$0xff] }
  0xc4   : > { %v701_v53 = vld [vmem:[%s9527_s4 + $0xd8] sm:$0xff]  ;;  %v703_v55 = vld [vmem:[%s9527_s4 + $0xe8] sm:$0xff]  ;;  %v702_v56 = vld [vmem:[%s9527_s4 + $0xe0] sm:$0xff] }
  0xc5   : > { %6559 = vmatpush3.bf16.xpose.msra.mxu0 %v6556_v6  ;;  %6785 = vmatpush3.bf16.xpose.msra.mxu1 %v6556_v6  ;;  %v705_v57 = vld [vmem:[%s9527_s4 + $0xf8] sm:$0xff]  ;;  %v704_v58 = vld [vmem:[%s9527_s4 + $0xf0] sm:$0xff]  ;;  %v643_v59 = vld [vmem:[#allocation7 + $0x8] sm:$0xff] }
  0xc6   : > { %6561 = vmatprep.subr.bf16.mxu0 %v6560_v15  ;;  %6778 = vmatprep.subr.bf16.mxu1 %v6560_v15  ;;  %v659_v60 = vld [vmem:[#allocation7 + $0x88] sm:$0xff]  ;;  %v644_v61 = vld [vmem:[#allocation7 + $0x10] sm:$0xff]  ;;  %v645_v63 = vld [vmem:[#allocation7 + $0x18] sm:$0xff] }
  0xc7   : > { %753 = vperm.xlu1 %6961, %v683_v23   ;;  %748 = vperm.xlu0 %6960, %v682_v24   ;;  %v660_v62 = vld [vmem:[#allocation7 + $0x90] sm:$0xff]  ;;  %v661_v0 = vld [vmem:[#allocation7 + $0x98] sm:$0xff]  ;;  %v646_v1 = vld [vmem:[#allocation7 + $0x20] sm:$0xff] }
  0xc8   : > { %v662_v2 = vld [vmem:[#allocation7 + $0xa0] sm:$0xff]  ;;  %v647_v3 = vld [vmem:[#allocation7 + $0x28] sm:$0xff]  ;;  %v648_v5 = vld [vmem:[#allocation7 + $0x30] sm:$0xff] }
  0xc9   : > { %v663_v4 = vld [vmem:[#allocation7 + $0xa8] sm:$0xff]  ;;  %v664_v6 = vld [vmem:[#allocation7 + $0xb0] sm:$0xff]  ;;  %v649_v7 = vld [vmem:[#allocation7 + $0x38] sm:$0xff] }
  0xca   : > { %v665_v8 = vld [vmem:[#allocation7 + $0xb8] sm:$0xff]  ;;  %v650_v9 = vld [vmem:[#allocation7 + $0x40] sm:$0xff]  ;;  %v651_v11 = vld [vmem:[#allocation7 + $0x48] sm:$0xff] }
  0xcb   : > { %763 = vperm.xlu1 %6961, %v685_v27   ;;  %758 = vperm.xlu0 %6960, %v684_v28   ;;  %v666_v10 = vld [vmem:[#allocation7 + $0xc0] sm:$0xff]  ;;  %v667_v12 = vld [vmem:[#allocation7 + $0xc8] sm:$0xff]  ;;  %v652_v13 = vld [vmem:[#allocation7 + $0x50] sm:$0xff] }
  0xcc   : > { %v668_v14 = vld [vmem:[#allocation7 + $0xd0] sm:$0xff]  ;;  %v669_v16 = vld [vmem:[#allocation7 + $0xd8] sm:$0xff]  ;;  %v654_v17 = vld [vmem:[#allocation7 + $0x60] sm:$0xff] }
  0xcd   : > { %6563 = vmatpush3.bf16.xpose.msra.mxu0 %v6560_v15  ;;  %6786 = vmatpush3.bf16.xpose.msra.mxu1 %v6560_v15  ;;  %v653_v15 = vld [vmem:[#allocation7 + $0x58] sm:$0xff]  ;;  %v670_v18 = vld [vmem:[#allocation7 + $0xe0] sm:$0xff]  ;;  %v655_v19 = vld [vmem:[#allocation7 + $0x68] sm:$0xff] }
  0xce   : > { %6565 = vmatprep.subr.bf16.mxu0 %v6564_v22  ;;  %6779 = vmatprep.subr.bf16.mxu1 %v6564_v22  ;;  %v671_v20 = vld [vmem:[#allocation7 + $0xe8] sm:$0xff]  ;;  %v656_v21 = vld [vmem:[#allocation7 + $0x70] sm:$0xff]  ;;  %v657_v23 = vld [vmem:[#allocation7 + $0x78] sm:$0xff] }
  0xcf   : > { %773 = vperm.xlu1 %6961, %v687_v30   ;;  %768 = vperm.xlu0 %6960, %v686_v31   ;;  %v673_v24 = vld [vmem:[#allocation7 + $0xf8] sm:$0xff] }
  0xd3   : > { %783 = vperm.xlu1 %6961, %v689_v34   ;;  %778 = vperm.xlu0 %6960, %v688_v35  }
  0xd5   : > { %6567 = vmatpush3.bf16.xpose.msra.mxu0 %v6564_v22  ;;  %6787 = vmatpush3.bf16.xpose.msra.mxu1 %v6564_v22  ;;  %v672_v22 = vld [vmem:[#allocation7 + $0xf0] sm:$0xff] }
  0xd6   : > { %6569 = vmatprep.subr.bf16.mxu0 %v6568_v29  ;;  %6780 = vmatprep.subr.bf16.mxu1 %v6568_v29 }
  0xd7   : > { %793 = vperm.xlu1 %6961, %v691_v37   ;;  %788 = vperm.xlu0 %6960, %v690_v38  }
  0xdb   : > { %803 = vperm.xlu1 %6961, %v693_v41   ;;  %798 = vperm.xlu0 %6960, %v692_v42  }
  0xdd   : > { %6571 = vmatpush3.bf16.xpose.msra.mxu0 %v6568_v29  ;;  %6788 = vmatpush3.bf16.xpose.msra.mxu1 %v6568_v29 }
  0xde   : > { %6573 = vmatprep.subr.bf16.mxu0 %v6572_v36  ;;  %6781 = vmatprep.subr.bf16.mxu1 %v6572_v36 }
  0xdf   : > { %813 = vperm.xlu1 %6961, %v695_v44   ;;  %808 = vperm.xlu0 %6960, %v694_v45  }
  0xe3   : > { %823 = vperm.xlu1 %6961, %v697_v48   ;;  %818 = vperm.xlu0 %6960, %v696_v49  }
  0xe5   : > { %6575 = vmatpush3.bf16.xpose.msra.mxu0 %v6572_v36  ;;  %6789 = vmatpush3.bf16.xpose.msra.mxu1 %v6572_v36 }
  0xe6   : > { %6577 = vmatprep.subr.bf16.mxu0 %v6576_v43  ;;  %6782 = vmatprep.subr.bf16.mxu1 %v6576_v43 }
  0xe7   : > { %833 = vperm.xlu1 %6961, %v699_v51   ;;  %828 = vperm.xlu0 %6960, %v698_v52  }
  0xeb   : > { %843 = vperm.xlu1 %6961, %v701_v53   ;;  %838 = vperm.xlu0 %6960, %v700_v54  }
  0xed   : > { %6579 = vmatpush3.bf16.xpose.msra.mxu0 %v6576_v43  ;;  %6790 = vmatpush3.bf16.xpose.msra.mxu1 %v6576_v43 }
  0xee   : > { %6581 = vmatprep.subr.bf16.mxu0 %v6580_v50  ;;  %6783 = vmatprep.subr.bf16.mxu1 %v6580_v50 }
  0xef   : > { %853 = vperm.xlu1 %6961, %v703_v55   ;;  %848 = vperm.xlu0 %6960, %v702_v56  }
  0xf3   : > { %863 = vperm.xlu1 %6961, %v705_v57   ;;  %858 = vperm.xlu0 %6960, %v704_v58  }
  0xf5   : > { %6583 = vmatpush3.bf16.xpose.msra.mxu0 %v6580_v50  ;;  %6791 = vmatpush3.bf16.xpose.msra.mxu1 %v6580_v50 }
  0xfc   : > { %6257 = vmatmul.mubr.f32.vlgmr.msra.gmra.mrb[0].mxu0 %v643_v59  ;;  %6281 = vmatmul.mubr.f32.vlgmr.msra.gmra.mrb[0].mxu1 %v659_v60 }
  0xfd   : > { %6259 = vmatprep.mubr.f32.mxu0 %v644_v61  ;;  %6283 = vmatprep.mubr.f32.mxu1 %v660_v62 }
 0x100   : > { %6260 = vmatmul.mubr.f32.gmra.mrb[2].mxu0 %v645_v63  ;;  %6284 = vmatmul.mubr.f32.gmra.mrb[2].mxu1 %v661_v0 }
 0x101   : > { %6262 = vmatprep.mubr.f32.mxu0 %v646_v1  ;;  %6286 = vmatprep.mubr.f32.mxu1 %v662_v2 }
 0x104   : > { %6263 = vmatmul.mubr.f32.gmra.mrb[4].mxu0 %v647_v3  ;;  %6287 = vmatmul.mubr.f32.gmra.mrb[4].mxu1 %v663_v4 }
 0x105   : > { %6265 = vmatprep.mubr.f32.mxu0 %v648_v5  ;;  %6289 = vmatprep.mubr.f32.mxu1 %v664_v6 }
 0x108   : > { %6266 = vmatmul.mubr.f32.gmra.mrb[6].mxu0 %v649_v7  ;;  %6290 = vmatmul.mubr.f32.gmra.mrb[6].mxu1 %v665_v8 }
 0x109   : > { %6268 = vmatprep.mubr.f32.mxu0 %v650_v9  ;;  %6292 = vmatprep.mubr.f32.mxu1 %v666_v10 }
 0x10c   : > { %6269 = vmatmul.mubr.f32.gmra.mrb[8].mxu0 %v651_v11  ;;  %6293 = vmatmul.mubr.f32.gmra.mrb[8].mxu1 %v667_v12 }
 0x10d   : > { %6271 = vmatprep.mubr.f32.mxu0 %v652_v13  ;;  %6295 = vmatprep.mubr.f32.mxu1 %v668_v14 }
 0x110   : > { %6272 = vmatmul.mubr.f32.gmra.mrb[10].mxu0 %v653_v15  ;;  %6296 = vmatmul.mubr.f32.gmra.mrb[10].mxu1 %v669_v16 }
 0x111   : > { %6274 = vmatprep.mubr.f32.mxu0 %v654_v17  ;;  %6298 = vmatprep.mubr.f32.mxu1 %v670_v18 }
 0x114   : > { %6275 = vmatmul.mubr.f32.gmra.mrb[12].mxu0 %v655_v19  ;;  %6299 = vmatmul.mubr.f32.gmra.mrb[12].mxu1 %v671_v20 }
 0x115   : > { %6277 = vmatprep.mubr.f32.mxu0 %v656_v21  ;;  %6301 = vmatprep.mubr.f32.mxu1 %v672_v22 }
 0x118   : > { %6278 = vmatmul.mubr.f32.gmra.mrb[14].mxu0 %v657_v23  ;;  %6302 = vmatmul.mubr.f32.gmra.mrb[14].mxu1 %v673_v24 }
 0x136   : > { %v719_v25 = vpop.permute.xlu1 %718  ;;  %v709_v26 = vpop.permute.xlu0 %708 }
 0x13a   : > { %v724_v27 = vpop.permute.xlu1 %723  ;;  %v714_v28 = vpop.permute.xlu0 %713 }
 0x13e   : > { %v734_v29 = vpop.permute.xlu1 %733  ;;  %v729_v30 = vpop.permute.xlu0 %728 }
 0x142   : > { %v744_v31 = vpop.permute.xlu1 %743  ;;  %v7890_v32 = vpop.permute.xlu0 %738 }
 0x146   : > { %v7892_v33 = vpop.permute.xlu1 %753  ;;  %v7894_v34 = vpop.permute.xlu0 %748 }
 0x14a   : > { %v7896_v35 = vpop.permute.xlu1 %763  ;;  %v7898_v36 = vpop.permute.xlu0 %758 }
 0x14e   : > { %v7900_v37 = vpop.permute.xlu1 %773  ;;  %v7902_v38 = vpop.permute.xlu0 %768 }
 0x152   : > { %v7904_v39 = vpop.permute.xlu1 %783  ;;  %v7906_v40 = vpop.permute.xlu0 %778 }
 0x156   : > { %v794_v41 = vpop.permute.xlu1 %793  ;;  %v789_v42 = vpop.permute.xlu0 %788 }
 0x15a   : > { %v804_v43 = vpop.permute.xlu1 %803  ;;  %v799_v44 = vpop.permute.xlu0 %798 }
 0x15e   : > { %v814_v45 = vpop.permute.xlu1 %813  ;;  %v809_v46 = vpop.permute.xlu0 %808 }
 0x162   : > { %v824_v47 = vpop.permute.xlu1 %823  ;;  %v819_v48 = vpop.permute.xlu0 %818 }
 0x166   : > { %v834_v57 = vpop.permute.xlu1 %833  ;;  %v829_v58 = vpop.permute.xlu0 %828 }
 0x16a   : > { %v844_v11 = vpop.permute.xlu1 %843  ;;  %v839_v12 = vpop.permute.xlu0 %838 }
 0x1cf   : > { %v6258_v49 = vpop.f32.mrb[0].mxu0  ;;  %v6282_v50 = vpop.f32.mrb[0].mxu1 }
 0x1d0   : > { %v938_v51 = vadd.f32 %v6258_v49, %v714_v28  ;;  %v1018_v52 = vadd.f32 %v6282_v50, %v794_v41  ;;  %v932_v53 = vpop.f32.mrb[1].mxu0  ;;  %v1012_v54 = vpop.f32.mrb[1].mxu1 }
 0x1d1   : > { %v933_v55 = vadd.f32 %v932_v53, %v709_v26  ;;  %v1013_v56 = vadd.f32 %v1012_v54, %v789_v42 }
 0x1d2   : > { %1092 = vst [vmem:[#allocation2 + $0x8] sm:$0xff] %v938_v51  ;;  %1108 = vst [vmem:[#allocation3 + $0x8] sm:$0xff] %v1018_v52 }
 0x1d3   : > { %1091 = vst [vmem:[#allocation2] sm:$0xff] %v933_v55  ;;  %1107 = vst [vmem:[#allocation3] sm:$0xff] %v1013_v56  ;;  %v6261_v59 = vpop.f32.mrb[2].mxu0  ;;  %v6285_v60 = vpop.f32.mrb[2].mxu1 }
 0x1d4   : > { %v948_v61 = vadd.f32 %v6261_v59, %v724_v27  ;;  %v1028_v62 = vadd.f32 %v6285_v60, %v804_v43  ;;  %v942_v63 = vpop.f32.mrb[3].mxu0  ;;  %v1022_v0 = vpop.f32.mrb[3].mxu1 }
 0x1d5   : > { %v943_v1 = vadd.f32 %v942_v63, %v719_v25  ;;  %v1023_v2 = vadd.f32 %v1022_v0, %v799_v44 }
 0x1d6   : > { %1094 = vst [vmem:[#allocation2 + $0x18] sm:$0xff] %v948_v61  ;;  %1110 = vst [vmem:[#allocation3 + $0x18] sm:$0xff] %v1028_v62 }
 0x1d7   : > { %1093 = vst [vmem:[#allocation2 + $0x10] sm:$0xff] %v943_v1  ;;  %1109 = vst [vmem:[#allocation3 + $0x10] sm:$0xff] %v1023_v2  ;;  %v6264_v3 = vpop.f32.mrb[4].mxu0  ;;  %v6288_v4 = vpop.f32.mrb[4].mxu1 }
 0x1d8   : > { %v958_v5 = vadd.f32 %v6264_v3, %v734_v29  ;;  %v1038_v6 = vadd.f32 %v6288_v4, %v814_v45  ;;  %v952_v7 = vpop.f32.mrb[5].mxu0  ;;  %v1032_v8 = vpop.f32.mrb[5].mxu1 }
 0x1d9   : > { %v953_v9 = vadd.f32 %v952_v7, %v729_v30  ;;  %v1033_v10 = vadd.f32 %v1032_v8, %v809_v46  ;;  %v854_v29 = vpop.permute.xlu1 %853  ;;  %v849_v30 = vpop.permute.xlu0 %848 }
 0x1da   : > { %1096 = vst [vmem:[#allocation2 + $0x28] sm:$0xff] %v958_v5  ;;  %1112 = vst [vmem:[#allocation3 + $0x28] sm:$0xff] %v1038_v6 }
 0x1db   : > { %1095 = vst [vmem:[#allocation2 + $0x20] sm:$0xff] %v953_v9  ;;  %1111 = vst [vmem:[#allocation3 + $0x20] sm:$0xff] %v1033_v10  ;;  %v6267_v13 = vpop.f32.mrb[6].mxu0  ;;  %v6291_v14 = vpop.f32.mrb[6].mxu1 }
 0x1dc   : > { %v968_v15 = vadd.f32 %v6267_v13, %v744_v31  ;;  %v1048_v16 = vadd.f32 %v6291_v14, %v824_v47  ;;  %v962_v17 = vpop.f32.mrb[7].mxu0  ;;  %v1042_v18 = vpop.f32.mrb[7].mxu1 }
 0x1dd   : > { %v963_v19 = vadd.f32 %v962_v17, %v7890_v32  ;;  %v1043_v20 = vadd.f32 %v1042_v18, %v819_v48  ;;  %v864_v52 = vpop.permute.xlu1 %863  ;;  %v859_v53 = vpop.permute.xlu0 %858 }
 0x1de   : > { %1098 = vst [vmem:[#allocation2 + $0x38] sm:$0xff] %v968_v15  ;;  %1114 = vst [vmem:[#allocation3 + $0x38] sm:$0xff] %v1048_v16 }
 0x1df   : > { %1097 = vst [vmem:[#allocation2 + $0x30] sm:$0xff] %v963_v19  ;;  %1113 = vst [vmem:[#allocation3 + $0x30] sm:$0xff] %v1043_v20  ;;  %v6270_v21 = vpop.f32.mrb[8].mxu0  ;;  %v6294_v22 = vpop.f32.mrb[8].mxu1 }
 0x1e0   : > { %v978_v23 = vadd.f32 %v6270_v21, %v7892_v33  ;;  %v1058_v24 = vadd.f32 %v6294_v22, %v834_v57  ;;  %v972_v25 = vpop.f32.mrb[9].mxu0  ;;  %v1052_v26 = vpop.f32.mrb[9].mxu1 }
 0x1e1   : > { %v973_v27 = vadd.f32 %v972_v25, %v7894_v34  ;;  %v1053_v28 = vadd.f32 %v1052_v26, %v829_v58 }
 0x1e2   : > { %1100 = vst [vmem:[#allocation2 + $0x48] sm:$0xff] %v978_v23  ;;  %1116 = vst [vmem:[#allocation3 + $0x48] sm:$0xff] %v1058_v24 }
 0x1e3   : > { %1099 = vst [vmem:[#allocation2 + $0x40] sm:$0xff] %v973_v27  ;;  %1115 = vst [vmem:[#allocation3 + $0x40] sm:$0xff] %v1053_v28  ;;  %v6273_v31 = vpop.f32.mrb[10].mxu0  ;;  %v6297_v32 = vpop.f32.mrb[10].mxu1 }
 0x1e4   : > { %v988_v41 = vadd.f32 %v6273_v31, %v7896_v35  ;;  %v1068_v42 = vadd.f32 %v6297_v32, %v844_v11  ;;  %v982_v43 = vpop.f32.mrb[11].mxu0  ;;  %v1062_v44 = vpop.f32.mrb[11].mxu1 }
 0x1e5   : > { %v983_v33 = vadd.f32 %v982_v43, %v7898_v36  ;;  %v1063_v45 = vadd.f32 %v1062_v44, %v839_v12 }
 0x1e6   : > { %1102 = vst [vmem:[#allocation2 + $0x58] sm:$0xff] %v988_v41  ;;  %1118 = vst [vmem:[#allocation3 + $0x58] sm:$0xff] %v1068_v42 }
 0x1e7   : > { %1101 = vst [vmem:[#allocation2 + $0x50] sm:$0xff] %v983_v33  ;;  %1117 = vst [vmem:[#allocation3 + $0x50] sm:$0xff] %v1063_v45  ;;  %v6276_v34 = vpop.f32.mrb[12].mxu0  ;;  %v6300_v46 = vpop.f32.mrb[12].mxu1 }
 0x1e8   : > { %v998_v47 = vadd.f32 %v6276_v34, %v7900_v37  ;;  %v1078_v48 = vadd.f32 %v6300_v46, %v854_v29  ;;  %v992_v49 = vpop.f32.mrb[13].mxu0  ;;  %v1072_v50 = vpop.f32.mrb[13].mxu1 }
 0x1e9   : > { %v993_v51 = vadd.f32 %v992_v49, %v7902_v38  ;;  %v1073_v35 = vadd.f32 %v1072_v50, %v849_v30 }
 0x1ea   : > { %1104 = vst [vmem:[#allocation2 + $0x68] sm:$0xff] %v998_v47  ;;  %1120 = vst [vmem:[#allocation3 + $0x68] sm:$0xff] %v1078_v48 }
 0x1eb   : > { %1103 = vst [vmem:[#allocation2 + $0x60] sm:$0xff] %v993_v51  ;;  %1119 = vst [vmem:[#allocation3 + $0x60] sm:$0xff] %v1073_v35  ;;  %v6279_v36 = vpop.f32.mrb[14].mxu0  ;;  %v6303_v54 = vpop.f32.mrb[14].mxu1 }
 0x1ec   : > { %v1008_v55 = vadd.f32 %v6279_v36, %v7904_v39  ;;  %v1088_v56 = vadd.f32 %v6303_v54, %v864_v52  ;;  %v1002_v57 = vpop.f32.mrb[15].mxu0  ;;  %v1082_v58 = vpop.f32.mrb[15].mxu1 }
 0x1ed   : > { %v1003_v37 = vadd.f32 %v1002_v57, %v7906_v40  ;;  %v1083_v59 = vadd.f32 %v1082_v58, %v859_v53 }
 0x1ee   : > { %1106 = vst [vmem:[#allocation2 + $0x78] sm:$0xff] %v1008_v55  ;;  %1122 = vst [vmem:[#allocation3 + $0x78] sm:$0xff] %v1088_v56 }
 0x1ef   : > { %1105 = vst [vmem:[#allocation2 + $0x70] sm:$0xff] %v1003_v37  ;;  %1121 = vst [vmem:[#allocation3 + $0x70] sm:$0xff] %v1083_v59 }
 0x1f0 PF: > { %v1133_v38 = vld [vmem:[#allocation4] sm:$0xff]  ;;  %v1134_v60 = vld [vmem:[#allocation4 + $0x8] sm:$0xff]  ;;  %v1135_v61 = vld [vmem:[#allocation4 + $0x10] sm:$0xff]  ;;  %s5893_s17 = sshll.u32 %s7424_s24, 6  ;;  %s7452_s12 = smov 64   ;;  %vm2453_vm0 = vcmask 261120  }
 0x1f1   : > { %v6584_v62 = vpack.c.bf16 %v1134_v60, %v1133_v38  ;;  %v1136_v63 = vld [vmem:[#allocation4 + $0x18] sm:$0xff]  ;;  %v1137_v0 = vld [vmem:[#allocation4 + $0x20] sm:$0xff]  ;;  %v1138_v1 = vld [vmem:[#allocation4 + $0x28] sm:$0xff]  ;;  %s7919_s23 = scalar_lea.vmem %s7771_s8, %s5893_s17  ;;  %s7453_s13 = smov 96   ;;  %vm4918_vm1 = vcmask 523264   ;;  %vm4927_vm2 = vcmask 785408  }
 0x1f2   : > { %v6588_v39 = vpack.c.bf16 %v1136_v63, %v1135_v61  ;;  %v6592_v40 = vpack.c.bf16 %v1138_v1, %v1137_v0  ;;  %v1125_v2 = vld [vmem:[%s7919_s23] sm:$0xff]  ;;  %v1139_v3 = vld [vmem:[#allocation4 + $0x30] sm:$0xff]  ;;  %v1140_v4 = vld [vmem:[#allocation4 + $0x38] sm:$0xff]  ;;  %s7454_s20 = smov 32   ;;  %s9591_s28 = sld [smem:[#allocation35_spill]] }
 0x1f3   : > { %6585 = vmatprep.subr.bf16.mxu0 %v6584_v62  ;;  %6336 = vmatprep.mubr.f32.mxu0 %v1125_v2  ;;  %v6596_v5 = vpack.c.bf16 %v1140_v4, %v1139_v3  ;;  %v1141_v6 = vld [vmem:[#allocation4 + $0x40] sm:$0xff]  ;;  %v1142_v7 = vld [vmem:[#allocation4 + $0x48] sm:$0xff]  ;;  %v1143_v9 = vld [vmem:[#allocation4 + $0x50] sm:$0xff]  ;;  %v1354_v3 = vlaneseq  ;;  %v7456_v4 = vmov 1934713408   ;;  %s9592_s14 = sld [smem:[#allocation36_spill]] }
 0x1f4   : > { %6587 = vmatpush3.bf16.msra.mxu0 %v6584_v62  ;;  %v6600_v8 = vpack.c.bf16 %v1142_v7, %v1141_v6  ;;  %v1144_v10 = vld [vmem:[#allocation4 + $0x58] sm:$0xff]  ;;  %v1145_v12 = vld [vmem:[#allocation4 + $0x60] sm:$0xff]  ;;  %v1146_v13 = vld [vmem:[#allocation4 + $0x68] sm:$0xff]  ;;  %s9593_s8 = sld [smem:[#allocation37_spill]]  ;;  %s9595_s29 = sld [smem:[#allocation39_spill]] }
 0x1f5   : > { %6589 = vmatprep.subr.bf16.mxu0 %v6588_v39  ;;  %v6604_v11 = vpack.c.bf16 %v1144_v10, %v1143_v9  ;;  %v6608_v14 = vpack.c.bf16 %v1146_v13, %v1145_v12  ;;  %v1147_v15 = vld [vmem:[#allocation4 + $0x70] sm:$0xff]  ;;  %v1148_v16 = vld [vmem:[#allocation4 + $0x78] sm:$0xff]  ;;  %v1126_v18 = vld [vmem:[%s7919_s23 + $0x8] sm:$0xff]  ;;  %v7999_v7 = vshrl.u32 %v1354_v3, 7  ;;  %s5967_s27 = sshll.u32 %s7424_s24, 3  ;;  %s5968_s0 = sshll.u32 %s7428_s25, 4 }
 0x1f6   : > { %v6612_v17 = vpack.c.bf16 %v1148_v16, %v1147_v15  ;;  %v1127_v19 = vld [vmem:[%s7919_s23 + $0x10] sm:$0xff]  ;;  %v1128_v20 = vld [vmem:[%s7919_s23 + $0x18] sm:$0xff]  ;;  %v1129_v21 = vld [vmem:[%s7919_s23 + $0x20] sm:$0xff]  ;;  %s5660_s18 = sadd.s32 %s5968_s0, %s5967_s27  ;;  %s9596_s3 = sld [smem:[#allocation29_spill]] }
 0x1f7   : > { %v1130_v22 = vld [vmem:[%s7919_s23 + $0x28] sm:$0xff]  ;;  %v1131_v23 = vld [vmem:[%s7919_s23 + $0x30] sm:$0xff]  ;;  %v1132_v24 = vld [vmem:[%s7919_s23 + $0x38] sm:$0xff]  ;;  %s5663_s30 = sshll.u32 %s7773_s10, 4  ;;  %s9597_s17 = sld [smem:[#allocation40_spill]]  ;;  %s9445_s30 = int_to_ptr.vmem [resolvable:$true] %s5663_s30 }
 0x1f8   : > { %6591 = vmatpush3.bf16.msra.mxu0 %v6588_v39  ;;  %v5894_v25 = vld [vmem:[%s9525_s2] ss:$0 sm:$0xff]  ;;  %v2438_v45 = vld [vmem:[#allocation2 + $0x8] sm:$0xff]  ;;  %v2439_v35 = vld [vmem:[#allocation2 + $0x10] sm:$0xff]  ;;  %s7330_s19 = scalar_lea.vmem %s9445_s30, 1024 }
 0x1f9   : > { %6593 = vmatprep.subr.bf16.mxu0 %v6592_v40  ;;  %v2437_v33 = vld [vmem:[#allocation2] sm:$0xff]  ;;  %v2450_v47 = vld [vmem:[#allocation2 + $0x68] sm:$0xff]  ;;  %v2440_v52 = vld [vmem:[#allocation2 + $0x18] sm:$0xff]  ;;  %p7331_p10 = scmp.ne.s32.totalorder %s9445_s30, %s7330_s19 }
 0x1fa   : > { %v2449_v34 = vld [vmem:[#allocation2 + $0x60] sm:$0xff]  ;;  %v6616_v46 = vpack.c.bf16 %v2438_v45, %v2437_v33  ;;  %v2451_v53 = vld [vmem:[#allocation2 + $0x70] sm:$0xff]  ;;  %v6620_v54 = vpack.c.bf16 %v2440_v52, %v2439_v35  ;;  %v2452_v55 = vld [vmem:[#allocation2 + $0x78] sm:$0xff] }
 0x1fb   : > { %v6640_v49 = vpack.c.bf16 %v2450_v47, %v2449_v34  ;;  %v6644_v56 = vpack.c.bf16 %v2452_v55, %v2451_v53  ;;  %v2441_v39 = vld [vmem:[#allocation2 + $0x20] sm:$0xff]  ;;  %v2442_v0 = vld [vmem:[#allocation2 + $0x28] sm:$0xff] }
 0x1fc   : > { %6595 = vmatpush3.bf16.msra.mxu0 %v6592_v40  ;;  %6617 = vmatprep.subr.bf16.mxu1 %v6616_v46  ;;  %v7996_v1 = vpack.c.bf16 %v2442_v0, %v2441_v39  ;;  %v7455_v40 = vmov 1983009808   ;;  %v2446_v33 = vld [vmem:[#allocation2 + $0x48] sm:$0xff]  ;;  %p9598_p12 = scmp.ne.s32.totalorder %s9596_s3, 0 }
 0x1fd   : > { %6597 = vmatprep.subr.bf16.mxu0 %v6596_v5  ;;  %6619 = vmatpush3.bf16.msra.mxu1 %v6616_v46  ;;  %v1352_v2 = vunpack.c.l.s4 %v7455_v40 }
 0x1fe   : > { %6621 = vmatprep.subr.bf16.mxu1 %v6620_v54  ;;  %p7332_p1 = pnand %p7331_p10, %p9598_p12 }
 0x1ff   : > { %v1353_v6 = vunpack.c.0.s8 %v1352_v2 }
 0x200   : > { %6599 = vmatpush3.bf16.msra.mxu0 %v6596_v5  ;;  %v1384_v5 = vunpack.c.l.s4 %v7456_v4  ;;  %p7333_p4 = pneg %p7332_p1 }
 0x201   : > { %6601 = vmatprep.subr.bf16.mxu0 %v6600_v8  ;;  %6623 = vmatpush3.bf16.msra.mxu1 %v6620_v54 }
 0x202   : > { %6625 = vmatprep.subr.bf16.mxu1 %v7996_v1  ;;  %v1385_v10 = vunpack.c.0.s8 %v1384_v5 }
 0x204   : > { %6603 = vmatpush3.bf16.msra.mxu0 %v6600_v8 }
 0x205   : > { %6605 = vmatprep.subr.bf16.mxu0 %v6604_v11 }
 0x208   : > { %6607 = vmatpush3.bf16.msra.mxu0 %v6604_v11  ;;  %v8002_v11 = vsub.s32 %v1353_v6, %v7999_v7 }
 0x209   : > { %6609 = vmatprep.subr.bf16.mxu0 %v6608_v14 }
 0x20c   : > { %6611 = vmatpush3.bf16.msra.mxu0 %v6608_v14 }
 0x20d   : > { %6613 = vmatprep.subr.bf16.mxu0 %v6612_v17 }
 0x210   : > { %6615 = vmatpush3.bf16.msra.mxu0 %v6612_v17 }
 0x211   : > { %6641 = vmatprep.subr.bf16.mxu0 %v6640_v49 }
 0x213   : > { %6337 = vmatmul.mubr.f32.vlgmr.msra.gmra.mrb[0].mxu0 %v1126_v18  ;;  %v8007_v18 = vsub.s32 %v1385_v10, %v7999_v7 }
 0x214   : > { %6339 = vmatprep.mubr.f32.mxu0 %v1127_v19  ;;  %6643 = vmatpush3.bf16.msra.mxu0 %v6640_v49 }
 0x215   : > { %6645 = vmatprep.subr.bf16.mxu0 %v6644_v56 }
 0x217   : > { %6340 = vmatmul.mubr.f32.gmra.mrb[2].mxu0 %v1128_v20 }
 0x218   : > { %6342 = vmatprep.mubr.f32.mxu0 %v1129_v21  ;;  %6647 = vmatpush3.bf16.msra.mxu0 %v6644_v56 }
 0x21b   : > { %6343 = vmatmul.mubr.f32.gmra.mrb[4].mxu0 %v1130_v22 }
 0x21c   : > { %6345 = vmatprep.mubr.f32.mxu0 %v1131_v23 }
 0x21f   : > { %6346 = vmatmul.mubr.f32.gmra.mrb[6].mxu0 %v1132_v24 }
 0x2e6   : > { %v6338_v26 = vpop.f32.mrb[0].mxu0 }
 0x2e7   : > { %v1228_v27 = vadd.f32 %v6338_v26, %v5894_v25  ;;  %v1222_v28 = vpop.f32.mrb[1].mxu0 }
 0x2e8   : > { %v1223_v30 = vadd.f32 %v5894_v25, %v1222_v28 }
 0x2e9   : > { %v7932_v29 = vmul.f32 0.17677669, %v1228_v27 }
 0x2ea   : > { %v6341_v31 = vpop.f32.mrb[2].mxu0  ;;  %v7938_v41 = vmul.f32 0.17677669, %v1223_v30 }
 0x2eb   : > { %1303 = vrot.lane.b32.xlu0 %v7932_v29, %s7452_s12  ;;  %1279 = vrot.lane.b32.xlu1 %v7932_v29, %s7453_s13  ;;  %v1232_v32 = vpop.f32.mrb[3].mxu0  ;;  %v1238_v43 = vadd.f32 %v6341_v31, %v5894_v25 }
 0x2ec   : > { %v1233_v36 = vadd.f32 %v5894_v25, %v1232_v32 }
 0x2ed   : > { %v7944_v50 = vmul.f32 0.17677669, %v1238_v43  ;;  %v2444_v43 = vld [vmem:[#allocation2 + $0x38] sm:$0xff] }
 0x2ee   : > { %v6344_v42 = vpop.f32.mrb[4].mxu0  ;;  %v7954_v57 = vmul.f32 0.17677669, %v1233_v36 }
 0x2ef   : > { %1327 = vrot.lane.b32.xlu1 %v7932_v29, %s7454_s20  ;;  %1277 = vrot.lane.b32.xlu0 %v7938_v41, %s7453_s13  ;;  %v1242_v44 = vpop.f32.mrb[5].mxu0  ;;  %v1248_v58 = vadd.f32 %v6344_v42, %v5894_v25 }
 0x2f0   : > { %v1243_v59 = vadd.f32 %v5894_v25, %v1242_v44  ;;  %v2445_v44 = vld [vmem:[#allocation2 + $0x40] sm:$0xff] }
 0x2f1   : > { %v7960_v37 = vmul.f32 0.17677669, %v1248_v58  ;;  %v8025_v55 = vpack.c.bf16 %v2446_v33, %v2445_v44 }
 0x2f2   : > { %v6347_v48 = vpop.f32.mrb[6].mxu0  ;;  %v7970_v38 = vmul.f32 0.17677669, %v1243_v59 }
 0x2f3   : > { %1325 = vrot.lane.b32.xlu1 %v7938_v41, %s7454_s20  ;;  %1301 = vrot.lane.b32.xlu0 %v7938_v41, %s7452_s12  ;;  %v1252_v51 = vpop.f32.mrb[7].mxu0  ;;  %v1258_v60 = vadd.f32 %v6347_v48, %v5894_v25 }
 0x2f4   : > { %v1253_v61 = vadd.f32 %v5894_v25, %v1252_v51 }
 0x2f5   : > { %v7976_v62 = vmul.f32 0.17677669, %v1258_v60 }
 0x2f6   : > { %v7978_v63 = vmul.f32 0.17677669, %v1253_v61 }
 0x2f7   : > { %1283 = vrot.lane.b32.xlu1 %v7944_v50, %s7453_s13  ;;  %1307 = vrot.lane.b32.xlu0 %v7944_v50, %s7452_s12 }
 0x2fb   : > { %1331 = vrot.lane.b32.xlu1 %v7944_v50, %s7454_s20  ;;  %1281 = vrot.lane.b32.xlu0 %v7954_v57, %s7453_s13 }
 0x2ff   : > { %1305 = vrot.lane.b32.xlu1 %v7954_v57, %s7452_s12  ;;  %1329 = vrot.lane.b32.xlu0 %v7954_v57, %s7454_s20 }
 0x303   : > { %1287 = vrot.lane.b32.xlu1 %v7960_v37, %s7453_s13  ;;  %1311 = vrot.lane.b32.xlu0 %v7960_v37, %s7452_s12 }
 0x307   : > { %1335 = vrot.lane.b32.xlu1 %v7960_v37, %s7454_s20  ;;  %1285 = vrot.lane.b32.xlu0 %v7970_v38, %s7453_s13 }
 0x30b   : > { %1309 = vrot.lane.b32.xlu1 %v7970_v38, %s7452_s12  ;;  %1333 = vrot.lane.b32.xlu0 %v7970_v38, %s7454_s20 }
 0x30f   : > { %1291 = vrot.lane.b32.xlu1 %v7976_v62, %s7453_s13  ;;  %1289 = vrot.lane.b32.xlu0 %v7978_v63, %s7453_s13 }
 0x313   : > { %1313 = vrot.lane.b32.xlu1 %v7978_v63, %s7452_s12  ;;  %1337 = vrot.lane.b32.xlu0 %v7978_v63, %s7454_s20 }
 0x317   : > { %1339 = vrot.lane.b32.xlu1 %v7976_v62, %s7454_s20  ;;  %1315 = vrot.lane.b32.xlu0 %v7976_v62, %s7452_s12 }
 0x35d   : > { %v1304_v8 = vpop.permute.xlu0 %1303  ;;  %v1280_v9 = vpop.permute.xlu1 %1279 }
 0x35e   : > { %v1417_v12 = vcombine.low %v7932_v29, %v1304_v8  ;;  %v1418_v13 = vcombine.high %v7932_v29, %v1304_v8  ;;  %v2443_v29 = vld [vmem:[#allocation2 + $0x30] sm:$0xff] }
 0x35f   : > { %v8023_v54 = vpack.c.bf16 %v2444_v43, %v2443_v29 }
 0x360   : > { %v1425_v19 = vrot.slane %v1417_v12, %v8002_v11  ;;  %v1432_v20 = vrot.slane %v1418_v13, %v8002_v11 }
 0x361   : > { %v1328_v14 = vpop.permute.xlu1 %1327  ;;  %v1278_v15 = vpop.permute.xlu0 %1277 }
 0x362   : > { %v1433_v16 = vcombine.low %v1280_v9, %v1328_v14  ;;  %v1434_v17 = vcombine.high %v1280_v9, %v1328_v14 }
 0x364   : > { %v1441_v21 = vrot.slane %v1433_v16, %v8002_v11  ;;  %v1448_v22 = vrot.slane %v1434_v17, %v8002_v11 }
 0x365   : > { %v1326_v23 = vpop.permute.xlu1 %1325  ;;  %v1302_v24 = vpop.permute.xlu0 %1301 }
 0x366   : > { %v1449_v25 = vcombine.low %v1425_v19, %v1441_v21  ;;  %v1450_v26 = vcombine.high %v1425_v19, %v1441_v21  ;;  %v1465_v27 = vcombine.low %v1432_v20, %v1448_v22  ;;  %v1466_v28 = vcombine.high %v1432_v20, %v1448_v22 }
 0x367   : > { %v1365_v30 = vcombine.low %v1278_v15, %v1326_v23  ;;  %v1366_v31 = vcombine.high %v1278_v15, %v1326_v23  ;;  %v1349_v32 = vcombine.low %v7938_v41, %v1302_v24  ;;  %v1350_v42 = vcombine.high %v7938_v41, %v1302_v24 }
 0x368   : > { %v1457_v45 = vrot.slane %v1449_v25, %v8007_v18  ;;  %v1464_v34 = vrot.slane %v1450_v26, %v8007_v18  ;;  %v1473_v46 = vrot.slane %v1465_v27, %v8007_v18  ;;  %v1480_v47 = vrot.slane %v1466_v28, %v8007_v18 }
 0x369   : > { %v1373_v48 = vrot.slane %v1365_v30, %v8002_v11  ;;  %v1380_v49 = vrot.slane %v1366_v31, %v8002_v11  ;;  %v1357_v51 = vrot.slane %v1349_v32, %v8002_v11  ;;  %v1364_v35 = vrot.slane %v1350_v42, %v8002_v11  ;;  %v1284_v41 = vpop.permute.xlu1 %1283  ;;  %v1308_v52 = vpop.permute.xlu0 %1307 }
 0x36a   : > { %v1961_v53 = vcombine.low %v1457_v45, %v1464_v34  ;;  %v5897_v36 = vcombine.high %v1457_v45, %v1464_v34  ;;  %v1977_v61 = vcombine.low %v1473_v46, %v1480_v47  ;;  %v5898_v39 = vcombine.high %v1473_v46, %v1480_v47 }
 0x36b   : > { %v1381_v56 = vcombine.low %v1357_v51, %v1373_v48  ;;  %v1382_v58 = vcombine.high %v1357_v51, %v1373_v48  ;;  %v1397_v59 = vcombine.low %v1364_v35, %v1380_v49  ;;  %v1398_v60 = vcombine.high %v1364_v35, %v1380_v49 }
 0x36c   : > { %v1553_v0 = vcombine.low %v7944_v50, %v1308_v52  ;;  %v1554_v40 = vcombine.high %v7944_v50, %v1308_v52  ;;  %v8034_v12 = vrot.slane %v1961_v53, %v8002_v11  ;;  %v8037_v13 = vrot.slane %v5897_v36, %v8002_v11 }
 0x36d   : > { %v1389_v2 = vrot.slane %v1381_v56, %v8007_v18  ;;  %v1396_v3 = vrot.slane %v1382_v58, %v8007_v18  ;;  %v1405_v4 = vrot.slane %v1397_v59, %v8007_v18  ;;  %v1412_v5 = vrot.slane %v1398_v60, %v8007_v18  ;;  %v1332_v6 = vpop.permute.xlu1 %1331  ;;  %v1282_v8 = vpop.permute.xlu0 %1281 }
 0x36e   : > { %v1569_v9 = vcombine.low %v1284_v41, %v1332_v6  ;;  %v1570_v10 = vcombine.high %v1284_v41, %v1332_v6  ;;  %v1561_v50 = vrot.slane %v1553_v0, %v8002_v11  ;;  %v1568_v14 = vrot.slane %v1554_v40, %v8002_v11 }
 0x36f   : > { %v1893_v15 = vcombine.low %v1389_v2, %v1396_v3  ;;  %v5895_v16 = vcombine.high %v1389_v2, %v1396_v3  ;;  %v1909_v20 = vcombine.low %v1405_v4, %v1412_v5  ;;  %v5896_v21 = vcombine.high %v1405_v4, %v1412_v5 }
 0x370   : > { %v1577_v17 = vrot.slane %v1569_v9, %v8002_v11  ;;  %v1584_v19 = vrot.slane %v1570_v10, %v8002_v11  ;;  %v8046_v26 = vrot.slane %v1977_v61, %v8002_v11  ;;  %v8049_v27 = vrot.slane %v5898_v39, %v8002_v11 }
 0x371   : > { %v1306_v22 = vpop.permute.xlu1 %1305  ;;  %v1330_v23 = vpop.permute.xlu0 %1329  ;;  %v1900_v24 = vrot.slane %v1893_v15, %v8002_v11  ;;  %v1908_v25 = vrot.slane %v5895_v16, %v8002_v11  ;;  %v1916_v53 = vrot.slane %v1909_v20, %v8002_v11  ;;  %v1924_v36 = vrot.slane %v5896_v21, %v8002_v11 }
 0x372   : > { %v1585_v28 = vcombine.low %v1561_v50, %v1577_v17  ;;  %v1586_v29 = vcombine.high %v1561_v50, %v1577_v17  ;;  %v1601_v30 = vcombine.low %v1568_v14, %v1584_v19  ;;  %v1602_v31 = vcombine.high %v1568_v14, %v1584_v19 }
 0x373   : > { %v1485_v32 = vcombine.low %v7954_v57, %v1306_v22  ;;  %v1486_v42 = vcombine.high %v7954_v57, %v1306_v22  ;;  %v1501_v43 = vcombine.low %v1282_v8, %v1330_v23  ;;  %v1502_v44 = vcombine.high %v1282_v8, %v1330_v23 }
 0x374   : > { %v8054_v33 = vrot.slane %v1585_v28, %v8007_v18  ;;  %v8057_v45 = vrot.slane %v1586_v29, %v8007_v18  ;;  %v8060_v34 = vrot.slane %v1601_v30, %v8007_v18  ;;  %v8063_v46 = vrot.slane %v1602_v31, %v8007_v18 }
 0x375   : > { %v1493_v47 = vrot.slane %v1485_v32, %v8002_v11  ;;  %v1500_v48 = vrot.slane %v1486_v42, %v8002_v11  ;;  %v1509_v57 = vrot.slane %v1501_v43, %v8002_v11  ;;  %v1516_v49 = vrot.slane %v1502_v44, %v8002_v11  ;;  %v1288_v51 = vpop.permute.xlu1 %1287  ;;  %v1312_v35 = vpop.permute.xlu0 %1311 }
 0x376   : > { %v2097_v41 = vcombine.low %v8054_v33, %v8057_v45  ;;  %v5901_v52 = vcombine.high %v8054_v33, %v8057_v45  ;;  %v1689_v61 = vcombine.low %v7960_v37, %v1312_v35  ;;  %v1690_v39 = vcombine.high %v7960_v37, %v1312_v35 }
 0x377   : > { %v1517_v56 = vcombine.low %v1493_v47, %v1509_v57  ;;  %v1518_v58 = vcombine.high %v1493_v47, %v1509_v57  ;;  %v1533_v59 = vcombine.low %v1500_v48, %v1516_v49  ;;  %v1534_v60 = vcombine.high %v1500_v48, %v1516_v49 }
 0x378   : > { %v1925_v0 = vcombine.low %v1900_v24, %v1908_v25  ;;  %v1926_v40 = vcombine.high %v1900_v24, %v1908_v25  ;;  %v2113_v2 = vcombine.low %v8060_v34, %v8063_v46  ;;  %v5902_v3 = vcombine.high %v8060_v34, %v8063_v46 }
 0x379   : > { %v8082_v4 = vrot.slane %v1517_v56, %v8007_v18  ;;  %v8085_v5 = vrot.slane %v1518_v58, %v8007_v18  ;;  %v1336_v6 = vpop.permute.xlu1 %1335  ;;  %v8087_v8 = vpop.permute.xlu0 %1285  ;;  %v8090_v9 = vrot.slane %v1533_v59, %v8007_v18  ;;  %v8093_v37 = vrot.slane %v1534_v60, %v8007_v18 }
 0x37a   : > { %v8096_v10 = vrot.slane %v1925_v0, %v8007_v18  ;;  %v1941_v50 = vcombine.low %v1916_v53, %v1924_v36  ;;  %v1697_v16 = vrot.slane %v1689_v61, %v8002_v11  ;;  %v1704_v17 = vrot.slane %v1690_v39, %v8002_v11 }
 0x37b   : > { %v2029_v14 = vcombine.low %v8082_v4, %v8085_v5  ;;  %v5899_v15 = vcombine.high %v8082_v4, %v8085_v5  ;;  %v1942_v19 = vcombine.high %v1916_v53, %v1924_v36  ;;  %v8108_v21 = vrot.slane %v1926_v40, %v8007_v18 }
 0x37c   : > { %v8105_v20 = vrot.slane %v1941_v50, %v8007_v18  ;;  %v1705_v22 = vcombine.low %v1288_v51, %v1336_v6  ;;  %v1706_v23 = vcombine.high %v1288_v51, %v1336_v6  ;;  %v1993_v24 = vcombine.low %v8034_v12, %v8037_v13 }
 0x37d   : > { %v1994_v25 = vcombine.high %v8034_v12, %v8037_v13  ;;  %v2009_v28 = vcombine.low %v8046_v26, %v8049_v27  ;;  %v1310_v29 = vpop.permute.xlu1 %1309  ;;  %v2045_v30 = vcombine.low %v8090_v9, %v8093_v37  ;;  %v8121_v32 = vrot.slane %v1942_v19, %v8007_v18  ;;  %v1334_v47 = vpop.permute.xlu0 %1333 }
 0x37e   : > { %v1957_v31 = vcombine.low %v8096_v10, %v8105_v20  ;;  %v1713_v42 = vrot.slane %v1705_v22, %v8002_v11  ;;  %v1720_v43 = vrot.slane %v1706_v23, %v8002_v11  ;;  %v8126_v44 = vrot.slane %v1993_v24, %v8007_v18 }
 0x37f   : > { %v8129_v12 = vrot.slane %v1994_v25, %v8007_v18  ;;  %v2010_v13 = vcombine.high %v8046_v26, %v8049_v27  ;;  %v1960_v48 = vcombine.high %v8108_v21, %v8121_v32  ;;  %v8137_v51 = vrot.slane %v2009_v28, %v8007_v18 }
 0x380   : > { %6356 = vmatprep.mubr.msk.f32.mxu1 %vm2453_vm0, %v1957_v31  ;;  %v1721_v57 = vcombine.low %v1697_v16, %v1713_v42  ;;  %v1722_v49 = vcombine.high %v1697_v16, %v1713_v42  ;;  %v1737_v35 = vcombine.low %v1704_v17, %v1720_v43  ;;  %v1738_v53 = vcombine.high %v1704_v17, %v1720_v43 }
 0x381   : > { %v8140_v36 = vrot.slane %v2010_v13, %v8007_v18  ;;  %v1621_v56 = vcombine.low %v7970_v38, %v1310_v29  ;;  %v8143_v58 = vpop.permute.xlu1 %1291  ;;  %v5900_v26 = vcombine.high %v8090_v9, %v8093_v37  ;;  %6416 = vmatprep.mubr.msk.f32.mxu0 %vm2453_vm0, %v1960_v48  ;;  %v2025_v60 = vcombine.low %v8126_v44, %v8137_v51  ;;  %v1290_v17 = vpop.permute.xlu0 %1289 }
 0x382   : > { %v8149_v27 = vrot.slane %v1721_v57, %v8007_v18  ;;  %v8152_v59 = vrot.slane %v1722_v49, %v8007_v18  ;;  %v8157_v61 = vrot.slane %v1737_v35, %v8007_v18  ;;  %v8160_v39 = vrot.slane %v1738_v53, %v8007_v18 }
 0x383   : > { %v2028_v0 = vcombine.high %v8129_v12, %v8140_v36  ;;  %v1622_v40 = vcombine.high %v7970_v38, %v1310_v29  ;;  %6357 = vmatmul.mubr.msk.f32.vlgmr.msra.gmra.mrb[0].mxu1 %vm2453_vm0, %v2025_v60  ;;  %v1629_v6 = vrot.slane %v1621_v56, %v8002_v11  ;;  %v1637_v9 = vcombine.low %v8087_v8, %v1334_v47 }
 0x384   : > { %v2233_v4 = vcombine.low %v8149_v27, %v8152_v59  ;;  %v5905_v5 = vcombine.high %v8149_v27, %v8152_v59  ;;  %v2249_v37 = vcombine.low %v8157_v61, %v8160_v39  ;;  %v5906_v50 = vcombine.high %v8157_v61, %v8160_v39  ;;  %6627 = vmatpush3.bf16.msra.mxu1 %v7996_v1 }
 0x385   : > { %6417 = vmatmul.mubr.msk.f32.vlgmr.msra.gmra.mrb[8].mxu0 %vm2453_vm0, %v2028_v0  ;;  %v1636_v38 = vrot.slane %v1622_v40, %v8002_v11  ;;  %v1638_v16 = vcombine.high %v8087_v8, %v1334_v47  ;;  %v1314_v19 = vpop.permute.xlu1 %1313  ;;  %v1645_v22 = vrot.slane %v1637_v9, %v8002_v11  ;;  %v2036_v23 = vrot.slane %v2029_v14, %v8002_v11  ;;  %v1338_v60 = vpop.permute.xlu0 %1337 }
 0x386   : > { %v2044_v24 = vrot.slane %v5899_v15, %v8002_v11  ;;  %v2052_v25 = vrot.slane %v2045_v30, %v8002_v11  ;;  %v2060_v29 = vrot.slane %v5900_v26, %v8002_v11  ;;  %v1757_v31 = vcombine.low %v7978_v63, %v1314_v19  ;;  %6629 = vmatprep.subr.bf16.mxu1 %v8023_v54 }
 0x387   : > { %v1652_v28 = vrot.slane %v1638_v16, %v8002_v11  ;;  %v1758_v8 = vcombine.high %v7978_v63, %v1314_v19  ;;  %v1653_v42 = vcombine.low %v1629_v6, %v1645_v22  ;;  %v1654_v43 = vcombine.high %v1629_v6, %v1645_v22 }
 0x388   : > { %v2061_v13 = vcombine.low %v2036_v23, %v2044_v24  ;;  %v2062_v14 = vcombine.high %v2036_v23, %v2044_v24  ;;  %v2077_v48 = vcombine.low %v2052_v25, %v2060_v29  ;;  %v2078_v30 = vcombine.high %v2052_v25, %v2060_v29  ;;  %6631 = vmatpush3.bf16.msra.mxu1 %v8023_v54 }
 0x389   : > { %v1669_v47 = vcombine.low %v1636_v38, %v1652_v28  ;;  %v1670_v15 = vcombine.high %v1636_v38, %v1652_v28  ;;  %v8190_v1 = vrot.slane %v1653_v42, %v8007_v18  ;;  %v8193_v57 = vrot.slane %v1654_v43, %v8007_v18  ;;  %6633 = vmatprep.subr.bf16.mxu1 %v8025_v55  ;;  %v1340_v9 = vpop.permute.xlu1 %1339  ;;  %v1316_v46 = vpop.permute.xlu0 %1315 }
 0x38a   : > { %v8196_v49 = vrot.slane %v2061_v13, %v8007_v18  ;;  %v8199_v63 = vrot.slane %v2062_v14, %v8007_v18  ;;  %v8209_v56 = vrot.slane %v2077_v48, %v8007_v18  ;;  %v8212_v26 = vrot.slane %v2078_v30, %v8007_v18 }
 0x38b   : > { %v8203_v35 = vrot.slane %v1669_v47, %v8007_v18  ;;  %v8206_v53 = vrot.slane %v1670_v15, %v8007_v18  ;;  %v2165_v0 = vcombine.low %v8190_v1, %v8193_v57  ;;  %v5903_v54 = vcombine.high %v8190_v1, %v8193_v57 }
 0x38c   : > { %v1765_v40 = vrot.slane %v1757_v31, %v8002_v11  ;;  %v1772_v6 = vrot.slane %v1758_v8, %v8002_v11  ;;  %v2093_v19 = vcombine.low %v8196_v49, %v8209_v56  ;;  %v2096_v22 = vcombine.high %v8199_v63, %v8212_v26 }
 0x38d   : > { %v2181_v38 = vcombine.low %v8203_v35, %v8206_v53  ;;  %v5904_v16 = vcombine.high %v8203_v35, %v8206_v53  ;;  %v2104_v23 = vrot.slane %v2097_v41, %v8002_v11  ;;  %v2112_v24 = vrot.slane %v5901_v52, %v8002_v11 }
 0x38e   : > { %v2120_v25 = vrot.slane %v2113_v2, %v8002_v11  ;;  %v2128_v28 = vrot.slane %v5902_v3, %v8002_v11  ;;  %6359 = vmatprep.mubr.msk.f32.mxu1 %vm2453_vm0, %v2093_v19  ;;  %6419 = vmatprep.mubr.msk.f32.mxu0 %vm2453_vm0, %v2096_v22  ;;  %v1773_v41 = vcombine.low %v1290_v17, %v1338_v60 }
 0x38f   : > { %v1774_v29 = vcombine.high %v1290_v17, %v1338_v60  ;;  %v1841_v31 = vcombine.low %v8143_v58, %v1340_v9  ;;  %v2129_v33 = vcombine.low %v2104_v23, %v2112_v24  ;;  %v2130_v52 = vcombine.high %v2104_v23, %v2112_v24 }
 0x390   : > { %v2145_v45 = vcombine.low %v2120_v25, %v2128_v28  ;;  %v2146_v8 = vcombine.high %v2120_v25, %v2128_v28  ;;  %v1781_v42 = vrot.slane %v1773_v41, %v8002_v11  ;;  %v1842_v43 = vcombine.high %v8143_v58, %v1340_v9 }
 0x391   : > { %v1788_v2 = vrot.slane %v1774_v29, %v8002_v11  ;;  %v1849_v34 = vrot.slane %v1841_v31, %v8002_v11  ;;  %v8253_v3 = vrot.slane %v2129_v33, %v8007_v18  ;;  %v8259_v13 = vrot.slane %v2130_v52, %v8007_v18 }
 0x392   : > { %v8256_v17 = vrot.slane %v2145_v45, %v8007_v18  ;;  %v8262_v14 = vrot.slane %v2146_v8, %v8007_v18  ;;  %v1789_v47 = vcombine.low %v1765_v40, %v1781_v42  ;;  %v1790_v15 = vcombine.high %v1765_v40, %v1781_v42 }
 0x393   : > { %v1805_v48 = vcombine.low %v1772_v6, %v1788_v2  ;;  %v1806_v30 = vcombine.high %v1772_v6, %v1788_v2  ;;  %v1856_v57 = vrot.slane %v1842_v43, %v8002_v11  ;;  %v1825_v35 = vcombine.low %v7976_v62, %v1316_v46 }
 0x394   : > { %v2161_v58 = vcombine.low %v8253_v3, %v8256_v17  ;;  %v2164_v1 = vcombine.high %v8259_v13, %v8262_v14  ;;  %v1797_v53 = vrot.slane %v1789_v47, %v8007_v18  ;;  %v1804_v60 = vrot.slane %v1790_v15, %v8007_v18 }
 0x395   : > { %v1813_v9 = vrot.slane %v1805_v48, %v8007_v18  ;;  %v1820_v40 = vrot.slane %v1806_v30, %v8007_v18  ;;  %v1826_v6 = vcombine.high %v7976_v62, %v1316_v46  ;;  %v1833_v19 = vrot.slane %v1825_v35, %v8002_v11 }
 0x396   : > { %6360 = vmatmul.mubr.msk.f32.gmra.mrb[2].mxu1 %vm2453_vm0, %v2161_v58  ;;  %6420 = vmatmul.mubr.msk.f32.gmra.mrb[10].mxu0 %vm2453_vm0, %v2164_v1  ;;  %v2172_v22 = vrot.slane %v2165_v0, %v8002_v11  ;;  %v2301_v23 = vcombine.low %v1797_v53, %v1804_v60  ;;  %v5907_v24 = vcombine.high %v1797_v53, %v1804_v60 }
 0x397   : > { %v2317_v25 = vcombine.low %v1813_v9, %v1820_v40  ;;  %v5908_v28 = vcombine.high %v1813_v9, %v1820_v40  ;;  %v1840_v41 = vrot.slane %v1826_v6, %v8002_v11  ;;  %v1857_v29 = vcombine.low %v1833_v19, %v1849_v34 }
 0x398   : > { %v1858_v31 = vcombine.high %v1833_v19, %v1849_v34  ;;  %v2180_v33 = vrot.slane %v5903_v54, %v8002_v11  ;;  %v2188_v45 = vrot.slane %v2181_v38, %v8002_v11  ;;  %v2196_v52 = vrot.slane %v5904_v16, %v8002_v11 }
 0x399   : > { %v2240_v62 = vrot.slane %v2233_v4, %v8002_v11  ;;  %v2248_v0 = vrot.slane %v5905_v5, %v8002_v11  ;;  %v1865_v8 = vrot.slane %v1857_v29, %v8007_v18  ;;  %v1873_v2 = vcombine.low %v1840_v41, %v1856_v57 }
 0x39a   : > { %v1872_v42 = vrot.slane %v1858_v31, %v8007_v18  ;;  %v1874_v54 = vcombine.high %v1840_v41, %v1856_v57  ;;  %v2197_v43 = vcombine.low %v2172_v22, %v2180_v33  ;;  %v2213_v38 = vcombine.low %v2188_v45, %v2196_v52 }
 0x39b   : > { %v2198_v34 = vcombine.high %v2172_v22, %v2180_v33  ;;  %v2214_v16 = vcombine.high %v2188_v45, %v2196_v52  ;;  %v1881_v46 = vrot.slane %v1873_v2, %v8007_v18  ;;  %v2256_v1 = vrot.slane %v2249_v37, %v8002_v11 }
 0x39c   : > { %v1888_v47 = vrot.slane %v1874_v54, %v8007_v18  ;;  %v2369_v4 = vcombine.low %v1865_v8, %v1872_v42  ;;  %v5909_v15 = vcombine.high %v1865_v8, %v1872_v42  ;;  %v8296_v48 = vrot.slane %v2197_v43, %v8007_v18 }
 0x39d   : > { %v8299_v27 = vrot.slane %v2213_v38, %v8007_v18  ;;  %v8302_v59 = vrot.slane %v2198_v34, %v8007_v18  ;;  %v8305_v5 = vrot.slane %v2214_v16, %v8007_v18  ;;  %v2264_v57 = vrot.slane %v5906_v50, %v8002_v11 }
 0x39e   : > { %v2385_v30 = vcombine.low %v1881_v46, %v1888_v47  ;;  %v5910_v58 = vcombine.high %v1881_v46, %v1888_v47  ;;  %v2265_v60 = vcombine.low %v2240_v62, %v2248_v0  ;;  %v2266_v9 = vcombine.high %v2240_v62, %v2248_v0 }
 0x39f   : > { %v2229_v35 = vcombine.low %v8296_v48, %v8299_v27  ;;  %v2232_v53 = vcombine.high %v8302_v59, %v8305_v5  ;;  %v2281_v40 = vcombine.low %v2256_v1, %v2264_v57  ;;  %v2282_v6 = vcombine.high %v2256_v1, %v2264_v57 }
 0x3a0   : > { %v2308_v19 = vrot.slane %v2301_v23, %v8002_v11  ;;  %v2316_v22 = vrot.slane %v5907_v24, %v8002_v11  ;;  %v2273_v61 = vrot.slane %v2265_v60, %v8007_v18  ;;  %v8325_v39 = vrot.slane %v2266_v9, %v8007_v18  ;;  %v2448_v60 = vld [vmem:[#allocation2 + $0x58] sm:$0xff] }
 0x3a1   : > { %6362 = vmatprep.mubr.msk.f32.mxu1 %vm2453_vm0, %v2229_v35  ;;  %6422 = vmatprep.mubr.msk.f32.mxu0 %vm2453_vm0, %v2232_v53  ;;  %v2324_v37 = vrot.slane %v2317_v25, %v8002_v11  ;;  %v2289_v50 = vrot.slane %v2281_v40, %v8007_v18  ;;  %v8330_v41 = vrot.slane %v2282_v6, %v8007_v18  ;;  %v2447_v53 = vld [vmem:[#allocation2 + $0x50] sm:$0xff] }
 0x3a2   : > { %v2332_v23 = vrot.slane %v5908_v28, %v8002_v11  ;;  %v2333_v29 = vcombine.low %v2308_v19, %v2316_v22  ;;  %v2334_v24 = vcombine.high %v2308_v19, %v2316_v22  ;;  %v2376_v31 = vrot.slane %v2369_v4, %v8002_v11 }
 0x3a3   : > { %v2384_v33 = vrot.slane %v5909_v15, %v8002_v11  ;;  %v2392_v45 = vrot.slane %v2385_v30, %v8002_v11  ;;  %v2297_v52 = vcombine.low %v2273_v61, %v2289_v50  ;;  %v2300_v62 = vcombine.high %v8325_v39, %v8330_v41 }
 0x3a4   : > { %v2341_v25 = vrot.slane %v2333_v29, %v8007_v18  ;;  %v2349_v0 = vcombine.low %v2324_v37, %v2332_v23  ;;  %v2348_v8 = vrot.slane %v2334_v24, %v8007_v18  ;;  %v2350_v42 = vcombine.high %v2324_v37, %v2332_v23 }
 0x3a5   : > { %v2400_v28 = vrot.slane %v5910_v58, %v8002_v11  ;;  %v2401_v2 = vcombine.low %v2376_v31, %v2384_v33  ;;  %6363 = vmatmul.mubr.msk.f32.gmra.mrb[4].mxu1 %vm2453_vm0, %v2297_v52  ;;  %6423 = vmatmul.mubr.msk.f32.gmra.mrb[12].mxu0 %vm2453_vm0, %v2300_v62  ;;  %v2402_v43 = vcombine.high %v2376_v31, %v2384_v33 }
 0x3a6   : > { %v2357_v54 = vrot.slane %v2349_v0, %v8007_v18  ;;  %v2364_v38 = vrot.slane %v2350_v42, %v8007_v18  ;;  %v1958_v35 = vcombine.high %v8096_v10, %v8105_v20  ;;  %v2026_v9 = vcombine.high %v8126_v44, %v8137_v51 }
 0x3a7   : > { %v2409_v34 = vrot.slane %v2401_v2, %v8007_v18  ;;  %v2417_v16 = vcombine.low %v2392_v45, %v2400_v28  ;;  %v2418_v46 = vcombine.high %v2392_v45, %v2400_v28  ;;  %v2416_v4 = vrot.slane %v2402_v43, %v8007_v18 }
 0x3a8   : > { %v2365_v47 = vcombine.low %v2341_v25, %v2357_v54  ;;  %v2368_v15 = vcombine.high %v2348_v8, %v2364_v38  ;;  %v6636_v40 = vpack.c.bf16 %v2448_v60, %v2447_v53  ;;  %v2094_v6 = vcombine.high %v8196_v49, %v8209_v56 }
 0x3a9   : > { %v2425_v30 = vrot.slane %v2417_v16, %v8007_v18  ;;  %v2432_v58 = vrot.slane %v2418_v46, %v8007_v18  ;;  %v2162_v10 = vcombine.high %v8253_v3, %v8256_v17  ;;  %v2230_v20 = vcombine.high %v8296_v48, %v8299_v27 }
 0x3aa   : > { %6365 = vmatprep.mubr.msk.f32.mxu1 %vm2453_vm0, %v2365_v47  ;;  %6425 = vmatprep.mubr.msk.f32.mxu0 %vm2453_vm0, %v2368_v15  ;;  %v2298_v44 = vcombine.high %v2273_v61, %v2289_v50  ;;  %v2366_v51 = vcombine.high %v2341_v25, %v2357_v54  ;;  %v2027_v56 = vcombine.low %v8129_v12, %v8140_v36 }
 0x3ab   : > { %v2433_v1 = vcombine.low %v2409_v34, %v2425_v30  ;;  %v2436_v57 = vcombine.high %v2416_v4, %v2432_v58  ;;  %v2434_v49 = vcombine.high %v2409_v34, %v2425_v30  ;;  %v2095_v3 = vcombine.low %v8199_v63, %v8212_v26 }
 0x3ac   : > { %v2163_v17 = vcombine.low %v8259_v13, %v8262_v14  ;;  %v2367_v12 = vcombine.low %v2348_v8, %v2364_v38  ;;  %v2435_v36 = vcombine.low %v2416_v4, %v2432_v58 }
 0x3ad   : > { %6366 = vmatmul.mubr.msk.f32.gmra.mrb[6].mxu1 %vm2453_vm0, %v2433_v1  ;;  %6426 = vmatmul.mubr.msk.f32.gmra.mrb[14].mxu0 %vm2453_vm0, %v2436_v57 }
 0x3ae   : > { %6376 = vmatprep.mubr.msk.f32.mxu1 %vm2453_vm0, %v1958_v35 }
 0x3b1   : > { %6377 = vmatmul.mubr.msk.f32.vlgmr.msra.gmra.mrb[8].mxu1 %vm2453_vm0, %v2026_v9 }
 0x3b2   : > { %6379 = vmatprep.mubr.msk.f32.mxu1 %vm2453_vm0, %v2094_v6  ;;  %6635 = vmatpush3.bf16.msra.mxu1 %v8025_v55  ;;  %v1959_v55 = vcombine.low %v8108_v21, %v8121_v32  ;;  %v2231_v21 = vcombine.low %v8302_v59, %v8305_v5  ;;  %v2299_v32 = vcombine.low %v8325_v39, %v8330_v41 }
 0x3b3   : > { %6637 = vmatprep.subr.bf16.mxu1 %v6636_v40 }
 0x3b5   : > { %6380 = vmatmul.mubr.msk.f32.gmra.mrb[10].mxu1 %vm2453_vm0, %v2162_v10 }
 0x3b6   : > { %6382 = vmatprep.mubr.msk.f32.mxu1 %vm2453_vm0, %v2230_v20  ;;  %6639 = vmatpush3.bf16.msra.mxu1 %v6636_v40  ;;  %v3290_v20 = vld [vmem:[#allocation3] sm:$0xff] }
 0x3b9   : > { %6383 = vmatmul.mubr.msk.f32.gmra.mrb[12].mxu1 %vm2453_vm0, %v2298_v44  ;;  %v3291_v44 = vld [vmem:[#allocation3 + $0x8] sm:$0xff] }
 0x3ba   : > { %6385 = vmatprep.mubr.msk.f32.mxu1 %vm2453_vm0, %v2366_v51  ;;  %v3292_v51 = vld [vmem:[#allocation3 + $0x10] sm:$0xff] }
 0x3bd   : > { %6386 = vmatmul.mubr.msk.f32.gmra.mrb[14].mxu1 %vm2453_vm0, %v2434_v49  ;;  %v6648_v49 = vpack.c.bf16 %v3291_v44, %v3290_v20 }
 0x3be   : > { %6396 = vmatprep.mubr.msk.f32.mxu1 %vm2453_vm0, %v1959_v55  ;;  %v3293_v55 = vld [vmem:[#allocation3 + $0x18] sm:$0xff] }
 0x3bf   : > { %6649 = vmatprep.subr.bf16.mxu1 %v6648_v49 }
 0x3c1   : > { %6397 = vmatmul.mubr.msk.f32.vlgmr.msra.gmra.mrb[16].mxu1 %vm2453_vm0, %v2027_v56 }
 0x3c2   : > { %6399 = vmatprep.mubr.msk.f32.mxu1 %vm2453_vm0, %v2095_v3  ;;  %v6652_v3 = vpack.c.bf16 %v3293_v55, %v3292_v51  ;;  %6651 = vmatpush3.bf16.xpose.msra.mxu1 %v6648_v49 }
 0x3c4   : > { %6653 = vmatprep.subr.bf16.mxu1 %v6652_v3 }
 0x3c5   : > { %6400 = vmatmul.mubr.msk.f32.gmra.mrb[18].mxu1 %vm2453_vm0, %v2163_v17 }
 0x3c6   : > { %6402 = vmatprep.mubr.msk.f32.mxu1 %vm2453_vm0, %v2231_v21 }
 0x3c9   : > { %6403 = vmatmul.mubr.msk.f32.gmra.mrb[20].mxu1 %vm2453_vm0, %v2299_v32 }
 0x3ca   : > { %6405 = vmatprep.mubr.msk.f32.mxu1 %vm2453_vm0, %v2367_v12  ;;  %6655 = vmatpush3.bf16.xpose.msra.mxu1 %v6652_v3 }
 0x3cd   : > { %6406 = vmatmul.mubr.msk.f32.gmra.mrb[22].mxu1 %vm2453_vm0, %v2435_v36 }
 0x456   : > { %v8392_v63 = vpop.f32.mrb[0].mxu1 }
 0x457   : > { %2972 = vmax.xlane.f32.xlu0 %v8392_v63  ;;  %v8397_v13 = vpop.f32.mrb[1].mxu1 }
 0x458   : > { %v8394_v26 = vpop.f32.mrb[8].mxu0 }
 0x459   : > { %v8399_v14 = vpop.f32.mrb[9].mxu0 }
 0x45b   : > { %2970 = vmax.xlane.f32.xlu0 %v8397_v13 }
 0x469   : > { %v8402_v48 = vpop.f32.mrb[2].mxu1  ;;  %v8404_v27 = vpop.f32.mrb[10].mxu0 }
 0x46a   : > { %v8406_v59 = vpop.f32.mrb[11].mxu0  ;;  %2976 = vmax.xlane.f32.xlu1 %v8402_v48  ;;  %v8409_v5 = vpop.f32.mrb[3].mxu1 }
 0x46e   : > { %2974 = vmax.xlane.f32.xlu1 %v8409_v5 }
 0x478   : > { %v8412_v19 = vpop.f32.mrb[4].mxu1  ;;  %v8414_v22 = vpop.f32.mrb[12].mxu0 }
 0x479   : > { %v8416_v61 = vpop.f32.mrb[5].mxu1  ;;  %v8418_v39 = vpop.f32.mrb[13].mxu0 }
 0x47a   : > { %2978 = vmax.xlane.f32.xlu1 %v8416_v61 }
 0x480   : > { %v8421_v37 = vpop.f32.mrb[6].mxu1  ;;  %v8423_v50 = vpop.f32.mrb[14].mxu0 }
 0x481   : > { %v8425_v41 = vpop.f32.mrb[7].mxu1  ;;  %v8427_v23 = vpop.f32.mrb[15].mxu0 }
 0x484   : > { %v8429_v29 = vpop.f32.mrb[8].mxu1 }
 0x485   : > { %2988 = vmax.xlane.f32.xlu0 %v8429_v29  ;;  %v8432_v24 = vpop.f32.mrb[9].mxu1 }
 0x486   : > { %2986 = vmax.xlane.f32.xlu1 %v8432_v24 }
 0x488   : > { %v8435_v31 = vpop.f32.mrb[10].mxu1 }
 0x489   : > { %2992 = vmax.xlane.f32.xlu0 %v8435_v31  ;;  %v8438_v33 = vpop.f32.mrb[11].mxu1 }
 0x48a   : > { %2980 = vmax.xlane.f32.xlu1 %v8412_v19 }
 0x48c   : > { %v8441_v45 = vpop.f32.mrb[12].mxu1 }
 0x48d   : > { %2990 = vmax.xlane.f32.xlu0 %v8438_v33  ;;  %v8444_v52 = vpop.f32.mrb[13].mxu1 }
 0x48e   : > { %2982 = vmax.xlane.f32.xlu1 %v8425_v41 }
 0x490   : > { %v8447_v62 = vpop.f32.mrb[14].mxu1 }
 0x491   : > { %2996 = vmax.xlane.f32.xlu0 %v8441_v45  ;;  %v8450_v25 = vpop.f32.mrb[15].mxu1 }
 0x492   : > { %2984 = vmax.xlane.f32.xlu1 %v8421_v37 }
 0x494   : > { %v8453_v0 = vpop.f32.mrb[16].mxu1 }
 0x495   : > { %2994 = vmax.xlane.f32.xlu0 %v8444_v52  ;;  %v8456_v8 = vpop.f32.mrb[17].mxu1 }
 0x496   : > { %3002 = vmax.xlane.f32.xlu1 %v8456_v8 }
 0x498   : > { %v8459_v42 = vpop.f32.mrb[18].mxu1 }
 0x499   : > { %3000 = vmax.xlane.f32.xlu0 %v8447_v62  ;;  %v8462_v28 = vpop.f32.mrb[19].mxu1 }
 0x49a   : > { %3004 = vmax.xlane.f32.xlu1 %v8453_v0 }
 0x49c   : > { %v8465_v2 = vpop.f32.mrb[20].mxu1 }
 0x49d   : > { %2998 = vmax.xlane.f32.xlu0 %v8450_v25  ;;  %v8468_v54 = vpop.f32.mrb[21].mxu1 }
 0x49e   : > { %3006 = vmax.xlane.f32.xlu1 %v8462_v28 }
 0x4a0   : > { %v8471_v43 = vpop.f32.mrb[22].mxu1 }
 0x4a1   : > { %3018 = vmax.xlane.f32.xlu0 %v8399_v14  ;;  %v8474_v38 = vpop.f32.mrb[23].mxu1 }
 0x4a2   : > { %3008 = vmax.xlane.f32.xlu1 %v8459_v42 }
 0x4a5   : > { %3020 = vmax.xlane.f32.xlu0 %v8394_v26 }
 0x4a6   : > { %3010 = vmax.xlane.f32.xlu1 %v8468_v54 }
 0x4a9   : > { %3022 = vmax.xlane.f32.xlu0 %v8406_v59 }
 0x4aa   : > { %3012 = vmax.xlane.f32.xlu1 %v8465_v2 }
 0x4ad   : > { %3024 = vmax.xlane.f32.xlu0 %v8404_v27 }
 0x4ae   : > { %3014 = vmax.xlane.f32.xlu1 %v8474_v38 }
 0x4b1   : > { %3026 = vmax.xlane.f32.xlu0 %v8418_v39 }
 0x4b2   : > { %3016 = vmax.xlane.f32.xlu1 %v8471_v43 }
 0x4b5   : > { %3028 = vmax.xlane.f32.xlu0 %v8414_v22 }
 0x4b9   : > { %3030 = vmax.xlane.f32.xlu0 %v8427_v23 }
 0x4bd   : > { %3032 = vmax.xlane.f32.xlu0 %v8423_v50 }
 0x4e4   : > { %v2973_v34 = vpop.xlane.xlu0 %2972 }
 0x4e5   : > { %v3035_v16 = vsub.f32 %v8392_v63, %v2973_v34 }
 0x4e7   : > { %v3068_v46 = vmul.f32 1.442695, %v3035_v16 }
 0x4e8   : > { %v2971_v47 = vpop.xlane.xlu0 %2970 }
 0x4e9   : > { %7022 = vpow2.f32 %v3068_v46  ;;  %v3034_v4 = vsub.f32 %v8397_v13, %v2971_v47 }
 0x4eb   : > { %v3066_v15 = vmul.f32 1.442695, %v3034_v4 }
 0x4ed   : > { %7024 = vpow2.f32 %v3066_v15 }
 0x4f3   : > { %v8490_v30 = vpop.eup %7022 }
 0x4f4   : > { %3132 = vadd.xlane.f32.xlu1 %v8490_v30 }
 0x4f7   : > { %v2977_v58 = vpop.xlane.xlu1 %2976  ;;  %v8493_v1 = vpop.eup %7024 }
 0x4f8   : > { %v3037_v57 = vsub.f32 %v8402_v48, %v2977_v58  ;;  %3130 = vadd.xlane.f32.xlu1 %v8493_v1 }
 0x4fa   : > { %v3072_v35 = vmul.f32 1.442695, %v3037_v57 }
 0x4fb   : > { %v2975_v53 = vpop.xlane.xlu1 %2974 }
 0x4fc   : > { %7026 = vpow2.f32 %v3072_v35  ;;  %v3036_v60 = vsub.f32 %v8409_v5, %v2975_v53 }
 0x4fe   : > { %v3070_v9 = vmul.f32 1.442695, %v3036_v60 }
 0x500   : > { %7028 = vpow2.f32 %v3070_v9 }
 0x506   : > { %v8498_v40 = vpop.eup %7026 }
 0x507   : > { %3136 = vadd.xlane.f32.xlu1 %v8498_v40  ;;  %v2979_v10 = vpop.xlane.xlu1 %2978 }
 0x508   : > { %v3038_v5 = vsub.f32 %v8416_v61, %v2979_v10 }
 0x50a   : > { %v8501_v6 = vpop.eup %7028  ;;  %v3074_v4 = vmul.f32 1.442695, %v3038_v5 }
 0x50b   : > { %3134 = vadd.xlane.f32.xlu1 %v8501_v6 }
 0x512   : > { %v2989_v56 = vpop.xlane.xlu0 %2988 }
 0x513   : > { %v3043_v17 = vsub.f32 %v8429_v29, %v2989_v56  ;;  %v2987_v21 = vpop.xlane.xlu1 %2986 }
 0x514   : > { %v3042_v32 = vsub.f32 %v8432_v24, %v2987_v21 }
 0x515   : > { %v3084_v12 = vmul.f32 1.442695, %v3043_v17 }
 0x516   : > { %v2993_v36 = vpop.xlane.xlu0 %2992  ;;  %v3082_v63 = vmul.f32 1.442695, %v3042_v32 }
 0x517   : > { %7030 = vpow2.f32 %v3084_v12  ;;  %v3045_v13 = vsub.f32 %v8435_v31, %v2993_v36  ;;  %v2981_v48 = vpop.xlane.xlu1 %2980 }
 0x518   : > { %v3039_v34 = vsub.f32 %v8412_v19, %v2981_v48  ;;  %7032 = vpow2.f32 %v3082_v63 }
 0x519   : > { %v3088_v29 = vmul.f32 1.442695, %v3045_v13 }
 0x51a   : > { %v3076_v16 = vmul.f32 1.442695, %v3039_v34  ;;  %v2991_v46 = vpop.xlane.xlu0 %2990 }
 0x51b   : > { %v3044_v47 = vsub.f32 %v8438_v33, %v2991_v46  ;;  %v2983_v24 = vpop.xlane.xlu1 %2982 }
 0x51c   : > { %7034 = vpow2.f32 %v3076_v16  ;;  %v3040_v61 = vsub.f32 %v8425_v41, %v2983_v24 }
 0x51d   : > { %7036 = vpow2.f32 %v3088_v29  ;;  %v3086_v58 = vmul.f32 1.442695, %v3044_v47 }
 0x51e   : > { %v2997_v15 = vpop.xlane.xlu0 %2996  ;;  %7038 = vpow2.f32 %v3074_v4  ;;  %v3078_v20 = vmul.f32 1.442695, %v3040_v61 }
 0x51f   : > { %v3047_v31 = vsub.f32 %v8441_v45, %v2997_v15  ;;  %v2985_v57 = vpop.xlane.xlu1 %2984  ;;  %7040 = vpow2.f32 %v3086_v58 }
 0x520   : > { %v3041_v19 = vsub.f32 %v8421_v37, %v2985_v57 }
 0x521   : > { %v8513_v35 = vpop.eup %7030  ;;  %v3092_v60 = vmul.f32 1.442695, %v3047_v31 }
 0x522   : > { %v3080_v53 = vmul.f32 1.442695, %v3041_v19  ;;  %3148 = vadd.xlane.f32.xlu0 %v8513_v35  ;;  %v2995_v33 = vpop.xlane.xlu0 %2994  ;;  %v8518_v44 = vpop.eup %7032 }
 0x523   : > { %v3046_v9 = vsub.f32 %v8444_v52, %v2995_v33  ;;  %v3003_v10 = vpop.xlane.xlu1 %3002 }
 0x524   : > { %7042 = vpow2.f32 %v3080_v53  ;;  %v3050_v45 = vsub.f32 %v8456_v8, %v3003_v10 }
 0x525   : > { %7044 = vpow2.f32 %v3092_v60  ;;  %v3090_v51 = vmul.f32 1.442695, %v3046_v9 }
 0x526   : > { %v8520_v41 = vpop.eup %7034  ;;  %3146 = vadd.xlane.f32.xlu0 %v8518_v44  ;;  %v3001_v37 = vpop.xlane.xlu0 %3000  ;;  %7046 = vpow2.f32 %v3078_v20  ;;  %v3098_v52 = vmul.f32 1.442695, %v3050_v45 }
 0x527   : > { %v3049_v49 = vsub.f32 %v8447_v62, %v3001_v37  ;;  %v3005_v55 = vpop.xlane.xlu1 %3004  ;;  %3140 = vadd.xlane.f32.xlu1 %v8520_v41  ;;  %v8526_v3 = vpop.eup %7036  ;;  %7048 = vpow2.f32 %v3090_v51  ;;  %v3295_v51 = vld [vmem:[#allocation3 + $0x28] sm:$0xff] }
 0x528   : > { %v3051_v56 = vsub.f32 %v8453_v0, %v3005_v55  ;;  %v8528_v8 = vpop.eup %7038  ;;  %7050 = vpow2.f32 %v3098_v52 }
 0x529   : > { %v3096_v21 = vmul.f32 1.442695, %v3049_v49  ;;  %v8534_v63 = vpop.eup %7040  ;;  %v3296_v49 = vld [vmem:[#allocation3 + $0x30] sm:$0xff] }
 0x52a   : > { %3152 = vadd.xlane.f32.xlu0 %v8526_v3  ;;  %v2999_v17 = vpop.xlane.xlu0 %2998  ;;  %v3100_v62 = vmul.f32 1.442695, %v3051_v56 }
 0x52b   : > { %v3048_v32 = vsub.f32 %v8450_v25, %v2999_v17  ;;  %v3007_v12 = vpop.xlane.xlu1 %3006  ;;  %3138 = vadd.xlane.f32.xlu1 %v8528_v8  ;;  %7052 = vpow2.f32 %v3096_v21  ;;  %v3297_v17 = vld [vmem:[#allocation3 + $0x38] sm:$0xff] }
 0x52c   : > { %v3052_v36 = vsub.f32 %v8462_v28, %v3007_v12  ;;  %7054 = vpow2.f32 %v3100_v62 }
 0x52d   : > { %v3094_v48 = vmul.f32 1.442695, %v3048_v32 }
 0x52e   : > { %v8536_v0 = vpop.eup %7042  ;;  %3150 = vadd.xlane.f32.xlu0 %v8534_v63  ;;  %v3019_v13 = vpop.xlane.xlu0 %3018  ;;  %v3102_v25 = vmul.f32 1.442695, %v3052_v36 }
 0x52f   : > { %v3058_v5 = vsub.f32 %v8399_v14, %v3019_v13  ;;  %v3009_v34 = vpop.xlane.xlu1 %3008  ;;  %3144 = vadd.xlane.f32.xlu1 %v8536_v0  ;;  %v8542_v46 = vpop.eup %7044  ;;  %7056 = vpow2.f32 %v3094_v48 }
 0x530   : > { %v3053_v16 = vsub.f32 %v8459_v42, %v3009_v34  ;;  %v8544_v28 = vpop.eup %7046  ;;  %7058 = vpow2.f32 %v3102_v25 }
 0x531   : > { %v3114_v47 = vmul.f32 1.442695, %v3058_v5  ;;  %v8550_v58 = vpop.eup %7048 }
 0x532   : > { %3156 = vadd.xlane.f32.xlu0 %v8542_v46  ;;  %v3021_v29 = vpop.xlane.xlu0 %3020  ;;  %v3104_v14 = vmul.f32 1.442695, %v3053_v16  ;;  %v8552_v42 = vpop.eup %7050 }
 0x533   : > { %v3059_v24 = vsub.f32 %v8394_v26, %v3021_v29  ;;  %v3011_v4 = vpop.xlane.xlu1 %3010  ;;  %3142 = vadd.xlane.f32.xlu1 %v8544_v28  ;;  %7060 = vpow2.f32 %v3114_v47  ;;  %v3298_v29 = vld [vmem:[#allocation3 + $0x40] sm:$0xff]  ;;  %v3299_v47 = vld [vmem:[#allocation3 + $0x48] sm:$0xff] }
 0x534   : > { %v3054_v15 = vsub.f32 %v8468_v54, %v3011_v4  ;;  %7062 = vpow2.f32 %v3104_v14 }
 0x535   : > { %v3116_v57 = vmul.f32 1.442695, %v3059_v24  ;;  %v8558_v33 = vpop.eup %7052 }
 0x536   : > { %3154 = vadd.xlane.f32.xlu0 %v8550_v58  ;;  %v3023_v31 = vpop.xlane.xlu0 %3022  ;;  %v3106_v26 = vmul.f32 1.442695, %v3054_v15  ;;  %v8560_v54 = vpop.eup %7054 }
 0x537   : > { %v3060_v61 = vsub.f32 %v8406_v59, %v3023_v31  ;;  %v3013_v19 = vpop.xlane.xlu1 %3012  ;;  %3162 = vadd.xlane.f32.xlu1 %v8552_v42  ;;  %7064 = vpow2.f32 %v3116_v57 }
 0x538   : > { %v3055_v53 = vsub.f32 %v8465_v2, %v3013_v19  ;;  %7066 = vpow2.f32 %v3106_v26  ;;  %v3294_v2 = vld [vmem:[#allocation3 + $0x20] sm:$0xff] }
 0x539   : > { %v3118_v9 = vmul.f32 1.442695, %v3060_v61  ;;  %v8566_v37 = vpop.eup %7056  ;;  %v6656_v56 = vpack.c.bf16 %v3295_v51, %v3294_v2 }
 0x53a   : > { %3160 = vadd.xlane.f32.xlu0 %v8558_v33  ;;  %v3025_v60 = vpop.xlane.xlu0 %3024  ;;  %v3108_v59 = vmul.f32 1.442695, %v3055_v53  ;;  %v8568_v55 = vpop.eup %7058 }
 0x53b   : > { %v3061_v10 = vsub.f32 %v8404_v27, %v3025_v60  ;;  %v3015_v20 = vpop.xlane.xlu1 %3014  ;;  %3164 = vadd.xlane.f32.xlu1 %v8560_v54  ;;  %7068 = vpow2.f32 %v3118_v9  ;;  %6657 = vmatprep.subr.bf16.mxu0 %v6656_v56  ;;  %v3302_v9 = vld [vmem:[#allocation3 + $0x60] sm:$0xff] }
 0x53c   : > { %v3056_v45 = vsub.f32 %v8474_v38, %v3015_v20  ;;  %v6660_v38 = vpack.c.bf16 %v3297_v17, %v3296_v49  ;;  %7070 = vpow2.f32 %v3108_v59  ;;  %6659 = vmatpush3.bf16.xpose.msra.mxu0 %v6656_v56  ;;  %v3300_v56 = vld [vmem:[#allocation3 + $0x50] sm:$0xff]  ;;  %v3301_v17 = vld [vmem:[#allocation3 + $0x58] sm:$0xff] }
 0x53d   : > { %v3120_v27 = vmul.f32 1.442695, %v3061_v10  ;;  %v8574_v36 = vpop.eup %7060  ;;  %v3303_v10 = vld [vmem:[#allocation3 + $0x68] sm:$0xff] }
 0x53e   : > { %3158 = vadd.xlane.f32.xlu0 %v8566_v37  ;;  %v3027_v52 = vpop.xlane.xlu0 %3026  ;;  %v3110_v12 = vmul.f32 1.442695, %v3056_v45  ;;  %v8576_v13 = vpop.eup %7062  ;;  %6661 = vmatprep.subr.bf16.mxu0 %v6660_v38  ;;  %v8610_v20 = vpack.c.bf16 %v3303_v10, %v3302_v9 }
 0x53f   : > { %v3062_v21 = vsub.f32 %v8418_v39, %v3027_v52  ;;  %v3017_v32 = vpop.xlane.xlu1 %3016  ;;  %3166 = vadd.xlane.f32.xlu1 %v8568_v55  ;;  %7072 = vpow2.f32 %v3120_v27 }
 0x540   : > { %v3057_v62 = vsub.f32 %v8471_v43, %v3017_v32  ;;  %7074 = vpow2.f32 %v3110_v12  ;;  %v6668_v32 = vpack.c.bf16 %v3301_v17, %v3300_v56 }
 0x541   : > { %v3122_v39 = vmul.f32 1.442695, %v3062_v21  ;;  %v8581_v25 = vpop.eup %7064 }
 0x542   : > { %3178 = vadd.xlane.f32.xlu0 %v8574_v36  ;;  %v3029_v48 = vpop.xlane.xlu0 %3028  ;;  %v3112_v34 = vmul.f32 1.442695, %v3057_v62  ;;  %v8583_v43 = vpop.eup %7066 }
 0x543   : > { %v3063_v5 = vsub.f32 %v8414_v22, %v3029_v48  ;;  %3168 = vadd.xlane.f32.xlu1 %v8576_v13  ;;  %7076 = vpow2.f32 %v3122_v39  ;;  %v6664_v22 = vpack.c.bf16 %v3299_v47, %v3298_v29 }
 0x544   : > { %7078 = vpow2.f32 %v3112_v34  ;;  %6663 = vmatpush3.bf16.xpose.msra.mxu0 %v6660_v38 }
 0x545   : > { %v3124_v24 = vmul.f32 1.442695, %v3063_v5  ;;  %v8588_v14 = vpop.eup %7068  ;;  %6665 = vmatprep.subr.bf16.mxu1 %v6664_v22  ;;  %6673 = vmatprep.subr.bf16.mxu0 %v8610_v20 }
 0x546   : > { %3180 = vadd.xlane.f32.xlu0 %v8581_v25  ;;  %v3031_v16 = vpop.xlane.xlu0 %3030  ;;  %v8590_v15 = vpop.eup %7070 }
 0x547   : > { %v3064_v4 = vsub.f32 %v8427_v23, %v3031_v16  ;;  %3170 = vadd.xlane.f32.xlu1 %v8583_v43  ;;  %7080 = vpow2.f32 %v3124_v24 }
 0x549   : > { %v3126_v57 = vmul.f32 1.442695, %v3064_v4  ;;  %v8595_v23 = vpop.eup %7072  ;;  %v3304_v4 = vld [vmem:[#allocation3 + $0x70] sm:$0xff] }
 0x54a   : > { %3182 = vadd.xlane.f32.xlu0 %v8588_v14  ;;  %v3033_v31 = vpop.xlane.xlu0 %3032  ;;  %v8597_v19 = vpop.eup %7074 }
 0x54b   : > { %v3065_v61 = vsub.f32 %v8423_v50, %v3033_v31  ;;  %3172 = vadd.xlane.f32.xlu1 %v8590_v15  ;;  %7082 = vpow2.f32 %v3126_v57 }
 0x54d   : > { %v3128_v26 = vmul.f32 1.442695, %v3065_v61  ;;  %v8601_v53 = vpop.eup %7076 }
 0x54e   : > { %3184 = vadd.xlane.f32.xlu0 %v8595_v23  ;;  %v8603_v60 = vpop.eup %7078 }
 0x54f   : > { %3174 = vadd.xlane.f32.xlu1 %v8597_v19  ;;  %7084 = vpow2.f32 %v3128_v26 }
 0x551   : > { %v8607_v50 = vpop.eup %7080 }
 0x552   : > { %3186 = vadd.xlane.f32.xlu0 %v8601_v53 }
 0x553   : > { %3176 = vadd.xlane.f32.xlu1 %v8603_v60 }
 0x555   : > { %v8612_v59 = vpop.eup %7082 }
 0x556   : > { %3188 = vadd.xlane.f32.xlu0 %v8607_v50 }
 0x559   : > { %v8616_v45 = vpop.eup %7084 }
 0x55a   : > { %3190 = vadd.xlane.f32.xlu0 %v8612_v59 }
 0x55e   : > { %3192 = vadd.xlane.f32.xlu0 %v8616_v45 }
 0x581   : > { %v3133_v2 = vpop.xlane.xlu1 %3132 }
 0x582   : > { %7086 = vrcp.f32 %v3133_v2 }
 0x585   : > { %v3131_v51 = vpop.xlane.xlu1 %3130 }
 0x586   : > { %7088 = vrcp.f32 %v3131_v51 }
 0x58c   : > { %v7087_v49 = vpop.eup %7086 }
 0x58d   : > { %v3227_v52 = vmul.f32 %v7087_v49, %v8490_v30 }
 0x58f   : > { %3259 = vst [vmem:[%s7775_s26 + $0x8] sm:$0xff] %v3227_v52 }
 0x590   : > { %v7089_v27 = vpop.eup %7088 }
 0x591   : > { %v3226_v21 = vmul.f32 %v7089_v27, %v8493_v1 }
 0x593   : > { %3258 = vst [vmem:[%s7775_s26] sm:$0xff] %v3226_v21  ;;  %6436 = vmatprep.mubr.f32.mxu1 %v3226_v21 }
 0x594   : > { %v3137_v38 = vpop.xlane.xlu1 %3136  ;;  %6437 = vmatmul.mubr.f32.vlgmr.msra.gmra.mrb[24].mxu1 %v3227_v52 }
 0x595   : > { %7090 = vrcp.f32 %v3137_v38  ;;  %6667 = vmatpush3.bf16.xpose.msra.mxu1 %v6664_v22  ;;  %v3305_v22 = vld [vmem:[#allocation3 + $0x78] sm:$0xff] }
 0x596   : > { %6669 = vmatprep.subr.bf16.mxu1 %v6668_v32  ;;  %v6676_v2 = vpack.c.bf16 %v3305_v22, %v3304_v4 }
 0x598   : > { %v3135_v12 = vpop.xlane.xlu1 %3134 }
 0x599   : > { %7092 = vrcp.f32 %v3135_v12 }
 0x59d   : > { %6671 = vmatpush3.bf16.xpose.msra.mxu1 %v6668_v32 }
 0x59f   : > { %v7091_v30 = vpop.eup %7090 }
 0x5a0   : > { %v3229_v62 = vmul.f32 %v7091_v30, %v8498_v40 }
 0x5a2   : > { %3261 = vst [vmem:[%s7775_s26 + $0x18] sm:$0xff] %v3229_v62 }
 0x5a3   : > { %v7093_v48 = vpop.eup %7092 }
 0x5a4   : > { %v3228_v39 = vmul.f32 %v7093_v48, %v8501_v6 }
 0x5a6   : > { %3260 = vst [vmem:[%s7775_s26 + $0x10] sm:$0xff] %v3228_v39  ;;  %6439 = vmatprep.mubr.f32.mxu1 %v3228_v39 }
 0x5a7   : > { %6440 = vmatmul.mubr.f32.gmra.mrb[26].mxu1 %v3229_v62 }
 0x5af   : > { %v3149_v1 = vpop.xlane.xlu0 %3148 }
 0x5b0   : > { %7094 = vrcp.f32 %v3149_v1 }
 0x5b3   : > { %v3147_v5 = vpop.xlane.xlu0 %3146 }
 0x5b4   : > { %7096 = vrcp.f32 %v3147_v5  ;;  %v3141_v34 = vpop.xlane.xlu1 %3140 }
 0x5b5   : > { %7098 = vrcp.f32 %v3141_v34 }
 0x5b7   : > { %v3153_v16 = vpop.xlane.xlu0 %3152 }
 0x5b8   : > { %7100 = vrcp.f32 %v3153_v16  ;;  %v3139_v29 = vpop.xlane.xlu1 %3138 }
 0x5b9   : > { %7102 = vrcp.f32 %v3139_v29 }
 0x5ba   : > { %v7095_v47 = vpop.eup %7094 }
 0x5bb   : > { %v3235_v40 = vmul.f32 %v7095_v47, %v8513_v35  ;;  %v3151_v24 = vpop.xlane.xlu0 %3150 }
 0x5bc   : > { %7104 = vrcp.f32 %v3151_v24  ;;  %v3145_v6 = vpop.xlane.xlu1 %3144 }
 0x5bd   : > { %3267 = vst [vmem:[%s7775_s26 + $0x48] sm:$0xff] %v3235_v40  ;;  %7106 = vrcp.f32 %v3145_v6 }
 0x5be   : > { %v7097_v31 = vpop.eup %7096 }
 0x5bf   : > { %v7099_v57 = vpop.eup %7098  ;;  %v3157_v61 = vpop.xlane.xlu0 %3156  ;;  %v3234_v26 = vmul.f32 %v7097_v31, %v8518_v44 }
 0x5c0   : > { %7108 = vrcp.f32 %v3157_v61  ;;  %v3143_v9 = vpop.xlane.xlu1 %3142  ;;  %v3231_v10 = vmul.f32 %v7099_v57, %v8520_v41 }
 0x5c1   : > { %7110 = vrcp.f32 %v3143_v9  ;;  %3266 = vst [vmem:[%s7775_s26 + $0x40] sm:$0xff] %v3234_v26  ;;  %6456 = vmatprep.mubr.f32.mxu0 %v3234_v26 }
 0x5c2   : > { %v7101_v35 = vpop.eup %7100  ;;  %6457 = vmatmul.mubr.f32.vlgmr.msra.gmra.mrb[16].mxu0 %v3235_v40  ;;  %3263 = vst [vmem:[%s7775_s26 + $0x28] sm:$0xff] %v3231_v10 }
 0x5c3   : > { %v7103_v51 = vpop.eup %7102  ;;  %v3155_v49 = vpop.xlane.xlu0 %3154  ;;  %v3237_v52 = vmul.f32 %v7101_v35, %v8526_v3  ;;  %6675 = vmatpush3.bf16.xpose.msra.mxu0 %v8610_v20 }
 0x5c4   : > { %7112 = vrcp.f32 %v3155_v49  ;;  %v3163_v44 = vpop.xlane.xlu1 %3162  ;;  %v3230_v41 = vmul.f32 %v7103_v51, %v8528_v8  ;;  %6677 = vmatprep.subr.bf16.mxu0 %v6676_v2 }
 0x5c5   : > { %7114 = vrcp.f32 %v3163_v44  ;;  %3269 = vst [vmem:[%s7775_s26 + $0x58] sm:$0xff] %v3237_v52 }
 0x5c6   : > { %v7105_v56 = vpop.eup %7104  ;;  %3262 = vst [vmem:[%s7775_s26 + $0x20] sm:$0xff] %v3230_v41  ;;  %6442 = vmatprep.mubr.f32.mxu1 %v3230_v41 }
 0x5c7   : > { %v7107_v17 = vpop.eup %7106  ;;  %6443 = vmatmul.mubr.f32.gmra.mrb[28].mxu1 %v3231_v10  ;;  %v3161_v27 = vpop.xlane.xlu0 %3160  ;;  %v3236_v21 = vmul.f32 %v7105_v56, %v8534_v63 }
 0x5c8   : > { %7116 = vrcp.f32 %v3161_v27  ;;  %v3165_v3 = vpop.xlane.xlu1 %3164  ;;  %v3233_v20 = vmul.f32 %v7107_v17, %v8536_v0 }
 0x5c9   : > { %7118 = vrcp.f32 %v3165_v3  ;;  %3268 = vst [vmem:[%s7775_s26 + $0x50] sm:$0xff] %v3236_v21  ;;  %6459 = vmatprep.mubr.f32.mxu0 %v3236_v21 }
 0x5ca   : > { %v7109_v8 = vpop.eup %7108  ;;  %6460 = vmatmul.mubr.f32.gmra.mrb[18].mxu0 %v3237_v52  ;;  %3265 = vst [vmem:[%s7775_s26 + $0x38] sm:$0xff] %v3233_v20 }
 0x5cb   : > { %v7111_v32 = vpop.eup %7110  ;;  %v3159_v38 = vpop.xlane.xlu0 %3158  ;;  %v3239_v12 = vmul.f32 %v7109_v8, %v8542_v46  ;;  %6679 = vmatpush3.bf16.xpose.msra.mxu0 %v6676_v2 }
 0x5cc   : > { %7120 = vrcp.f32 %v3159_v38  ;;  %v3167_v63 = vpop.xlane.xlu1 %3166  ;;  %v3232_v30 = vmul.f32 %v7111_v32, %v8544_v28 }
 0x5cd   : > { %7122 = vrcp.f32 %v3167_v63  ;;  %3271 = vst [vmem:[%s7775_s26 + $0x68] sm:$0xff] %v3239_v12  ;;  %v4938_v63 = vld [vmem:[#allocation9 + $0x10] sm:$0xff] }
 0x5ce   : > { %v7113_v0 = vpop.eup %7112  ;;  %3264 = vst [vmem:[%s7775_s26 + $0x30] sm:$0xff] %v3232_v30  ;;  %6445 = vmatprep.mubr.f32.mxu1 %v3232_v30 }
 0x5cf   : > { %v7115_v62 = vpop.eup %7114  ;;  %6446 = vmatmul.mubr.f32.gmra.mrb[30].mxu1 %v3233_v20  ;;  %v3179_v48 = vpop.xlane.xlu0 %3178  ;;  %v3238_v39 = vmul.f32 %v7113_v0, %v8550_v58  ;;  %v4939_v0 = vld [vmem:[#allocation9 + $0x18] sm:$0xff] }
 0x5d0   : > { %7124 = vrcp.f32 %v3179_v48  ;;  %v3169_v1 = vpop.xlane.xlu1 %3168  ;;  %v3242_v46 = vmul.f32 %v7115_v62, %v8552_v42  ;;  %v4940_v62 = vld [vmem:[#allocation9 + $0x20] sm:$0xff]  ;;  %v4941_v48 = vld [vmem:[#allocation9 + $0x28] sm:$0xff] }
 0x5d1   : > { %7126 = vrcp.f32 %v3169_v1  ;;  %3270 = vst [vmem:[%s7775_s26 + $0x60] sm:$0xff] %v3238_v39  ;;  %6462 = vmatprep.mubr.f32.mxu0 %v3238_v39  ;;  %v4942_v39 = vld [vmem:[#allocation9 + $0x30] sm:$0xff]  ;;  %v4943_v1 = vld [vmem:[#allocation9 + $0x38] sm:$0xff] }
 0x5d2   : > { %v7117_v28 = vpop.eup %7116  ;;  %6463 = vmatmul.mubr.f32.gmra.mrb[20].mxu0 %v3239_v12  ;;  %3274 = vst [vmem:[%s7775_s26 + $0x80] sm:$0xff] %v3242_v46  ;;  %6476 = vmatprep.mubr.f32.mxu1 %v3242_v46  ;;  %v4937_v12 = vld [vmem:[#allocation9 + $0x8] sm:$0xff]  ;;  %v6692_v46 = vpack.c.bf16 %v4943_v1, %v4942_v39 }
 0x5d3   : > { %v7119_v5 = vpop.eup %7118  ;;  %v3181_v34 = vpop.xlane.xlu0 %3180  ;;  %v3241_v16 = vmul.f32 %v7117_v28, %v8558_v33  ;;  %v4944_v28 = vld [vmem:[#allocation9 + $0x40] sm:$0xff] }
 0x5d4   : > { %v3243_v58 = vmul.f32 %v7119_v5, %v8560_v54  ;;  %7128 = vrcp.f32 %v3181_v34  ;;  %v3171_v29 = vpop.xlane.xlu1 %3170  ;;  %v4945_v5 = vld [vmem:[#allocation9 + $0x48] sm:$0xff] }
 0x5d5   : > { %7130 = vrcp.f32 %v3171_v29  ;;  %3273 = vst [vmem:[%s7775_s26 + $0x78] sm:$0xff] %v3241_v16  ;;  %v6696_v34 = vpack.c.bf16 %v4945_v5, %v4944_v28 }
 0x5d6   : > { %v7121_v42 = vpop.eup %7120  ;;  %3275 = vst [vmem:[%s7775_s26 + $0x88] sm:$0xff] %v3243_v58  ;;  %6477 = vmatmul.mubr.f32.vlgmr.msra.gmra.mrb[32].mxu1 %v3243_v58  ;;  %v4947_v58 = vld [vmem:[#allocation9 + $0x58] sm:$0xff] }
 0x5d7   : > { %v7123_v47 = vpop.eup %7122  ;;  %v3183_v40 = vpop.xlane.xlu0 %3182  ;;  %v3240_v24 = vmul.f32 %v7121_v42, %v8566_v37 }
 0x5d8   : > { %7132 = vrcp.f32 %v3183_v40  ;;  %v3173_v6 = vpop.xlane.xlu1 %3172  ;;  %v3244_v33 = vmul.f32 %v7123_v47, %v8568_v55 }
 0x5d9   : > { %7134 = vrcp.f32 %v3173_v6  ;;  %3272 = vst [vmem:[%s7775_s26 + $0x70] sm:$0xff] %v3240_v24  ;;  %6465 = vmatprep.mubr.f32.mxu0 %v3240_v24 }
 0x5da   : > { %v7125_v54 = vpop.eup %7124  ;;  %6466 = vmatmul.mubr.f32.gmra.mrb[22].mxu0 %v3241_v16  ;;  %3276 = vst [vmem:[%s7775_s26 + $0x90] sm:$0xff] %v3244_v33  ;;  %6479 = vmatprep.mubr.f32.mxu1 %v3244_v33  ;;  %v4946_v16 = vld [vmem:[#allocation9 + $0x50] sm:$0xff] }
 0x5db   : > { %v7127_v4 = vpop.eup %7126  ;;  %v3185_v22 = vpop.xlane.xlu0 %3184  ;;  %v3250_v31 = vmul.f32 %v7125_v54, %v8574_v36  ;;  %v6700_v47 = vpack.c.bf16 %v4947_v58, %v4946_v16 }
 0x5dc   : > { %7136 = vrcp.f32 %v3185_v22  ;;  %v3175_v37 = vpop.xlane.xlu1 %3174  ;;  %v3245_v57 = vmul.f32 %v7127_v4, %v8576_v13 }
 0x5dd   : > { %7138 = vrcp.f32 %v3175_v37  ;;  %3282 = vst [vmem:[%s7775_s26 + $0xc0] sm:$0xff] %v3250_v31  ;;  %6496 = vmatprep.mubr.f32.mxu0 %v3250_v31 }
 0x5de   : > { %v7129_v55 = vpop.eup %7128  ;;  %3277 = vst [vmem:[%s7775_s26 + $0x98] sm:$0xff] %v3245_v57  ;;  %6480 = vmatmul.mubr.f32.gmra.mrb[34].mxu1 %v3245_v57 }
 0x5df   : > { %v7131_v61 = vpop.eup %7130  ;;  %v3251_v26 = vmul.f32 %v7129_v55, %v8581_v25  ;;  %v3187_v9 = vpop.xlane.xlu0 %3186 }
 0x5e0   : > { %7140 = vrcp.f32 %v3187_v9  ;;  %v3177_v10 = vpop.xlane.xlu1 %3176  ;;  %v3246_v36 = vmul.f32 %v7131_v61, %v8583_v43 }
 0x5e1   : > { %3283 = vst [vmem:[%s7775_s26 + $0xc8] sm:$0xff] %v3251_v26  ;;  %7142 = vrcp.f32 %v3177_v10  ;;  %6497 = vmatmul.mubr.f32.vlgmr.msra.gmra.mrb[24].mxu0 %v3251_v26 }
 0x5e2   : > { %v7133_v13 = vpop.eup %7132  ;;  %3278 = vst [vmem:[%s7775_s26 + $0xa0] sm:$0xff] %v3246_v36  ;;  %6482 = vmatprep.mubr.f32.mxu1 %v3246_v36 }
 0x5e3   : > { %v7135_v2 = vpop.eup %7134  ;;  %v3189_v35 = vpop.xlane.xlu0 %3188  ;;  %v3252_v51 = vmul.f32 %v7133_v13, %v8588_v14 }
 0x5e4   : > { %7144 = vrcp.f32 %v3189_v35  ;;  %v3247_v25 = vmul.f32 %v7135_v2, %v8590_v15 }
 0x5e5   : > { %3284 = vst [vmem:[%s7775_s26 + $0xd0] sm:$0xff] %v3252_v51  ;;  %6499 = vmatprep.mubr.f32.mxu0 %v3252_v51 }
 0x5e6   : > { %v7137_v49 = vpop.eup %7136  ;;  %3279 = vst [vmem:[%s7775_s26 + $0xa8] sm:$0xff] %v3247_v25  ;;  %6483 = vmatmul.mubr.f32.gmra.mrb[36].mxu1 %v3247_v25 }
 0x5e7   : > { %v7139_v43 = vpop.eup %7138  ;;  %v3191_v52 = vpop.xlane.xlu0 %3190  ;;  %v3253_v44 = vmul.f32 %v7137_v49, %v8595_v23 }
 0x5e8   : > { %7146 = vrcp.f32 %v3191_v52  ;;  %v3248_v41 = vmul.f32 %v7139_v43, %v8597_v19 }
 0x5e9   : > { %3285 = vst [vmem:[%s7775_s26 + $0xd8] sm:$0xff] %v3253_v44  ;;  %6500 = vmatmul.mubr.f32.gmra.mrb[26].mxu0 %v3253_v44 }
 0x5ea   : > { %v7141_v14 = vpop.eup %7140  ;;  %3280 = vst [vmem:[%s7775_s26 + $0xb0] sm:$0xff] %v3248_v41  ;;  %6485 = vmatprep.mubr.f32.mxu1 %v3248_v41 }
 0x5eb   : > { %v7143_v15 = vpop.eup %7142  ;;  %v3193_v56 = vpop.xlane.xlu0 %3192  ;;  %v3254_v17 = vmul.f32 %v7141_v14, %v8601_v53 }
 0x5ec   : > { %7148 = vrcp.f32 %v3193_v56  ;;  %v3249_v27 = vmul.f32 %v7143_v15, %v8603_v60 }
 0x5ed   : > { %3286 = vst [vmem:[%s7775_s26 + $0xe0] sm:$0xff] %v3254_v17  ;;  %6502 = vmatprep.mubr.f32.mxu0 %v3254_v17 }
 0x5ee   : > { %v7145_v23 = vpop.eup %7144  ;;  %3281 = vst [vmem:[%s7775_s26 + $0xb8] sm:$0xff] %v3249_v27  ;;  %6486 = vmatmul.mubr.f32.gmra.mrb[38].mxu1 %v3249_v27 }
 0x5ef   : > { %v3255_v19 = vmul.f32 %v7145_v23, %v8607_v50  ;;  %v4936_v50 = vld [vmem:[#allocation9] sm:$0xff] }
 0x5f0   : > { %v6680_v30 = vpack.c.bf16 %v4937_v12, %v4936_v50 }
 0x5f1   : > { %3287 = vst [vmem:[%s7775_s26 + $0xe8] sm:$0xff] %v3255_v19  ;;  %6503 = vmatmul.mubr.f32.gmra.mrb[28].mxu0 %v3255_v19 }
 0x5f2   : > { %v7147_v21 = vpop.eup %7146  ;;  %6681 = vmatprep.subr.bf16.mxu1 %v6680_v30 }
 0x5f3   : > { %v3256_v3 = vmul.f32 %v7147_v21, %v8612_v59  ;;  %v6684_v59 = vpack.c.bf16 %v4939_v0, %v4938_v63  ;;  %6683 = vmatpush3.bf16.msra.mxu1 %v6680_v30 }
 0x5f5   : > { %3288 = vst [vmem:[%s7775_s26 + $0xf0] sm:$0xff] %v3256_v3  ;;  %6505 = vmatprep.mubr.f32.mxu0 %v3256_v3  ;;  %6685 = vmatprep.subr.bf16.mxu1 %v6684_v59 }
 0x5f6   : > { %v7149_v20 = vpop.eup %7148 }
 0x5f7   : > { %v3257_v53 = vmul.f32 %v7149_v20, %v8616_v45  ;;  %v6688_v45 = vpack.c.bf16 %v4941_v48, %v4940_v62  ;;  %6687 = vmatpush3.bf16.msra.mxu1 %v6684_v59 }
 0x5f9   : > { %3289 = vst [vmem:[%s7775_s26 + $0xf8] sm:$0xff] %v3257_v53  ;;  %6506 = vmatmul.mubr.f32.gmra.mrb[30].mxu0 %v3257_v53  ;;  %6689 = vmatprep.subr.bf16.mxu1 %v6688_v45 }
 0x5fb   : > { %6691 = vmatpush3.bf16.msra.mxu1 %v6688_v45 }
 0x5fc   : > { %6693 = vmatprep.subr.bf16.mxu1 %v6692_v46 }
 0x5ff   : > { %6695 = vmatpush3.bf16.msra.mxu1 %v6692_v46 }
 0x600   : > { %6697 = vmatprep.subr.bf16.mxu1 %v6696_v34 }
 0x603   : > { %6699 = vmatpush3.bf16.msra.mxu1 %v6696_v34 }
 0x604   : > { %6701 = vmatprep.subr.bf16.mxu1 %v6700_v47 }
 0x607   : > { %6703 = vmatpush3.bf16.msra.mxu1 %v6700_v47 }
 0x667   : > { %v6438_v60 = vpop.f32.mrb[24].mxu1 }
 0x668   : > { %v8684_v8 = vpop.f32.mrb[25].mxu1 }
 0x67a   : > { %v8686_v32 = vpop.f32.mrb[26].mxu1 }
 0x67b   : > { %v8688_v38 = vpop.f32.mrb[27].mxu1 }
 0x695   : > { %v6458_v29 = vpop.f32.mrb[16].mxu0 }
 0x696   : > { %v3477_v42 = vpop.f32.mrb[17].mxu0 }
 0x69a   : > { %v8690_v40 = vpop.f32.mrb[28].mxu1 }
 0x69b   : > { %v8692_v24 = vpop.f32.mrb[29].mxu1 }
 0x69d   : > { %v8694_v6 = vpop.f32.mrb[18].mxu0 }
 0x69e   : > { %v8696_v33 = vpop.f32.mrb[19].mxu0 }
 0x6a2   : > { %v8698_v54 = vpop.f32.mrb[30].mxu1 }
 0x6a3   : > { %v8700_v4 = vpop.f32.mrb[31].mxu1 }
 0x6a5   : > { %v8702_v22 = vpop.f32.mrb[20].mxu0 }
 0x6a6   : > { %v8704_v31 = vpop.f32.mrb[21].mxu0 }
 0x6a9   : > { %v6478_v37 = vpop.f32.mrb[32].mxu1 }
 0x6aa   : > { %v3794_v57 = vcombine.low %v6438_v60, %v6478_v37  ;;  %v3795_v55 = vcombine.high %v6438_v60, %v6478_v37  ;;  %v3582_v61 = vpop.f32.mrb[33].mxu1 }
 0x6ab   : > { %v3726_v26 = vcombine.low %v8684_v8, %v3582_v61  ;;  %v3727_v9 = vcombine.high %v8684_v8, %v3582_v61 }
 0x6ac   : > { %v3802_v52 = vrot.slane %v3794_v57, %v8002_v11  ;;  %v3809_v44 = vrot.slane %v3795_v55, %v8002_v11 }
 0x6ad   : > { %v8708_v10 = vpop.f32.mrb[22].mxu0  ;;  %v3734_v56 = vrot.slane %v3726_v26, %v8002_v11  ;;  %v3741_v17 = vrot.slane %v3727_v9, %v8002_v11 }
 0x6ae   : > { %v8710_v36 = vpop.f32.mrb[23].mxu0 }
 0x6b1   : > { %v6481_v13 = vpop.f32.mrb[34].mxu1 }
 0x6b2   : > { %v3930_v2 = vcombine.low %v8686_v32, %v6481_v13  ;;  %v3931_v35 = vcombine.high %v8686_v32, %v6481_v13  ;;  %v3592_v51 = vpop.f32.mrb[35].mxu1 }
 0x6b3   : > { %v3862_v25 = vcombine.low %v8688_v38, %v3592_v51  ;;  %v3863_v49 = vcombine.high %v8688_v38, %v3592_v51 }
 0x6b4   : > { %v6498_v43 = vpop.f32.mrb[24].mxu0  ;;  %v8721_v19 = vrot.slane %v3930_v2, %v8002_v11  ;;  %v8724_v21 = vrot.slane %v3931_v35, %v8002_v11 }
 0x6b5   : > { %v3810_v41 = vcombine.low %v6458_v29, %v6498_v43  ;;  %v3811_v14 = vcombine.high %v6458_v29, %v6498_v43  ;;  %v3687_v15 = vpop.f32.mrb[25].mxu0  ;;  %v8729_v53 = vrot.slane %v3862_v25, %v8002_v11  ;;  %v8732_v60 = vrot.slane %v3863_v49, %v8002_v11 }
 0x6b6   : > { %v3742_v27 = vcombine.low %v3477_v42, %v3687_v15  ;;  %v3743_v23 = vcombine.high %v3477_v42, %v3687_v15 }
 0x6b7   : > { %v3818_v3 = vrot.slane %v3810_v41, %v8002_v11  ;;  %v3825_v20 = vrot.slane %v3811_v14, %v8002_v11 }
 0x6b8   : > { %v3750_v8 = vrot.slane %v3742_v27, %v8002_v11  ;;  %v3757_v32 = vrot.slane %v3743_v23, %v8002_v11 }
 0x6b9   : > { %v3826_v38 = vcombine.low %v3802_v52, %v3818_v3  ;;  %v3827_v50 = vcombine.high %v3802_v52, %v3818_v3  ;;  %v3842_v12 = vcombine.low %v3809_v44, %v3825_v20  ;;  %v3843_v63 = vcombine.high %v3809_v44, %v3825_v20  ;;  %v6484_v30 = vpop.f32.mrb[36].mxu1 }
 0x6ba   : > { %v3758_v0 = vcombine.low %v3734_v56, %v3750_v8  ;;  %v3759_v59 = vcombine.high %v3734_v56, %v3750_v8  ;;  %v3774_v62 = vcombine.low %v3741_v17, %v3757_v32  ;;  %v3775_v48 = vcombine.high %v3741_v17, %v3757_v32  ;;  %v3602_v45 = vpop.f32.mrb[37].mxu1 }
 0x6bb   : > { %v3834_v39 = vrot.slane %v3826_v38, %v8007_v18  ;;  %v3841_v1 = vrot.slane %v3827_v50, %v8007_v18  ;;  %v3850_v46 = vrot.slane %v3842_v12, %v8007_v18  ;;  %v3857_v28 = vrot.slane %v3843_v63, %v8007_v18 }
 0x6bc   : > { %v3766_v5 = vrot.slane %v3758_v0, %v8007_v18  ;;  %v3773_v34 = vrot.slane %v3759_v59, %v8007_v18  ;;  %v3782_v16 = vrot.slane %v3774_v62, %v8007_v18  ;;  %v3789_v58 = vrot.slane %v3775_v48, %v8007_v18  ;;  %v6501_v29 = vpop.f32.mrb[26].mxu0 }
 0x6bd   : > { %v4338_v42 = vcombine.low %v3834_v39, %v3841_v1  ;;  %v5945_v47 = vcombine.high %v3834_v39, %v3841_v1  ;;  %v4354_v37 = vcombine.low %v3850_v46, %v3857_v28  ;;  %v5946_v57 = vcombine.high %v3850_v46, %v3857_v28  ;;  %v3697_v55 = vpop.f32.mrb[27].mxu0 }
 0x6be   : > { %v4270_v61 = vcombine.low %v3766_v5, %v3773_v34  ;;  %v5943_v26 = vcombine.high %v3766_v5, %v3773_v34  ;;  %v4286_v9 = vcombine.low %v3782_v16, %v3789_v58  ;;  %v5944_v13 = vcombine.high %v3782_v16, %v3789_v58 }
 0x6bf   : > { %v8745_v2 = vrot.slane %v4338_v42, %v8002_v11  ;;  %v8748_v35 = vrot.slane %v5945_v47, %v8002_v11  ;;  %v8751_v51 = vrot.slane %v4354_v37, %v8002_v11  ;;  %v8754_v25 = vrot.slane %v5946_v57, %v8002_v11 }
 0x6c0   : > { %v8757_v49 = vrot.slane %v4270_v61, %v8002_v11  ;;  %v8760_v43 = vrot.slane %v5943_v26, %v8002_v11  ;;  %v8763_v52 = vrot.slane %v4286_v9, %v8002_v11  ;;  %v8766_v44 = vrot.slane %v5944_v13, %v8002_v11 }
 0x6c1   : > { %v4066_v41 = vcombine.low %v8690_v40, %v6484_v30  ;;  %v4067_v14 = vcombine.high %v8690_v40, %v6484_v30  ;;  %v3998_v15 = vcombine.low %v8692_v24, %v3602_v45  ;;  %v3999_v56 = vcombine.high %v8692_v24, %v3602_v45  ;;  %v6487_v17 = vpop.f32.mrb[38].mxu1 }
 0x6c2   : > { %v3946_v27 = vcombine.low %v8694_v6, %v6501_v29  ;;  %v3947_v23 = vcombine.high %v8694_v6, %v6501_v29  ;;  %v3878_v3 = vcombine.low %v8696_v33, %v3697_v55  ;;  %v3879_v20 = vcombine.high %v8696_v33, %v3697_v55  ;;  %v3612_v8 = vpop.f32.mrb[39].mxu1 }
 0x6c3   : > { %v8777_v32 = vrot.slane %v4066_v41, %v8002_v11  ;;  %v8780_v38 = vrot.slane %v4067_v14, %v8002_v11  ;;  %v8783_v40 = vrot.slane %v3998_v15, %v8002_v11  ;;  %v8786_v24 = vrot.slane %v3999_v56, %v8002_v11 }
 0x6c4   : > { %v3954_v50 = vrot.slane %v3946_v27, %v8002_v11  ;;  %v3961_v6 = vrot.slane %v3947_v23, %v8002_v11  ;;  %v3886_v12 = vrot.slane %v3878_v3, %v8002_v11  ;;  %v3893_v33 = vrot.slane %v3879_v20, %v8002_v11  ;;  %v6504_v63 = vpop.f32.mrb[28].mxu0 }
 0x6c5   : > { %v4202_v30 = vcombine.low %v8698_v54, %v6487_v17  ;;  %v4203_v0 = vcombine.high %v8698_v54, %v6487_v17  ;;  %v4134_v59 = vcombine.low %v8700_v4, %v3612_v8  ;;  %v4135_v62 = vcombine.high %v8700_v4, %v3612_v8  ;;  %v3707_v48 = vpop.f32.mrb[29].mxu0 }
 0x6c6   : > { %v3962_v45 = vcombine.low %v8721_v19, %v3954_v50  ;;  %v3963_v39 = vcombine.high %v8721_v19, %v3954_v50  ;;  %v3978_v1 = vcombine.low %v8724_v21, %v3961_v6  ;;  %v3979_v46 = vcombine.high %v8724_v21, %v3961_v6 }
 0x6c7   : > { %v3894_v28 = vcombine.low %v8729_v53, %v3886_v12  ;;  %v3895_v5 = vcombine.high %v8729_v53, %v3886_v12  ;;  %v3910_v34 = vcombine.low %v8732_v60, %v3893_v33  ;;  %v3911_v54 = vcombine.high %v8732_v60, %v3893_v33 }
 0x6c8   : > { %v3970_v16 = vrot.slane %v3962_v45, %v8007_v18  ;;  %v3977_v4 = vrot.slane %v3963_v39, %v8007_v18  ;;  %v3986_v58 = vrot.slane %v3978_v1, %v8007_v18  ;;  %v3993_v19 = vrot.slane %v3979_v46, %v8007_v18 }
 0x6c9   : > { %v3902_v29 = vrot.slane %v3894_v28, %v8007_v18  ;;  %v3909_v21 = vrot.slane %v3895_v5, %v8007_v18  ;;  %v3918_v42 = vrot.slane %v3910_v34, %v8007_v18  ;;  %v3925_v53 = vrot.slane %v3911_v54, %v8007_v18 }
 0x6ca   : > { %v4474_v47 = vcombine.low %v3970_v16, %v3977_v4  ;;  %v5949_v37 = vcombine.high %v3970_v16, %v3977_v4  ;;  %v4490_v57 = vcombine.low %v3986_v58, %v3993_v19  ;;  %v5950_v60 = vcombine.high %v3986_v58, %v3993_v19 }
 0x6cb   : > { %v4406_v55 = vcombine.low %v3902_v29, %v3909_v21  ;;  %v5947_v61 = vcombine.high %v3902_v29, %v3909_v21  ;;  %v4422_v26 = vcombine.low %v3918_v42, %v3925_v53  ;;  %v5948_v9 = vcombine.high %v3918_v42, %v3925_v53 }
 0x6cc   : > { %v8813_v13 = vrot.slane %v4474_v47, %v8002_v11  ;;  %v8816_v41 = vrot.slane %v5949_v37, %v8002_v11  ;;  %v8819_v14 = vrot.slane %v4490_v57, %v8002_v11  ;;  %v8822_v15 = vrot.slane %v5950_v60, %v8002_v11  ;;  %v8824_v56 = vpop.f32.mrb[30].mxu0 }
 0x6cd   : > { %v8827_v17 = vrot.slane %v4406_v55, %v8002_v11  ;;  %v8830_v27 = vrot.slane %v5947_v61, %v8002_v11  ;;  %v8833_v23 = vrot.slane %v4422_v26, %v8002_v11  ;;  %v8836_v3 = vrot.slane %v5948_v9, %v8002_v11  ;;  %v8838_v20 = vpop.f32.mrb[31].mxu0 }
 0x6ce   : > { %v8841_v8 = vrot.slane %v4202_v30, %v8002_v11  ;;  %v8844_v50 = vrot.slane %v4203_v0, %v8002_v11  ;;  %v8847_v6 = vrot.slane %v4134_v59, %v8002_v11  ;;  %v8850_v12 = vrot.slane %v4135_v62, %v8002_v11 }
 0x6cf   : > { %v4082_v33 = vcombine.low %v8702_v22, %v6504_v63  ;;  %v4083_v45 = vcombine.high %v8702_v22, %v6504_v63  ;;  %v4014_v39 = vcombine.low %v8704_v31, %v3707_v48  ;;  %v4015_v1 = vcombine.high %v8704_v31, %v3707_v48 }
 0x6d0   : > { %v4303_v30 = vcombine.high %v8757_v49, %v8760_v43  ;;  %v4319_v0 = vcombine.high %v8763_v52, %v8766_v44  ;;  %v4371_v59 = vcombine.high %v8745_v2, %v8748_v35  ;;  %v4387_v62 = vcombine.high %v8751_v51, %v8754_v25 }
 0x6d1   : > { %v4090_v46 = vrot.slane %v4082_v33, %v8002_v11  ;;  %v4097_v22 = vrot.slane %v4083_v45, %v8002_v11  ;;  %v4022_v63 = vrot.slane %v4014_v39, %v8002_v11  ;;  %v4029_v31 = vrot.slane %v4015_v1, %v8002_v11 }
 0x6d2   : > { %v8869_v48 = vrot.slane %v4303_v30, %v8007_v18  ;;  %v8872_v28 = vrot.slane %v4319_v0, %v8007_v18  ;;  %v8875_v5 = vrot.slane %v4371_v59, %v8007_v18  ;;  %v8878_v34 = vrot.slane %v4387_v62, %v8007_v18 }
 0x6d3   : > { %v4098_v54 = vcombine.low %v8777_v32, %v4090_v46  ;;  %v4099_v16 = vcombine.high %v8777_v32, %v4090_v46  ;;  %v4114_v4 = vcombine.low %v8780_v38, %v4097_v22  ;;  %v4115_v58 = vcombine.high %v8780_v38, %v4097_v22 }
 0x6d4   : > { %v4030_v19 = vcombine.low %v8783_v40, %v4022_v63  ;;  %v4031_v29 = vcombine.high %v8783_v40, %v4022_v63  ;;  %v4046_v21 = vcombine.low %v8786_v24, %v4029_v31  ;;  %v4047_v42 = vcombine.high %v8786_v24, %v4029_v31 }
 0x6d5   : > { %v4106_v53 = vrot.slane %v4098_v54, %v8007_v18  ;;  %v4113_v47 = vrot.slane %v4099_v16, %v8007_v18  ;;  %v4122_v37 = vrot.slane %v4114_v4, %v8007_v18  ;;  %v4129_v32 = vrot.slane %v4115_v58, %v8007_v18 }
 0x6d6   : > { %v4038_v57 = vrot.slane %v4030_v19, %v8007_v18  ;;  %v4045_v38 = vrot.slane %v4031_v29, %v8007_v18  ;;  %v4054_v60 = vrot.slane %v4046_v21, %v8007_v18  ;;  %v4061_v40 = vrot.slane %v4047_v42, %v8007_v18 }
 0x6d7   : > { %v4610_v55 = vcombine.low %v4106_v53, %v4113_v47  ;;  %v5953_v61 = vcombine.high %v4106_v53, %v4113_v47  ;;  %v4626_v26 = vcombine.low %v4122_v37, %v4129_v32  ;;  %v5954_v24 = vcombine.high %v4122_v37, %v4129_v32 }
 0x6d8   : > { %v4542_v9 = vcombine.low %v4038_v57, %v4045_v38  ;;  %v5951_v33 = vcombine.high %v4038_v57, %v4045_v38  ;;  %v4558_v45 = vcombine.low %v4054_v60, %v4061_v40  ;;  %v5952_v39 = vcombine.high %v4054_v60, %v4061_v40 }
 0x6d9   : > { %v8897_v1 = vrot.slane %v4610_v55, %v8002_v11  ;;  %v8900_v30 = vrot.slane %v5953_v61, %v8002_v11  ;;  %v8903_v0 = vrot.slane %v4626_v26, %v8002_v11  ;;  %v8906_v59 = vrot.slane %v5954_v24, %v8002_v11 }
 0x6da   : > { %v8909_v62 = vrot.slane %v4542_v9, %v8002_v11  ;;  %v8912_v46 = vrot.slane %v5951_v33, %v8002_v11  ;;  %v8915_v22 = vrot.slane %v4558_v45, %v8002_v11  ;;  %v8918_v63 = vrot.slane %v5952_v39, %v8002_v11 }
 0x6db   : > { %v4336_v31 = vcombine.low %v8869_v48, %v8872_v28  ;;  %v4404_v54 = vcombine.low %v8875_v5, %v8878_v34  ;;  %v4302_v16 = vcombine.low %v8757_v49, %v8760_v43  ;;  %v4318_v4 = vcombine.low %v8763_v52, %v8766_v44 }
 0x6dc   : > { %v4370_v58 = vcombine.low %v8745_v2, %v8748_v35  ;;  %v4386_v19 = vcombine.low %v8751_v51, %v8754_v25  ;;  %v4218_v29 = vcombine.low %v8708_v10, %v8824_v56  ;;  %v4219_v21 = vcombine.high %v8708_v10, %v8824_v56 }
 0x6dd   : > { %v6967_v42 = vpack.i.bf16 %v4404_v54, %v4336_v31  ;;  %v8937_v53 = vrot.slane %v4302_v16, %v8007_v18  ;;  %v8940_v49 = vrot.slane %v4318_v4, %v8007_v18  ;;  %v4150_v43 = vcombine.low %v8710_v36, %v8838_v20 }
 0x6de   : > { %v8945_v2 = vrot.slane %v4370_v58, %v8007_v18  ;;  %v8948_v35 = vrot.slane %v4386_v19, %v8007_v18  ;;  %v4226_v51 = vrot.slane %v4218_v29, %v8002_v11  ;;  %v4233_v10 = vrot.slane %v4219_v21, %v8002_v11 }
 0x6df   : > { %6968 = vrot.lane.b32.xlu0 %v6967_v42, %s7452_s12  ;;  %v4335_v25 = vcombine.high %v8937_v53, %v8940_v49  ;;  %v4334_v52 = vcombine.low %v8937_v53, %v8940_v49  ;;  %v4151_v44 = vcombine.high %v8710_v36, %v8838_v20  ;;  %v4158_v56 = vrot.slane %v4150_v43, %v8002_v11 }
 0x6e0   : > { %v4402_v47 = vcombine.low %v8945_v2, %v8948_v35  ;;  %v4403_v37 = vcombine.high %v8945_v2, %v8948_v35  ;;  %v4234_v32 = vcombine.low %v8841_v8, %v4226_v51  ;;  %v4235_v57 = vcombine.high %v8841_v8, %v4226_v51 }
 0x6e1   : > { %v4250_v38 = vcombine.low %v8844_v50, %v4233_v10  ;;  %v4251_v60 = vcombine.high %v8844_v50, %v4233_v10  ;;  %v4165_v40 = vrot.slane %v4151_v44, %v8002_v11  ;;  %v4166_v36 = vcombine.low %v8847_v6, %v4158_v56 }
 0x6e2   : > { %v6962_v20 = vpack.i.bf16 %v4403_v37, %v4335_v25  ;;  %v4242_v55 = vrot.slane %v4234_v32, %v8007_v18  ;;  %v4249_v61 = vrot.slane %v4235_v57, %v8007_v18  ;;  %v4167_v26 = vcombine.high %v8847_v6, %v4158_v56 }
 0x6e3   : > { %v4258_v24 = vrot.slane %v4250_v38, %v8007_v18  ;;  %v4265_v9 = vrot.slane %v4251_v60, %v8007_v18  ;;  %v4174_v8 = vrot.slane %v4166_v36, %v8007_v18  ;;  %v4182_v33 = vcombine.low %v8850_v12, %v4165_v40 }
 0x6e4   : > { %6963 = vrot.lane.b32.xlu1 %v6962_v20, %s7454_s20  ;;  %v4746_v50 = vcombine.low %v4242_v55, %v4249_v61  ;;  %v5957_v45 = vcombine.high %v4242_v55, %v4249_v61  ;;  %v4181_v39 = vrot.slane %v4167_v26, %v8007_v18  ;;  %v4183_v31 = vcombine.high %v8850_v12, %v4165_v40 }
 0x6e5   : > { %v4762_v54 = vcombine.low %v4258_v24, %v4265_v9  ;;  %v5958_v16 = vcombine.high %v4258_v24, %v4265_v9  ;;  %v4190_v6 = vrot.slane %v4182_v33, %v8007_v18  ;;  %v4337_v4 = vcombine.high %v8869_v48, %v8872_v28 }
 0x6e6   : > { %v8984_v58 = vrot.slane %v4746_v50, %v8002_v11  ;;  %v8987_v19 = vrot.slane %v5957_v45, %v8002_v11  ;;  %v4197_v29 = vrot.slane %v4183_v31, %v8007_v18  ;;  %v4678_v21 = vcombine.low %v4174_v8, %v4181_v39 }
 0x6e7   : > { %v8991_v42 = vrot.slane %v4762_v54, %v8002_v11  ;;  %v8994_v12 = vrot.slane %v5958_v16, %v8002_v11  ;;  %v5955_v43 = vcombine.high %v4174_v8, %v4181_v39  ;;  %v4405_v51 = vcombine.high %v8875_v5, %v8878_v34 }
 0x6e8   : > { %v8999_v48 = vrot.slane %v4678_v21, %v8002_v11  ;;  %v4694_v28 = vcombine.low %v4190_v6, %v4197_v29  ;;  %v5956_v10 = vcombine.high %v4190_v6, %v4197_v29  ;;  %v4439_v25 = vcombine.high %v8827_v17, %v8830_v27 }
 0x6e9   : > { %v9004_v44 = vrot.slane %v5955_v43, %v8002_v11  ;;  %v6972_v56 = vpack.i.bf16 %v4405_v51, %v4337_v4  ;;  %v4455_v37 = vcombine.high %v8833_v23, %v8836_v3  ;;  %v4507_v32 = vcombine.high %v8813_v13, %v8816_v41 }
 0x6ea   : > { %v9011_v5 = vrot.slane %v4694_v28, %v8002_v11  ;;  %v9014_v34 = vrot.slane %v5956_v10, %v8002_v11  ;;  %v4453_v57 = vrot.slane %v4439_v25, %v8007_v18  ;;  %v4523_v38 = vcombine.high %v8819_v14, %v8822_v15 }
 0x6eb   : > { %6973 = vrot.lane.b32.xlu1 %v6972_v56, %s7453_s13  ;;  %v4469_v60 = vrot.slane %v4455_v37, %v8007_v18  ;;  %v4521_v40 = vrot.slane %v4507_v32, %v8007_v18  ;;  %v4438_v36 = vcombine.low %v8827_v17, %v8830_v27  ;;  %v4454_v20 = vcombine.low %v8833_v23, %v8836_v3 }
 0x6ec   : > { %v4537_v11 = vrot.slane %v4523_v38, %v8007_v18  ;;  %v4506_v55 = vcombine.low %v8813_v13, %v8816_v41  ;;  %v4522_v61 = vcombine.low %v8819_v14, %v8822_v15  ;;  %v4575_v26 = vcombine.high %v8909_v62, %v8912_v46 }
 0x6ed   : > { %v4472_v24 = vcombine.low %v4453_v57, %v4469_v60  ;;  %v9034_v9 = vrot.slane %v4438_v36, %v8007_v18  ;;  %v9037_v17 = vrot.slane %v4454_v20, %v8007_v18  ;;  %v4473_v27 = vcombine.high %v4453_v57, %v4469_v60 }
 0x6ee   : > { %v4540_v23 = vcombine.low %v4521_v40, %v4537_v11  ;;  %v9040_v3 = vrot.slane %v4506_v55, %v8007_v18  ;;  %v9043_v13 = vrot.slane %v4522_v61, %v8007_v18  ;;  %v4541_v41 = vcombine.high %v4521_v40, %v4537_v11 }
 0x6ef   : > { %v4471_v14 = vcombine.high %v9034_v9, %v9037_v17  ;;  %v4470_v15 = vcombine.low %v9034_v9, %v9037_v17  ;;  %v4589_v8 = vrot.slane %v4575_v26, %v8007_v18  ;;  %v4591_v33 = vcombine.high %v8915_v22, %v8918_v63 }
 0x6f0   : > { %v6982_v50 = vpack.i.bf16 %v4540_v23, %v4472_v24  ;;  %v4538_v45 = vcombine.low %v9040_v3, %v9043_v13  ;;  %v4539_v39 = vcombine.high %v9040_v3, %v9043_v13  ;;  %v6987_v31 = vpack.i.bf16 %v4541_v41, %v4473_v27  ;;  %v4948_v24 = vld [vmem:[#allocation9 + $0x60] sm:$0xff] }
 0x6f1   : > { %v4605_v54 = vrot.slane %v4591_v33, %v8007_v18  ;;  %v4643_v16 = vcombine.high %v8897_v1, %v8900_v30  ;;  %v4659_v6 = vcombine.high %v8903_v0, %v8906_v59  ;;  %v4574_v4 = vcombine.low %v8909_v62, %v8912_v46  ;;  %v4950_v33 = vld [vmem:[#allocation9 + $0x70] sm:$0xff] }
 0x6f2   : > { %6983 = vrot.lane.b32.xlu0 %v6982_v50, %s7452_s12  ;;  %v6977_v29 = vpack.i.bf16 %v4539_v39, %v4471_v14  ;;  %v4590_v21 = vcombine.low %v8915_v22, %v8918_v63  ;;  %v4642_v43 = vcombine.low %v8897_v1, %v8900_v30  ;;  %v4658_v51 = vcombine.low %v8903_v0, %v8906_v59  ;;  %v4951_v50 = vld [vmem:[#allocation9 + $0x78] sm:$0xff] }
 0x6f3   : > { %v4608_v28 = vcombine.low %v4589_v8, %v4605_v54  ;;  %v4657_v10 = vrot.slane %v4643_v16, %v8007_v18  ;;  %v4673_v25 = vrot.slane %v4659_v6, %v8007_v18  ;;  %v9073_v56 = vrot.slane %v4574_v4, %v8007_v18 }
 0x6f4   : > { %6978 = vrot.lane.b32.xlu1 %v6977_v29, %s7454_s20  ;;  %v9077_v62 = vrot.slane %v4590_v21, %v8007_v18  ;;  %v9080_v46 = vrot.slane %v4642_v43, %v8007_v18  ;;  %v9083_v1 = vrot.slane %v4658_v51, %v8007_v18  ;;  %v4609_v30 = vcombine.high %v4589_v8, %v4605_v54  ;;  %v4949_v8 = vld [vmem:[#allocation9 + $0x68] sm:$0xff] }
 0x6f5   : > { %v4676_v0 = vcombine.low %v4657_v10, %v4673_v25  ;;  %v4677_v59 = vcombine.high %v4657_v10, %v4673_v25  ;;  %v4711_v22 = vcombine.high %v8999_v48, %v9004_v44  ;;  %v4727_v63 = vcombine.high %v9011_v5, %v9014_v34 }
 0x6f6   : > { %v4607_v37 = vcombine.high %v9073_v56, %v9077_v62  ;;  %v4674_v32 = vcombine.low %v9080_v46, %v9083_v1  ;;  %v4675_v57 = vcombine.high %v9080_v46, %v9083_v1  ;;  %v4606_v38 = vcombine.low %v9073_v56, %v9077_v62 }
 0x6f7   : > { %v6997_v60 = vpack.i.bf16 %v4676_v0, %v4608_v28  ;;  %v7002_v40 = vpack.i.bf16 %v4677_v59, %v4609_v30  ;;  %v4725_v36 = vrot.slane %v4711_v22, %v8007_v18  ;;  %v4741_v20 = vrot.slane %v4727_v63, %v8007_v18 }
 0x6f8   : > { %6988 = vrot.lane.b32.xlu1 %v6987_v31, %s7453_s13  ;;  %v6992_v11 = vpack.i.bf16 %v4675_v57, %v4607_v37  ;;  %v4779_v55 = vcombine.high %v8984_v58, %v8987_v19  ;;  %v4795_v61 = vcombine.high %v8991_v42, %v8994_v12  ;;  %v4710_v26 = vcombine.low %v8999_v48, %v9004_v44 }
 0x6f9   : > { %v4744_v27 = vcombine.low %v4725_v36, %v4741_v20  ;;  %v4726_v23 = vcombine.low %v9011_v5, %v9014_v34  ;;  %v4778_v41 = vcombine.low %v8984_v58, %v8987_v19  ;;  %v4794_v14 = vcombine.low %v8991_v42, %v8994_v12 }
 0x6fa   : > { %6993 = vrot.lane.b32.xlu0 %v6992_v11, %s7454_s20  ;;  %v4793_v39 = vrot.slane %v4779_v55, %v8007_v18  ;;  %v4809_v48 = vrot.slane %v4795_v61, %v8007_v18  ;;  %v9116_v44 = vrot.slane %v4710_v26, %v8007_v18  ;;  %v4745_v31 = vcombine.high %v4725_v36, %v4741_v20 }
 0x6fb   : > { %v9119_v5 = vrot.slane %v4726_v23, %v8007_v18  ;;  %v9122_v58 = vrot.slane %v4778_v41, %v8007_v18  ;;  %v9125_v19 = vrot.slane %v4794_v14, %v8007_v18  ;;  %v6704_v34 = vpack.c.bf16 %v4949_v8, %v4948_v24 }
 0x6fc   : > { %6998 = vrot.lane.b32.xlu1 %v6997_v60, %s7452_s12  ;;  %v4812_v42 = vcombine.low %v4793_v39, %v4809_v48  ;;  %v4813_v12 = vcombine.high %v4793_v39, %v4809_v48  ;;  %v6708_v54 = vpack.c.bf16 %v4951_v50, %v4950_v33 }
 0x6fd   : > { %v4743_v16 = vcombine.high %v9116_v44, %v9119_v5  ;;  %v4810_v6 = vcombine.low %v9122_v58, %v9125_v19  ;;  %v4811_v4 = vcombine.high %v9122_v58, %v9125_v19  ;;  %v4742_v29 = vcombine.low %v9116_v44, %v9119_v5  ;;  %6705 = vmatprep.subr.bf16.mxu1 %v6704_v34  ;;  %v5959_v5 = vld [vmem:[%s9529_s6] ss:$0 sm:$0xff] }
 0x6fe   : > { %7003 = vrot.lane.b32.xlu0 %v7002_v40, %s7453_s13  ;;  %v7012_v18 = vpack.i.bf16 %v4812_v42, %v4744_v27  ;;  %v7017_v21 = vpack.i.bf16 %v4813_v12, %v4745_v31  ;;  %6707 = vmatpush3.bf16.msra.mxu1 %v6704_v34 }
 0x6ff   : > { %v7007_v43 = vpack.i.bf16 %v4811_v4, %v4743_v16  ;;  %6709 = vmatprep.subr.bf16.mxu1 %v6708_v54 }
 0x701   : > { %7008 = vrot.lane.b32.xlu1 %v7007_v43, %s7454_s20 }
 0x702   : > { %7013 = vrot.lane.b32.xlu0 %v7012_v18, %s7452_s12  ;;  %6711 = vmatpush3.bf16.msra.mxu1 %v6708_v54  ;;  %s7458_s12 = smov [#allocation13]  }
 0x705   : > { %7018 = vrot.lane.b32.xlu1 %v7017_v21, %s7453_s13  ;;  %s9594_s13 = sld [smem:[#allocation38_spill]] }
 0x751   : > { %v6969_v25 = vpop.permute.xlu0 %6968 }
 0x752   : > { %v6971_v30 = vunpack.i.h.bf16 %v6969_v25  ;;  %v6970_v0 = vunpack.i.l.bf16 %v6969_v25 }
 0x756   : > { %v6964_v51 = vpop.permute.xlu1 %6963 }
 0x757   : > { %v6966_v28 = vunpack.i.h.bf16 %v6964_v51  ;;  %v6965_v10 = vunpack.i.l.bf16 %v6964_v51 }
 0x759   : > { %v4911_v59 = vsel %vm2453_vm0, %v4402_v47, %v6966_v28  ;;  %v4910_v22 = vsel %vm2453_vm0, %v4334_v52, %v6965_v10  ;;  %v7182_v10 = vld [vmem:[%s7919_s23 + $0x8] sm:$0xff] }
 0x75a   : > { %v4920_v60 = vsel %vm4918_vm1, %v4911_v59, %v6971_v30  ;;  %v4919_v40 = vsel %vm4918_vm1, %v4910_v22, %v6970_v0  ;;  %v7183_v30 = vld [vmem:[%s7919_s23] sm:$0xff] }
 0x75d   : > { %v6974_v63 = vpop.permute.xlu1 %6973 }
 0x75e   : > { %v6976_v37 = vunpack.i.h.bf16 %v6974_v63  ;;  %v6975_v57 = vunpack.i.l.bf16 %v6974_v63 }
 0x760   : > { %v4928_v36 = vsel %vm4927_vm2, %v4919_v40, %v6975_v57  ;;  %v4929_v2 = vsel %vm4927_vm2, %v4920_v60, %v6976_v37  ;;  %v7184_v57 = vld [vmem:[%s7919_s23 + $0x10] sm:$0xff] }
 0x761   : > { %6540 = vmatprep.mubr.f32.mxu1 %v4928_v36 }
 0x762   : > { %6541 = vmatmul.mubr.f32.vlgmr.msra.gmra.mrb[40].mxu1 %v4929_v2 }
 0x764   : > { %v6984_v35 = vpop.permute.xlu0 %6983 }
 0x765   : > { %v6986_v49 = vunpack.i.h.bf16 %v6984_v35  ;;  %v6985_v52 = vunpack.i.l.bf16 %v6984_v35  ;;  %v7185_v35 = vld [vmem:[%s7919_s23 + $0x18] sm:$0xff] }
 0x766   : > { %v6979_v47 = vpop.permute.xlu1 %6978 }
 0x767   : > { %v6981_v20 = vunpack.i.h.bf16 %v6979_v47  ;;  %v6980_v53 = vunpack.i.l.bf16 %v6979_v47 }
 0x769   : > { %v4912_v11 = vsel %vm2453_vm0, %v4470_v15, %v6980_v53  ;;  %v4913_v55 = vsel %vm2453_vm0, %v4538_v45, %v6981_v20  ;;  %v7186_v53 = vld [vmem:[%s7919_s23 + $0x28] sm:$0xff] }
 0x76a   : > { %v6989_v61 = vpop.permute.xlu1 %6988  ;;  %v4921_v23 = vsel %vm4918_vm1, %v4912_v11, %v6985_v52  ;;  %v4922_v41 = vsel %vm4918_vm1, %v4913_v55, %v6986_v49  ;;  %v7187_v52 = vld [vmem:[%s7919_s23 + $0x20] sm:$0xff] }
 0x76b   : > { %v6991_v26 = vunpack.i.h.bf16 %v6989_v61  ;;  %v6990_v24 = vunpack.i.l.bf16 %v6989_v61 }
 0x76c   : > { %v6994_v27 = vpop.permute.xlu0 %6993 }
 0x76d   : > { %v6996_v14 = vunpack.i.h.bf16 %v6994_v27  ;;  %v6995_v8 = vunpack.i.l.bf16 %v6994_v27  ;;  %v4930_v33 = vsel %vm4927_vm2, %v4921_v23, %v6990_v24  ;;  %v4931_v9 = vsel %vm4927_vm2, %v4922_v41, %v6991_v26  ;;  %v7188_v27 = vld [vmem:[%s7919_s23 + $0x38] sm:$0xff]  ;;  %v7189_v41 = vld [vmem:[%s7919_s23 + $0x30] sm:$0xff] }
 0x76e   : > { %v6999_v17 = vpop.permute.xlu1 %6998  ;;  %6543 = vmatprep.mubr.f32.mxu1 %v4930_v33  ;;  %v5194_v33 = vld [vmem:[#allocation10 + $0x18] sm:$0xff] }
 0x76f   : > { %v7001_v15 = vunpack.i.h.bf16 %v6999_v17  ;;  %v7000_v3 = vunpack.i.l.bf16 %v6999_v17  ;;  %6544 = vmatmul.mubr.f32.gmra.mrb[42].mxu1 %v4931_v9  ;;  %v4914_v13 = vsel %vm2453_vm0, %v4606_v38, %v6995_v8  ;;  %v4915_v45 = vsel %vm2453_vm0, %v4674_v32, %v6996_v14  ;;  %v5192_v8 = vld [vmem:[#allocation10 + $0x8] sm:$0xff]  ;;  %v5191_v9 = vld [vmem:[#allocation10] sm:$0xff] }
 0x770   : > { %v7004_v50 = vpop.permute.xlu0 %7003  ;;  %v6712_v17 = vpack.c.bf16 %v5194_v33, %v5192_v8  ;;  %v5214_v8 = vld [vmem:[#allocation10 + $0xb8] sm:$0xff] }
 0x771   : > { %v7006_v39 = vunpack.i.h.bf16 %v7004_v50  ;;  %v7005_v48 = vunpack.i.l.bf16 %v7004_v50  ;;  %v4923_v31 = vsel %vm4918_vm1, %v4914_v13, %v7000_v3  ;;  %v4924_v42 = vsel %vm4918_vm1, %v4915_v45, %v7001_v15  ;;  %v5193_v15 = vld [vmem:[#allocation10 + $0x10] sm:$0xff]  ;;  %v5196_v3 = vld [vmem:[#allocation10 + $0x28] sm:$0xff]  ;;  %v5198_v13 = vld [vmem:[#allocation10 + $0x38] sm:$0xff] }
 0x772   : > { %v6714_v45 = vpack.c.bf16 %v5193_v15, %v5191_v9  ;;  %v6716_v50 = vpack.c.bf16 %v5198_v13, %v5196_v3  ;;  %6713 = vmatprep.subr.bf16.mxu0 %v6712_v17  ;;  %v5211_v9 = vld [vmem:[#allocation10 + $0xa0] sm:$0xff]  ;;  %v5213_v17 = vld [vmem:[#allocation10 + $0xb0] sm:$0xff]  ;;  %v5216_v3 = vld [vmem:[#allocation10 + $0xc8] sm:$0xff] }
 0x773   : > { %v7009_v12 = vpop.permute.xlu1 %7008  ;;  %v4932_v34 = vsel %vm4927_vm2, %v4923_v31, %v7005_v48  ;;  %v4933_v54 = vsel %vm4927_vm2, %v4924_v42, %v7006_v39  ;;  %v5195_v39 = vld [vmem:[#allocation10 + $0x20] sm:$0xff]  ;;  %v5197_v48 = vld [vmem:[#allocation10 + $0x30] sm:$0xff]  ;;  %v5200_v31 = vld [vmem:[#allocation10 + $0x48] sm:$0xff]  ;;  %v6734_v15 = vpack.c.bf16 %v5213_v17, %v5211_v9 }
 0x774   : > { %v7011_v56 = vunpack.i.h.bf16 %v7009_v12  ;;  %v7010_v62 = vunpack.i.l.bf16 %v7009_v12  ;;  %v7014_v38 = vpop.permute.xlu0 %7013  ;;  %6546 = vmatprep.mubr.f32.mxu1 %v4932_v34  ;;  %v5202_v42 = vld [vmem:[#allocation10 + $0x58] sm:$0xff]  ;;  %6715 = vmatpush1.bf16.msra.mxu0 %v6714_v45  ;;  %v6718_v12 = vpack.c.bf16 %v5197_v48, %v5195_v39  ;;  %v5217_v39 = vld [vmem:[#allocation10 + $0xd0] sm:$0xff] }
 0x775   : > { %v7016_v16 = vunpack.i.h.bf16 %v7014_v38  ;;  %v7015_v46 = vunpack.i.l.bf16 %v7014_v38  ;;  %6547 = vmatmul.mubr.f32.gmra.mrb[44].mxu1 %v4933_v54  ;;  %6717 = vmatprep.subr.bf16.mxu0 %v6716_v50  ;;  %v6720_v34 = vpack.c.bf16 %v5202_v42, %v5200_v31  ;;  %v5199_v54 = vld [vmem:[#allocation10 + $0x40] sm:$0xff]  ;;  %v5218_v13 = vld [vmem:[#allocation10 + $0xd8] sm:$0xff]  ;;  %v5220_v31 = vld [vmem:[#allocation10 + $0xe8] sm:$0xff] }
 0x776   : > { %v4916_v1 = vsel %vm2453_vm0, %v4742_v29, %v7010_v62  ;;  %v4917_v32 = vsel %vm2453_vm0, %v4810_v6, %v7011_v56  ;;  %v5201_v56 = vld [vmem:[#allocation10 + $0x50] sm:$0xff]  ;;  %v6736_v45 = vpack.c.bf16 %v5218_v13, %v5216_v3  ;;  %v5215_v50 = vld [vmem:[#allocation10 + $0xc0] sm:$0xff]  ;;  %v5222_v42 = vld [vmem:[#allocation10 + $0xf8] sm:$0xff] }
 0x777   : > { %v7019_v4 = vpop.permute.xlu1 %7018  ;;  %v4925_v43 = vsel %vm4918_vm1, %v4916_v1, %v7015_v46  ;;  %v4926_v51 = vsel %vm4918_vm1, %v4917_v32, %v7016_v16  ;;  %v6722_v62 = vpack.c.bf16 %v5201_v56, %v5199_v54  ;;  %v6738_v48 = vpack.c.bf16 %v5217_v39, %v5215_v50  ;;  %v5221_v54 = vld [vmem:[#allocation10 + $0xf0] sm:$0xff] }
 0x778   : > { %v7021_v18 = vunpack.i.h.bf16 %v7019_v4  ;;  %v7020_v21 = vunpack.i.l.bf16 %v7019_v4  ;;  %6719 = vmatpush1.bf16.msra.mxu0 %v6718_v12  ;;  %v6740_v12 = vpack.c.bf16 %v5222_v42, %v5220_v31  ;;  %v9283_v42 = vld [vmem:[%s9530_s7] ss:$0 sm:$0xff] }
 0x779   : > { %6721 = vmatprep.subr.bf16.mxu0 %v6720_v34  ;;  %v5219_v34 = vld [vmem:[#allocation10 + $0xe0] sm:$0xff] }
 0x77a   : > { %v4934_v28 = vsel %vm4927_vm2, %v4925_v43, %v7020_v21  ;;  %v4935_v44 = vsel %vm4927_vm2, %v4926_v51, %v7021_v18  ;;  %v6742_v56 = vpack.c.bf16 %v5221_v54, %v5219_v34 }
 0x77b   : > { %6549 = vmatprep.mubr.f32.mxu1 %v4934_v28 }
 0x77c   : > { %6550 = vmatmul.mubr.f32.gmra.mrb[46].mxu1 %v4935_v44  ;;  %6723 = vmatpush1.bf16.msra.mxu0 %v6722_v62  ;;  %v7457_v62 = vmov 0.0  }
 0x77d   : > { %5299 = vmatprep.mubr.f32.mxu0 %v7457_v62 }
 0x835   : > { %v6542_v58 = vpop.f32.mrb[40].mxu1 }
 0x836   : > { %v5031_v19 = vadd.f32 %v6542_v58, %v5959_v5  ;;  %v5025_v6 = vpop.f32.mrb[41].mxu1 }
 0x837   : > { %v5026_v29 = vadd.f32 %v5959_v5, %v5025_v6 }
 0x838   : > { %v9192_v25 = vadd.f32 %v7182_v10, %v5031_v19 }
 0x839   : > { %v5064_v0 = vadd.f32 %v7183_v30, %v5026_v29 }
 0x83a   : > { %5074 = vadd.xlane.f32.xlu1 %v9192_v25 }
 0x83b   : > { %5072 = vadd.xlane.f32.xlu0 %v5064_v0 }
 0x842   : > { %v6545_v59 = vpop.f32.mrb[42].mxu1 }
 0x843   : > { %v5035_v22 = vpop.f32.mrb[43].mxu1  ;;  %v5041_v37 = vadd.f32 %v6545_v59, %v5959_v5 }
 0x844   : > { %v5036_v63 = vadd.f32 %v5959_v5, %v5035_v22 }
 0x845   : > { %v5067_v47 = vadd.f32 %v7185_v35, %v5041_v37  ;;  %v5204_v35 = vld [vmem:[#allocation10 + $0x68] sm:$0xff] }
 0x846   : > { %v5066_v60 = vadd.f32 %v7184_v57, %v5036_v63 }
 0x848   : > { %5076 = vadd.xlane.f32.xlu0 %v5066_v60  ;;  %v6548_v40 = vpop.f32.mrb[44].mxu1 }
 0x849   : > { %v5051_v36 = vadd.f32 %v6548_v40, %v5959_v5  ;;  %v5045_v2 = vpop.f32.mrb[45].mxu1 }
 0x84a   : > { %v5046_v20 = vadd.f32 %v5959_v5, %v5045_v2 }
 0x84b   : > { %v9199_v49 = vadd.f32 %v7186_v53, %v5051_v36 }
 0x84c   : > { %v5068_v11 = vadd.f32 %v7187_v52, %v5046_v20  ;;  %5078 = vadd.xlane.f32.xlu0 %v5067_v47  ;;  %v5205_v52 = vld [vmem:[#allocation10 + $0x70] sm:$0xff] }
 0x84e   : > { %5080 = vadd.xlane.f32.xlu1 %v5068_v11 }
 0x84f   : > { %v6551_v55 = vpop.f32.mrb[46].mxu1 }
 0x850   : > { %5082 = vadd.xlane.f32.xlu0 %v9199_v49  ;;  %v5061_v61 = vadd.f32 %v6551_v55, %v5959_v5  ;;  %v5055_v26 = vpop.f32.mrb[47].mxu1 }
 0x851   : > { %v5056_v24 = vadd.f32 %v5959_v5, %v5055_v26  ;;  %v5210_v26 = vld [vmem:[#allocation10 + $0x98] sm:$0xff] }
 0x852   : > { %v9204_v23 = vadd.f32 %v7188_v27, %v5061_v61  ;;  %v5208_v61 = vld [vmem:[#allocation10 + $0x88] sm:$0xff]  ;;  %v5207_v27 = vld [vmem:[#allocation10 + $0x80] sm:$0xff] }
 0x853   : > { %v5070_v14 = vadd.f32 %v7189_v41, %v5056_v24  ;;  %v6728_v24 = vpack.c.bf16 %v5210_v26, %v5208_v61  ;;  %v5391_v61 = vld [vmem:[#allocation12 + $0xd8] sm:$0xff] }
 0x854   : > { %5086 = vadd.xlane.f32.xlu0 %v9204_v23 }
 0x855   : > { %5084 = vadd.xlane.f32.xlu1 %v5070_v14 }
 0x8c7   : > { %v5075_v38 = vpop.xlane.xlu1 %5074 }
 0x8c8   : > { %v5090_v16 = vmul.f32 0.0078125, %v5075_v38  ;;  %v5073_v46 = vpop.xlane.xlu0 %5072  ;;  %v5380_v38 = vld [vmem:[#allocation12 + $0x80] sm:$0xff] }
 0x8c9   : > { %v5089_v1 = vmul.f32 0.0078125, %v5073_v46  ;;  %v5364_v46 = vld [vmem:[#allocation12] sm:$0xff] }
 0x8ca   : > { %v9209_v32 = vsub.f32 %v9192_v25, %v5090_v16  ;;  %v5381_v16 = vld [vmem:[#allocation12 + $0x88] sm:$0xff] }
 0x8cb   : > { %v9211_v4 = vsub.f32 %v5064_v0, %v5089_v1  ;;  %v6744_v1 = vpack.c.bf16 %v5381_v16, %v5380_v38  ;;  %v9290_v38 = vld [vmem:[%s9591_s28] ss:$0 sm:$0xff]  ;;  %s5969_s28 = sshll.u32 %s5660_s18, 7 }
 0x8cc   : > { %v5106_v18 = vmul.f32 %v9209_v32, %v9209_v32  ;;  %s9443_s23 = scalar_lea.hbm %s9597_s17, %s5969_s28 }
 0x8cd   : > { %v5105_v21 = vmul.f32 %v9211_v4, %v9211_v4  ;;  %6792 = vmatprep.subr.bf16.mxu1 %v6744_v1 }
 0x8ce   : > { %5115 = vadd.xlane.f32.xlu0 %v5106_v18  ;;  %v5365_v18 = vld [vmem:[#allocation12 + $0x8] sm:$0xff] }
 0x8cf   : > { %5113 = vadd.xlane.f32.xlu1 %v5105_v21  ;;  %v5382_v21 = vld [vmem:[#allocation12 + $0x90] sm:$0xff] }
 0x8d5   : > { %v5077_v43 = vpop.xlane.xlu0 %5076 }
 0x8d6   : > { %v5091_v51 = vmul.f32 0.0078125, %v5077_v43  ;;  %v5383_v43 = vld [vmem:[#allocation12 + $0x98] sm:$0xff] }
 0x8d8   : > { %v9217_v28 = vsub.f32 %v5066_v60, %v5091_v51  ;;  %v9244_v51 = vpack.c.bf16 %v5365_v18, %v5364_v46 }
 0x8d9   : > { %v5079_v44 = vpop.xlane.xlu0 %5078 }
 0x8da   : > { %v5092_v5 = vmul.f32 0.0078125, %v5079_v44  ;;  %v5107_v58 = vmul.f32 %v9217_v28, %v9217_v28  ;;  %v9246_v44 = vpack.c.bf16 %v5383_v43, %v5382_v21  ;;  %6800 = vmatpush3.bf16.msra.mxu1 %v9244_v51 }
 0x8db   : > { %v5081_v19 = vpop.xlane.xlu1 %5080 }
 0x8dc   : > { %v9221_v6 = vsub.f32 %v5067_v47, %v5092_v5  ;;  %5117 = vadd.xlane.f32.xlu1 %v5107_v58  ;;  %v5093_v29 = vmul.f32 0.0078125, %v5081_v19  ;;  %v5206_v47 = vld [vmem:[#allocation10 + $0x78] sm:$0xff]  ;;  %v5366_v5 = vld [vmem:[#allocation12 + $0x10] sm:$0xff]  ;;  %v5384_v19 = vld [vmem:[#allocation12 + $0xa0] sm:$0xff]  ;;  %6793 = vmatprep.subr.bf16.mxu1 %v9246_v44 }
 0x8dd   : > { %v5083_v10 = vpop.xlane.xlu0 %5082  ;;  %v6724_v53 = vpack.c.bf16 %v5206_v47, %v5204_v35  ;;  %v5367_v58 = vld [vmem:[#allocation12 + $0x18] sm:$0xff]  ;;  %v5388_v47 = vld [vmem:[#allocation12 + $0xc0] sm:$0xff] }
 0x8de   : > { %v9223_v25 = vsub.f32 %v5068_v11, %v5093_v29  ;;  %v5094_v30 = vmul.f32 0.0078125, %v5083_v10  ;;  %v5108_v0 = vmul.f32 %v9221_v6, %v9221_v6  ;;  %v5385_v29 = vld [vmem:[#allocation12 + $0xa8] sm:$0xff]  ;;  %v9250_v10 = vpack.c.bf16 %v5367_v58, %v5366_v5  ;;  %v5371_v35 = vld [vmem:[#allocation12 + $0x38] sm:$0xff] }
 0x8df   : > { %6725 = vmatprep.subr.bf16.mxu0 %v6724_v53 }
 0x8e0   : > { %v9228_v59 = vsub.f32 %v9199_v49, %v5094_v30  ;;  %5119 = vadd.xlane.f32.xlu0 %v5108_v0  ;;  %v5109_v22 = vmul.f32 %v9223_v25, %v9223_v25  ;;  %v5203_v49 = vld [vmem:[#allocation10 + $0x60] sm:$0xff]  ;;  %v9252_v30 = vpack.c.bf16 %v5385_v29, %v5384_v19  ;;  %6801 = vmatpush3.bf16.msra.mxu1 %v9250_v10 }
 0x8e1   : > { %v5087_v63 = vpop.xlane.xlu0 %5086  ;;  %v6726_v55 = vpack.c.bf16 %v5205_v52, %v5203_v49  ;;  %v5368_v0 = vld [vmem:[#allocation12 + $0x20] sm:$0xff] }
 0x8e2   : > { %5121 = vadd.xlane.f32.xlu1 %v5109_v22  ;;  %v5110_v37 = vmul.f32 %v9228_v59, %v9228_v59  ;;  %v5096_v57 = vmul.f32 0.0078125, %v5087_v63  ;;  %v5085_v60 = vpop.xlane.xlu1 %5084  ;;  %v5369_v22 = vld [vmem:[#allocation12 + $0x28] sm:$0xff]  ;;  %v5386_v63 = vld [vmem:[#allocation12 + $0xb0] sm:$0xff]  ;;  %6794 = vmatprep.subr.bf16.mxu1 %v9252_v30  ;;  %v5372_v52 = vld [vmem:[#allocation12 + $0x40] sm:$0xff] }
 0x8e3   : > { %v5095_v40 = vmul.f32 0.0078125, %v5085_v60  ;;  %6727 = vmatpush1.bf16.msra.mxu0 %v6726_v55  ;;  %v5390_v55 = vld [vmem:[#allocation12 + $0xd0] sm:$0xff] }
 0x8e4   : > { %5123 = vadd.xlane.f32.xlu0 %v5110_v37  ;;  %v9235_v36 = vsub.f32 %v9204_v23, %v5096_v57  ;;  %v5209_v23 = vld [vmem:[#allocation10 + $0x90] sm:$0xff]  ;;  %6729 = vmatprep.subr.bf16.mxu0 %v6728_v24  ;;  %v5387_v37 = vld [vmem:[#allocation12 + $0xb8] sm:$0xff]  ;;  %v9256_v57 = vpack.c.bf16 %v5369_v22, %v5368_v0  ;;  %v9270_v24 = vpack.c.bf16 %v5391_v61, %v5390_v55 }
 0x8e5   : > { %v9237_v2 = vsub.f32 %v5070_v14, %v5095_v40  ;;  %v6730_v41 = vpack.c.bf16 %v5209_v23, %v5207_v27  ;;  %v5212_v14 = vld [vmem:[#allocation10 + $0xa8] sm:$0xff]  ;;  %v9258_v60 = vpack.c.bf16 %v5387_v37, %v5386_v63  ;;  %v5370_v40 = vld [vmem:[#allocation12 + $0x30] sm:$0xff]  ;;  %v5375_v23 = vld [vmem:[#allocation12 + $0x58] sm:$0xff] }
 0x8e6   : > { %v5112_v20 = vmul.f32 %v9235_v36, %v9235_v36  ;;  %v6732_v33 = vpack.c.bf16 %v5214_v8, %v5212_v14  ;;  %6802 = vmatpush3.bf16.msra.mxu1 %v9256_v57  ;;  %v9262_v53 = vpack.c.bf16 %v5371_v35, %v5370_v40  ;;  %v5374_v27 = vld [vmem:[#allocation12 + $0x50] sm:$0xff]  ;;  %v5393_v14 = vld [vmem:[#allocation12 + $0xe8] sm:$0xff] }
 0x8e7   : > { %v5111_v11 = vmul.f32 %v9237_v2, %v9237_v2  ;;  %6731 = vmatpush1.bf16.msra.mxu0 %v6730_v41  ;;  %6795 = vmatprep.subr.bf16.mxu1 %v9258_v60  ;;  %v5392_v41 = vld [vmem:[#allocation12 + $0xe0] sm:$0xff]  ;;  %v9274_v8 = vpack.c.bf16 %v5375_v23, %v5374_v27 }
 0x8e8   : > { %5127 = vadd.xlane.f32.xlu0 %v5112_v20  ;;  %6733 = vmatprep.subr.bf16.mxu0 %v6732_v33  ;;  %v5389_v20 = vld [vmem:[#allocation12 + $0xc8] sm:$0xff]  ;;  %v9276_v33 = vpack.c.bf16 %v5393_v14, %v5392_v41 }
 0x8e9   : > { %5125 = vadd.xlane.f32.xlu1 %v5111_v11  ;;  %v9264_v49 = vpack.c.bf16 %v5389_v20, %v5388_v47  ;;  %v5373_v11 = vld [vmem:[#allocation12 + $0x48] sm:$0xff] }
 0x8ea   : > { %6803 = vmatpush3.bf16.msra.mxu1 %v9262_v53  ;;  %v9268_v26 = vpack.c.bf16 %v5373_v11, %v5372_v52  ;;  %v5377_v14 = vld [vmem:[#allocation12 + $0x68] sm:$0xff] }
 0x8eb   : > { %6735 = vmatpush1.bf16.msra.mxu0 %v6734_v15  ;;  %6796 = vmatprep.subr.bf16.mxu1 %v9264_v49 }
 0x8ec   : > { %6737 = vmatprep.subr.bf16.mxu0 %v6736_v45 }
 0x8ee   : > { %6804 = vmatpush3.bf16.msra.mxu1 %v9268_v26 }
 0x8ef   : > { %6739 = vmatpush1.bf16.msra.mxu0 %v6738_v48  ;;  %6797 = vmatprep.subr.bf16.mxu1 %v9270_v24 }
 0x8f0   : > { %6741 = vmatprep.subr.bf16.mxu0 %v6740_v12 }
 0x8f2   : > { %6805 = vmatpush3.bf16.msra.mxu1 %v9274_v8 }
 0x8f3   : > { %6743 = vmatpush1.bf16.msra.mxu0 %v6742_v56  ;;  %6798 = vmatprep.subr.bf16.mxu1 %v9276_v33 }
 0x8f4   : > { %6745 = vmatprep.subr.bf16.mxu0 %v6744_v1 }
 0x95b   : > { %v5116_v9 = vpop.xlane.xlu0 %5115 }
 0x95c   : > { %v5130_v17 = vmul.f32 0.0078125, %v5116_v9  ;;  %v5114_v15 = vpop.xlane.xlu1 %5113  ;;  %v5395_v9 = vld [vmem:[#allocation12 + $0xf8] sm:$0xff] }
 0x95d   : > { %v5129_v3 = vmul.f32 0.0078125, %v5114_v15  ;;  %v5378_v15 = vld [vmem:[#allocation12 + $0x70] sm:$0xff] }
 0x95e   : > { %v5138_v13 = vadd.f32 1e-05, %v5130_v17 }
 0x95f   : > { %v5137_v45 = vadd.f32 1e-05, %v5129_v3  ;;  %v5379_v3 = vld [vmem:[#allocation12 + $0x78] sm:$0xff] }
 0x960   : > { %7150 = vrsqrt.f32 %v5138_v13  ;;  %v6774_v13 = vpack.c.bf16 %v5379_v3, %v5378_v15  ;;  %v5962_v3 = vld [vmem:[%s9593_s8] ss:$0 sm:$0xff]  ;;  %s5643_s8 = scalar_lea.sflag [#allocation6], %s7762_s16 }
 0x961   : > { %7152 = vrsqrt.f32 %v5137_v45  ;;  %v5223_v45 = vld [vmem:[%s9592_s14] sm:$0x3] }
 0x969   : > { %v5118_v50 = vpop.xlane.xlu1 %5117 }
 0x96a   : > { %v7151_v39 = vpop.eup %7150  ;;  %v5131_v48 = vmul.f32 0.0078125, %v5118_v50  ;;  %v5231_v50 = vsub.s32 1, %v7999_v7 }
 0x96b   : > { %v7153_v31 = vpop.eup %7152  ;;  %v5154_v54 = vmul.f32 %v7151_v39, %v9209_v32 }
 0x96c   : > { %v5153_v12 = vmul.f32 %v7153_v31, %v9211_v4  ;;  %v5139_v34 = vadd.f32 1e-05, %v5131_v48  ;;  %v5232_v48 = vrot.slane %v5223_v45, %v5231_v50 }
 0x96d   : > { %v5120_v56 = vpop.xlane.xlu0 %5119  ;;  %v5169_v4 = vmul.f32 %v9283_v42, %v5154_v54 }
 0x96e   : > { %7154 = vrsqrt.f32 %v5139_v34  ;;  %v5132_v16 = vmul.f32 0.0078125, %v5120_v56  ;;  %v5168_v46 = vmul.f32 %v9283_v42, %v5153_v12 }
 0x96f   : > { %v5122_v1 = vpop.xlane.xlu1 %5121  ;;  %v9301_v29 = vadd.f32 %v9290_v38, %v5169_v4 }
 0x970   : > { %v5140_v18 = vadd.f32 1e-05, %v5132_v16  ;;  %v5133_v21 = vmul.f32 0.0078125, %v5122_v1  ;;  %v9294_v43 = vadd.f32 %v9290_v38, %v5168_v46 }
 0x971   : > { %v5124_v5 = vpop.xlane.xlu0 %5123 }
 0x972   : > { %7156 = vrsqrt.f32 %v5140_v18  ;;  %v5141_v32 = vadd.f32 1e-05, %v5133_v21  ;;  %v5134_v58 = vmul.f32 0.0078125, %v5124_v5  ;;  %5300 = vmatmul.mubr.f32.vlgmr.msra.gmra.mrb[32].mxu0 %v9294_v43 }
 0x973   : > { %5305 = vmatprep.mubr.f32.mxu0 %v7457_v62  ;;  %6747 = vmatpush3.bf16.msra.mxu0 %v9244_v51 }
 0x974   : > { %7158 = vrsqrt.f32 %v5141_v32  ;;  %v5142_v19 = vadd.f32 1e-05, %v5134_v58  ;;  %6749 = vmatprep.subr.bf16.mxu0 %v9246_v44 }
 0x975   : > { %v5128_v0 = vpop.xlane.xlu0 %5127 }
 0x976   : > { %7160 = vrsqrt.f32 %v5142_v19  ;;  %v5136_v22 = vmul.f32 0.0078125, %v5128_v0  ;;  %v5126_v63 = vpop.xlane.xlu1 %5125  ;;  %5306 = vmatmul.mubr.f32.gmra.mrb[34].mxu0 %v9301_v29 }
 0x977   : > { %v5135_v37 = vmul.f32 0.0078125, %v5126_v63  ;;  %5311 = vmatprep.mubr.f32.mxu0 %v7457_v62  ;;  %6751 = vmatpush3.bf16.msra.mxu0 %v9250_v10 }
 0x978   : > { %v7155_v40 = vpop.eup %7154  ;;  %v5144_v51 = vadd.f32 1e-05, %v5136_v22  ;;  %6753 = vmatprep.subr.bf16.mxu0 %v9252_v30 }
 0x979   : > { %v5143_v35 = vadd.f32 1e-05, %v5135_v37  ;;  %v5155_v47 = vmul.f32 %v7155_v40, %v9217_v28 }
 0x97b   : > { %7162 = vrsqrt.f32 %v5143_v35  ;;  %v5170_v44 = vmul.f32 %v9283_v42, %v5155_v47  ;;  %6755 = vmatpush3.bf16.msra.mxu0 %v9256_v57 }
 0x97c   : > { %v7157_v20 = vpop.eup %7156  ;;  %7164 = vrsqrt.f32 %v5144_v51  ;;  %6757 = vmatprep.subr.bf16.mxu0 %v9258_v60 }
 0x97d   : > { %v9313_v52 = vadd.f32 %v9290_v38, %v5170_v44  ;;  %v5156_v10 = vmul.f32 %v7157_v20, %v9221_v6 }
 0x97e   : > { %v7159_v11 = vpop.eup %7158 }
 0x97f   : > { %5312 = vmatmul.mubr.f32.gmra.mrb[36].mxu0 %v9313_v52  ;;  %v5171_v30 = vmul.f32 %v9283_v42, %v5156_v10  ;;  %v5157_v28 = vmul.f32 %v7159_v11, %v9223_v25 }
 0x980   : > { %v7161_v55 = vpop.eup %7160  ;;  %5317 = vmatprep.mubr.f32.mxu0 %v7457_v62  ;;  %6759 = vmatpush3.bf16.msra.mxu0 %v9262_v53 }
 0x981   : > { %v9322_v57 = vadd.f32 %v9290_v38, %v5171_v30  ;;  %v5172_v60 = vmul.f32 %v9283_v42, %v5157_v28  ;;  %v5158_v61 = vmul.f32 %v7161_v55, %v9228_v59  ;;  %6761 = vmatprep.subr.bf16.mxu0 %v9264_v49 }
 0x983   : > { %5318 = vmatmul.mubr.f32.gmra.mrb[38].mxu0 %v9322_v57  ;;  %v9329_v6 = vadd.f32 %v9290_v38, %v5172_v60  ;;  %v5173_v53 = vmul.f32 %v9283_v42, %v5158_v61 }
 0x984   : > { %5323 = vmatprep.mubr.f32.mxu0 %v7457_v62  ;;  %6763 = vmatpush3.bf16.msra.mxu0 %v9268_v26 }
 0x985   : > { %v7163_v25 = vpop.eup %7162  ;;  %6765 = vmatprep.subr.bf16.mxu0 %v9270_v24  ;;  %v9341_v49 = vadd.f32 %v9290_v38, %v5173_v53 }
 0x986   : > { %v7165_v27 = vpop.eup %7164  ;;  %v5159_v23 = vmul.f32 %v7163_v25, %v9237_v2 }
 0x987   : > { %5324 = vmatmul.mubr.f32.gmra.mrb[40].mxu0 %v9329_v6  ;;  %v5160_v26 = vmul.f32 %v7165_v27, %v9235_v36  ;;  %v5376_v36 = vld [vmem:[#allocation12 + $0x60] sm:$0xff] }
 0x988   : > { %5329 = vmatprep.mubr.f32.mxu0 %v7457_v62  ;;  %v5174_v59 = vmul.f32 %v9283_v42, %v5159_v23  ;;  %6767 = vmatpush3.bf16.msra.mxu0 %v9274_v8  ;;  %v6770_v8 = vpack.c.bf16 %v5377_v14, %v5376_v36 }
 0x989   : > { %6769 = vmatprep.subr.bf16.mxu0 %v9276_v33  ;;  %v5175_v2 = vmul.f32 %v9283_v42, %v5160_v26  ;;  %v5394_v33 = vld [vmem:[#allocation12 + $0xf0] sm:$0xff] }
 0x98a   : > { %v9347_v24 = vadd.f32 %v9290_v38, %v5174_v59  ;;  %v6772_v17 = vpack.c.bf16 %v5395_v9, %v5394_v33  ;;  %6806 = vmatpush3.bf16.msra.mxu1 %v6770_v8 }
 0x98b   : > { %5330 = vmatmul.mubr.f32.gmra.mrb[42].mxu0 %v9341_v49  ;;  %v9354_v41 = vadd.f32 %v9290_v38, %v5175_v2 }
 0x98c   : > { %5335 = vmatprep.mubr.f32.mxu0 %v7457_v62  ;;  %6771 = vmatpush3.bf16.msra.mxu0 %v6770_v8 }
 0x98d   : > { %6773 = vmatprep.subr.bf16.mxu0 %v6772_v17  ;;  %6799 = vmatprep.subr.bf16.mxu1 %v6772_v17 }
 0x98e   : > { %6807 = vmatpush3.bf16.msra.mxu1 %v6774_v13 }
 0x98f   : > { %5336 = vmatmul.mubr.f32.gmra.mrb[44].mxu0 %v9347_v24 }
 0x990   : > { %5341 = vmatprep.mubr.f32.mxu0 %v7457_v62  ;;  %6775 = vmatpush3.bf16.msra.mxu0 %v6774_v13  ;;  %v5227_v62 = vsub.s32 0, %v7999_v7 }
 0x992   : > { %v5228_v39 = vrot.slane %v5223_v45, %v5227_v62 }
 0x993   : > { %5342 = vmatmul.mubr.f32.gmra.mrb[46].mxu0 %v9354_v41 }
 0xa45   : > { %v5301_v31 = vpop.f32.mrb[32].mxu0 }
 0xa46   : > { %v5302_v42 = vadd.f32 %v5301_v31, %v5228_v39  ;;  %v5303_v12 = vpop.f32.mrb[33].mxu0 }
 0xa47   : > { %v5304_v34 = vadd.f32 %v5303_v12, %v5232_v48 }
 0xa48   : > { %v5348_v38 = vmax.f32 %v5302_v42, 0.0 }
 0xa49   : > { %v5349_v54 = vmax.f32 %v5304_v34, 0.0  ;;  %v5307_v56 = vpop.f32.mrb[34].mxu0 }
 0xa4a   : > { %v5308_v16 = vadd.f32 %v5307_v56, %v5228_v39  ;;  %v5309_v46 = vpop.f32.mrb[35].mxu0 }
 0xa4b   : > { %v5310_v1 = vadd.f32 %v5309_v46, %v5232_v48  ;;  %5467 = vmatprep.mubr.f32.mxu0 %v5349_v54 }
 0xa4c   : > { %5468 = vmatmul.mubr.f32.vlgmr.msra.gmra.mrb[48].mxu0 %v5348_v38  ;;  %v5350_v21 = vmax.f32 %v5308_v16, 0.0 }
 0xa4d   : > { %v5351_v18 = vmax.f32 %v5310_v1, 0.0 }
 0xa4f   : > { %5472 = vmatprep.mubr.f32.mxu0 %v5351_v18 }
 0xa50   : > { %5473 = vmatmul.mubr.f32.gmra.mrb[50].mxu0 %v5350_v21 }
 0xa52   : > { %v5313_v4 = vpop.f32.mrb[36].mxu0 }
 0xa53   : > { %v5314_v7 = vadd.f32 %v5313_v4, %v5228_v39  ;;  %v5315_v5 = vpop.f32.mrb[37].mxu0 }
 0xa54   : > { %v5316_v32 = vadd.f32 %v5315_v5, %v5232_v48 }
 0xa55   : > { %v5352_v0 = vmax.f32 %v5314_v7, 0.0 }
 0xa56   : > { %v5353_v58 = vmax.f32 %v5316_v32, 0.0  ;;  %v5319_v19 = vpop.f32.mrb[38].mxu0 }
 0xa57   : > { %v5320_v22 = vadd.f32 %v5319_v19, %v5228_v39  ;;  %v5321_v63 = vpop.f32.mrb[39].mxu0 }
 0xa58   : > { %v5322_v37 = vadd.f32 %v5321_v63, %v5232_v48  ;;  %5477 = vmatprep.mubr.f32.mxu0 %v5353_v58 }
 0xa59   : > { %5478 = vmatmul.mubr.f32.gmra.mrb[52].mxu0 %v5352_v0  ;;  %v5354_v35 = vmax.f32 %v5320_v22, 0.0 }
 0xa5a   : > { %v5355_v40 = vmax.f32 %v5322_v37, 0.0  ;;  %v5325_v51 = vpop.f32.mrb[40].mxu0 }
 0xa5b   : > { %v5326_v47 = vadd.f32 %v5325_v51, %v5228_v39  ;;  %v5327_v44 = vpop.f32.mrb[41].mxu0 }
 0xa5c   : > { %v5328_v20 = vadd.f32 %v5327_v44, %v5232_v48  ;;  %5482 = vmatprep.mubr.f32.mxu1 %v5355_v40 }
 0xa5d   : > { %5483 = vmatmul.mubr.f32.vlgmr.msra.gmra.mrb[48].mxu1 %v5354_v35  ;;  %v5356_v30 = vmax.f32 %v5326_v47, 0.0 }
 0xa5e   : > { %v5357_v10 = vmax.f32 %v5328_v20, 0.0  ;;  %v5331_v11 = vpop.f32.mrb[42].mxu0 }
 0xa5f   : > { %v5332_v28 = vadd.f32 %v5331_v11, %v5228_v39  ;;  %v5333_v55 = vpop.f32.mrb[43].mxu0 }
 0xa60   : > { %v5334_v60 = vadd.f32 %v5333_v55, %v5232_v48  ;;  %5487 = vmatprep.mubr.f32.mxu1 %v5357_v10 }
 0xa61   : > { %5488 = vmatmul.mubr.f32.gmra.mrb[50].mxu1 %v5356_v30  ;;  %v5358_v53 = vmax.f32 %v5332_v28, 0.0 }
 0xa62   : > { %v5359_v61 = vmax.f32 %v5334_v60, 0.0  ;;  %v5337_v25 = vpop.f32.mrb[44].mxu0 }
 0xa63   : > { %v5338_v27 = vadd.f32 %v5337_v25, %v5228_v39  ;;  %v5339_v23 = vpop.f32.mrb[45].mxu0 }
 0xa64   : > { %v5340_v59 = vadd.f32 %v5339_v23, %v5232_v48  ;;  %5492 = vmatprep.mubr.f32.mxu1 %v5359_v61 }
 0xa65   : > { %5493 = vmatmul.mubr.f32.gmra.mrb[52].mxu1 %v5358_v53  ;;  %v5360_v36 = vmax.f32 %v5338_v27, 0.0 }
 0xa66   : > { %v5361_v26 = vmax.f32 %v5340_v59, 0.0  ;;  %v5343_v2 = vpop.f32.mrb[46].mxu0 }
 0xa67   : > { %v5344_v14 = vadd.f32 %v5343_v2, %v5228_v39  ;;  %v5345_v8 = vpop.f32.mrb[47].mxu0 }
 0xa68   : > { %v5346_v33 = vadd.f32 %v5345_v8, %v5232_v48  ;;  %5497 = vmatprep.mubr.f32.mxu1 %v5361_v26 }
 0xa69   : > { %5498 = vmatmul.mubr.f32.gmra.mrb[54].mxu1 %v5360_v36  ;;  %v5362_v17 = vmax.f32 %v5344_v14, 0.0 }
 0xa6a   : > { %v5363_v9 = vmax.f32 %v5346_v33, 0.0 }
 0xa6c   : > { %5502 = vmatprep.mubr.f32.mxu1 %v5363_v9 }
 0xa6d   : > { %5503 = vmatmul.mubr.f32.gmra.mrb[56].mxu1 %v5362_v17 }
 0xb1f   : > { %v6200_v15 = vpop.f32.mrb[48].mxu0 }
 0xb20   : > { %v6201_v13 = vpop.f32.mrb[49].mxu0 }
 0xb21   : > { %v6202_v62 = vadd.f32 %v6201_v13, %v6200_v15 }
 0xb23   : > { %v5470_v45 = vadd.f32 %v6202_v62, %v5962_v3  ;;  %v6203_v50 = vpop.f32.mrb[50].mxu0 }
 0xb24   : > { %v6204_v31 = vpop.f32.mrb[51].mxu0 }
 0xb25   : > { %v6205_v42 = vadd.f32 %v6204_v31, %v6203_v50  ;;  %v5508_v39 = vadd.f32 %v5470_v45, %v9294_v43 }
 0xb27   : > { %v5475_v48 = vadd.f32 %v6205_v42, %v5962_v3  ;;  %5516 = vadd.xlane.f32.xlu1 %v5508_v39 }
 0xb29   : > { %v5509_v12 = vadd.f32 %v5475_v48, %v9301_v29 }
 0xb2b   : > { %5518 = vadd.xlane.f32.xlu0 %v5509_v12 }
 0xb2c   : > { %v6206_v34 = vpop.f32.mrb[52].mxu0 }
 0xb2d   : > { %v6207_v54 = vpop.f32.mrb[53].mxu0 }
 0xb2e   : > { %v6208_v56 = vadd.f32 %v6207_v54, %v6206_v34 }
 0xb30   : > { %v5480_v38 = vadd.f32 %v6208_v56, %v5962_v3  ;;  %v6209_v16 = vpop.f32.mrb[48].mxu1 }
 0xb31   : > { %v6210_v46 = vpop.f32.mrb[49].mxu1 }
 0xb32   : > { %v6211_v1 = vadd.f32 %v6210_v46, %v6209_v16  ;;  %v5510_v18 = vadd.f32 %v5480_v38, %v9313_v52 }
 0xb34   : > { %v5485_v21 = vadd.f32 %v6211_v1, %v5962_v3  ;;  %v6212_v4 = vpop.f32.mrb[50].mxu1  ;;  %5520 = vadd.xlane.f32.xlu1 %v5510_v18 }
 0xb35   : > { %v6213_v7 = vpop.f32.mrb[51].mxu1 }
 0xb36   : > { %v6214_v5 = vadd.f32 %v6213_v7, %v6212_v4  ;;  %v5511_v43 = vadd.f32 %v5485_v21, %v9322_v57  ;;  %v9405_v7 = vld [vmem:[%s9595_s29] ss:$0 sm:$0xff] }
 0xb38   : > { %v5490_v32 = vadd.f32 %v6214_v5, %v5962_v3  ;;  %v6215_v58 = vpop.f32.mrb[52].mxu1  ;;  %5522 = vadd.xlane.f32.xlu0 %v5511_v43 }
 0xb39   : > { %v6216_v29 = vpop.f32.mrb[53].mxu1 }
 0xb3a   : > { %v6217_v19 = vadd.f32 %v6216_v29, %v6215_v58  ;;  %v5512_v0 = vadd.f32 %v5490_v32, %v9329_v6 }
 0xb3c   : > { %v5495_v22 = vadd.f32 %v6217_v19, %v5962_v3  ;;  %v6218_v63 = vpop.f32.mrb[54].mxu1  ;;  %5524 = vadd.xlane.f32.xlu1 %v5512_v0 }
 0xb3d   : > { %v6219_v37 = vpop.f32.mrb[55].mxu1 }
 0xb3e   : > { %v6220_v40 = vadd.f32 %v6219_v37, %v6218_v63  ;;  %v5513_v52 = vadd.f32 %v5495_v22, %v9341_v49 }
 0xb40   : > { %v5500_v51 = vadd.f32 %v6220_v40, %v5962_v3  ;;  %5526 = vadd.xlane.f32.xlu0 %v5513_v52  ;;  %v6221_v35 = vpop.f32.mrb[56].mxu1 }
 0xb41   : > { %v6222_v47 = vpop.f32.mrb[57].mxu1 }
 0xb42   : > { %v6223_v44 = vadd.f32 %v6222_v47, %v6221_v35  ;;  %v5514_v57 = vadd.f32 %v5500_v51, %v9347_v24 }
 0xb44   : > { %v5505_v20 = vadd.f32 %v6223_v44, %v5962_v3  ;;  %5528 = vadd.xlane.f32.xlu1 %v5514_v57 }
 0xb46   : > { %v5515_v10 = vadd.f32 %v5505_v20, %v9354_v41 }
 0xb48   : > { %5530 = vadd.xlane.f32.xlu0 %v5515_v10 }
 0xbb4   : > { %v5517_v6 = vpop.xlane.xlu1 %5516 }
 0xbb5   : > { %v5532_v11 = vmul.f32 0.0078125, %v5517_v6 }
 0xbb7   : > { %v5540_v30 = vsub.f32 %v5508_v39, %v5532_v11 }
 0xbb8   : > { %v5519_v28 = vpop.xlane.xlu0 %5518 }
 0xbb9   : > { %v5533_v55 = vmul.f32 0.0078125, %v5519_v28  ;;  %v5548_v60 = vmul.f32 %v5540_v30, %v5540_v30 }
 0xbbb   : > { %v5541_v61 = vsub.f32 %v5509_v12, %v5533_v55  ;;  %5556 = vadd.xlane.f32.xlu1 %v5548_v60 }
 0xbbd   : > { %v5549_v49 = vmul.f32 %v5541_v61, %v5541_v61 }
 0xbbf   : > { %5558 = vadd.xlane.f32.xlu0 %v5549_v49 }
 0xbc1   : > { %v5521_v25 = vpop.xlane.xlu1 %5520 }
 0xbc2   : > { %v5534_v53 = vmul.f32 0.0078125, %v5521_v25 }
 0xbc4   : > { %v9373_v27 = vsub.f32 %v5510_v18, %v5534_v53  ;;  %v9400_v18 = vld [vmem:[%s9594_s13] ss:$0 sm:$0xff]  ;;  %s7334_s13 = sshll.u32 %s7458_s12, 4  ;;  %s7335_s13 = int_to_ptr.vmem [resolvable:$false] %s7334_s13 }
 0xbc5   : > { %v5523_v24 = vpop.xlane.xlu0 %5522  ;;  %s7336_s20 = scalar_lea.vmem %s7335_s13, 2048  ;;  %p7337_p5 = scmp.lt.s32.totalorder %s9445_s30, %s7335_s13 }
 0xbc6   : > { %v5535_v23 = vmul.f32 0.0078125, %v5523_v24  ;;  %v5550_v41 = vmul.f32 %v9373_v27, %v9373_v27  ;;  %p7338_p6 = scmp.lt.s32.totalorder %s7336_s20, %s7330_s19 }
 0xbc8   : > { %v9377_v59 = vsub.f32 %v5511_v43, %v5535_v23  ;;  %5560 = vadd.xlane.f32.xlu1 %v5550_v41  ;;  %p7339_p7 = por %p7338_p6, %p7337_p5 }
 0xbc9   : > { %v5525_v26 = vpop.xlane.xlu1 %5524 }
 0xbca   : > { %v5536_v2 = vmul.f32 0.0078125, %v5525_v26  ;;  %v5551_v36 = vmul.f32 %v9377_v59, %v9377_v59  ;;  %p7340_p9 = pnand %p7339_p7, %p7333_p4 }
 0xbcc   : > { %v9381_v14 = vsub.f32 %v5512_v0, %v5536_v2  ;;  %5562 = vadd.xlane.f32.xlu0 %v5551_v36 }
 0xbcd   : > { %v5527_v8 = vpop.xlane.xlu0 %5526 }
 0xbce   : > { %v5537_v33 = vmul.f32 0.0078125, %v5527_v8  ;;  %v5552_v9 = vmul.f32 %v9381_v14, %v9381_v14 }
 0xbd0   : > { %v9385_v17 = vsub.f32 %v5513_v52, %v5537_v33  ;;  %5564 = vadd.xlane.f32.xlu1 %v5552_v9 }
 0xbd1   : > { %v5529_v15 = vpop.xlane.xlu1 %5528 }
 0xbd2   : > { %v5538_v3 = vmul.f32 0.0078125, %v5529_v15  ;;  %v5553_v13 = vmul.f32 %v9385_v17, %v9385_v17 }
 0xbd4   : > { %v9389_v62 = vsub.f32 %v5514_v57, %v5538_v3  ;;  %5566 = vadd.xlane.f32.xlu0 %v5553_v13 }
 0xbd5   : > { %v5531_v45 = vpop.xlane.xlu0 %5530 }
 0xbd6   : > { %v5539_v50 = vmul.f32 0.0078125, %v5531_v45  ;;  %v5554_v31 = vmul.f32 %v9389_v62, %v9389_v62 }
 0xbd8   : > { %v9393_v42 = vsub.f32 %v5515_v10, %v5539_v50  ;;  %5568 = vadd.xlane.f32.xlu1 %v5554_v31 }
 0xbda   : > { %v5555_v39 = vmul.f32 %v9393_v42, %v9393_v42 }
 0xbdc   : > { %5570 = vadd.xlane.f32.xlu0 %v5555_v39 }
 0xc48   : > { %v5557_v48 = vpop.xlane.xlu1 %5556 }
 0xc49   : > { %v5572_v12 = vmul.f32 0.0078125, %v5557_v48 }
 0xc4b   : > { %v5580_v34 = vadd.f32 1e-05, %v5572_v12 }
 0xc4c   : > { %v5559_v54 = vpop.xlane.xlu0 %5558 }
 0xc4d   : > { %7166 = vrsqrt.f32 %v5580_v34  ;;  %v5573_v56 = vmul.f32 0.0078125, %v5559_v54 }
 0xc4f   : > { %v5581_v38 = vadd.f32 1e-05, %v5573_v56 }
 0xc51   : > { %7168 = vrsqrt.f32 %v5581_v38 }
 0xc55   : > { %v5561_v16 = vpop.xlane.xlu1 %5560 }
 0xc56   : > { %v5574_v46 = vmul.f32 0.0078125, %v5561_v16 }
 0xc57   : > { %v7167_v1 = vpop.eup %7166 }
 0xc58   : > { %v5596_v21 = vmul.f32 %v7167_v1, %v5540_v30  ;;  %v5582_v4 = vadd.f32 1e-05, %v5574_v46 }
 0xc59   : > { %v5563_v5 = vpop.xlane.xlu0 %5562 }
 0xc5a   : > { %v5611_v43 = vmul.f32 %v9400_v18, %v5596_v21  ;;  %7170 = vrsqrt.f32 %v5582_v4  ;;  %v5575_v32 = vmul.f32 0.0078125, %v5563_v5 }
 0xc5b   : > { %v7169_v58 = vpop.eup %7168 }
 0xc5c   : > { %v5626_v29 = vadd.f32 %v9405_v7, %v5611_v43  ;;  %v5597_v19 = vmul.f32 %v7169_v58, %v5541_v61  ;;  %v5583_v0 = vadd.f32 1e-05, %v5575_v32 }
 0xc5d   : > { %v5565_v22 = vpop.xlane.xlu1 %5564 }
 0xc5e   : > { %5634 = vst [vmem:[%s7773_s10] sm:$0xff] %v5626_v29  ;;  %v5612_v63 = vmul.f32 %v9400_v18, %v5597_v19  ;;  %7172 = vrsqrt.f32 %v5583_v0  ;;  %v5576_v37 = vmul.f32 0.0078125, %v5565_v22 }
 0xc60   : > { %v5627_v40 = vadd.f32 %v9405_v7, %v5612_v63  ;;  %v5584_v52 = vadd.f32 1e-05, %v5576_v37 }
 0xc61   : > { %v5567_v51 = vpop.xlane.xlu0 %5566 }
 0xc62   : > { %5635 = vst [vmem:[%s7773_s10 + $0x8] sm:$0xff] %v5627_v40  ;;  %7174 = vrsqrt.f32 %v5584_v52  ;;  %v5577_v35 = vmul.f32 0.0078125, %v5567_v51 }
 0xc64   : > { %v7171_v47 = vpop.eup %7170  ;;  %v5585_v44 = vadd.f32 1e-05, %v5577_v35 }
 0xc65   : > { %v5598_v57 = vmul.f32 %v7171_v47, %v9373_v27  ;;  %v5569_v20 = vpop.xlane.xlu1 %5568 }
 0xc66   : > { %7176 = vrsqrt.f32 %v5585_v44  ;;  %v5578_v10 = vmul.f32 0.0078125, %v5569_v20 }
 0xc67   : > { %v5613_v6 = vmul.f32 %v9400_v18, %v5598_v57 }
 0xc68   : > { %v7173_v11 = vpop.eup %7172  ;;  %v5586_v30 = vadd.f32 1e-05, %v5578_v10 }
 0xc69   : > { %v5628_v28 = vadd.f32 %v9405_v7, %v5613_v6  ;;  %v5599_v55 = vmul.f32 %v7173_v11, %v9377_v59  ;;  %v5571_v60 = vpop.xlane.xlu0 %5570 }
 0xc6a   : > { %7178 = vrsqrt.f32 %v5586_v30  ;;  %v5579_v61 = vmul.f32 0.0078125, %v5571_v60 }
 0xc6b   : > { %5636 = vst [vmem:[%s7773_s10 + $0x10] sm:$0xff] %v5628_v28  ;;  %v5614_v49 = vmul.f32 %v9400_v18, %v5599_v55 }
 0xc6c   : > { %v7175_v25 = vpop.eup %7174  ;;  %v5587_v53 = vadd.f32 1e-05, %v5579_v61 }
 0xc6d   : > { %v5629_v27 = vadd.f32 %v9405_v7, %v5614_v49  ;;  %v5600_v24 = vmul.f32 %v7175_v25, %v9381_v14 }
 0xc6e   : > { %7180 = vrsqrt.f32 %v5587_v53 }
 0xc6f   : > { %5637 = vst [vmem:[%s7773_s10 + $0x18] sm:$0xff] %v5629_v27  ;;  %v5615_v23 = vmul.f32 %v9400_v18, %v5600_v24 }
 0xc70   : > { %v7177_v41 = vpop.eup %7176 }
 0xc71   : > { %v5630_v59 = vadd.f32 %v9405_v7, %v5615_v23  ;;  %v5601_v26 = vmul.f32 %v7177_v41, %v9385_v17 }
 0xc73   : > { %5638 = vst [vmem:[%s7773_s10 + $0x20] sm:$0xff] %v5630_v59  ;;  %v5616_v2 = vmul.f32 %v9400_v18, %v5601_v26 }
 0xc74   : > { %v7179_v36 = vpop.eup %7178 }
 0xc75   : > { %v5631_v14 = vadd.f32 %v9405_v7, %v5616_v2  ;;  %v5602_v8 = vmul.f32 %v7179_v36, %v9389_v62 }
 0xc77   : > { %5639 = vst [vmem:[%s7773_s10 + $0x28] sm:$0xff] %v5631_v14  ;;  %v5617_v33 = vmul.f32 %v9400_v18, %v5602_v8 }
 0xc78   : > { %v7181_v9 = vpop.eup %7180 }
 0xc79   : > { %v5632_v17 = vadd.f32 %v9405_v7, %v5617_v33  ;;  %v5603_v15 = vmul.f32 %v7181_v9, %v9393_v42 }
 0xc7b   : > { %5640 = vst [vmem:[%s7773_s10 + $0x30] sm:$0xff] %v5632_v17  ;;  %v5618_v3 = vmul.f32 %v9400_v18, %v5603_v15 }
 0xc7d   : > { %v5633_v13 = vadd.f32 %v9405_v7, %v5618_v3 }
 0xc7f   : > { %5641 = vst [vmem:[%s7773_s10 + $0x38] sm:$0xff] %v5633_v13 }
 0xc80   : > { %7343 = shalt.err (!%p7340_p9)
}
 0xc81   : > { %s7344_s10 = scalar_lea.hbm %s9443_s23, 1024  ;;  %s7348_s0 = scalar_lea.hbm %s9597_s17, 4096 }
 0xc82   : > { %p7345_p11 = scmp.ne.s32.totalorder %s9443_s23, %s7344_s10  ;;  %p7349_p2 = scmp.lt.u32.totalorder %s9443_s23, %s9597_s17 }
 0xc83   : > { %p7350_p0 = scmp.lt.u32.totalorder %s7348_s0, %s7344_s10  ;;  %p7352_p10 = scmp.lt.u32.totalorder %s7344_s10, %s9443_s23 }
 0xc84   : > { %p7346_p13 = pnand %p7345_p11, %p9598_p12 }
 0xc85   : > { %p7351_p8 = por %p7350_p0, %p7349_p2 }
 0xc86   : > { %p7347_p3 = pneg %p7346_p13 }
 0xc87   : > { %p7353_p1 = por %p7352_p10, %p7351_p8 }
 0xc89   : > { %p7354_p4 = pnand %p7353_p1, %p7347_p3 }
 0xc8b   : > { %7357 = shalt.err (!%p7354_p4)
}
 0xc8c   : > { %s7459_s21 = smov 128   ;;  %s7460_s14 = smov 8  }
 0xc8d   : > { %6828 = dma.vmem_to_hbm [thread:$0]  (%p9598_p12), %s9445_s30, 1024, %s9443_s23, %s5643_s8, %s7459_s21, %s7459_s21, %s7460_s14  }
 0xc8e   : > { %s5648_s19 = scalar_lea.sflag [#allocation15], %s7762_s16 }
 0xc8f   : > { %s5971_s12 = sshll.u32 %s7428_s25, 6  ;;  %s5697_s13 = sshll.u32 %s7775_s26, 4  ;;  %s5698_s13 = int_to_ptr.vmem [resolvable:$true] %s5697_s13 }
 0xc90   : > { %s5678_s20 = sadd.s32 %s5971_s12, %s5967_s27  ;;  %s9599_s30 = sld [smem:[#allocation41_spill]] }
 0xc91   : > { %s5972_s10 = sshll.u32 %s5678_s20, 7  ;;  %s7461_s23 = smov 1024  }
 0xc92   : > { %6829 = sst [smem:[#allocation17]] (%p9598_p12), %s7461_s23  ;;  %s7462_s8 = smov 2048  }
 0xc93   : > { %6830 = sst [smem:[#allocation17 + $0x1]] (%p9598_p12), %s7462_s8  ;;  %s7463_s0 = smov 8  }
 0xc94   : > { %6831 = sst [smem:[#allocation17 + $0x2]] (%p9598_p12), %s7463_s0  ;;  %s7464_s25 = smov 128  }
 0xc95   : > { %6832 = sst [smem:[#allocation17 + $0x3]] (%p9598_p12), %s7464_s25  ;;  %s7465_s24 = smov [#allocation16]  }
 0xc96   : > { %s5680_s16 = scalar_lea.hbm %s9599_s30, %s5972_s10  ;;  %6833 = sst [smem:[#allocation17 + $0x4]] (%p9598_p12), %s7464_s25 }
 0xc97   : > { %6834 = sst [smem:[#allocation17 + $0x5]] (%p9598_p12), %s7463_s0  ;;  %s7466_s26 = smov 0  }
 0xc98   : > { %6835 = dma.general (%p9598_p12), %s5698_s13, 4096, %s5680_s16, %s5648_s19, %s7465_s24, [#allocation17], %s7466_s26, 0  }
 0xc99 PF: > { %s9600_s27 = sld [smem:[#allocation27_spill]]  ;;  %s9601_s18 = sld [smem:[#allocation23_spill]] }
 0xc9a   : > { %s9602_s28 = sld [smem:[#allocation31_spill]] }
 0xc9f   : > { %p6871_p5 = scmp.ge.s32.totalorder %s9600_s27, 2  ;;  %s5725_s21 = sand.u32 1, %s9601_s18  }
 0xca0   : > { %p9603_p6 = scmp.ne.s32.totalorder %s9602_s28, 0  ;;  %s5726_s14 = scalar_lea.sflag [#allocation6], %s5725_s21 }
 0xca2   : > { %p6855_p7 = pnand %p6871_p5, %p9603_p6 }
 0xca4   : > { %7403 = dma.done.wait (!%p6855_p7), %s5726_s14, 1024  }
 0xca5   : > { %7405 = vsyncadd (!%p6855_p7), %s5726_s14, 4294966272  ;;  %s5735_s12 = scalar_lea.sflag [#allocation15], %s5725_s21 }
 0xca6   : > { %7407 = dma.done.wait (!%p6855_p7), %s5735_s12, 4096  }
 0xca7   : > { %7409 = vsyncadd (!%p6855_p7), %s5735_s12, 4294963200  ;;  %s36_s28 = sadd.s32 1, %s9600_s27   ;;  %s9604_s3 = sld [smem:[#allocation24_spill]] }
 0xca8   : > { %p33_p9 = scmp.ge.s32.totalorder %s36_s28, 6   ;;  %s9605_s23 = sld [smem:[#allocation32_spill]] }
 0xca9   : > { %s9606_s24 = sld [smem:[#allocation25_spill]]  ;;  %s9607_s25 = sld [smem:[#allocation26_spill]] }
 0xcaa   : > { %s9608_s26 = sld [smem:[#allocation28_spill]]  ;;  %s9609_s27 = sld [smem:[#allocation30_spill]] }
 0xcab   : > { %s9610_s21 = smov %s7416_s22  ;;  %35 = sbr.rel (!%p33_p9) target bundleno = 20 (0x14), region = 163 }
 0xcad   : > { %s9611_s22 = smov %s9604_s3 }
 0xcb2   :  { %5740 = vsyncpa [#allocation5], 1 }
 0xcb3   :  { %5742 = vsyncpa [#allocation5 + $0x1], 1 }
 0xcb4   :  { %5743 = vsyncpa [#allocation8], 1 }
 0xcb5   :  { %5744 = vsyncpa [#allocation11], 1 }
 0xcb6   :  { %5745 = vsyncpa [#allocation6], 1 }
 0xcb7   :  { %5747 = vsyncpa [#allocation6 + $0x1], 1 }
 0xcb8   :  { %5748 = vsyncpa [#allocation15], 1 }
 0xcb9   :  { %5750 = vsyncpa [#allocation15 + $0x1], 1 }

</bundles_post_ra>
